<compile_context>
chip_gen: v5e
topology: v5e:2x2
jax: 0.10.0
libtpu: 0.0.40
codegen_flags: <defaults>
</compile_context>

<pallas_src>
import jax
import jax.numpy as jnp
import numpy as np
from jax import lax
from jax.experimental import pallas as pl
from jax.experimental.pallas import tpu as pltpu

_SQRT_HALF = 0.7071067811865476


def _erf(x):
    # Abramowitz & Stegun 7.1.26 rational approximation (|err| < 1.5e-7).
    # exp and the approximate reciprocal run on the EUP slot (idle in this
    # VALU-bound kernel); the rest is cheap VPU arithmetic.
    a1, a2, a3, a4, a5 = 0.254829592, -0.284496736, 1.421413741, -1.453152027, 1.061405429
    p = 0.3275911
    s = jnp.where(x >= 0.0, 1.0, -1.0)
    ax = jnp.abs(x)
    t = pl.reciprocal(1.0 + p * ax, approx=True)          # EUP vrcp, not a VALU divide
    y = 1.0 - ((((a5 * t + a4) * t + a3) * t + a2) * t + a1) * t * jnp.exp(-ax * ax)
    return s * y


def _gelu(x):
    # erf-based ("exact") GELU, matching torch.nn.GELU() default.
    return 0.5 * x * (1.0 + _erf(x * _SQRT_HALF))


def _make_kernel(Bt, H, W, C, L, kernel_sizes, pad_max, padl):
    HP = H + 2 * pad_max            # padded rows (major dim)
    WPL = padl + W + pad_max        # padded cols (sublane dim), left pad aligned to 8
    M = Bt * H * W

    def kernel(x_ref, wq_ref, wz_ref, wg_ref, bq_ref, bz_ref, bg_ref, *args):
        wf_refs = args[:L]
        wh_ref, bh_ref, wout_ref, bout_ref, o_ref, pad_ref = args[L:]

        x2 = x_ref[...].reshape(M, C)                     # bf16 (Bt*H*W, C)

        # proj_in split into lane-aligned matmuls (bf16 operands, f32 accumulate).
        # q is computed later, right before it is needed.
        z = (jnp.dot(x2, wz_ref[...], preferred_element_type=jnp.float32)
             + bz_ref[...]).reshape(Bt, H, W, C)
        gates = (jnp.dot(x2, wg_ref[...], preferred_element_type=jnp.float32)
                 + bg_ref[...]).reshape(Bt, H, W, L + 1)

        # Zero only the border ring of the padded conv scratch: the centre is
        # overwritten every focal level, only the ring is ever read as zero.
        if pad_max > 0:
            pad_ref[:, 0:pad_max, :, :] = jnp.zeros((Bt, pad_max, WPL, C), jnp.float32)
            pad_ref[:, pad_max + H:HP, :, :] = jnp.zeros((Bt, pad_max, WPL, C), jnp.float32)
            pad_ref[:, pad_max:pad_max + H, 0:padl, :] = jnp.zeros(
                (Bt, H, padl, C), jnp.float32)
            pad_ref[:, pad_max:pad_max + H, padl + W:WPL, :] = jnp.zeros(
                (Bt, H, pad_max, C), jnp.float32)

        z_cur = jnp.zeros((Bt, H, W, C), jnp.float32)
        for l in range(L):
            k = kernel_sizes[l]
            pad = k // 2
            roff = pad_max - pad      # row offset (major dim: free address math)
            coff = padl - pad         # col offset inside a loaded row band
            # write current z into the sublane-aligned centre of the padded buffer
            pad_ref[:, pad_max:pad_max + H, padl:padl + W, :] = z
            wf_ref = wf_refs[l]       # (k*k, C): whole-row taps, no (k,k,C) slicing
            acc = jnp.zeros((Bt, H, W, C), jnp.float32)
            for dy in range(k):
                # one clean band load per dy; dx-shifted windows come from the
                # in-register band via sublane shifts (XLU), not extra vlds.
                band = pad_ref[:, roff + dy:roff + dy + H, :, :]       # (Bt,H,WPL,C)
                for dx in range(k):
                    idx = dy * k + dx
                    win = band[:, :, coff + dx:coff + dx + W, :]
                    acc = acc + win * wf_ref[idx:idx + 1, :]
            z = _gelu(acc)                               # focal_block[l] output
            z_cur = z_cur + z * gates[:, :, :, l:l + 1]

        # global-context branch: GELU(spatial mean of final z) * last gate
        z_mean = jnp.mean(z, axis=(1, 2), keepdims=True)               # (Bt,1,1,C)
        z_cur = z_cur + _gelu(z_mean) * gates[:, :, :, L:L + 1]

        # h: 1x1 conv with bias == per-pixel linear C -> C (MXU)
        zc2 = z_cur.reshape(M, C).astype(jnp.bfloat16)
        modulator = (jnp.dot(zc2, wh_ref[...], preferred_element_type=jnp.float32)
                     + bh_ref[...])

        # q branch of proj_in (deferred: keeps the conv loop's live set small)
        q = (jnp.dot(x_ref[...].reshape(M, C), wq_ref[...],
                     preferred_element_type=jnp.float32) + bq_ref[...])
        y = (q * modulator).astype(jnp.bfloat16)
        # proj_out: Linear(C -> C); nn.Dropout is identity in eval/inference mode.
        out = jnp.dot(y, wout_ref[...], preferred_element_type=jnp.float32) + bout_ref[...]
        # TODO(synk): for stages where C is not a multiple of 128 (e.g. C=96) a
        # lane-dense (H, W*C) output view would turn these masked partial stores
        # into dense vst, but needs an in-kernel lane relayout of `out`.
        o_ref[...] = out.reshape(Bt, H, W, C).astype(o_ref.dtype)

    return kernel


def focal_modulation(x, w_in, b_in, wfs, wh, bh, wout, bout,
                     focal_level, kernel_sizes, *, batch_tile=None):
    B, H, W, C = x.shape
    L = focal_level
    pad_max = max(k // 2 for k in kernel_sizes)
    padl = ((pad_max + 7) // 8) * 8            # sublane-aligned left pad of the scratch
    HP = H + 2 * pad_max
    WPL = padl + W + pad_max

    # --- split the fused proj_in weight into three lane-aligned matrices ---
    w_q, w_z, w_g = w_in[:, :C], w_in[:, C:2 * C], w_in[:, 2 * C:]
    b_q, b_z, b_g = b_in[:, :C], b_in[:, C:2 * C], b_in[:, 2 * C:]

    # bf16 MXU operands (f32 accumulation in the kernel); biases stay f32; the
    # depthwise/elementwise path stays f32 (v5e has no bf16 VALU).
    bf16 = jnp.bfloat16
    x_bf = x.astype(bf16)
    w_q, w_z, w_g, wh_b, wout_b = (a.astype(bf16) for a in (w_q, w_z, w_g, wh, wout))

    # depthwise weights pre-flattened to (k*k, C): zero-cost row taps in-kernel
    wfs_flat = [wf.reshape(k * k, C) for wf, k in zip(wfs, kernel_sizes)]

    # --- batch tile: several batch elements per grid step (amortize ~0.35us/step
    #     at small H*W*C), capped so the working set stays well inside v7x's
    #     64 MiB VMEM, keeping >=2 grid steps when possible for the 2 TensorCores.
    if batch_tile is None:
        per_batch = 4 * (HP * WPL * C + 12 * H * W * C)
        batch_tile = max(1, min(B, (24 << 20) // max(per_batch, 1)))
        if B >= 2:
            batch_tile = min(batch_tile, max(1, B // 2))
        while B % batch_tile:
            batch_tile -= 1
    assert B % batch_tile == 0, "batch_tile must divide B"
    Bt = batch_tile
    grid = (B // Bt,)

    kernel = _make_kernel(Bt, H, W, C, L, kernel_sizes, pad_max, padl)

    def _rep_spec(a):
        zeros = (0,) * a.ndim
        return pl.BlockSpec(a.shape, lambda b, _z=zeros: _z)

    x_spec = pl.BlockSpec((Bt, H, W, C), lambda b: (b, 0, 0, 0))
    in_specs = ([x_spec]
                + [_rep_spec(a) for a in (w_q, w_z, w_g, b_q, b_z, b_g)]
                + [_rep_spec(a) for a in wfs_flat]
                + [_rep_spec(a) for a in (wh_b, bh, wout_b, bout)])
    out_spec = pl.BlockSpec((Bt, H, W, C), lambda b: (b, 0, 0, 0))

    # rough cost model: 5 matmuls + depthwise taps + GELU transcendentals
    Mtot = B * H * W
    mm_flops = 2 * Mtot * C * (4 * C + (L + 1))
    conv_flops = 2 * Mtot * C * sum(k * k for k in kernel_sizes)
    ew_flops = 14 * Mtot * C * (L + 2)
    n_weight_bytes = sum(int(np.prod(a.shape)) * a.dtype.itemsize
                         for a in (w_q, w_z, w_g, b_q, b_z, b_g,
                                   wh_b, bh, wout_b, bout, *wfs_flat))
    cost = pl.CostEstimate(
        flops=int(mm_flops + conv_flops + ew_flops),
        transcendentals=int(Mtot * C * L + B * C),
        bytes_accessed=int(x_bf.size * 2 + B * H * W * C * 4 + n_weight_bytes))

    # explicit VMEM budget (matters on v7x: 64 MiB physical / 32 MiB scoped default)
    block_bytes = Bt * H * W * C * (2 + 4)     # bf16 in block + f32 out block
    scratch_bytes = Bt * HP * WPL * C * 4
    live_bytes = 12 * Bt * H * W * C * 4
    vmem_limit = int(min(48 << 20,
                         max(16 << 20, 2 * (2 * block_bytes + scratch_bytes + live_bytes))))

    return pl.pallas_call(
        kernel,
        out_shape=jax.ShapeDtypeStruct((B, H, W, C), jnp.float32),
        grid=grid,
        in_specs=in_specs,
        out_specs=out_spec,
        scratch_shapes=[pltpu.VMEM((Bt, HP, WPL, C), jnp.float32)],
        compiler_params=pltpu.CompilerParams(
            dimension_semantics=("parallel",),
            vmem_limit_bytes=vmem_limit),
        cost_estimate=cost,
    )(x_bf, w_q, w_z, w_g, b_q, b_z, b_g, *wfs_flat, wh_b, bh, wout_b, bout)


def focal_modulation_reference(x, w_in, b_in, wfs, wh, bh, wout, bout, focal_level):
    """Pure-JAX reference (mirrors the PyTorch forward, eval mode)."""
    B, H, W, C = x.shape
    hi = lax.Precision.HIGHEST
    t = jnp.einsum('bhwc,cd->bhwd', x, w_in, precision=hi) + b_in.reshape(-1)
    q = t[..., :C]
    z = t[..., C:2 * C]
    gates = t[..., 2 * C:]
    z_cur = jnp.zeros_like(q)
    for l in range(focal_level):
        wf = wfs[l]                                    # (k, k, C)
        z = lax.conv_general_dilated(
            z, wf[:, :, None, :], window_strides=(1, 1), padding='SAME',
            dimension_numbers=('NHWC', 'HWIO', 'NHWC'),
            feature_group_count=C, precision=hi)
        z = jax.nn.gelu(z, approximate=False)
        z_cur = z_cur + z * gates[..., l:l + 1]
    z_mean = z.mean(axis=(1, 2), keepdims=True)
    z_cur = z_cur + jax.nn.gelu(z_mean, approximate=False) * gates[..., focal_level:focal_level + 1]
    modulator = jnp.einsum('bhwc,cd->bhwd', z_cur, wh, precision=hi) + bh.reshape(-1)
    y = q * modulator
    return jnp.einsum('bhwc,cd->bhwd', y, wout, precision=hi) + bout.reshape(-1)


if __name__ == "__main__":
    B, H, W, C = 4, 8, 8, 16
    focal_window, focal_level, focal_factor, p = 3, 2, 2, 0.0
    kernel_sizes = [focal_factor * l + focal_window for l in range(focal_level)]  # [3, 5]
    D = 2 * C + focal_level + 1

    key = jax.random.PRNGKey(0)
    ks = jax.random.split(key, 8 + focal_level)
    w_in = 0.1 * jax.random.normal(ks[0], (C, D), jnp.float32)
    b_in = 0.1 * jax.random.normal(ks[1], (1, D), jnp.float32)
    wfs = [(1.0 / (k * k)) * jax.random.normal(ks[2 + l], (k, k, C), jnp.float32)
           for l, k in enumerate(kernel_sizes)]
    wh = 0.1 * jax.random.normal(ks[2 + focal_level], (C, C), jnp.float32)
    bh = 0.1 * jax.random.normal(ks[3 + focal_level], (1, C), jnp.float32)
    wout = 0.1 * jax.random.normal(ks[4 + focal_level], (C, C), jnp.float32)
    bout = 0.1 * jax.random.normal(ks[5 + focal_level], (1, C), jnp.float32)
    x = jax.random.normal(ks[6 + focal_level], (B, H, W, C), jnp.float32)

    out = focal_modulation(x, w_in, b_in, wfs, wh, bh, wout, bout,
                           focal_level, kernel_sizes)
    out = jax.block_until_ready(out)

    ref = focal_modulation_reference(x, w_in, b_in, wfs, wh, bh, wout, bout, focal_level)
    # bf16 MXU operands / bf16 input vs the HIGHEST-precision f32 reference;
    # tolerance validated for these small, O(0.1) magnitude outputs.
    np.testing.assert_allclose(np.asarray(out), np.asarray(ref), rtol=2e-2, atol=2e-2)
    print("KERNEL_OK")
</pallas_src>

<mosaic_0001>
module attributes {stable_mosaic.version = 11 : i64} {
  func.func @kernel(%arg0: i32, %arg1: memref<2x8x8x16xbf16, #tpu.memory_space<vmem>>, %arg2: memref<16x16xbf16, #tpu.memory_space<vmem>>, %arg3: memref<16x16xbf16, #tpu.memory_space<vmem>>, %arg4: memref<16x3xbf16, #tpu.memory_space<vmem>>, %arg5: memref<1x16xf32, #tpu.memory_space<vmem>>, %arg6: memref<1x16xf32, #tpu.memory_space<vmem>>, %arg7: memref<1x3xf32, #tpu.memory_space<vmem>>, %arg8: memref<9x16xf32, #tpu.memory_space<vmem>>, %arg9: memref<25x16xf32, #tpu.memory_space<vmem>>, %arg10: memref<16x16xbf16, #tpu.memory_space<vmem>>, %arg11: memref<1x16xf32, #tpu.memory_space<vmem>>, %arg12: memref<16x16xbf16, #tpu.memory_space<vmem>>, %arg13: memref<1x16xf32, #tpu.memory_space<vmem>>, %arg14: memref<2x8x8x16xf32, #tpu.memory_space<vmem>>, %arg15: memref<2x12x18x16xf32, #tpu.memory_space<vmem>>) attributes {dimension_semantics = [#tpu.dimension_semantics<parallel>], iteration_bounds = array<i64: 2>, scalar_prefetch = 0 : i64, scratch_operands = 1 : i64, tpu.core_type = #tpu.core_type<tc>, window_params = [{transform_indices = @transform_0, window_bounds = array<i64: 2, 8, 8, 16>}, {pipeline_mode = #tpu.pipeline_mode<synchronous>, transform_indices = @transform_1, window_bounds = array<i64: 16, 16>}, {pipeline_mode = #tpu.pipeline_mode<synchronous>, transform_indices = @transform_2, window_bounds = array<i64: 16, 16>}, {pipeline_mode = #tpu.pipeline_mode<synchronous>, transform_indices = @transform_3, window_bounds = array<i64: 16, 3>}, {pipeline_mode = #tpu.pipeline_mode<synchronous>, transform_indices = @transform_4, window_bounds = array<i64: 1, 16>}, {pipeline_mode = #tpu.pipeline_mode<synchronous>, transform_indices = @transform_5, window_bounds = array<i64: 1, 16>}, {pipeline_mode = #tpu.pipeline_mode<synchronous>, transform_indices = @transform_6, window_bounds = array<i64: 1, 3>}, {pipeline_mode = #tpu.pipeline_mode<synchronous>, transform_indices = @transform_7, window_bounds = array<i64: 9, 16>}, {pipeline_mode = #tpu.pipeline_mode<synchronous>, transform_indices = @transform_8, window_bounds = array<i64: 25, 16>}, {pipeline_mode = #tpu.pipeline_mode<synchronous>, transform_indices = @transform_9, window_bounds = array<i64: 16, 16>}, {pipeline_mode = #tpu.pipeline_mode<synchronous>, transform_indices = @transform_10, window_bounds = array<i64: 1, 16>}, {pipeline_mode = #tpu.pipeline_mode<synchronous>, transform_indices = @transform_11, window_bounds = array<i64: 16, 16>}, {pipeline_mode = #tpu.pipeline_mode<synchronous>, transform_indices = @transform_12, window_bounds = array<i64: 1, 16>}, {transform_indices = @transform_13, window_bounds = array<i64: 2, 8, 8, 16>}]} {
    %c0 = arith.constant 0 : index
    %c0_0 = arith.constant 0 : index
    %c0_1 = arith.constant 0 : index
    %c0_2 = arith.constant 0 : index
    %0 = vector.load %arg1[%c0, %c0_0, %c0_1, %c0_2] : memref<2x8x8x16xbf16, #tpu.memory_space<vmem>>, vector<2x8x8x16xbf16>
    %1 = vector.shape_cast %0 : vector<2x8x8x16xbf16> to vector<128x16xbf16>
    %c0_3 = arith.constant 0 : index
    %c0_4 = arith.constant 0 : index
    %2 = vector.load %arg3[%c0_3, %c0_4] : memref<16x16xbf16, #tpu.memory_space<vmem>>, vector<16x16xbf16>
    %cst = arith.constant dense<0.000000e+00> : vector<128x16xf32>
    %3 = tpu.matmul %1, %2, %cst {dimension_numbers = #tpu.dot_dimension_numbers<[1], [0], [0], [1], [0, 0, 1, 1], [], []>} : vector<128x16xbf16>, vector<16x16xbf16>, vector<128x16xf32> -> vector<128x16xf32>
    %c0_5 = arith.constant 0 : index
    %c0_6 = arith.constant 0 : index
    %4 = vector.load %arg6[%c0_5, %c0_6] : memref<1x16xf32, #tpu.memory_space<vmem>>, vector<1x16xf32>
    %5 = vector.broadcast %4 : vector<1x16xf32> to vector<128x16xf32>
    %6 = arith.addf %3, %5 : vector<128x16xf32>
    %7 = vector.shape_cast %6 : vector<128x16xf32> to vector<2x8x8x16xf32>
    %c0_7 = arith.constant 0 : index
    %c0_8 = arith.constant 0 : index
    %8 = vector.load %arg4[%c0_7, %c0_8] : memref<16x3xbf16, #tpu.memory_space<vmem>>, vector<16x3xbf16>
    %cst_9 = arith.constant dense<0.000000e+00> : vector<128x3xf32>
    %9 = tpu.matmul %1, %8, %cst_9 {dimension_numbers = #tpu.dot_dimension_numbers<[1], [0], [0], [1], [0, 0, 1, 1], [], []>} : vector<128x16xbf16>, vector<16x3xbf16>, vector<128x3xf32> -> vector<128x3xf32>
    %c0_10 = arith.constant 0 : index
    %c0_11 = arith.constant 0 : index
    %10 = vector.load %arg7[%c0_10, %c0_11] : memref<1x3xf32, #tpu.memory_space<vmem>>, vector<1x3xf32>
    %11 = vector.broadcast %10 : vector<1x3xf32> to vector<128x3xf32>
    %12 = arith.addf %9, %11 : vector<128x3xf32>
    %13 = vector.shape_cast %12 : vector<128x3xf32> to vector<2x8x8x3xf32>
    %cst_12 = arith.constant 0.000000e+00 : f32
    %14 = vector.broadcast %cst_12 : f32 to vector<2x2x18x16xf32>
    %c0_13 = arith.constant 0 : index
    %c0_14 = arith.constant 0 : index
    %c0_15 = arith.constant 0 : index
    %c0_16 = arith.constant 0 : index
    %15 = vector.load %arg15[%c0_13, %c0_14, %c0_15, %c0_16] : memref<2x12x18x16xf32, #tpu.memory_space<vmem>>, vector<2x2x18x16xf32>
    tpu.vector_store %arg15[%c0_13, %c0_14, %c0_15, %c0_16], %14 {strides = array<i32>} : memref<2x12x18x16xf32, #tpu.memory_space<vmem>>, vector<2x2x18x16xf32>,
    %cst_17 = arith.constant 0.000000e+00 : f32
    %16 = vector.broadcast %cst_17 : f32 to vector<2x2x18x16xf32>
    %c0_18 = arith.constant 0 : index
    %c10 = arith.constant 10 : index
    %c0_19 = arith.constant 0 : index
    %c0_20 = arith.constant 0 : index
    %17 = vector.load %arg15[%c0_18, %c10, %c0_19, %c0_20] : memref<2x12x18x16xf32, #tpu.memory_space<vmem>>, vector<2x2x18x16xf32>
    tpu.vector_store %arg15[%c0_18, %c10, %c0_19, %c0_20], %16 {strides = array<i32>} : memref<2x12x18x16xf32, #tpu.memory_space<vmem>>, vector<2x2x18x16xf32>,
    %cst_21 = arith.constant 0.000000e+00 : f32
    %18 = vector.broadcast %cst_21 : f32 to vector<2x8x8x16xf32>
    %c0_22 = arith.constant 0 : index
    %c2 = arith.constant 2 : index
    %c0_23 = arith.constant 0 : index
    %c0_24 = arith.constant 0 : index
    %19 = vector.load %arg15[%c0_22, %c2, %c0_23, %c0_24] : memref<2x12x18x16xf32, #tpu.memory_space<vmem>>, vector<2x8x8x16xf32>
    tpu.vector_store %arg15[%c0_22, %c2, %c0_23, %c0_24], %18 {strides = array<i32>} : memref<2x12x18x16xf32, #tpu.memory_space<vmem>>, vector<2x8x8x16xf32>,
    %cst_25 = arith.constant 0.000000e+00 : f32
    %20 = vector.broadcast %cst_25 : f32 to vector<2x8x2x16xf32>
    %c0_26 = arith.constant 0 : index
    %c2_27 = arith.constant 2 : index
    %c16 = arith.constant 16 : index
    %c0_28 = arith.constant 0 : index
    %21 = vector.load %arg15[%c0_26, %c2_27, %c16, %c0_28] : memref<2x12x18x16xf32, #tpu.memory_space<vmem>>, vector<2x8x2x16xf32>
    tpu.vector_store %arg15[%c0_26, %c2_27, %c16, %c0_28], %20 {strides = array<i32>} : memref<2x12x18x16xf32, #tpu.memory_space<vmem>>, vector<2x8x2x16xf32>,
    %cst_29 = arith.constant 0.000000e+00 : f32
    %22 = vector.broadcast %cst_29 : f32 to vector<2x8x8x16xf32>
    %c0_30 = arith.constant 0 : index
    %c2_31 = arith.constant 2 : index
    %c8 = arith.constant 8 : index
    %c0_32 = arith.constant 0 : index
    %23 = vector.load %arg15[%c0_30, %c2_31, %c8, %c0_32] : memref<2x12x18x16xf32, #tpu.memory_space<vmem>>, vector<2x8x8x16xf32>
    tpu.vector_store %arg15[%c0_30, %c2_31, %c8, %c0_32], %7 {strides = array<i32>} : memref<2x12x18x16xf32, #tpu.memory_space<vmem>>, vector<2x8x8x16xf32>,
    %cst_33 = arith.constant 0.000000e+00 : f32
    %24 = vector.broadcast %cst_33 : f32 to vector<2x8x8x16xf32>
    %c0_34 = arith.constant 0 : index
    %c1 = arith.constant 1 : index
    %c0_35 = arith.constant 0 : index
    %c0_36 = arith.constant 0 : index
    %25 = vector.load %arg15[%c0_34, %c1, %c0_35, %c0_36] : memref<2x12x18x16xf32, #tpu.memory_space<vmem>>, vector<2x8x18x16xf32>
    %26 = vector.extract_strided_slice %25 {offsets = [0, 0, 7, 0], sizes = [2, 8, 8, 16], strides = [1, 1, 1, 1]} : vector<2x8x18x16xf32> to vector<2x8x8x16xf32>
    %c0_37 = arith.constant 0 : index
    %c0_38 = arith.constant 0 : index
    %27 = vector.load %arg8[%c0_37, %c0_38] : memref<9x16xf32, #tpu.memory_space<vmem>>, vector<1x16xf32>
    %28 = vector.shape_cast %27 : vector<1x16xf32> to vector<1x1x1x16xf32>
    %29 = vector.broadcast %28 : vector<1x1x1x16xf32> to vector<2x8x8x16xf32>
    %30 = arith.mulf %26, %29 : vector<2x8x8x16xf32>
    %31 = arith.addf %24, %30 : vector<2x8x8x16xf32>
    %32 = vector.extract_strided_slice %25 {offsets = [0, 0, 8, 0], sizes = [2, 8, 8, 16], strides = [1, 1, 1, 1]} : vector<2x8x18x16xf32> to vector<2x8x8x16xf32>
    %c1_39 = arith.constant 1 : index
    %c0_40 = arith.constant 0 : index
    %33 = vector.load %arg8[%c1_39, %c0_40] : memref<9x16xf32, #tpu.memory_space<vmem>>, vector<1x16xf32>
    %34 = vector.shape_cast %33 : vector<1x16xf32> to vector<1x1x1x16xf32>
    %35 = vector.broadcast %34 : vector<1x1x1x16xf32> to vector<2x8x8x16xf32>
    %36 = arith.mulf %32, %35 : vector<2x8x8x16xf32>
    %37 = arith.addf %31, %36 : vector<2x8x8x16xf32>
    %38 = vector.extract_strided_slice %25 {offsets = [0, 0, 9, 0], sizes = [2, 8, 8, 16], strides = [1, 1, 1, 1]} : vector<2x8x18x16xf32> to vector<2x8x8x16xf32>
    %c2_41 = arith.constant 2 : index
    %c0_42 = arith.constant 0 : index
    %39 = vector.load %arg8[%c2_41, %c0_42] : memref<9x16xf32, #tpu.memory_space<vmem>>, vector<1x16xf32>
    %40 = vector.shape_cast %39 : vector<1x16xf32> to vector<1x1x1x16xf32>
    %41 = vector.broadcast %40 : vector<1x1x1x16xf32> to vector<2x8x8x16xf32>
    %42 = arith.mulf %38, %41 : vector<2x8x8x16xf32>
    %43 = arith.addf %37, %42 : vector<2x8x8x16xf32>
    %c0_43 = arith.constant 0 : index
    %c2_44 = arith.constant 2 : index
    %c0_45 = arith.constant 0 : index
    %c0_46 = arith.constant 0 : index
    %44 = vector.load %arg15[%c0_43, %c2_44, %c0_45, %c0_46] : memref<2x12x18x16xf32, #tpu.memory_space<vmem>>, vector<2x8x18x16xf32>
    %45 = vector.extract_strided_slice %44 {offsets = [0, 0, 7, 0], sizes = [2, 8, 8, 16], strides = [1, 1, 1, 1]} : vector<2x8x18x16xf32> to vector<2x8x8x16xf32>
    %c3 = arith.constant 3 : index
    %c0_47 = arith.constant 0 : index
    %46 = vector.load %arg8[%c3, %c0_47] : memref<9x16xf32, #tpu.memory_space<vmem>>, vector<1x16xf32>
    %47 = vector.shape_cast %46 : vector<1x16xf32> to vector<1x1x1x16xf32>
    %48 = vector.broadcast %47 : vector<1x1x1x16xf32> to vector<2x8x8x16xf32>
    %49 = arith.mulf %45, %48 : vector<2x8x8x16xf32>
    %50 = arith.addf %43, %49 : vector<2x8x8x16xf32>
    %51 = vector.extract_strided_slice %44 {offsets = [0, 0, 8, 0], sizes = [2, 8, 8, 16], strides = [1, 1, 1, 1]} : vector<2x8x18x16xf32> to vector<2x8x8x16xf32>
    %c4 = arith.constant 4 : index
    %c0_48 = arith.constant 0 : index
    %52 = vector.load %arg8[%c4, %c0_48] : memref<9x16xf32, #tpu.memory_space<vmem>>, vector<1x16xf32>
    %53 = vector.shape_cast %52 : vector<1x16xf32> to vector<1x1x1x16xf32>
    %54 = vector.broadcast %53 : vector<1x1x1x16xf32> to vector<2x8x8x16xf32>
    %55 = arith.mulf %51, %54 : vector<2x8x8x16xf32>
    %56 = arith.addf %50, %55 : vector<2x8x8x16xf32>
    %57 = vector.extract_strided_slice %44 {offsets = [0, 0, 9, 0], sizes = [2, 8, 8, 16], strides = [1, 1, 1, 1]} : vector<2x8x18x16xf32> to vector<2x8x8x16xf32>
    %c5 = arith.constant 5 : index
    %c0_49 = arith.constant 0 : index
    %58 = vector.load %arg8[%c5, %c0_49] : memref<9x16xf32, #tpu.memory_space<vmem>>, vector<1x16xf32>
    %59 = vector.shape_cast %58 : vector<1x16xf32> to vector<1x1x1x16xf32>
    %60 = vector.broadcast %59 : vector<1x1x1x16xf32> to vector<2x8x8x16xf32>
    %61 = arith.mulf %57, %60 : vector<2x8x8x16xf32>
    %62 = arith.addf %56, %61 : vector<2x8x8x16xf32>
    %c0_50 = arith.constant 0 : index
    %c3_51 = arith.constant 3 : index
    %c0_52 = arith.constant 0 : index
    %c0_53 = arith.constant 0 : index
    %63 = vector.load %arg15[%c0_50, %c3_51, %c0_52, %c0_53] : memref<2x12x18x16xf32, #tpu.memory_space<vmem>>, vector<2x8x18x16xf32>
    %64 = vector.extract_strided_slice %63 {offsets = [0, 0, 7, 0], sizes = [2, 8, 8, 16], strides = [1, 1, 1, 1]} : vector<2x8x18x16xf32> to vector<2x8x8x16xf32>
    %c6 = arith.constant 6 : index
    %c0_54 = arith.constant 0 : index
    %65 = vector.load %arg8[%c6, %c0_54] : memref<9x16xf32, #tpu.memory_space<vmem>>, vector<1x16xf32>
    %66 = vector.shape_cast %65 : vector<1x16xf32> to vector<1x1x1x16xf32>
    %67 = vector.broadcast %66 : vector<1x1x1x16xf32> to vector<2x8x8x16xf32>
    %68 = arith.mulf %64, %67 : vector<2x8x8x16xf32>
    %69 = arith.addf %62, %68 : vector<2x8x8x16xf32>
    %70 = vector.extract_strided_slice %63 {offsets = [0, 0, 8, 0], sizes = [2, 8, 8, 16], strides = [1, 1, 1, 1]} : vector<2x8x18x16xf32> to vector<2x8x8x16xf32>
    %c7 = arith.constant 7 : index
    %c0_55 = arith.constant 0 : index
    %71 = vector.load %arg8[%c7, %c0_55] : memref<9x16xf32, #tpu.memory_space<vmem>>, vector<1x16xf32>
    %72 = vector.shape_cast %71 : vector<1x16xf32> to vector<1x1x1x16xf32>
    %73 = vector.broadcast %72 : vector<1x1x1x16xf32> to vector<2x8x8x16xf32>
    %74 = arith.mulf %70, %73 : vector<2x8x8x16xf32>
    %75 = arith.addf %69, %74 : vector<2x8x8x16xf32>
    %76 = vector.extract_strided_slice %63 {offsets = [0, 0, 9, 0], sizes = [2, 8, 8, 16], strides = [1, 1, 1, 1]} : vector<2x8x18x16xf32> to vector<2x8x8x16xf32>
    %c8_56 = arith.constant 8 : index
    %c0_57 = arith.constant 0 : index
    %77 = vector.load %arg8[%c8_56, %c0_57] : memref<9x16xf32, #tpu.memory_space<vmem>>, vector<1x16xf32>
    %78 = vector.shape_cast %77 : vector<1x16xf32> to vector<1x1x1x16xf32>
    %79 = vector.broadcast %78 : vector<1x1x1x16xf32> to vector<2x8x8x16xf32>
    %80 = arith.mulf %76, %79 : vector<2x8x8x16xf32>
    %81 = arith.addf %75, %80 : vector<2x8x8x16xf32>
    %cst_58 = arith.constant 5.000000e-01 : f32
    %82 = vector.broadcast %cst_58 : f32 to vector<2x8x8x16xf32>
    %83 = arith.mulf %82, %81 : vector<2x8x8x16xf32>
    %cst_59 = arith.constant 0.707106769 : f32
    %84 = vector.broadcast %cst_59 : f32 to vector<2x8x8x16xf32>
    %85 = arith.mulf %81, %84 : vector<2x8x8x16xf32>
    %cst_60 = arith.constant 0.000000e+00 : f32
    %86 = vector.broadcast %cst_60 : f32 to vector<2x8x8x16xf32>
    %87 = arith.cmpf oge, %85, %86 : vector<2x8x8x16xf32>
    %cst_61 = arith.constant 1.000000e+00 : f32
    %cst_62 = arith.constant -1.000000e+00 : f32
    %88 = vector.broadcast %cst_61 : f32 to vector<2x8x8x16xf32>
    %89 = vector.broadcast %cst_62 : f32 to vector<2x8x8x16xf32>
    %90 = arith.select %87, %88, %89 : vector<2x8x8x16xi1>, vector<2x8x8x16xf32>
    %91 = math.absf %85 : vector<2x8x8x16xf32>
    %cst_63 = arith.constant 0.327591091 : f32
    %92 = vector.broadcast %cst_63 : f32 to vector<2x8x8x16xf32>
    %93 = arith.mulf %92, %91 : vector<2x8x8x16xf32>
    %cst_64 = arith.constant 1.000000e+00 : f32
    %94 = vector.broadcast %cst_64 : f32 to vector<2x8x8x16xf32>
    %95 = arith.addf %94, %93 : vector<2x8x8x16xf32>
    %96 = tpu.reciprocal %95 {approx = true} : vector<2x8x8x16xf32> -> vector<2x8x8x16xf32>
    %cst_65 = arith.constant 1.06140542 : f32
    %97 = vector.broadcast %cst_65 : f32 to vector<2x8x8x16xf32>
    %98 = arith.mulf %97, %96 : vector<2x8x8x16xf32>
    %cst_66 = arith.constant -1.45315206 : f32
    %99 = vector.broadcast %cst_66 : f32 to vector<2x8x8x16xf32>
    %100 = arith.addf %98, %99 : vector<2x8x8x16xf32>
    %101 = arith.mulf %100, %96 : vector<2x8x8x16xf32>
    %cst_67 = arith.constant 1.42141378 : f32
    %102 = vector.broadcast %cst_67 : f32 to vector<2x8x8x16xf32>
    %103 = arith.addf %101, %102 : vector<2x8x8x16xf32>
    %104 = arith.mulf %103, %96 : vector<2x8x8x16xf32>
    %cst_68 = arith.constant -0.284496725 : f32
    %105 = vector.broadcast %cst_68 : f32 to vector<2x8x8x16xf32>
    %106 = arith.addf %104, %105 : vector<2x8x8x16xf32>
    %107 = arith.mulf %106, %96 : vector<2x8x8x16xf32>
    %cst_69 = arith.constant 0.254829586 : f32
    %108 = vector.broadcast %cst_69 : f32 to vector<2x8x8x16xf32>
    %109 = arith.addf %107, %108 : vector<2x8x8x16xf32>
    %110 = arith.mulf %109, %96 : vector<2x8x8x16xf32>
    %cst_70 = arith.constant 0.000000e+00 : f32
    %111 = vector.broadcast %cst_70 : f32 to vector<2x8x8x16xf32>
    %112 = arith.subf %111, %91 : vector<2x8x8x16xf32>
    %113 = arith.mulf %112, %91 : vector<2x8x8x16xf32>
    %114 = math.exp %113 : vector<2x8x8x16xf32>
    %115 = arith.mulf %110, %114 : vector<2x8x8x16xf32>
    %cst_71 = arith.constant 1.000000e+00 : f32
    %116 = vector.broadcast %cst_71 : f32 to vector<2x8x8x16xf32>
    %117 = arith.subf %116, %115 : vector<2x8x8x16xf32>
    %118 = arith.mulf %90, %117 : vector<2x8x8x16xf32>
    %cst_72 = arith.constant 1.000000e+00 : f32
    %119 = vector.broadcast %cst_72 : f32 to vector<2x8x8x16xf32>
    %120 = arith.addf %119, %118 : vector<2x8x8x16xf32>
    %121 = arith.mulf %83, %120 : vector<2x8x8x16xf32>
    %122 = vector.extract_strided_slice %13 {offsets = [0, 0, 0, 0], sizes = [2, 8, 8, 1], strides = [1, 1, 1, 1]} : vector<2x8x8x3xf32> to vector<2x8x8x1xf32>
    %123 = vector.broadcast %122 : vector<2x8x8x1xf32> to vector<2x8x8x16xf32>
    %124 = arith.mulf %121, %123 : vector<2x8x8x16xf32>
    %125 = arith.addf %22, %124 : vector<2x8x8x16xf32>
    %c0_73 = arith.constant 0 : index
    %c2_74 = arith.constant 2 : index
    %c8_75 = arith.constant 8 : index
    %c0_76 = arith.constant 0 : index
    %126 = vector.load %arg15[%c0_73, %c2_74, %c8_75, %c0_76] : memref<2x12x18x16xf32, #tpu.memory_space<vmem>>, vector<2x8x8x16xf32>
    tpu.vector_store %arg15[%c0_73, %c2_74, %c8_75, %c0_76], %121 {strides = array<i32>} : memref<2x12x18x16xf32, #tpu.memory_space<vmem>>, vector<2x8x8x16xf32>,
    %cst_77 = arith.constant 0.000000e+00 : f32
    %127 = vector.broadcast %cst_77 : f32 to vector<2x8x8x16xf32>
    %c0_78 = arith.constant 0 : index
    %c0_79 = arith.constant 0 : index
    %c0_80 = arith.constant 0 : index
    %c0_81 = arith.constant 0 : index
    %128 = vector.load %arg15[%c0_78, %c0_79, %c0_80, %c0_81] : memref<2x12x18x16xf32, #tpu.memory_space<vmem>>, vector<2x8x18x16xf32>
    %129 = vector.extract_strided_slice %128 {offsets = [0, 0, 6, 0], sizes = [2, 8, 8, 16], strides = [1, 1, 1, 1]} : vector<2x8x18x16xf32> to vector<2x8x8x16xf32>
    %c0_82 = arith.constant 0 : index
    %c0_83 = arith.constant 0 : index
    %130 = vector.load %arg9[%c0_82, %c0_83] : memref<25x16xf32, #tpu.memory_space<vmem>>, vector<1x16xf32>
    %131 = vector.shape_cast %130 : vector<1x16xf32> to vector<1x1x1x16xf32>
    %132 = vector.broadcast %131 : vector<1x1x1x16xf32> to vector<2x8x8x16xf32>
    %133 = arith.mulf %129, %132 : vector<2x8x8x16xf32>
    %134 = arith.addf %127, %133 : vector<2x8x8x16xf32>
    %135 = vector.extract_strided_slice %128 {offsets = [0, 0, 7, 0], sizes = [2, 8, 8, 16], strides = [1, 1, 1, 1]} : vector<2x8x18x16xf32> to vector<2x8x8x16xf32>
    %c1_84 = arith.constant 1 : index
    %c0_85 = arith.constant 0 : index
    %136 = vector.load %arg9[%c1_84, %c0_85] : memref<25x16xf32, #tpu.memory_space<vmem>>, vector<1x16xf32>
    %137 = vector.shape_cast %136 : vector<1x16xf32> to vector<1x1x1x16xf32>
    %138 = vector.broadcast %137 : vector<1x1x1x16xf32> to vector<2x8x8x16xf32>
    %139 = arith.mulf %135, %138 : vector<2x8x8x16xf32>
    %140 = arith.addf %134, %139 : vector<2x8x8x16xf32>
    %141 = vector.extract_strided_slice %128 {offsets = [0, 0, 8, 0], sizes = [2, 8, 8, 16], strides = [1, 1, 1, 1]} : vector<2x8x18x16xf32> to vector<2x8x8x16xf32>
    %c2_86 = arith.constant 2 : index
    %c0_87 = arith.constant 0 : index
    %142 = vector.load %arg9[%c2_86, %c0_87] : memref<25x16xf32, #tpu.memory_space<vmem>>, vector<1x16xf32>
    %143 = vector.shape_cast %142 : vector<1x16xf32> to vector<1x1x1x16xf32>
    %144 = vector.broadcast %143 : vector<1x1x1x16xf32> to vector<2x8x8x16xf32>
    %145 = arith.mulf %141, %144 : vector<2x8x8x16xf32>
    %146 = arith.addf %140, %145 : vector<2x8x8x16xf32>
    %147 = vector.extract_strided_slice %128 {offsets = [0, 0, 9, 0], sizes = [2, 8, 8, 16], strides = [1, 1, 1, 1]} : vector<2x8x18x16xf32> to vector<2x8x8x16xf32>
    %c3_88 = arith.constant 3 : index
    %c0_89 = arith.constant 0 : index
    %148 = vector.load %arg9[%c3_88, %c0_89] : memref<25x16xf32, #tpu.memory_space<vmem>>, vector<1x16xf32>
    %149 = vector.shape_cast %148 : vector<1x16xf32> to vector<1x1x1x16xf32>
    %150 = vector.broadcast %149 : vector<1x1x1x16xf32> to vector<2x8x8x16xf32>
    %151 = arith.mulf %147, %150 : vector<2x8x8x16xf32>
    %152 = arith.addf %146, %151 : vector<2x8x8x16xf32>
    %153 = vector.extract_strided_slice %128 {offsets = [0, 0, 10, 0], sizes = [2, 8, 8, 16], strides = [1, 1, 1, 1]} : vector<2x8x18x16xf32> to vector<2x8x8x16xf32>
    %c4_90 = arith.constant 4 : index
    %c0_91 = arith.constant 0 : index
    %154 = vector.load %arg9[%c4_90, %c0_91] : memref<25x16xf32, #tpu.memory_space<vmem>>, vector<1x16xf32>
    %155 = vector.shape_cast %154 : vector<1x16xf32> to vector<1x1x1x16xf32>
    %156 = vector.broadcast %155 : vector<1x1x1x16xf32> to vector<2x8x8x16xf32>
    %157 = arith.mulf %153, %156 : vector<2x8x8x16xf32>
    %158 = arith.addf %152, %157 : vector<2x8x8x16xf32>
    %c0_92 = arith.constant 0 : index
    %c1_93 = arith.constant 1 : index
    %c0_94 = arith.constant 0 : index
    %c0_95 = arith.constant 0 : index
    %159 = vector.load %arg15[%c0_92, %c1_93, %c0_94, %c0_95] : memref<2x12x18x16xf32, #tpu.memory_space<vmem>>, vector<2x8x18x16xf32>
    %160 = vector.extract_strided_slice %159 {offsets = [0, 0, 6, 0], sizes = [2, 8, 8, 16], strides = [1, 1, 1, 1]} : vector<2x8x18x16xf32> to vector<2x8x8x16xf32>
    %c5_96 = arith.constant 5 : index
    %c0_97 = arith.constant 0 : index
    %161 = vector.load %arg9[%c5_96, %c0_97] : memref<25x16xf32, #tpu.memory_space<vmem>>, vector<1x16xf32>
    %162 = vector.shape_cast %161 : vector<1x16xf32> to vector<1x1x1x16xf32>
    %163 = vector.broadcast %162 : vector<1x1x1x16xf32> to vector<2x8x8x16xf32>
    %164 = arith.mulf %160, %163 : vector<2x8x8x16xf32>
    %165 = arith.addf %158, %164 : vector<2x8x8x16xf32>
    %166 = vector.extract_strided_slice %159 {offsets = [0, 0, 7, 0], sizes = [2, 8, 8, 16], strides = [1, 1, 1, 1]} : vector<2x8x18x16xf32> to vector<2x8x8x16xf32>
    %c6_98 = arith.constant 6 : index
    %c0_99 = arith.constant 0 : index
    %167 = vector.load %arg9[%c6_98, %c0_99] : memref<25x16xf32, #tpu.memory_space<vmem>>, vector<1x16xf32>
    %168 = vector.shape_cast %167 : vector<1x16xf32> to vector<1x1x1x16xf32>
    %169 = vector.broadcast %168 : vector<1x1x1x16xf32> to vector<2x8x8x16xf32>
    %170 = arith.mulf %166, %169 : vector<2x8x8x16xf32>
    %171 = arith.addf %165, %170 : vector<2x8x8x16xf32>
    %172 = vector.extract_strided_slice %159 {offsets = [0, 0, 8, 0], sizes = [2, 8, 8, 16], strides = [1, 1, 1, 1]} : vector<2x8x18x16xf32> to vector<2x8x8x16xf32>
    %c7_100 = arith.constant 7 : index
    %c0_101 = arith.constant 0 : index
    %173 = vector.load %arg9[%c7_100, %c0_101] : memref<25x16xf32, #tpu.memory_space<vmem>>, vector<1x16xf32>
    %174 = vector.shape_cast %173 : vector<1x16xf32> to vector<1x1x1x16xf32>
    %175 = vector.broadcast %174 : vector<1x1x1x16xf32> to vector<2x8x8x16xf32>
    %176 = arith.mulf %172, %175 : vector<2x8x8x16xf32>
    %177 = arith.addf %171, %176 : vector<2x8x8x16xf32>
    %178 = vector.extract_strided_slice %159 {offsets = [0, 0, 9, 0], sizes = [2, 8, 8, 16], strides = [1, 1, 1, 1]} : vector<2x8x18x16xf32> to vector<2x8x8x16xf32>
    %c8_102 = arith.constant 8 : index
    %c0_103 = arith.constant 0 : index
    %179 = vector.load %arg9[%c8_102, %c0_103] : memref<25x16xf32, #tpu.memory_space<vmem>>, vector<1x16xf32>
    %180 = vector.shape_cast %179 : vector<1x16xf32> to vector<1x1x1x16xf32>
    %181 = vector.broadcast %180 : vector<1x1x1x16xf32> to vector<2x8x8x16xf32>
    %182 = arith.mulf %178, %181 : vector<2x8x8x16xf32>
    %183 = arith.addf %177, %182 : vector<2x8x8x16xf32>
    %184 = vector.extract_strided_slice %159 {offsets = [0, 0, 10, 0], sizes = [2, 8, 8, 16], strides = [1, 1, 1, 1]} : vector<2x8x18x16xf32> to vector<2x8x8x16xf32>
    %c9 = arith.constant 9 : index
    %c0_104 = arith.constant 0 : index
    %185 = vector.load %arg9[%c9, %c0_104] : memref<25x16xf32, #tpu.memory_space<vmem>>, vector<1x16xf32>
    %186 = vector.shape_cast %185 : vector<1x16xf32> to vector<1x1x1x16xf32>
    %187 = vector.broadcast %186 : vector<1x1x1x16xf32> to vector<2x8x8x16xf32>
    %188 = arith.mulf %184, %187 : vector<2x8x8x16xf32>
    %189 = arith.addf %183, %188 : vector<2x8x8x16xf32>
    %c0_105 = arith.constant 0 : index
    %c2_106 = arith.constant 2 : index
    %c0_107 = arith.constant 0 : index
    %c0_108 = arith.constant 0 : index
    %190 = vector.load %arg15[%c0_105, %c2_106, %c0_107, %c0_108] : memref<2x12x18x16xf32, #tpu.memory_space<vmem>>, vector<2x8x18x16xf32>
    %191 = vector.extract_strided_slice %190 {offsets = [0, 0, 6, 0], sizes = [2, 8, 8, 16], strides = [1, 1, 1, 1]} : vector<2x8x18x16xf32> to vector<2x8x8x16xf32>
    %c10_109 = arith.constant 10 : index
    %c0_110 = arith.constant 0 : index
    %192 = vector.load %arg9[%c10_109, %c0_110] : memref<25x16xf32, #tpu.memory_space<vmem>>, vector<1x16xf32>
    %193 = vector.shape_cast %192 : vector<1x16xf32> to vector<1x1x1x16xf32>
    %194 = vector.broadcast %193 : vector<1x1x1x16xf32> to vector<2x8x8x16xf32>
    %195 = arith.mulf %191, %194 : vector<2x8x8x16xf32>
    %196 = arith.addf %189, %195 : vector<2x8x8x16xf32>
    %197 = vector.extract_strided_slice %190 {offsets = [0, 0, 7, 0], sizes = [2, 8, 8, 16], strides = [1, 1, 1, 1]} : vector<2x8x18x16xf32> to vector<2x8x8x16xf32>
    %c11 = arith.constant 11 : index
    %c0_111 = arith.constant 0 : index
    %198 = vector.load %arg9[%c11, %c0_111] : memref<25x16xf32, #tpu.memory_space<vmem>>, vector<1x16xf32>
    %199 = vector.shape_cast %198 : vector<1x16xf32> to vector<1x1x1x16xf32>
    %200 = vector.broadcast %199 : vector<1x1x1x16xf32> to vector<2x8x8x16xf32>
    %201 = arith.mulf %197, %200 : vector<2x8x8x16xf32>
    %202 = arith.addf %196, %201 : vector<2x8x8x16xf32>
    %203 = vector.extract_strided_slice %190 {offsets = [0, 0, 8, 0], sizes = [2, 8, 8, 16], strides = [1, 1, 1, 1]} : vector<2x8x18x16xf32> to vector<2x8x8x16xf32>
    %c12 = arith.constant 12 : index
    %c0_112 = arith.constant 0 : index
    %204 = vector.load %arg9[%c12, %c0_112] : memref<25x16xf32, #tpu.memory_space<vmem>>, vector<1x16xf32>
    %205 = vector.shape_cast %204 : vector<1x16xf32> to vector<1x1x1x16xf32>
    %206 = vector.broadcast %205 : vector<1x1x1x16xf32> to vector<2x8x8x16xf32>
    %207 = arith.mulf %203, %206 : vector<2x8x8x16xf32>
    %208 = arith.addf %202, %207 : vector<2x8x8x16xf32>
    %209 = vector.extract_strided_slice %190 {offsets = [0, 0, 9, 0], sizes = [2, 8, 8, 16], strides = [1, 1, 1, 1]} : vector<2x8x18x16xf32> to vector<2x8x8x16xf32>
    %c13 = arith.constant 13 : index
    %c0_113 = arith.constant 0 : index
    %210 = vector.load %arg9[%c13, %c0_113] : memref<25x16xf32, #tpu.memory_space<vmem>>, vector<1x16xf32>
    %211 = vector.shape_cast %210 : vector<1x16xf32> to vector<1x1x1x16xf32>
    %212 = vector.broadcast %211 : vector<1x1x1x16xf32> to vector<2x8x8x16xf32>
    %213 = arith.mulf %209, %212 : vector<2x8x8x16xf32>
    %214 = arith.addf %208, %213 : vector<2x8x8x16xf32>
    %215 = vector.extract_strided_slice %190 {offsets = [0, 0, 10, 0], sizes = [2, 8, 8, 16], strides = [1, 1, 1, 1]} : vector<2x8x18x16xf32> to vector<2x8x8x16xf32>
    %c14 = arith.constant 14 : index
    %c0_114 = arith.constant 0 : index
    %216 = vector.load %arg9[%c14, %c0_114] : memref<25x16xf32, #tpu.memory_space<vmem>>, vector<1x16xf32>
    %217 = vector.shape_cast %216 : vector<1x16xf32> to vector<1x1x1x16xf32>
    %218 = vector.broadcast %217 : vector<1x1x1x16xf32> to vector<2x8x8x16xf32>
    %219 = arith.mulf %215, %218 : vector<2x8x8x16xf32>
    %220 = arith.addf %214, %219 : vector<2x8x8x16xf32>
    %c0_115 = arith.constant 0 : index
    %c3_116 = arith.constant 3 : index
    %c0_117 = arith.constant 0 : index
    %c0_118 = arith.constant 0 : index
    %221 = vector.load %arg15[%c0_115, %c3_116, %c0_117, %c0_118] : memref<2x12x18x16xf32, #tpu.memory_space<vmem>>, vector<2x8x18x16xf32>
    %222 = vector.extract_strided_slice %221 {offsets = [0, 0, 6, 0], sizes = [2, 8, 8, 16], strides = [1, 1, 1, 1]} : vector<2x8x18x16xf32> to vector<2x8x8x16xf32>
    %c15 = arith.constant 15 : index
    %c0_119 = arith.constant 0 : index
    %223 = vector.load %arg9[%c15, %c0_119] : memref<25x16xf32, #tpu.memory_space<vmem>>, vector<1x16xf32>
    %224 = vector.shape_cast %223 : vector<1x16xf32> to vector<1x1x1x16xf32>
    %225 = vector.broadcast %224 : vector<1x1x1x16xf32> to vector<2x8x8x16xf32>
    %226 = arith.mulf %222, %225 : vector<2x8x8x16xf32>
    %227 = arith.addf %220, %226 : vector<2x8x8x16xf32>
    %228 = vector.extract_strided_slice %221 {offsets = [0, 0, 7, 0], sizes = [2, 8, 8, 16], strides = [1, 1, 1, 1]} : vector<2x8x18x16xf32> to vector<2x8x8x16xf32>
    %c16_120 = arith.constant 16 : index
    %c0_121 = arith.constant 0 : index
    %229 = vector.load %arg9[%c16_120, %c0_121] : memref<25x16xf32, #tpu.memory_space<vmem>>, vector<1x16xf32>
    %230 = vector.shape_cast %229 : vector<1x16xf32> to vector<1x1x1x16xf32>
    %231 = vector.broadcast %230 : vector<1x1x1x16xf32> to vector<2x8x8x16xf32>
    %232 = arith.mulf %228, %231 : vector<2x8x8x16xf32>
    %233 = arith.addf %227, %232 : vector<2x8x8x16xf32>
    %234 = vector.extract_strided_slice %221 {offsets = [0, 0, 8, 0], sizes = [2, 8, 8, 16], strides = [1, 1, 1, 1]} : vector<2x8x18x16xf32> to vector<2x8x8x16xf32>
    %c17 = arith.constant 17 : index
    %c0_122 = arith.constant 0 : index
    %235 = vector.load %arg9[%c17, %c0_122] : memref<25x16xf32, #tpu.memory_space<vmem>>, vector<1x16xf32>
    %236 = vector.shape_cast %235 : vector<1x16xf32> to vector<1x1x1x16xf32>
    %237 = vector.broadcast %236 : vector<1x1x1x16xf32> to vector<2x8x8x16xf32>
    %238 = arith.mulf %234, %237 : vector<2x8x8x16xf32>
    %239 = arith.addf %233, %238 : vector<2x8x8x16xf32>
    %240 = vector.extract_strided_slice %221 {offsets = [0, 0, 9, 0], sizes = [2, 8, 8, 16], strides = [1, 1, 1, 1]} : vector<2x8x18x16xf32> to vector<2x8x8x16xf32>
    %c18 = arith.constant 18 : index
    %c0_123 = arith.constant 0 : index
    %241 = vector.load %arg9[%c18, %c0_123] : memref<25x16xf32, #tpu.memory_space<vmem>>, vector<1x16xf32>
    %242 = vector.shape_cast %241 : vector<1x16xf32> to vector<1x1x1x16xf32>
    %243 = vector.broadcast %242 : vector<1x1x1x16xf32> to vector<2x8x8x16xf32>
    %244 = arith.mulf %240, %243 : vector<2x8x8x16xf32>
    %245 = arith.addf %239, %244 : vector<2x8x8x16xf32>
    %246 = vector.extract_strided_slice %221 {offsets = [0, 0, 10, 0], sizes = [2, 8, 8, 16], strides = [1, 1, 1, 1]} : vector<2x8x18x16xf32> to vector<2x8x8x16xf32>
    %c19 = arith.constant 19 : index
    %c0_124 = arith.constant 0 : index
    %247 = vector.load %arg9[%c19, %c0_124] : memref<25x16xf32, #tpu.memory_space<vmem>>, vector<1x16xf32>
    %248 = vector.shape_cast %247 : vector<1x16xf32> to vector<1x1x1x16xf32>
    %249 = vector.broadcast %248 : vector<1x1x1x16xf32> to vector<2x8x8x16xf32>
    %250 = arith.mulf %246, %249 : vector<2x8x8x16xf32>
    %251 = arith.addf %245, %250 : vector<2x8x8x16xf32>
    %c0_125 = arith.constant 0 : index
    %c4_126 = arith.constant 4 : index
    %c0_127 = arith.constant 0 : index
    %c0_128 = arith.constant 0 : index
    %252 = vector.load %arg15[%c0_125, %c4_126, %c0_127, %c0_128] : memref<2x12x18x16xf32, #tpu.memory_space<vmem>>, vector<2x8x18x16xf32>
    %253 = vector.extract_strided_slice %252 {offsets = [0, 0, 6, 0], sizes = [2, 8, 8, 16], strides = [1, 1, 1, 1]} : vector<2x8x18x16xf32> to vector<2x8x8x16xf32>
    %c20 = arith.constant 20 : index
    %c0_129 = arith.constant 0 : index
    %254 = vector.load %arg9[%c20, %c0_129] : memref<25x16xf32, #tpu.memory_space<vmem>>, vector<1x16xf32>
    %255 = vector.shape_cast %254 : vector<1x16xf32> to vector<1x1x1x16xf32>
    %256 = vector.broadcast %255 : vector<1x1x1x16xf32> to vector<2x8x8x16xf32>
    %257 = arith.mulf %253, %256 : vector<2x8x8x16xf32>
    %258 = arith.addf %251, %257 : vector<2x8x8x16xf32>
    %259 = vector.extract_strided_slice %252 {offsets = [0, 0, 7, 0], sizes = [2, 8, 8, 16], strides = [1, 1, 1, 1]} : vector<2x8x18x16xf32> to vector<2x8x8x16xf32>
    %c21 = arith.constant 21 : index
    %c0_130 = arith.constant 0 : index
    %260 = vector.load %arg9[%c21, %c0_130] : memref<25x16xf32, #tpu.memory_space<vmem>>, vector<1x16xf32>
    %261 = vector.shape_cast %260 : vector<1x16xf32> to vector<1x1x1x16xf32>
    %262 = vector.broadcast %261 : vector<1x1x1x16xf32> to vector<2x8x8x16xf32>
    %263 = arith.mulf %259, %262 : vector<2x8x8x16xf32>
    %264 = arith.addf %258, %263 : vector<2x8x8x16xf32>
    %265 = vector.extract_strided_slice %252 {offsets = [0, 0, 8, 0], sizes = [2, 8, 8, 16], strides = [1, 1, 1, 1]} : vector<2x8x18x16xf32> to vector<2x8x8x16xf32>
    %c22 = arith.constant 22 : index
    %c0_131 = arith.constant 0 : index
    %266 = vector.load %arg9[%c22, %c0_131] : memref<25x16xf32, #tpu.memory_space<vmem>>, vector<1x16xf32>
    %267 = vector.shape_cast %266 : vector<1x16xf32> to vector<1x1x1x16xf32>
    %268 = vector.broadcast %267 : vector<1x1x1x16xf32> to vector<2x8x8x16xf32>
    %269 = arith.mulf %265, %268 : vector<2x8x8x16xf32>
    %270 = arith.addf %264, %269 : vector<2x8x8x16xf32>
    %271 = vector.extract_strided_slice %252 {offsets = [0, 0, 9, 0], sizes = [2, 8, 8, 16], strides = [1, 1, 1, 1]} : vector<2x8x18x16xf32> to vector<2x8x8x16xf32>
    %c23 = arith.constant 23 : index
    %c0_132 = arith.constant 0 : index
    %272 = vector.load %arg9[%c23, %c0_132] : memref<25x16xf32, #tpu.memory_space<vmem>>, vector<1x16xf32>
    %273 = vector.shape_cast %272 : vector<1x16xf32> to vector<1x1x1x16xf32>
    %274 = vector.broadcast %273 : vector<1x1x1x16xf32> to vector<2x8x8x16xf32>
    %275 = arith.mulf %271, %274 : vector<2x8x8x16xf32>
    %276 = arith.addf %270, %275 : vector<2x8x8x16xf32>
    %277 = vector.extract_strided_slice %252 {offsets = [0, 0, 10, 0], sizes = [2, 8, 8, 16], strides = [1, 1, 1, 1]} : vector<2x8x18x16xf32> to vector<2x8x8x16xf32>
    %c24 = arith.constant 24 : index
    %c0_133 = arith.constant 0 : index
    %278 = vector.load %arg9[%c24, %c0_133] : memref<25x16xf32, #tpu.memory_space<vmem>>, vector<1x16xf32>
    %279 = vector.shape_cast %278 : vector<1x16xf32> to vector<1x1x1x16xf32>
    %280 = vector.broadcast %279 : vector<1x1x1x16xf32> to vector<2x8x8x16xf32>
    %281 = arith.mulf %277, %280 : vector<2x8x8x16xf32>
    %282 = arith.addf %276, %281 : vector<2x8x8x16xf32>
    %cst_134 = arith.constant 5.000000e-01 : f32
    %283 = vector.broadcast %cst_134 : f32 to vector<2x8x8x16xf32>
    %284 = arith.mulf %283, %282 : vector<2x8x8x16xf32>
    %cst_135 = arith.constant 0.707106769 : f32
    %285 = vector.broadcast %cst_135 : f32 to vector<2x8x8x16xf32>
    %286 = arith.mulf %282, %285 : vector<2x8x8x16xf32>
    %cst_136 = arith.constant 0.000000e+00 : f32
    %287 = vector.broadcast %cst_136 : f32 to vector<2x8x8x16xf32>
    %288 = arith.cmpf oge, %286, %287 : vector<2x8x8x16xf32>
    %cst_137 = arith.constant 1.000000e+00 : f32
    %cst_138 = arith.constant -1.000000e+00 : f32
    %289 = vector.broadcast %cst_137 : f32 to vector<2x8x8x16xf32>
    %290 = vector.broadcast %cst_138 : f32 to vector<2x8x8x16xf32>
    %291 = arith.select %288, %289, %290 : vector<2x8x8x16xi1>, vector<2x8x8x16xf32>
    %292 = math.absf %286 : vector<2x8x8x16xf32>
    %cst_139 = arith.constant 0.327591091 : f32
    %293 = vector.broadcast %cst_139 : f32 to vector<2x8x8x16xf32>
    %294 = arith.mulf %293, %292 : vector<2x8x8x16xf32>
    %cst_140 = arith.constant 1.000000e+00 : f32
    %295 = vector.broadcast %cst_140 : f32 to vector<2x8x8x16xf32>
    %296 = arith.addf %295, %294 : vector<2x8x8x16xf32>
    %297 = tpu.reciprocal %296 {approx = true} : vector<2x8x8x16xf32> -> vector<2x8x8x16xf32>
    %cst_141 = arith.constant 1.06140542 : f32
    %298 = vector.broadcast %cst_141 : f32 to vector<2x8x8x16xf32>
    %299 = arith.mulf %298, %297 : vector<2x8x8x16xf32>
    %cst_142 = arith.constant -1.45315206 : f32
    %300 = vector.broadcast %cst_142 : f32 to vector<2x8x8x16xf32>
    %301 = arith.addf %299, %300 : vector<2x8x8x16xf32>
    %302 = arith.mulf %301, %297 : vector<2x8x8x16xf32>
    %cst_143 = arith.constant 1.42141378 : f32
    %303 = vector.broadcast %cst_143 : f32 to vector<2x8x8x16xf32>
    %304 = arith.addf %302, %303 : vector<2x8x8x16xf32>
    %305 = arith.mulf %304, %297 : vector<2x8x8x16xf32>
    %cst_144 = arith.constant -0.284496725 : f32
    %306 = vector.broadcast %cst_144 : f32 to vector<2x8x8x16xf32>
    %307 = arith.addf %305, %306 : vector<2x8x8x16xf32>
    %308 = arith.mulf %307, %297 : vector<2x8x8x16xf32>
    %cst_145 = arith.constant 0.254829586 : f32
    %309 = vector.broadcast %cst_145 : f32 to vector<2x8x8x16xf32>
    %310 = arith.addf %308, %309 : vector<2x8x8x16xf32>
    %311 = arith.mulf %310, %297 : vector<2x8x8x16xf32>
    %cst_146 = arith.constant 0.000000e+00 : f32
    %312 = vector.broadcast %cst_146 : f32 to vector<2x8x8x16xf32>
    %313 = arith.subf %312, %292 : vector<2x8x8x16xf32>
    %314 = arith.mulf %313, %292 : vector<2x8x8x16xf32>
    %315 = math.exp %314 : vector<2x8x8x16xf32>
    %316 = arith.mulf %311, %315 : vector<2x8x8x16xf32>
    %cst_147 = arith.constant 1.000000e+00 : f32
    %317 = vector.broadcast %cst_147 : f32 to vector<2x8x8x16xf32>
    %318 = arith.subf %317, %316 : vector<2x8x8x16xf32>
    %319 = arith.mulf %291, %318 : vector<2x8x8x16xf32>
    %cst_148 = arith.constant 1.000000e+00 : f32
    %320 = vector.broadcast %cst_148 : f32 to vector<2x8x8x16xf32>
    %321 = arith.addf %320, %319 : vector<2x8x8x16xf32>
    %322 = arith.mulf %284, %321 : vector<2x8x8x16xf32>
    %323 = vector.extract_strided_slice %13 {offsets = [0, 0, 0, 1], sizes = [2, 8, 8, 1], strides = [1, 1, 1, 1]} : vector<2x8x8x3xf32> to vector<2x8x8x1xf32>
    %324 = vector.broadcast %323 : vector<2x8x8x1xf32> to vector<2x8x8x16xf32>
    %325 = arith.mulf %322, %324 : vector<2x8x8x16xf32>
    %326 = arith.addf %125, %325 : vector<2x8x8x16xf32>
    %cst_149 = arith.constant dense<0.000000e+00> : vector<2x16xf32>
    %327 = vector.multi_reduction <add>, %322, %cst_149 [1, 2] : vector<2x8x8x16xf32> to vector<2x16xf32>
    %328 = vector.shape_cast %327 : vector<2x16xf32> to vector<2x1x1x16xf32>
    %cst_150 = arith.constant 6.400000e+01 : f32
    %329 = vector.broadcast %cst_150 : f32 to vector<2x1x1x16xf32>
    %330 = arith.divf %328, %329 : vector<2x1x1x16xf32>
    %cst_151 = arith.constant 5.000000e-01 : f32
    %331 = vector.broadcast %cst_151 : f32 to vector<2x1x1x16xf32>
    %332 = arith.mulf %331, %330 : vector<2x1x1x16xf32>
    %cst_152 = arith.constant 0.707106769 : f32
    %333 = vector.broadcast %cst_152 : f32 to vector<2x1x1x16xf32>
    %334 = arith.mulf %330, %333 : vector<2x1x1x16xf32>
    %cst_153 = arith.constant 0.000000e+00 : f32
    %335 = vector.broadcast %cst_153 : f32 to vector<2x1x1x16xf32>
    %336 = arith.cmpf oge, %334, %335 : vector<2x1x1x16xf32>
    %cst_154 = arith.constant 1.000000e+00 : f32
    %cst_155 = arith.constant -1.000000e+00 : f32
    %337 = vector.broadcast %cst_154 : f32 to vector<2x1x1x16xf32>
    %338 = vector.broadcast %cst_155 : f32 to vector<2x1x1x16xf32>
    %339 = arith.select %336, %337, %338 : vector<2x1x1x16xi1>, vector<2x1x1x16xf32>
    %340 = math.absf %334 : vector<2x1x1x16xf32>
    %cst_156 = arith.constant 0.327591091 : f32
    %341 = vector.broadcast %cst_156 : f32 to vector<2x1x1x16xf32>
    %342 = arith.mulf %341, %340 : vector<2x1x1x16xf32>
    %cst_157 = arith.constant 1.000000e+00 : f32
    %343 = vector.broadcast %cst_157 : f32 to vector<2x1x1x16xf32>
    %344 = arith.addf %343, %342 : vector<2x1x1x16xf32>
    %345 = tpu.reciprocal %344 {approx = true} : vector<2x1x1x16xf32> -> vector<2x1x1x16xf32>
    %cst_158 = arith.constant 1.06140542 : f32
    %346 = vector.broadcast %cst_158 : f32 to vector<2x1x1x16xf32>
    %347 = arith.mulf %346, %345 : vector<2x1x1x16xf32>
    %cst_159 = arith.constant -1.45315206 : f32
    %348 = vector.broadcast %cst_159 : f32 to vector<2x1x1x16xf32>
    %349 = arith.addf %347, %348 : vector<2x1x1x16xf32>
    %350 = arith.mulf %349, %345 : vector<2x1x1x16xf32>
    %cst_160 = arith.constant 1.42141378 : f32
    %351 = vector.broadcast %cst_160 : f32 to vector<2x1x1x16xf32>
    %352 = arith.addf %350, %351 : vector<2x1x1x16xf32>
    %353 = arith.mulf %352, %345 : vector<2x1x1x16xf32>
    %cst_161 = arith.constant -0.284496725 : f32
    %354 = vector.broadcast %cst_161 : f32 to vector<2x1x1x16xf32>
    %355 = arith.addf %353, %354 : vector<2x1x1x16xf32>
    %356 = arith.mulf %355, %345 : vector<2x1x1x16xf32>
    %cst_162 = arith.constant 0.254829586 : f32
    %357 = vector.broadcast %cst_162 : f32 to vector<2x1x1x16xf32>
    %358 = arith.addf %356, %357 : vector<2x1x1x16xf32>
    %359 = arith.mulf %358, %345 : vector<2x1x1x16xf32>
    %cst_163 = arith.constant 0.000000e+00 : f32
    %360 = vector.broadcast %cst_163 : f32 to vector<2x1x1x16xf32>
    %361 = arith.subf %360, %340 : vector<2x1x1x16xf32>
    %362 = arith.mulf %361, %340 : vector<2x1x1x16xf32>
    %363 = math.exp %362 : vector<2x1x1x16xf32>
    %364 = arith.mulf %359, %363 : vector<2x1x1x16xf32>
    %cst_164 = arith.constant 1.000000e+00 : f32
    %365 = vector.broadcast %cst_164 : f32 to vector<2x1x1x16xf32>
    %366 = arith.subf %365, %364 : vector<2x1x1x16xf32>
    %367 = arith.mulf %339, %366 : vector<2x1x1x16xf32>
    %cst_165 = arith.constant 1.000000e+00 : f32
    %368 = vector.broadcast %cst_165 : f32 to vector<2x1x1x16xf32>
    %369 = arith.addf %368, %367 : vector<2x1x1x16xf32>
    %370 = arith.mulf %332, %369 : vector<2x1x1x16xf32>
    %371 = vector.extract_strided_slice %13 {offsets = [0, 0, 0, 2], sizes = [2, 8, 8, 1], strides = [1, 1, 1, 1]} : vector<2x8x8x3xf32> to vector<2x8x8x1xf32>
    %372 = vector.broadcast %370 : vector<2x1x1x16xf32> to vector<2x8x8x16xf32>
    %373 = vector.broadcast %371 : vector<2x8x8x1xf32> to vector<2x8x8x16xf32>
    %374 = arith.mulf %372, %373 : vector<2x8x8x16xf32>
    %375 = arith.addf %326, %374 : vector<2x8x8x16xf32>
    %376 = vector.shape_cast %375 : vector<2x8x8x16xf32> to vector<128x16xf32>
    %377 = arith.truncf %376 : vector<128x16xf32> to vector<128x16xbf16>
    %c0_166 = arith.constant 0 : index
    %c0_167 = arith.constant 0 : index
    %378 = vector.load %arg10[%c0_166, %c0_167] : memref<16x16xbf16, #tpu.memory_space<vmem>>, vector<16x16xbf16>
    %cst_168 = arith.constant dense<0.000000e+00> : vector<128x16xf32>
    %379 = tpu.matmul %377, %378, %cst_168 {dimension_numbers = #tpu.dot_dimension_numbers<[1], [0], [0], [1], [0, 0, 1, 1], [], []>} : vector<128x16xbf16>, vector<16x16xbf16>, vector<128x16xf32> -> vector<128x16xf32>
    %c0_169 = arith.constant 0 : index
    %c0_170 = arith.constant 0 : index
    %380 = vector.load %arg11[%c0_169, %c0_170] : memref<1x16xf32, #tpu.memory_space<vmem>>, vector<1x16xf32>
    %381 = vector.broadcast %380 : vector<1x16xf32> to vector<128x16xf32>
    %382 = arith.addf %379, %381 : vector<128x16xf32>
    %c0_171 = arith.constant 0 : index
    %c0_172 = arith.constant 0 : index
    %c0_173 = arith.constant 0 : index
    %c0_174 = arith.constant 0 : index
    %383 = vector.load %arg1[%c0_171, %c0_172, %c0_173, %c0_174] : memref<2x8x8x16xbf16, #tpu.memory_space<vmem>>, vector<2x8x8x16xbf16>
    %384 = vector.shape_cast %383 : vector<2x8x8x16xbf16> to vector<128x16xbf16>
    %c0_175 = arith.constant 0 : index
    %c0_176 = arith.constant 0 : index
    %385 = vector.load %arg2[%c0_175, %c0_176] : memref<16x16xbf16, #tpu.memory_space<vmem>>, vector<16x16xbf16>
    %cst_177 = arith.constant dense<0.000000e+00> : vector<128x16xf32>
    %386 = tpu.matmul %384, %385, %cst_177 {dimension_numbers = #tpu.dot_dimension_numbers<[1], [0], [0], [1], [0, 0, 1, 1], [], []>} : vector<128x16xbf16>, vector<16x16xbf16>, vector<128x16xf32> -> vector<128x16xf32>
    %c0_178 = arith.constant 0 : index
    %c0_179 = arith.constant 0 : index
    %387 = vector.load %arg5[%c0_178, %c0_179] : memref<1x16xf32, #tpu.memory_space<vmem>>, vector<1x16xf32>
    %388 = vector.broadcast %387 : vector<1x16xf32> to vector<128x16xf32>
    %389 = arith.addf %386, %388 : vector<128x16xf32>
    %390 = arith.mulf %389, %382 : vector<128x16xf32>
    %391 = arith.truncf %390 : vector<128x16xf32> to vector<128x16xbf16>
    %c0_180 = arith.constant 0 : index
    %c0_181 = arith.constant 0 : index
    %392 = vector.load %arg12[%c0_180, %c0_181] : memref<16x16xbf16, #tpu.memory_space<vmem>>, vector<16x16xbf16>
    %cst_182 = arith.constant dense<0.000000e+00> : vector<128x16xf32>
    %393 = tpu.matmul %391, %392, %cst_182 {dimension_numbers = #tpu.dot_dimension_numbers<[1], [0], [0], [1], [0, 0, 1, 1], [], []>} : vector<128x16xbf16>, vector<16x16xbf16>, vector<128x16xf32> -> vector<128x16xf32>
    %c0_183 = arith.constant 0 : index
    %c0_184 = arith.constant 0 : index
    %394 = vector.load %arg13[%c0_183, %c0_184] : memref<1x16xf32, #tpu.memory_space<vmem>>, vector<1x16xf32>
    %395 = vector.broadcast %394 : vector<1x16xf32> to vector<128x16xf32>
    %396 = arith.addf %393, %395 : vector<128x16xf32>
    %397 = vector.shape_cast %396 : vector<128x16xf32> to vector<2x8x8x16xf32>
    %c0_185 = arith.constant 0 : index
    %c0_186 = arith.constant 0 : index
    %c0_187 = arith.constant 0 : index
    %c0_188 = arith.constant 0 : index
    %398 = vector.load %arg14[%c0_185, %c0_186, %c0_187, %c0_188] : memref<2x8x8x16xf32, #tpu.memory_space<vmem>>, vector<2x8x8x16xf32>
    tpu.vector_store %arg14[%c0_185, %c0_186, %c0_187, %c0_188], %397 {strides = array<i32>} : memref<2x8x8x16xf32, #tpu.memory_space<vmem>>, vector<2x8x8x16xf32>,
    return
  }
  func.func @transform_0(%arg0: i32) -> (i32, i32, i32, i32) {
    %c0_i32 = arith.constant 0 : i32
    %c0_i32_0 = arith.constant 0 : i32
    %c0_i32_1 = arith.constant 0 : i32
    %c0_i32_2 = arith.constant 0 : i32
    return %arg0, %c0_i32, %c0_i32_0, %c0_i32_1 : i32, i32, i32, i32
  }
  func.func @transform_1(%arg0: i32) -> (i32, i32) {
    %c0_i32 = arith.constant 0 : i32
    %c0_i32_0 = arith.constant 0 : i32
    %c0_i32_1 = arith.constant 0 : i32
    return %c0_i32, %c0_i32_0 : i32, i32
  }
  func.func @transform_2(%arg0: i32) -> (i32, i32) {
    %c0_i32 = arith.constant 0 : i32
    %c0_i32_0 = arith.constant 0 : i32
    %c0_i32_1 = arith.constant 0 : i32
    return %c0_i32, %c0_i32_0 : i32, i32
  }
  func.func @transform_3(%arg0: i32) -> (i32, i32) {
    %c0_i32 = arith.constant 0 : i32
    %c0_i32_0 = arith.constant 0 : i32
    %c0_i32_1 = arith.constant 0 : i32
    return %c0_i32, %c0_i32_0 : i32, i32
  }
  func.func @transform_4(%arg0: i32) -> (i32, i32) {
    %c0_i32 = arith.constant 0 : i32
    %c0_i32_0 = arith.constant 0 : i32
    %c0_i32_1 = arith.constant 0 : i32
    return %c0_i32, %c0_i32_0 : i32, i32
  }
  func.func @transform_5(%arg0: i32) -> (i32, i32) {
    %c0_i32 = arith.constant 0 : i32
    %c0_i32_0 = arith.constant 0 : i32
    %c0_i32_1 = arith.constant 0 : i32
    return %c0_i32, %c0_i32_0 : i32, i32
  }
  func.func @transform_6(%arg0: i32) -> (i32, i32) {
    %c0_i32 = arith.constant 0 : i32
    %c0_i32_0 = arith.constant 0 : i32
    %c0_i32_1 = arith.constant 0 : i32
    return %c0_i32, %c0_i32_0 : i32, i32
  }
  func.func @transform_7(%arg0: i32) -> (i32, i32) {
    %c0_i32 = arith.constant 0 : i32
    %c0_i32_0 = arith.constant 0 : i32
    %c0_i32_1 = arith.constant 0 : i32
    return %c0_i32, %c0_i32_0 : i32, i32
  }
  func.func @transform_8(%arg0: i32) -> (i32, i32) {
    %c0_i32 = arith.constant 0 : i32
    %c0_i32_0 = arith.constant 0 : i32
    %c0_i32_1 = arith.constant 0 : i32
    return %c0_i32, %c0_i32_0 : i32, i32
  }
  func.func @transform_9(%arg0: i32) -> (i32, i32) {
    %c0_i32 = arith.constant 0 : i32
    %c0_i32_0 = arith.constant 0 : i32
    %c0_i32_1 = arith.constant 0 : i32
    return %c0_i32, %c0_i32_0 : i32, i32
  }
  func.func @transform_10(%arg0: i32) -> (i32, i32) {
    %c0_i32 = arith.constant 0 : i32
    %c0_i32_0 = arith.constant 0 : i32
    %c0_i32_1 = arith.constant 0 : i32
    return %c0_i32, %c0_i32_0 : i32, i32
  }
  func.func @transform_11(%arg0: i32) -> (i32, i32) {
    %c0_i32 = arith.constant 0 : i32
    %c0_i32_0 = arith.constant 0 : i32
    %c0_i32_1 = arith.constant 0 : i32
    return %c0_i32, %c0_i32_0 : i32, i32
  }
  func.func @transform_12(%arg0: i32) -> (i32, i32) {
    %c0_i32 = arith.constant 0 : i32
    %c0_i32_0 = arith.constant 0 : i32
    %c0_i32_1 = arith.constant 0 : i32
    return %c0_i32, %c0_i32_0 : i32, i32
  }
  func.func @transform_13(%arg0: i32) -> (i32, i32, i32, i32) {
    %c0_i32 = arith.constant 0 : i32
    %c0_i32_0 = arith.constant 0 : i32
    %c0_i32_1 = arith.constant 0 : i32
    %c0_i32_2 = arith.constant 0 : i32
    return %arg0, %c0_i32, %c0_i32_0, %c0_i32_1 : i32, i32, i32, i32
  }
}

</mosaic_0001>

<bundles_post_ra>
// kernel: tpu_custom_call.1
= control target key start
LH: loop header
LB: loop body
LE: loop exit
PB: predicated region body
PF: predicated region fallthrough
CT: control target
= control target key end

     0   :  { %s15996_s0 = inlined_call_operand.hbm [shape: bf16[4,8,8,16], index: 0, kind: input, shape index: {}]   ;;  %s15997_s1 = inlined_call_operand.vmem [shape: bf16[16,16], index: 1, kind: input, shape index: {}]   ;;  %s15998_s2 = inlined_call_operand.vmem [shape: bf16[16,16], index: 2, kind: input, shape index: {}]   ;;  %s15999_s3 = inlined_call_operand.vmem [shape: bf16[16,3], index: 3, kind: input, shape index: {}]   ;;  %s16000_s4 = inlined_call_operand.vmem [shape: f32[1,16], index: 4, kind: input, shape index: {}]   ;;  %s16001_s5 = inlined_call_operand.hbm [shape: f32[1,16], index: 5, kind: input, shape index: {}]   ;;  %s16002_s6 = inlined_call_operand.hbm [shape: f32[1,3], index: 6, kind: input, shape index: {}]   ;;  %s16003_s7 = inlined_call_operand.vmem [shape: f32[9,16], index: 7, kind: input, shape index: {}]   ;;  %s16004_s8 = inlined_call_operand.vmem [shape: f32[25,16], index: 8, kind: input, shape index: {}]   ;;  %s16005_s9 = inlined_call_operand.vmem [shape: bf16[16,16], index: 9, kind: input, shape index: {}]   ;;  %s16006_s10 = inlined_call_operand.vmem [shape: f32[1,16], index: 10, kind: input, shape index: {}]   ;;  %s16007_s11 = inlined_call_operand.vmem [shape: bf16[16,16], index: 11, kind: input, shape index: {}]   ;;  %s16008_s12 = inlined_call_operand.vmem [shape: f32[1,16], index: 12, kind: input, shape index: {}]   ;;  %s16009_s13 = inlined_call_operand.hbm [shape: f32[4,8,8,16], index: 13, kind: output, shape index: {}]  }
   0x1   :  { %16244 = sst [smem:[#allocation112_spill]] %s16001_s5 }
   0x2   :  { %16245 = sst [smem:[#allocation113_spill]] %s16002_s6 }
   0x3   :  { %16246 = sst [smem:[#allocation114_spill]] %s16006_s10 }
   0x4   :  { %16247 = sst [smem:[#allocation115_spill]] %s16008_s12 }
   0x5   :  { %16248 = sst [smem:[#allocation116_spill]] %s16009_s13 }
   0x6   :  { %18 = vsyncpa [#allocation4], 0 }
   0x7   :  { %20 = vsyncpa [#allocation4 + $0x1], 0 }
   0x8   :  { %21 = vsyncpa [#allocation7], 0 }
   0x9   :  { %22 = vsyncpa [#allocation5], 0 }
   0xa   :  { %24 = vsyncpa [#allocation5 + $0x1], 0  ;;  %s9709_s25 = smov 0   ;;  %s9711_s26 = smov 0  }
   0xb   :  { %s9713_s27 = smov 0   ;;  %s9715_s28 = smov 0  }
   0xc LB: > { %16249 = sst [smem:[#allocation13_spill]] %s9613_s25  ;;  %s9730_s29 = sadd.s32 4294967295, %s9625_s28   ;;  %s9625_s28 = sphi %s9715_s28, %s16966_s28   ;;  %s9621_s27 = sphi %s9713_s27, %s16970_s27   ;;  %s9617_s26 = sphi %s9711_s26, %s16969_s26   ;;  %s9613_s25 = sphi %s9709_s25, %s16968_s25  }
   0xd   : > { %s8718_s30 = sadd.s32 4294967294, %s9625_s28   ;;  %s9734_s14 = sadd.s32 1, %s9625_s28  }
   0xe   : > { %16250 = sst [smem:[#allocation14_spill]] %s9734_s14  ;;  %s37_s15 = sadd.s32 1, %s9621_s27 }
   0xf   : > { %s34_s16 = ssub.s32 %s9625_s28, %s9734_s14  ;;  %p44_p0 = scmp.ne.s32.totalorder %s9621_s27, %s9617_s26 }
  0x10   : > { %p35_p1 = scmp.eq.s32.totalorder %s34_s16, 0  ;;  %p45_p2 = scmp.eq.s32.totalorder %s9625_s28, 0 }
  0x11   : > { %p50_p3 = scmp.ne.s32.totalorder %s9617_s26, %s9613_s25  ;;  %p51_p4 = scmp.eq.s32.totalorder %s9730_s29, 0 }
  0x12   : > { %s9746_s17 = scalar_select %p35_p1, %s9621_s27, %s37_s15  }
  0x13   : > { %p9748_p5 = por %p45_p2, %p44_p0  ;;  %p9754_p6 = por %p51_p4, %p50_p3 }
  0x14   : > { %16251 = sst [smem:[#allocation15_spill]] %s9746_s17  ;;  %p326_p7 = scmp.eq.s32.totalorder %s9730_s29, 1 }
  0x15   : > { %p332_p8 = scmp.eq.s32.totalorder %s8718_s30, 1  ;;  %p8719_p9 = scmp.ge.s32.totalorder %s9625_s28, 1 }
  0x16   : > { %p339_p10 = scmp.lt.s32.totalorder %s9625_s28, 3  ;;  %p9761_p11 = por %p326_p7, %p44_p0 }
  0x17   : > { %p9765_p12 = por %p332_p8, %p50_p3  ;;  %s16259_s5 = sld [smem:[#allocation112_spill]] }
  0x18   : > { %s16254_s20 = scalar_select %p9761_p11, 1, 0 }
  0x19   : > { %s16256_s21 = scalar_select %p9765_p12, 1, 0 }
  0x1a   : > { %16255 = sst [smem:[#allocation16_spill]] %s16254_s20  ;;  %p9769_p13 = pnand %p8719_p9, %p339_p10 }
  0x1b   : > { %16257 = sst [smem:[#allocation17_spill]] %s16256_s21  ;;  %s9627_s15 = smov [#allocation6]  }
  0x1c   : > { %p8902_p1 = pneg %p9769_p13  ;;  %s365_s16 = sshll.u32 %s9627_s15, 4  ;;  %s366_s16 = int_to_ptr.vmem [resolvable:$true] %s365_s16 }
  0x1d   : > { %s363_s30 = sshll.u32 %s16259_s5, 4  ;;  %p8919_p3 = scmp.lt.s32.totalorder %s9625_s28, 2  ;;  %s364_s30 = int_to_ptr.hbm [resolvable:$true] %s363_s30 }
  0x1e   : > { %p8903_p2 = pnand %p8902_p1, %p51_p4  ;;  %s16260_s6 = sld [smem:[#allocation113_spill]] }
  0x1f   : > { %p9787_p7 = pnand %p8919_p3, %p9748_p5  ;;  %s9628_s24 = smov [#allocation8]  }
  0x20   : > { %8905 = dma.hbm_to_vmem [thread:$0]  (!%p8903_p2), %s364_s30, 16, %s366_s16, [#allocation7]  }
  0x21   : > { %s377_s5 = sshll.u32 %s9628_s24, 4  ;;  %s406_s25 = sand.u32 1, %s9621_s27   ;;  %s378_s5 = int_to_ptr.vmem [resolvable:$true] %s377_s5 }
  0x22   : > { %s8723_s15 = sshll.u32 %s406_s25, 6  ;;  %s8863_s13 = sshll.u32 %s9625_s28, 6 }
  0x23   : > { %s416_s14 = scalar_lea.hbm %s15996_s0, %s8863_s13  ;;  %s410_s17 = scalar_lea.vmem [#allocation3], %s8723_s15 }
  0x24   : > { %s375_s21 = sshll.u32 %s16260_s6, 4  ;;  %s419_s6 = sshll.u32 %s410_s17, 4  ;;  %s376_s21 = int_to_ptr.hbm [resolvable:$true] %s375_s21  ;;  %s420_s6 = int_to_ptr.vmem [resolvable:$true] %s419_s6 }
  0x25   : > { %8908 = dma.hbm_to_vmem [thread:$0]  (!%p8903_p2), %s376_s21, 16, %s378_s5, [#allocation7]  }
  0x26   : > { %s417_s30 = sshll.u32 %s416_s14, 4  ;;  %s407_s18 = scalar_lea.sflag [#allocation4], %s406_s25  ;;  %s418_s30 = int_to_ptr.hbm [resolvable:$true] %s417_s30 }
  0x27   : > { %s9525_s16 = sshra.s32 %s418_s30, 4  ;;  %p9529_p8 = pneg %p9787_p7  ;;  %s9526_s16 = int_to_ptr.hbm [resolvable:$true] %s9525_s16 }
  0x28   : > { %s9527_s10 = scalar_lea.hbm %s9526_s16, 64  ;;  %s9532_s24 = scalar_lea.hbm %s15996_s0, 128 }
  0x29   : > { %p9528_p5 = scmp.ne.s32.totalorder %s9526_s16, %s9527_s10  ;;  %p9533_p1 = scmp.lt.s32.totalorder %s9526_s16, %s15996_s0 }
  0x2a   : > { %p9534_p2 = scmp.lt.s32.totalorder %s9532_s24, %s9527_s10 }
  0x2b   : > { %p9530_p9 = pnand %p9529_p8, %p9528_p5 }
  0x2c   : > { %p9535_p3 = por %p9534_p2, %p9533_p1 }
  0x2d   : > { %p9531_p10 = pneg %p9530_p9 }
  0x2f   : > { %p9536_p0 = pnand %p9535_p3, %p9531_p10 }
  0x31   : > { %9539 = shalt.err (!%p9536_p0)
}
  0x32   : > { %s9629_s25 = smov 64   ;;  %s9630_s20 = smov 4  }
  0x33   : > { %8912 = dma.hbm_to_vmem [thread:$0]  (!%p9787_p7), %s418_s30, 1024, %s420_s6, %s407_s18, %s9629_s25, %s9629_s25, %s9630_s20  }
  0x34   : > { %431 = sbr.rel (%p9769_p13) target bundleno = 1889 (0x761), region = 72 }
  0x39   : > { %s9809_s15 = sand.u32 1, %s9617_s26  }
  0x3a   : > { %s8728_s14 = sshll.u32 %s9809_s15, 6  ;;  %s434_s17 = scalar_lea.sflag [#allocation4], %s9809_s15 }
  0x3b   : > { %s9813_s10 = scalar_lea.vmem [#allocation3], %s8728_s14 }
  0x3c   : > { %9600 = dma.done.wait (%p9754_p6), %s434_s17, 1024  }
  0x3d   : > { %9602 = vsyncadd (%p9754_p6), %s434_s17, 4294966272 }
  0x3e   : > { %9604 = dma.done.wait (%p51_p4), [#allocation7], 32  }
  0x3f   : > { %9606 = vsyncadd (%p51_p4), [#allocation7], 4294967264  ;;  %v8872_v0 = vld [vmem:[%s15998_s2] sm:$0xff]  ;;  %v8866_v2 = vld [vmem:[%s9813_s10 + $0x10] sm:$0xff]  ;;  %vm562_vm0 = vcmask 130048   ;;  %v9631_v10 = vmov 0.0  }
  0x40   : > { %v8864_v1 = vld [vmem:[%s9813_s10] sm:$0xff]  ;;  %594 = vmatpush.bf16.msra.mxu0 %v8872_v0  ;;  %8887 = vmatpush.bf16.msra.mxu1 %v8872_v0  ;;  %v9830_v4 = vld [vmem:[%s9813_s10 + $0x30] sm:$0xff]  ;;  %v8865_v6 = vld [vmem:[%s9813_s10 + $0x8] sm:$0xff]  ;;  %724 = vst.msk [vmem:[#allocation2 + $0x30] sm:$0xff] %vm562_vm0, %v9631_v10  ;;  %vm699_vm1 = vcmask 123904   ;;  %vm1051_vm2 = vcmask 1045504  }
  0x41   : > { %v8868_v3 = vld [vmem:[%s9813_s10 + $0x20] sm:$0xff]  ;;  %8888 = vmatpush.bf16.msra.mxu2 %v8872_v0  ;;  %8889 = vmatpush.bf16.msra.mxu3 %v8872_v0  ;;  %v8867_v7 = vld [vmem:[%s9813_s10 + $0x18] sm:$0xff]  ;;  %v8869_v8 = vld [vmem:[%s9813_s10 + $0x28] sm:$0xff]  ;;  %697 = vst.msk [vmem:[#allocation2] sm:$0xff] %vm562_vm0, %v9631_v10  ;;  %vm16170_vm7 = vcmask 130055   ;;  %vm16169_vm8 = vcmask 129024  }
  0x42   : > { %v8873_v5 = vld [vmem:[%s15999_s3] sm:$0xff]  ;;  %v9844_v9 = vld [vmem:[%s9813_s10 + $0x38] sm:$0xff]  ;;  %698 = vst.msk [vmem:[#allocation2 + $0x8] sm:$0xff] %vm562_vm0, %v9631_v10  ;;  %v10040_v59 = vld [vmem:[%s16003_s7 + $0x8] ss:$0 sm:$0xff]  ;;  %s16959_s20 = sld [smem:[#allocation114_spill]] }
  0x43   : > { %8768 = vmatmul.msk.bf16.vlgmr.msra.gmra.mxu0 %vm562_vm0, %v8864_v1  ;;  %8770 = vmatmul.msk.bf16.vlgmr.msra.gmra.mxu1 %vm562_vm0, %v8866_v2  ;;  %701 = vst.msk [vmem:[#allocation2 + $0x18] sm:$0xff] %vm562_vm0, %v9631_v10  ;;  %v9919_v11 = vld [vmem:[#allocation6] ss:$0 sm:$0xff]  ;;  %v9994_v33 = vld [vmem:[%s16003_s7 + $0x1] ss:$0 sm:$0xff]  ;;  %s8731_s14 = sshll.u32 %s9809_s15, 7 }
  0x44   : > { %8772 = vmatmul.msk.bf16.vlgmr.msra.gmra.mxu2 %vm562_vm0, %v8868_v3  ;;  %8774 = vmatmul.msk.bf16.vlgmr.msra.gmra.mxu3 %vm562_vm0, %v9830_v4  ;;  %702 = vst.msk [vmem:[#allocation2 + $0x20] sm:$0xff] %vm562_vm0, %v9631_v10  ;;  %v10002_v36 = vld [vmem:[%s16003_s7 + $0x2] ss:$0 sm:$0xff]  ;;  %v10009_v38 = vld [vmem:[%s16003_s7] ss:$0 sm:$0xff]  ;;  %s16960_s22 = sld [smem:[#allocation115_spill]] }
  0x45   : > { %655 = vmatpush.bf16.msrb.mxu1 %v8873_v5  ;;  %704 = vst.msk [vmem:[#allocation2 + $0x120] sm:$0xff] %vm562_vm0, %v9631_v10  ;;  %v10020_v48 = vld [vmem:[%s16003_s7 + $0x3] ss:$0 sm:$0xff]  ;;  %v10025_v49 = vld [vmem:[%s16003_s7 + $0x4] ss:$0 sm:$0xff]  ;;  %s15928_s19 = scalar_lea.vmem [#allocation9], %s8731_s14 }
  0x46   : > { %705 = vst.msk [vmem:[#allocation2 + $0x128] sm:$0xff] %vm562_vm0, %v9631_v10  ;;  %v10030_v50 = vld [vmem:[%s16003_s7 + $0x5] ss:$0 sm:$0xff]  ;;  %s8886_s23 = sshll.u32 %s9730_s29, 7  ;;  %s16962_s5 = sld [smem:[#allocation116_spill]] }
  0x47   : > { %707 = vst.msk [vmem:[#allocation2 + $0x138] sm:$0xff] %vm562_vm0, %v9631_v10  ;;  %v776_v37 = vld [vmem:[#allocation2 + $0x30] sm:$0xff]  ;;  %s8623_s24 = sshll.u32 %s15928_s19, 4  ;;  %s8610_s12 = scalar_lea.sflag [#allocation5], %s9809_s15  ;;  %s8624_s24 = int_to_ptr.vmem [resolvable:$true] %s8623_s24 }
  0x48   : > { %708 = vst.msk [vmem:[#allocation2 + $0x140] sm:$0xff] %vm562_vm0, %v9631_v10  ;;  %v825_v41 = vmul.f32 %v10009_v38, %v776_v37 }
  0x49   : > { %711 = vst.msk [vmem:[#allocation2 + $0xf0] sm:$0xff] %vm562_vm0, %v9631_v10 }
  0x4a   : > { %712 = vst.msk [vmem:[#allocation2 + $0xf8] sm:$0xff] %vm562_vm0, %v9631_v10 }
  0x4b   : > { %714 = vst.msk [vmem:[#allocation2 + $0x108] sm:$0xff] %vm562_vm0, %v9631_v10 }
  0x4c   : > { %715 = vst.msk [vmem:[#allocation2 + $0x110] sm:$0xff] %vm562_vm0, %v9631_v10  ;;  %s8622_s21 = scalar_lea.hbm %s16962_s5, %s8886_s23  ;;  %s9575_s14 = scalar_lea.hbm %s16962_s5, 256 }
  0x4d   : > { %717 = vst.msk [vmem:[#allocation2 + $0x210] sm:$0xff] %vm562_vm0, %v9631_v10 }
  0x4e   : > { %718 = vst.msk [vmem:[#allocation2 + $0x218] sm:$0xff] %vm562_vm0, %v9631_v10 }
  0x4f   : > { %720 = vst.msk [vmem:[#allocation2 + $0x228] sm:$0xff] %vm562_vm0, %v9631_v10 }
  0x50   : > { %721 = vst.msk [vmem:[#allocation2 + $0x230] sm:$0xff] %vm562_vm0, %v9631_v10 }
  0x51   : > { %725 = vst.msk [vmem:[#allocation2 + $0x48] sm:$0xff] %vm562_vm0, %v9631_v10 }
  0x52   : > { %726 = vst.msk [vmem:[#allocation2 + $0x60] sm:$0xff] %vm562_vm0, %v9631_v10 }
  0x53   : > { %8769 = vmatmul.msk.bf16.gmra.mxu0 %vm562_vm0, %v8865_v6  ;;  %8771 = vmatmul.msk.bf16.gmra.mxu1 %vm562_vm0, %v8867_v7  ;;  %727 = vst.msk [vmem:[#allocation2 + $0x78] sm:$0xff] %vm562_vm0, %v9631_v10 }
  0x54   : > { %8773 = vmatmul.msk.bf16.gmra.mxu2 %vm562_vm0, %v8869_v8  ;;  %8775 = vmatmul.msk.bf16.gmra.mxu3 %vm562_vm0, %v9844_v9  ;;  %728 = vst.msk [vmem:[#allocation2 + $0x90] sm:$0xff] %vm562_vm0, %v9631_v10 }
  0x55   : > { %729 = vst.msk [vmem:[#allocation2 + $0xa8] sm:$0xff] %vm562_vm0, %v9631_v10 }
  0x56   : > { %730 = vst.msk [vmem:[#allocation2 + $0xc0] sm:$0xff] %vm562_vm0, %v9631_v10 }
  0x57   : > { %731 = vst.msk [vmem:[#allocation2 + $0xd8] sm:$0xff] %vm562_vm0, %v9631_v10 }
  0x58   : > { %732 = vst.msk [vmem:[#allocation2 + $0x150] sm:$0xff] %vm562_vm0, %v9631_v10  ;;  %v10042_v61 = vld [vmem:[#allocation2 + $0x48] sm:$0xff] }
  0x59   : > { %733 = vst.msk [vmem:[#allocation2 + $0x168] sm:$0xff] %vm562_vm0, %v9631_v10 }
  0x5a   : > { %734 = vst.msk [vmem:[#allocation2 + $0x180] sm:$0xff] %vm562_vm0, %v9631_v10 }
  0x5b   : > { %735 = vst.msk [vmem:[#allocation2 + $0x198] sm:$0xff] %vm562_vm0, %v9631_v10  ;;  %v788_v53 = vld [vmem:[#allocation2 + $0x90] sm:$0xff] }
  0x5c   : > { %736 = vst.msk [vmem:[#allocation2 + $0x1b0] sm:$0xff] %vm562_vm0, %v9631_v10 }
  0x5d   : > { %737 = vst.msk [vmem:[#allocation2 + $0x1c8] sm:$0xff] %vm562_vm0, %v9631_v10 }
  0x5e   : > { %738 = vst.msk [vmem:[#allocation2 + $0x1e0] sm:$0xff] %vm562_vm0, %v9631_v10 }
  0x5f   : > { %739 = vst.msk [vmem:[#allocation2 + $0x1f8] sm:$0xff] %vm562_vm0, %v9631_v10 }
  0x60   : > { %744 = vst.msk [vmem:[#allocation2 + $0xa0] sm:$0x3] %vm699_vm1, %v9631_v10 }
  0x61   : > { %700 = vst.msk [vmem:[#allocation2 + $0x10] sm:$0x3] %vm699_vm1, %v9631_v10 }
  0x62   : > { %703 = vst.msk [vmem:[#allocation2 + $0x28] sm:$0x3] %vm699_vm1, %v9631_v10 }
  0x63   : > { %8780 = vmatmul.msk.bf16.vlgmr.msrb.gmra.mxu1 %vm562_vm0, %v8864_v1  ;;  %706 = vst.msk [vmem:[#allocation2 + $0x130] sm:$0x3] %vm699_vm1, %v9631_v10  ;;  %v812_v60 = vld [vmem:[#allocation2 + $0x1b0] sm:$0xff]  ;;  %v833_v1 = vmul.f32 %v10009_v38, %v788_v53 }
  0x64   : > { %709 = vst.msk [vmem:[#allocation2 + $0x148] sm:$0x3] %vm699_vm1, %v9631_v10 }
  0x65   : > { %713 = vst.msk [vmem:[#allocation2 + $0x100] sm:$0x3] %vm699_vm1, %v9631_v10 }
  0x66   : > { %716 = vst.msk [vmem:[#allocation2 + $0x118] sm:$0x3] %vm699_vm1, %v9631_v10 }
  0x67   : > { %719 = vst.msk [vmem:[#allocation2 + $0x220] sm:$0x3] %vm699_vm1, %v9631_v10  ;;  %v790_v43 = vld [vmem:[#allocation2 + $0xa0] sm:$0x3] }
  0x68   : > { %722 = vst.msk [vmem:[#allocation2 + $0x238] sm:$0x3] %vm699_vm1, %v9631_v10  ;;  %v1178_v54 = vld [vmem:[#allocation2 + $0xa0] sm:$0x3]  ;;  %v998_v56 = vmul.f32 %v10002_v36, %v790_v43 }
  0x69   : > { %740 = vst.msk [vmem:[#allocation2 + $0x40] sm:$0x3] %vm699_vm1, %v9631_v10  ;;  %v1566_v55 = vld [vmem:[#allocation2 + $0xa0] sm:$0x3] }
  0x6a   : > { %741 = vst.msk [vmem:[#allocation2 + $0x58] sm:$0x3] %vm699_vm1, %v9631_v10 }
  0x6b   : > { %742 = vst.msk [vmem:[#allocation2 + $0x70] sm:$0x3] %vm699_vm1, %v9631_v10 }
  0x6c   : > { %743 = vst.msk [vmem:[#allocation2 + $0x88] sm:$0x3] %vm699_vm1, %v9631_v10 }
  0x6d   : > { %745 = vst.msk [vmem:[#allocation2 + $0xb8] sm:$0x3] %vm699_vm1, %v9631_v10 }
  0x6e   : > { %746 = vst.msk [vmem:[#allocation2 + $0xd0] sm:$0x3] %vm699_vm1, %v9631_v10 }
  0x6f   : > { %747 = vst.msk [vmem:[#allocation2 + $0xe8] sm:$0x3] %vm699_vm1, %v9631_v10 }
  0x70   : > { %748 = vst.msk [vmem:[#allocation2 + $0x160] sm:$0x3] %vm699_vm1, %v9631_v10  ;;  %v778_v34 = vld [vmem:[#allocation2 + $0x40] sm:$0x3] }
  0x71   : > { %749 = vst.msk [vmem:[#allocation2 + $0x178] sm:$0x3] %vm699_vm1, %v9631_v10  ;;  %v990_v40 = vmul.f32 %v10002_v36, %v778_v34  ;;  %v1169_v5 = vld [vmem:[#allocation2 + $0x58] sm:$0x3] }
  0x72   : > { %750 = vst.msk [vmem:[#allocation2 + $0x190] sm:$0x3] %vm699_vm1, %v9631_v10  ;;  %v1560_v37 = vld [vmem:[#allocation2 + $0x70] sm:$0x3] }
  0x73   : > { %8781 = vmatmul.msk.bf16.gmra.mxu1 %vm562_vm0, %v8865_v6  ;;  %751 = vst.msk [vmem:[#allocation2 + $0x1a8] sm:$0x3] %vm699_vm1, %v9631_v10  ;;  %v1056_v46 = vrot.slane %v990_v40, 2 }
  0x74   : > { %752 = vst.msk [vmem:[#allocation2 + $0x1c0] sm:$0x3] %vm699_vm1, %v9631_v10  ;;  %v1181_v53 = vld [vmem:[#allocation2 + $0xb8] sm:$0x3] }
  0x75   : > { %753 = vst.msk [vmem:[#allocation2 + $0x1d8] sm:$0x3] %vm699_vm1, %v9631_v10 }
  0x76   : > { %754 = vst.msk [vmem:[#allocation2 + $0x1f0] sm:$0x3] %vm699_vm1, %v9631_v10 }
  0x77   : > { %755 = vst.msk [vmem:[#allocation2 + $0x208] sm:$0x3] %vm699_vm1, %v9631_v10  ;;  %v1068_v10 = vrot.slane %v998_v56, 2 }
  0x83   : > { %8782 = vmatmul.msk.bf16.gmra.mxu1 %vm562_vm0, %v8866_v2  ;;  %v10051_v2 = vmul.f32 %v10030_v50, %v1178_v54 }
  0x93   : > { %8783 = vmatmul.msk.bf16.gmra.mxu1 %vm562_vm0, %v8867_v7  ;;  %v10059_v7 = vmul.f32 %v10009_v38, %v812_v60 }
  0xa3   : > { %8784 = vmatmul.msk.bf16.gmra.mxu1 %vm562_vm0, %v8868_v3  ;;  %v10054_v3 = vmul.f32 %v10040_v59, %v1566_v55 }
  0xa5   : > { %16262 = vst [vmem:[#allocation18_spill] sm:$0xff] %v10054_v3 }
  0xb3   : > { %8785 = vmatmul.msk.bf16.gmra.mxu1 %vm562_vm0, %v8869_v8  ;;  %v1216_v8 = vmul.f32 %v10020_v48, %v10042_v61 }
  0xc0   : > { %v596_v12 = vpop.f32.mrf.mxu0  ;;  %v606_v13 = vpop.f32.mrf.mxu1 }
  0xc1   : > { %v597_v14 = vadd.f32 %v9919_v11, %v596_v12  ;;  %v607_v15 = vadd.f32 %v9919_v11, %v606_v13 }
  0xc3   : > { %756 = vst.msk [vmem:[#allocation2 + $0x38] sm:$0xff] %vm562_vm0, %v597_v14  ;;  %8786 = vmatmul.msk.bf16.gmra.mxu1 %vm562_vm0, %v9830_v4 }
  0xc4   : > { %760 = vst.msk [vmem:[#allocation2 + $0x98] sm:$0xff] %vm562_vm0, %v607_v15 }
  0xc7   : > { %v616_v16 = vpop.f32.mrf.mxu2  ;;  %v626_v18 = vpop.f32.mrf.mxu3 }
  0xc8   : > { %v598_v17 = vpop.f32.mrf.mxu0  ;;  %v608_v19 = vpop.f32.mrf.mxu1  ;;  %v617_v20 = vadd.f32 %v9919_v11, %v616_v16  ;;  %v627_v21 = vadd.f32 %v9919_v11, %v626_v18 }
  0xc9   : > { %v599_v23 = vadd.f32 %v9919_v11, %v598_v17  ;;  %v609_v24 = vadd.f32 %v9919_v11, %v608_v19  ;;  %v10074_v17 = vld [vmem:[%s16003_s7 + $0x7] ss:$0 sm:$0xff] }
  0xca   : > { %764 = vst.msk [vmem:[#allocation2 + $0x158] sm:$0xff] %vm562_vm0, %v617_v20  ;;  %v777_v31 = vld [vmem:[#allocation2 + $0x38] sm:$0xff]  ;;  %v791_v20 = vld [vmem:[#allocation2 + $0xa8] sm:$0xff] }
  0xcb   : > { %768 = vst.msk [vmem:[#allocation2 + $0x1b8] sm:$0xff] %vm562_vm0, %v627_v21  ;;  %v890_v35 = vmul.f32 %v9994_v33, %v777_v31  ;;  %v989_v39 = vmul.f32 %v10002_v36, %v777_v31  ;;  %v10014_v45 = vld [vmem:[#allocation2 + $0x98] sm:$0xff]  ;;  %v826_v47 = vmul.f32 %v10009_v38, %v777_v31  ;;  %v1381_v21 = vmul.f32 %v10030_v50, %v1169_v5 }
  0xcc   : > { %757 = vst.msk [vmem:[#allocation2 + $0x50] sm:$0xff] %vm562_vm0, %v599_v23  ;;  %v894_v58 = vmul.f32 %v9994_v33, %v10014_v45  ;;  %v997_v62 = vmul.f32 %v10002_v36, %v10014_v45  ;;  %v834_v12 = vmul.f32 %v10009_v38, %v10014_v45  ;;  %v10107_v43 = vmul.f32 %v10020_v48, %v10014_v45 }
  0xcd   : > { %761 = vst.msk [vmem:[#allocation2 + $0xb0] sm:$0xff] %vm562_vm0, %v609_v24  ;;  %v922_v42 = vrot.slane %v890_v35, 1  ;;  %v1055_v44 = vrot.slane %v989_v39, 2 }
  0xce   : > { %v926_v13 = vrot.slane %v894_v58, 1  ;;  %v1067_v16 = vrot.slane %v997_v62, 2  ;;  %v1772_v58 = vmul.f32 %v10040_v59, %v1560_v37 }
  0xcf   : > { %v618_v22 = vpop.f32.mrf.mxu2  ;;  %v628_v27 = vpop.f32.mrf.mxu3  ;;  %v955_v52 = vadd.f32 %v922_v42, %v825_v41  ;;  %v956_v57 = vadd.f32 %v922_v42, %v826_v47  ;;  %v1057_v63 = vsel %vm1051_vm2, %v1055_v44, %v1056_v46  ;;  %v1446_v42 = vrot.slane %v1381_v21, 2 }
  0xd0   : > { %v601_v25 = vpop.f32.mrf.mxu0  ;;  %v619_v26 = vadd.f32 %v9919_v11, %v618_v22  ;;  %v611_v28 = vpop.f32.mrf.mxu1  ;;  %v629_v29 = vadd.f32 %v9919_v11, %v628_v27  ;;  %v1455_v22 = vrot.slane %v10051_v2, 2  ;;  %v10088_v27 = vmul.f32 %v10030_v50, %v10014_v45 }
  0xd1   : > { %v602_v30 = vadd.f32 %v9919_v11, %v601_v25  ;;  %v612_v32 = vadd.f32 %v9919_v11, %v611_v28  ;;  %v1134_v6 = vadd.f32 %v1055_v44, %v955_v52  ;;  %v1135_v14 = vadd.f32 %v1057_v63, %v956_v57  ;;  %v10114_v52 = vld [vmem:[#allocation2 + $0x60] sm:$0xff] }
  0xd2   : > { %765 = vst.msk [vmem:[#allocation2 + $0x170] sm:$0xff] %vm562_vm0, %v619_v26  ;;  %v835_v25 = vmul.f32 %v10009_v38, %v791_v20  ;;  %v10084_v26 = vmul.f32 %v10025_v49, %v10014_v45  ;;  %v10092_v28 = vmul.f32 %v10074_v17, %v10014_v45  ;;  %v964_v31 = vadd.f32 %v926_v13, %v834_v12 }
  0xd3   : > { %8787 = vmatmul.msk.bf16.gmra.mxu1 %vm562_vm0, %v9844_v9  ;;  %769 = vst.msk [vmem:[#allocation2 + $0x1d0] sm:$0xff] %vm562_vm0, %v629_v29  ;;  %v10032_v51 = vld [vmem:[#allocation2 + $0x50] sm:$0xff]  ;;  %v1248_v29 = vadd.f32 %v1216_v8, %v1134_v6  ;;  %v1069_v41 = vsel %vm1051_vm2, %v1067_v16, %v1068_v10  ;;  %v1224_v47 = vmul.f32 %v10020_v48, %v791_v20  ;;  %v16019_v55 = vrot.slane %v10088_v27, 2 }
  0xd4   : > { %758 = vst.msk [vmem:[#allocation2 + $0x68] sm:$0xff] %vm562_vm0, %v602_v30  ;;  %v1281_v0 = vmul.f32 %v10025_v49, %v10032_v51  ;;  %v1217_v4 = vmul.f32 %v10020_v48, %v10032_v51  ;;  %v10063_v9 = vld [vmem:[#allocation2 + $0xb0] sm:$0xff]  ;;  %v1380_v19 = vmul.f32 %v10030_v50, %v10032_v51  ;;  %v963_v30 = vadd.f32 %v926_v13, %v833_v1  ;;  %v813_v1 = vld [vmem:[#allocation2 + $0x1b8] sm:$0xff] }
  0xd5   : > { %762 = vst.msk [vmem:[#allocation2 + $0xc8] sm:$0xff] %vm562_vm0, %v612_v32  ;;  %v10069_v15 = vmul.f32 %v9994_v33, %v10063_v9  ;;  %v10097_v32 = vld [vmem:[%s16003_s7 + $0x6] ss:$0 sm:$0xff]  ;;  %v10102_v35 = vmul.f32 %v10002_v36, %v10063_v9  ;;  %v1389_v6 = vmul.f32 %v10030_v50, %v1181_v53  ;;  %v1225_v8 = vmul.f32 %v10020_v48, %v10063_v9 }
  0xd6   : > { %v1313_v18 = vrot.slane %v1281_v0, 1  ;;  %v1249_v24 = vadd.f32 %v1217_v4, %v1135_v14  ;;  %16264 = vst [vmem:[#allocation20_spill] sm:$0xff] %v10092_v28  ;;  %v1445_v40 = vrot.slane %v1380_v19, 2  ;;  %v10111_v44 = vmul.f32 %v10097_v32, %v10014_v45  ;;  %v794_v14 = vld [vmem:[#allocation2 + $0xc0] sm:$0xff] }
  0xd7   : > { %16263 = vst [vmem:[#allocation19_spill] sm:$0xff] %v10069_v15  ;;  %v16018_v34 = vrot.slane %v10069_v15, 1  ;;  %v1142_v60 = vadd.f32 %v1067_v16, %v963_v30  ;;  %v16017_v63 = vrot.slane %v10102_v35, 2  ;;  %v1143_v0 = vadd.f32 %v1069_v41, %v964_v31 }
  0xd8   : > { %16265 = vst [vmem:[#allocation21_spill] sm:$0xff] %v10102_v35  ;;  %v1346_v39 = vadd.f32 %v1313_v18, %v1248_v29  ;;  %v1347_v46 = vadd.f32 %v1313_v18, %v1249_v24  ;;  %v1447_v4 = vsel %vm1051_vm2, %v1445_v40, %v1446_v42  ;;  %v1607_v5 = vmul.f32 %v10097_v32, %v10114_v52 }
  0xd9   : > { %v965_v62 = vadd.f32 %v16018_v34, %v835_v25  ;;  %v1285_v10 = vmul.f32 %v10025_v49, %v10063_v9  ;;  %v1388_v16 = vmul.f32 %v10030_v50, %v10063_v9  ;;  %v1837_v19 = vrot.slane %v1772_v58, 2  ;;  %v1569_v58 = vld [vmem:[#allocation2 + $0xb8] sm:$0x3] }
  0xda   : > { %v1524_v2 = vadd.f32 %v1445_v40, %v1346_v39  ;;  %v1525_v12 = vadd.f32 %v1447_v4, %v1347_v46  ;;  %v1226_v20 = vmul.f32 %v10020_v48, %v794_v14  ;;  %v902_v21 = vmul.f32 %v9994_v33, %v813_v1  ;;  %v10155_v34 = vld [vmem:[#allocation2 + $0x1d0] sm:$0xff] }
  0xdb   : > { %v10119_v57 = vld [vmem:[#allocation2 + $0x68] sm:$0xff]  ;;  %v1144_v24 = vadd.f32 %v16017_v63, %v965_v62  ;;  %v10148_v30 = vsel %vm1051_vm2, %v16019_v55, %v1455_v22  ;;  %v10152_v31 = vmul.f32 %v10040_v59, %v10014_v45  ;;  %v1256_v40 = vadd.f32 %v1224_v47, %v1142_v60  ;;  %v814_v22 = vld [vmem:[#allocation2 + $0x1c0] sm:$0x3]  ;;  %16267 = vst [vmem:[#allocation23_spill] sm:$0xff] %v10155_v34 }
  0xdc   : > { %v1608_v13 = vmul.f32 %v10097_v32, %v10119_v57  ;;  %v1672_v18 = vmul.f32 %v10074_v17, %v10119_v57  ;;  %v1771_v29 = vmul.f32 %v10040_v59, %v10119_v57  ;;  %v1639_v37 = vadd.f32 %v1607_v5, %v1524_v2  ;;  %v815_v60 = vld [vmem:[#allocation2 + $0x1c8] sm:$0xff] }
  0xdd   : > { %16266 = vst [vmem:[#allocation22_spill] sm:$0xff] %v10152_v31  ;;  %v1257_v41 = vadd.f32 %v1225_v8, %v1143_v0  ;;  %v1317_v42 = vrot.slane %v1285_v10, 1  ;;  %v1457_v53 = vrot.slane %v1388_v16, 2  ;;  %v1013_v63 = vmul.f32 %v10002_v36, %v813_v1 }
  0xde   : > { %v1640_v25 = vadd.f32 %v1608_v13, %v1525_v12  ;;  %v1704_v39 = vrot.slane %v1672_v18, 1  ;;  %v1836_v46 = vrot.slane %v1771_v29, 2  ;;  %v1458_v12 = vrot.slane %v1389_v6, 2 }
  0xdf   : > { %v934_v13 = vrot.slane %v902_v21, 1  ;;  %v10158_v23 = vadd.f32 %v1226_v20, %v1144_v24  ;;  %v10163_v0 = vmul.f32 %v9994_v33, %v10155_v34  ;;  %v1354_v6 = vadd.f32 %v1317_v42, %v1256_v40 }
  0xe0   : > { %v1737_v62 = vadd.f32 %v1704_v39, %v1639_v37  ;;  %v1738_v4 = vadd.f32 %v1704_v39, %v1640_v25  ;;  %v1838_v45 = vsel %vm1051_vm2, %v1836_v46, %v1837_v19  ;;  %v1355_v8 = vadd.f32 %v1317_v42, %v1257_v41 }
  0xe1   : > { %16268 = vst [vmem:[#allocation24_spill] sm:$0xff] %v10158_v23  ;;  %v10170_v10 = vmul.f32 %v10040_v59, %v1569_v58  ;;  %v851_v16 = vmul.f32 %v10009_v38, %v815_v60  ;;  %v1014_v18 = vmul.f32 %v10002_v36, %v814_v22  ;;  %v1459_v21 = vsel %vm1051_vm2, %v1457_v53, %v1458_v12 }
  0xe2   : > { %16269 = vst [vmem:[#allocation25_spill] sm:$0xff] %v10163_v0  ;;  %v10165_v2 = vadd.f32 %v1836_v46, %v1737_v62  ;;  %v10167_v5 = vadd.f32 %v1838_v45, %v1738_v4  ;;  %v850_v24 = vmul.f32 %v10009_v38, %v813_v1  ;;  %v979_v25 = vadd.f32 %v934_v13, %v10059_v7  ;;  %v795_v46 = vld [vmem:[#allocation2 + $0xc8] sm:$0xff] }
  0xe3   : > { %16270 = vst [vmem:[#allocation26_spill] sm:$0xff] %v10170_v10  ;;  %v1091_v29 = vrot.slane %v1013_v63, 2  ;;  %v1240_v37 = vmul.f32 %v10020_v48, %v815_v60  ;;  %v16021_v39 = vrot.slane %v10163_v0, 1  ;;  %v10187_v40 = vmul.f32 %v10002_v36, %v10155_v34  ;;  %v1572_v60 = vld [vmem:[#allocation2 + $0xd0] sm:$0x3] }
  0xe4   : > { %v10175_v19 = vmul.f32 0.70710677, %v10165_v2  ;;  %v10178_v20 = vmul.f32 0.70710677, %v10167_v5  ;;  %v1532_v58 = vadd.f32 %v1457_v53, %v1354_v6  ;;  %v10198_v7 = vmul.f32 %v10009_v38, %v10114_v52 }
  0xe5   : > { %16271 = vst [vmem:[#allocation27_spill] sm:$0xff] %v10187_v40  ;;  %v1533_v63 = vadd.f32 %v1459_v21, %v1355_v8  ;;  %v1092_v62 = vrot.slane %v1014_v18, 2  ;;  %v980_v22 = vadd.f32 %v934_v13, %v850_v24  ;;  %v1158_v45 = vadd.f32 %v1091_v29, %v979_v25  ;;  %v621_v8 = vpop.f32.mrf.mxu2  ;;  %v631_v24 = vpop.f32.mrf.mxu3 }
  0xe6   : > { %v10190_v41 = vand.u32 2147483647, %v10175_v19  ;;  %v10193_v42 = vand.u32 2147483647, %v10178_v20  ;;  %v1615_v47 = vmul.f32 %v10097_v32, %v794_v14  ;;  %v1616_v56 = vmul.f32 %v10097_v32, %v795_v46 }
  0xe7   : > { %v981_v53 = vadd.f32 %v16021_v39, %v851_v16  ;;  %v16020_v6 = vrot.slane %v10187_v40, 2  ;;  %v1676_v54 = vmul.f32 %v10074_v17, %v795_v46  ;;  %v1779_v13 = vmul.f32 %v10040_v59, %v795_v46 }
  0xe8   : > { %v2107_v4 = vmul.f32 0.3275911, %v10190_v41  ;;  %v2108_v12 = vmul.f32 0.3275911, %v10193_v42  ;;  %v1647_v18 = vadd.f32 %v1615_v47, %v1532_v58  ;;  %v1648_v21 = vadd.f32 %v1616_v56, %v1533_v63 }
  0xe9   : > { %v10211_v14 = vmul.f32 %v10097_v32, %v10063_v9  ;;  %v1093_v25 = vsel %vm1051_vm2, %v1091_v29, %v1092_v62  ;;  %v1780_v16 = vmul.f32 %v10040_v59, %v1572_v60  ;;  %v622_v47 = vadd.f32 %v9919_v11, %v621_v8  ;;  %v10228_v62 = vld [vmem:[#allocation2 + $0x1e0] sm:$0xff]  ;;  %v603_v60 = vpop.f32.mrf.mxu0 }
  0xea   : > { %v2139_v1 = vadd.f32 1.0, %v2107_v4  ;;  %v2140_v55 = vadd.f32 1.0, %v2108_v12  ;;  %v1708_v4 = vrot.slane %v1676_v54, 1  ;;  %v1848_v12 = vrot.slane %v1779_v13, 2 }
  0xeb   : > { %v1160_v56 = vadd.f32 %v16020_v6, %v981_v53  ;;  %v1293_v46 = vmul.f32 %v10025_v49, %v10155_v34  ;;  %v1849_v58 = vrot.slane %v1780_v16, 2  ;;  %v632_v63 = vadd.f32 %v9919_v11, %v631_v24  ;;  %766 = vst.msk [vmem:[#allocation2 + $0x188] sm:$0xff] %vm562_vm0, %v622_v47 }
  0xec   : > { %9040 = vrcp.f32 %v2139_v1  ;;  %v10223_v29 = vmul.f32 %v10074_v17, %v10063_v9  ;;  %v1745_v54 = vadd.f32 %v1708_v4, %v1647_v18  ;;  %v1746_v1 = vadd.f32 %v1708_v4, %v1648_v21 }
  0xed   : > { %9042 = vrcp.f32 %v2140_v55  ;;  %v1241_v55 = vmul.f32 %v10020_v48, %v10155_v34  ;;  %v1159_v53 = vadd.f32 %v1093_v25, %v980_v22  ;;  %v10232_v8 = vmul.f32 %v10030_v50, %v10155_v34  ;;  %770 = vst.msk [vmem:[#allocation2 + $0x1e8] sm:$0xff] %vm562_vm0, %v632_v63 }
  0xee   : > { %16272 = vst [vmem:[#allocation28_spill] sm:$0xff] %v10223_v29  ;;  %v1850_v13 = vsel %vm1051_vm2, %v1848_v12, %v1849_v58  ;;  %v1242_v24 = vmul.f32 %v10020_v48, %v10228_v62  ;;  %v1272_v16 = vadd.f32 %v1240_v37, %v1158_v45  ;;  %v892_v18 = vmul.f32 %v9994_v33, %v10119_v57 }
  0xef   : > { %v10240_v21 = vadd.f32 %v1848_v12, %v1745_v54  ;;  %v10242_v4 = vadd.f32 %v1850_v13, %v1746_v1  ;;  %v1325_v25 = vrot.slane %v1293_v46, 1  ;;  %v2491_v47 = vsub.f32 0.0, %v10190_v41  ;;  %v1205_v1 = vld [vmem:[#allocation2 + $0x1d8] sm:$0x3] }
  0xf0   : > { %v10247_v6 = vadd.f32 %v1242_v24, %v1160_v56  ;;  %v604_v58 = vadd.f32 %v9919_v11, %v603_v60  ;;  %v2492_v12 = vsub.f32 0.0, %v10193_v42  ;;  %v1273_v13 = vadd.f32 %v1241_v55, %v1159_v53 }
  0xf1   : > { %v10256_v54 = vmul.f32 0.70710677, %v10240_v21  ;;  %v1481_v46 = vrot.slane %v10232_v8, 2  ;;  %v10261_v24 = vmul.f32 0.70710677, %v10242_v4  ;;  %v924_v11 = vrot.slane %v892_v18, 1 }
  0xf2   : > { %v10244_v22 = vpop.eup %9040  ;;  %16273 = vst [vmem:[#allocation29_spill] sm:$0xff] %v10247_v6  ;;  %v10266_v60 = vmul.f32 %v10002_v36, %v10119_v57  ;;  %v1370_v6 = vadd.f32 %v1325_v25, %v1272_v16  ;;  %v2523_v55 = vmul.f32 %v2491_v47, %v10190_v41  ;;  %v830_v8 = vmul.f32 %v10009_v38, %v10119_v57 }
  0xf3   : > { %v10250_v63 = vpop.eup %9042  ;;  %v2203_v45 = vmul.f32 1.0614054, %v10244_v22  ;;  %759 = vst.msk [vmem:[#allocation2 + $0x80] sm:$0xff] %vm562_vm0, %v604_v58  ;;  %v2083_v37 = vand.u32 2147483647, %v10256_v54  ;;  %v2524_v18 = vmul.f32 %v2492_v12, %v10193_v42  ;;  %v1371_v0 = vadd.f32 %v1325_v25, %v1273_v13 }
  0xf4   : > { %v2204_v56 = vmul.f32 1.0614054, %v10250_v63  ;;  %v2084_v53 = vand.u32 2147483647, %v10261_v24  ;;  %v1405_v34 = vmul.f32 %v10030_v50, %v1205_v1  ;;  %v959_v16 = vadd.f32 %v924_v11, %v10198_v7 }
  0xf5   : > { %v2235_v39 = vadd.f32 -1.4531521, %v2203_v45  ;;  %v2115_v58 = vmul.f32 0.3275911, %v2083_v37  ;;  %v16032_v41 = vrot.slane %v10266_v60, 2  ;;  %v1548_v15 = vadd.f32 %v1481_v46, %v1370_v6 }
  0xf6   : > { %v2236_v23 = vadd.f32 -1.4531521, %v2204_v56  ;;  %v2116_v45 = vmul.f32 0.3275911, %v2084_v53  ;;  %v2557_v31 = vmul.f32 1.442695, %v2523_v55 }
  0xf7   : > { %v2267_v40 = vmul.f32 %v10244_v22, %v2235_v39  ;;  %v2147_v56 = vadd.f32 1.0, %v2115_v58  ;;  %v10279_v39 = vadd.f32 %v924_v11, %v830_v8  ;;  %v2559_v25 = vmul.f32 1.442695, %v2524_v18  ;;  %v1596_v11 = vld [vmem:[#allocation2 + $0x1f0] sm:$0x3] }
  0xf8   : > { %v2268_v35 = vmul.f32 %v10250_v63, %v2236_v23  ;;  %v2148_v3 = vadd.f32 1.0, %v2116_v45  ;;  %vm2011_vm3 = vcmp.ge.f32.partialorder %v10175_v19, 0.0  ;;  %v1482_v7 = vrot.slane %v1405_v34, 2  ;;  %v819_v45 = vld [vmem:[#allocation2 + $0x1e8] sm:$0xff] }
  0xf9   : > { %v2299_v47 = vadd.f32 1.4214138, %v2267_v40  ;;  %9044 = vrcp.f32 %v2147_v56  ;;  %v10286_v40 = vadd.f32 %v16032_v41, %v959_v16  ;;  %vm2012_vm4 = vcmp.ge.f32.partialorder %v10178_v20, 0.0 }
  0xfa   : > { %v2300_v10 = vadd.f32 1.4214138, %v2268_v35  ;;  %9046 = vrcp.f32 %v2148_v3  ;;  %v2499_v6 = vsub.f32 0.0, %v2083_v37  ;;  %v10290_v12 = vmul.f32 0.5, %v10165_v2 }
  0xfb   : > { %v2331_v42 = vmul.f32 %v10244_v22, %v2299_v47  ;;  %9048 = vpow2.f32 %v2557_v31  ;;  %v2500_v13 = vsub.f32 0.0, %v2084_v53  ;;  %v10293_v19 = vmul.f32 0.5, %v10167_v5 }
  0xfc   : > { %v2332_v23 = vmul.f32 %v10250_v63, %v2300_v10  ;;  %v16033_v3 = vmov -1.0   ;;  %9050 = vpow2.f32 %v2559_v25  ;;  %v1483_v2 = vsel %vm1051_vm2, %v1481_v46, %v1482_v7 }
  0xfd   : > { %v2363_v35 = vadd.f32 -0.28449672, %v2331_v42  ;;  %v2043_v34 = vsel %vm2011_vm3, 1.0, %v16033_v3  ;;  %v2044_v20 = vsel %vm2012_vm4, 1.0, %v16033_v3  ;;  %v1631_v31 = vmul.f32 %v10097_v32, %v10228_v62 }
  0xfe   : > { %v2364_v1 = vadd.f32 -0.28449672, %v2332_v23  ;;  %v10305_v5 = vmul.f32 0.5, %v10240_v21  ;;  %v2531_v58 = vmul.f32 %v2499_v6, %v2083_v37  ;;  %v1796_v16 = vmul.f32 %v10040_v59, %v1596_v11 }
  0xff   : > { %v2395_v10 = vmul.f32 %v10244_v22, %v2363_v35  ;;  %v10302_v8 = vpop.eup %9044  ;;  %vm2019_vm5 = vcmp.ge.f32.partialorder %v10256_v54, 0.0  ;;  %v2532_v42 = vmul.f32 %v2500_v13, %v2084_v53  ;;  %v10314_v25 = vmul.f32 0.5, %v10242_v4 }
 0x100   : > { %v2396_v55 = vmul.f32 %v10250_v63, %v2364_v1  ;;  %v10308_v47 = vpop.eup %9046  ;;  %v2211_v46 = vmul.f32 1.0614054, %v10302_v8  ;;  %v1549_v23 = vadd.f32 %v1483_v2, %v1371_v0  ;;  %vm2020_vm6 = vcmp.ge.f32.partialorder %v10261_v24, 0.0 }
 0x101   : > { %v2427_v18 = vadd.f32 0.2548296, %v2395_v10  ;;  %v2212_v21 = vmul.f32 1.0614054, %v10308_v47  ;;  %v9049_v37 = vpop.eup %9048  ;;  %v1632_v6 = vmul.f32 %v10097_v32, %v819_v45  ;;  %v10321_v53 = vsel %vm2019_vm5, 1.0, %v16033_v3 }
 0x102   : > { %v2428_v56 = vadd.f32 0.2548296, %v2396_v55  ;;  %v2243_v35 = vadd.f32 -1.4531521, %v2211_v46  ;;  %v9051_v54 = vpop.eup %9050  ;;  %v2573_v13 = vmul.f32 1.442695, %v2531_v58  ;;  %v1663_v10 = vadd.f32 %v1631_v31, %v1548_v15 }
 0x103   : > { %v2459_v62 = vmul.f32 %v10244_v22, %v2427_v18  ;;  %v2244_v22 = vadd.f32 -1.4531521, %v2212_v21  ;;  %v2575_v0 = vmul.f32 1.442695, %v2532_v42  ;;  %v1664_v2 = vadd.f32 %v1632_v6, %v1549_v23 }
 0x104   : > { %v2460_v7 = vmul.f32 %v10250_v63, %v2428_v56  ;;  %v2275_v11 = vmul.f32 %v10302_v8, %v2243_v35  ;;  %v1684_v18 = vmul.f32 %v10074_v17, %v819_v45  ;;  %v10330_v58 = vsel %vm2020_vm6, 1.0, %v16033_v3 }
 0x105   : > { %v2619_v1 = vmul.f32 %v9049_v37, %v2459_v62  ;;  %v2276_v63 = vmul.f32 %v10308_v47, %v2244_v22  ;;  %v1795_v62 = vmul.f32 %v10040_v59, %v819_v45  ;;  %v1873_v37 = vrot.slane %v1796_v16, 2  ;;  %v773_v45 = vld [vmem:[#allocation2 + $0x18] sm:$0xff] }
 0x106   : > { %v2620_v4 = vmul.f32 %v9051_v54, %v2460_v7  ;;  %v2307_v46 = vadd.f32 1.4214138, %v2275_v11  ;;  %v1716_v15 = vrot.slane %v1684_v18, 1  ;;  %9052 = vpow2.f32 %v2573_v13 }
 0x107   : > { %v2651_v55 = vsub.f32 1.0, %v2619_v1  ;;  %v2308_v42 = vadd.f32 1.4214138, %v2276_v63  ;;  %v1872_v23 = vrot.slane %v1795_v62, 2  ;;  %9054 = vpow2.f32 %v2575_v0 }
 0x108   : > { %v2652_v56 = vsub.f32 1.0, %v2620_v4  ;;  %v2339_v7 = vmul.f32 %v10302_v8, %v2307_v46  ;;  %v1761_v54 = vadd.f32 %v1716_v15, %v1663_v10  ;;  %v1762_v1 = vadd.f32 %v1716_v15, %v1664_v2 }
 0x109   : > { %v2683_v21 = vmul.f32 %v2651_v55, %v2043_v34  ;;  %v2340_v6 = vmul.f32 %v10308_v47, %v2308_v42  ;;  %v1874_v24 = vsel %vm1051_vm2, %v1872_v23, %v1873_v37  ;;  %v10338_v55 = vld [vmem:[#allocation2 + $0x20] sm:$0xff]  ;;  %v823_v63 = vmul.f32 %v10009_v38, %v773_v45 }
 0x10a   : > { %v2684_v31 = vmul.f32 %v2652_v56, %v2044_v20  ;;  %v2371_v34 = vadd.f32 -0.28449672, %v2339_v7  ;;  %v1939_v20 = vadd.f32 %v1872_v23, %v1761_v54  ;;  %v1940_v11 = vadd.f32 %v1874_v24, %v1762_v1  ;;  %v10352_v56 = vld [vmem:[#allocation2 + $0x78] sm:$0xff]  ;;  %v10368_v23 = vld [vmem:[#allocation2 + $0x80] sm:$0xff] }
 0x10b   : > { %v2715_v35 = vadd.f32 1.0, %v2683_v21  ;;  %v2372_v4 = vadd.f32 -0.28449672, %v2340_v6  ;;  %v824_v0 = vmul.f32 %v10009_v38, %v10338_v55  ;;  %v10360_v21 = vmul.f32 %v10009_v38, %v10032_v51 }
 0x10c   : > { %v2716_v16 = vadd.f32 1.0, %v2684_v31  ;;  %v2403_v10 = vmul.f32 %v10302_v8, %v2371_v34  ;;  %v10350_v2 = vmul.f32 0.5, %v1939_v20  ;;  %v2003_v18 = vmul.f32 0.70710677, %v1939_v20  ;;  %v9053_v46 = vpop.eup %9052 }
 0x10d   : > { %v10336_v22 = vmul.f32 %v2715_v35, %v10290_v12  ;;  %v2404_v12 = vmul.f32 %v10308_v47, %v2372_v4  ;;  %v2004_v37 = vmul.f32 0.70710677, %v1940_v11  ;;  %v10364_v42 = vmul.f32 %v10009_v38, %v10352_v56  ;;  %v9055_v35 = vpop.eup %9054 }
 0x10e   : > { %v10341_v13 = vmul.f32 %v2716_v16, %v10293_v19  ;;  %v827_v19 = vmul.f32 %v10009_v38, %v10042_v61  ;;  %v2435_v62 = vadd.f32 0.2548296, %v2403_v10  ;;  %v10366_v31 = vmul.f32 0.5, %v1940_v11 }
 0x10f   : > { %16274 = vst [vmem:[#allocation30_spill] sm:$0xff] %v10336_v22  ;;  %v2436_v15 = vadd.f32 0.2548296, %v2404_v12  ;;  %v2099_v7 = vand.u32 2147483647, %v2003_v18  ;;  %v889_v61 = vmul.f32 %v9994_v33, %v10338_v55  ;;  %vm2035_vm9 = vcmp.ge.f32.partialorder %v2003_v18, 0.0 }
 0x110   : > { %16275 = vst [vmem:[#allocation31_spill] sm:$0xff] %v10341_v13  ;;  %v2467_v6 = vmul.f32 %v10302_v8, %v2435_v62  ;;  %v2100_v54 = vand.u32 2147483647, %v2004_v37  ;;  %v891_v1 = vmul.f32 %v9994_v33, %v10032_v51  ;;  %vm2036_vm10 = vcmp.ge.f32.partialorder %v2004_v37, 0.0 }
 0x111   : > { %2941 = vst.msk [vmem:[#allocation2 + $0x49] sm:$0x80] %vm16170_vm7, %v10336_v22  ;;  %v2468_v45 = vmul.f32 %v10308_v47, %v2436_v15  ;;  %v2131_v16 = vmul.f32 0.3275911, %v2099_v7  ;;  %v2515_v34 = vsub.f32 0.0, %v2099_v7  ;;  %v893_v11 = vmul.f32 %v9994_v33, %v10368_v23 }
 0x112   : > { %2942 = vst.msk [vmem:[#allocation2 + $0x51] sm:$0x7f] %vm16169_vm8, %v10341_v13  ;;  %v2627_v24 = vmul.f32 %v9053_v46, %v2467_v6  ;;  %v2132_v4 = vmul.f32 0.3275911, %v2100_v54  ;;  %v2516_v20 = vsub.f32 0.0, %v2100_v54  ;;  %v921_v8 = vrot.slane %v889_v61, 1 }
 0x113   : > { %v2628_v10 = vmul.f32 %v9055_v35, %v2468_v45  ;;  %v2163_v12 = vadd.f32 1.0, %v2131_v16  ;;  %v2547_v41 = vmul.f32 %v2515_v34, %v2099_v7  ;;  %v923_v22 = vrot.slane %v891_v1, 1  ;;  %v775_v7 = vld [vmem:[#allocation2 + $0x28] sm:$0x3] }
 0x114   : > { %v2659_v62 = vsub.f32 1.0, %v2627_v24  ;;  %v2164_v3 = vadd.f32 1.0, %v2132_v4  ;;  %v2548_v13 = vmul.f32 %v2516_v20, %v2100_v54  ;;  %v832_v15 = vmul.f32 %v10009_v38, %v10368_v23  ;;  %v781_v54 = vld [vmem:[#allocation2 + $0x58] sm:$0x3] }
 0x115   : > { %v2660_v29 = vsub.f32 1.0, %v2628_v10  ;;  %9056 = vrcp.f32 %v2163_v12  ;;  %v2605_v47 = vmul.f32 1.442695, %v2547_v41  ;;  %v16276_v6 = vmov -1.0   ;;  %v784_v41 = vld [vmem:[#allocation2 + $0x70] sm:$0x3] }
 0x116   : > { %v2691_v46 = vmul.f32 %v2659_v62, %v10321_v53  ;;  %v10383_v28 = vsel %vm2035_vm9, 1.0, %v16276_v6  ;;  %9058 = vrcp.f32 %v2164_v3  ;;  %v2607_v33 = vmul.f32 1.442695, %v2548_v13  ;;  %v787_v53 = vld [vmem:[#allocation2 + $0x88] sm:$0x3] }
 0x117   : > { %v2692_v61 = vmul.f32 %v2660_v29, %v10330_v58  ;;  %v10388_v35 = vsel %vm2036_vm10, 1.0, %v16276_v6  ;;  %v925_v1 = vrot.slane %v893_v11, 1  ;;  %v953_v45 = vadd.f32 %v921_v8, %v823_v63 }
 0x118   : > { %v2723_v38 = vadd.f32 1.0, %v2691_v46  ;;  %9060 = vpow2.f32 %v2605_v47  ;;  %v954_v16 = vadd.f32 %v921_v8, %v824_v0  ;;  %v957_v18 = vadd.f32 %v923_v22, %v827_v19 }
 0x119   : > { %v2724_v34 = vadd.f32 1.0, %v2692_v61  ;;  %9062 = vpow2.f32 %v2607_v33  ;;  %v987_v3 = vmul.f32 %v10002_v36, %v10338_v55  ;;  %v988_v29 = vmul.f32 %v10002_v36, %v775_v7 }
 0x11a   : > { %v10394_v58 = vmul.f32 %v2723_v38, %v10305_v5  ;;  %v991_v13 = vmul.f32 %v10002_v36, %v10032_v51  ;;  %v992_v63 = vmul.f32 %v10002_v36, %v781_v54  ;;  %v994_v37 = vmul.f32 %v10002_v36, %v784_v41  ;;  %v10408_v5 = vld [vmem:[#allocation2 + $0x30] sm:$0xff] }
 0x11b   : > { %v10400_v24 = vpop.eup %9056  ;;  %v10403_v0 = vmul.f32 %v2724_v34, %v10314_v25  ;;  %v995_v55 = vmul.f32 %v10002_v36, %v10368_v23  ;;  %v996_v19 = vmul.f32 %v10002_v36, %v787_v53  ;;  %v1052_v4 = vrot.slane %v987_v3, 2  ;;  %v1165_v53 = vld [vmem:[#allocation2 + $0x38] sm:$0xff] }
 0x11c   : > { %16277 = vst [vmem:[#allocation32_spill] sm:$0xff] %v10394_v58  ;;  %v10410_v20 = vpop.eup %9058  ;;  %v2227_v11 = vmul.f32 1.0614054, %v10400_v24  ;;  %v958_v10 = vadd.f32 %v923_v22, %v10360_v21  ;;  %v1053_v12 = vrot.slane %v988_v29, 2  ;;  %v1058_v25 = vrot.slane %v991_v13, 2 }
 0x11d   : > { %16278 = vst [vmem:[#allocation33_spill] sm:$0xff] %v10403_v0  ;;  %v2228_v8 = vmul.f32 1.0614054, %v10410_v20  ;;  %v961_v36 = vadd.f32 %v925_v1, %v10364_v42  ;;  %v1059_v62 = vrot.slane %v992_v63, 2  ;;  %v1062_v47 = vrot.slane %v994_v37, 2 }
 0x11e   : > { %2949 = vst.msk [vmem:[#allocation2 + $0xa9] sm:$0x80] %vm16170_vm7, %v10394_v58  ;;  %v10420_v46 = vpop.eup %9060  ;;  %v2259_v33 = vadd.f32 -1.4531521, %v2227_v11  ;;  %v1054_v7 = vsel %vm1051_vm2, %v1052_v4, %v1053_v12  ;;  %v1064_v61 = vrot.slane %v995_v55, 2  ;;  %v1065_v54 = vrot.slane %v996_v19, 2 }
 0x11f   : > { %2950 = vst.msk [vmem:[#allocation2 + $0xb1] sm:$0x7f] %vm16169_vm8, %v10403_v0  ;;  %v10423_v41 = vpop.eup %9062  ;;  %v2260_v22 = vadd.f32 -1.4531521, %v2228_v8  ;;  %v962_v21 = vadd.f32 %v925_v1, %v832_v15  ;;  %v1060_v38 = vsel %vm1051_vm2, %v1058_v25, %v1059_v62  ;;  %v1214_v34 = vmul.f32 %v10020_v48, %v10408_v5  ;;  %v10434_v1 = vld [vmem:[#allocation2 + $0x90] sm:$0xff] }
 0x120   : > { %v2291_v42 = vmul.f32 %v10400_v24, %v2259_v33  ;;  %v16279_v3 = vrot.slane %v10266_v60, 2  ;;  %v1132_v13 = vadd.f32 %v1052_v4, %v953_v45  ;;  %v1133_v63 = vadd.f32 %v1054_v7, %v954_v16 }
 0x121   : > { %v2292_v37 = vmul.f32 %v10410_v20, %v2260_v22  ;;  %v1066_v55 = vsel %vm1051_vm2, %v1064_v61, %v1065_v54  ;;  %v1136_v19 = vadd.f32 %v1058_v25, %v957_v18  ;;  %v1137_v15 = vadd.f32 %v1060_v38, %v958_v10 }
 0x122   : > { %v1063_v29 = vsel %vm1051_vm2, %v16279_v3, %v1062_v47  ;;  %v2323_v11 = vadd.f32 1.4214138, %v2291_v42  ;;  %v1215_v12 = vmul.f32 %v10020_v48, %v1165_v53  ;;  %v1218_v8 = vmul.f32 %v10020_v48, %v10114_v52 }
 0x123   : > { %v1219_v60 = vmul.f32 %v10020_v48, %v10119_v57  ;;  %v2324_v62 = vadd.f32 1.4214138, %v2292_v37  ;;  %v1139_v45 = vadd.f32 %v1063_v29, %v10279_v39  ;;  %v1220_v16 = vmul.f32 %v10020_v48, %v10352_v56  ;;  %v1166_v39 = vld [vmem:[#allocation2 + $0x40] sm:$0x3] }
 0x124   : > { %v1221_v18 = vmul.f32 %v10020_v48, %v10368_v23  ;;  %v2355_v4 = vmul.f32 %v10400_v24, %v2323_v11  ;;  %v1140_v10 = vadd.f32 %v1064_v61, %v961_v36  ;;  %v1141_v25 = vadd.f32 %v1066_v55, %v962_v21  ;;  %v1172_v55 = vld [vmem:[#allocation2 + $0x70] sm:$0x3] }
 0x125   : > { %v1222_v47 = vmul.f32 %v10020_v48, %v10434_v1  ;;  %v2356_v52 = vmul.f32 %v10410_v20, %v2324_v62  ;;  %v1246_v33 = vadd.f32 %v1214_v34, %v1132_v13  ;;  %v1247_v7 = vadd.f32 %v1215_v12, %v1133_v63  ;;  %v1175_v12 = vld [vmem:[#allocation2 + $0x88] sm:$0x3] }
 0x126   : > { %v1250_v54 = vadd.f32 %v1218_v8, %v1136_v19  ;;  %v2387_v22 = vadd.f32 -0.28449672, %v2355_v4  ;;  %v1251_v38 = vadd.f32 %v1219_v60, %v1137_v15  ;;  %v1252_v42 = vadd.f32 %v1220_v16, %v10286_v40 }
 0x127   : > { %v1280_v3 = vmul.f32 %v10025_v49, %v1165_v53  ;;  %v2388_v29 = vadd.f32 -0.28449672, %v2356_v52  ;;  %v1253_v37 = vadd.f32 %v1221_v18, %v1139_v45  ;;  %v1282_v36 = vmul.f32 %v10025_v49, %v10119_v57 }
 0x128   : > { %v1283_v48 = vmul.f32 %v10025_v49, %v10368_v23  ;;  %v2419_v61 = vmul.f32 %v10400_v24, %v2387_v22  ;;  %v1254_v21 = vadd.f32 %v1222_v47, %v1140_v10  ;;  %v1378_v13 = vmul.f32 %v10030_v50, %v1165_v53 }
 0x129   : > { %v1312_v34 = vrot.slane %v1280_v3, 1  ;;  %v2420_v63 = vmul.f32 %v10410_v20, %v2388_v29  ;;  %v1314_v40 = vrot.slane %v1282_v36, 1  ;;  %v1379_v15 = vmul.f32 %v10030_v50, %v1166_v39 }
 0x12a   : > { %v1315_v19 = vrot.slane %v1283_v48, 1  ;;  %v2451_v11 = vadd.f32 0.2548296, %v2419_v61  ;;  %v1255_v8 = vadd.f32 %v10107_v43, %v1141_v25  ;;  %v1382_v49 = vmul.f32 %v10030_v50, %v10119_v57  ;;  %v10477_v61 = vld [vmem:[#allocation2 + $0x48] sm:$0xff] }
 0x12b   : > { %v1344_v60 = vadd.f32 %v1312_v34, %v1246_v33  ;;  %v2452_v62 = vadd.f32 0.2548296, %v2420_v63  ;;  %v1345_v45 = vadd.f32 %v1312_v34, %v1247_v7  ;;  %v1348_v16 = vadd.f32 %v1314_v40, %v1250_v54 }
 0x12c   : > { %v1349_v18 = vadd.f32 %v1314_v40, %v1251_v38  ;;  %v2483_v53 = vmul.f32 %v10400_v24, %v2451_v11  ;;  %v1350_v4 = vadd.f32 %v1315_v19, %v1252_v42  ;;  %v1383_v10 = vmul.f32 %v10030_v50, %v1172_v55 }
 0x12d   : > { %v1384_v47 = vmul.f32 %v10030_v50, %v10368_v23  ;;  %v2484_v52 = vmul.f32 %v10410_v20, %v2452_v62  ;;  %v1385_v43 = vmul.f32 %v10030_v50, %v1175_v12  ;;  %v1442_v25 = vrot.slane %v1378_v13, 2 }
 0x12e   : > { %v1443_v33 = vrot.slane %v1379_v15, 2  ;;  %v2643_v57 = vmul.f32 %v10420_v46, %v2483_v53  ;;  %v1448_v22 = vrot.slane %v1382_v49, 2  ;;  %v1449_v7 = vrot.slane %v1383_v10, 2  ;;  %v1567_v15 = vld [vmem:[#allocation2 + $0xa8] sm:$0xff]  ;;  %v1557_v53 = vld [vmem:[#allocation2 + $0x58] sm:$0x3] }
 0x12f   : > { %v1451_v54 = vrot.slane %v1384_v47, 2  ;;  %v2644_v39 = vmul.f32 %v10423_v41, %v2484_v52  ;;  %v16280_v24 = vrot.slane %v10084_v26, 1  ;;  %v1452_v3 = vrot.slane %v1385_v43, 2 }
 0x130   : > { %v1444_v42 = vsel %vm1051_vm2, %v1442_v25, %v1443_v33  ;;  %v2675_v29 = vsub.f32 1.0, %v2643_v57  ;;  %v1351_v36 = vadd.f32 %v1315_v19, %v1253_v37  ;;  %v1450_v48 = vsel %vm1051_vm2, %v1448_v22, %v1449_v7 }
 0x131   : > { %v1352_v38 = vadd.f32 %v16280_v24, %v1254_v21  ;;  %v16281_v20 = vmov %v16280_v24  ;;  %v2676_v46 = vsub.f32 1.0, %v2644_v39  ;;  %v1453_v34 = vsel %vm1051_vm2, %v1451_v54, %v1452_v3  ;;  %v16285_v3 = vld [vmem:[#allocation20_spill] sm:$0xff] }
 0x132   : > { %v1353_v50 = vadd.f32 %v16281_v20, %v1255_v8  ;;  %v1522_v13 = vadd.f32 %v1442_v25, %v1344_v60  ;;  %v1523_v41 = vadd.f32 %v1444_v42, %v1345_v45  ;;  %v2707_v63 = vmul.f32 %v2675_v29, %v10383_v28 }
 0x133   : > { %v1526_v21 = vadd.f32 %v1448_v22, %v1348_v16  ;;  %v1527_v55 = vadd.f32 %v1450_v48, %v1349_v18  ;;  %v1528_v40 = vadd.f32 %v1451_v54, %v1350_v4  ;;  %v2708_v37 = vmul.f32 %v2676_v46, %v10388_v35 }
 0x134   : > { %v1605_v26 = vmul.f32 %v10097_v32, %v10477_v61  ;;  %v1606_v19 = vmul.f32 %v10097_v32, %v10032_v51  ;;  %v1609_v11 = vmul.f32 %v10097_v32, %v10352_v56  ;;  %v2739_v12 = vadd.f32 1.0, %v2707_v63 }
 0x135   : > { %v1529_v8 = vadd.f32 %v1453_v34, %v1351_v36  ;;  %v1610_v28 = vmul.f32 %v10097_v32, %v10368_v23  ;;  %v1611_v60 = vmul.f32 %v10097_v32, %v10434_v1  ;;  %v2740_v49 = vadd.f32 1.0, %v2708_v37  ;;  %v1563_v1 = vld [vmem:[#allocation2 + $0x88] sm:$0x3] }
 0x136   : > { %v16282_v35 = vrot.slane %v10088_v27, 2  ;;  %v1531_v45 = vadd.f32 %v10148_v30, %v1353_v50  ;;  %v1613_v16 = vmul.f32 %v10097_v32, %v1567_v15  ;;  %v1777_v18 = vmul.f32 %v10040_v59, %v10063_v9  ;;  %v16291_v15 = vld [vmem:[#allocation18_spill] sm:$0xff] }
 0x137   : > { %v10499_v56 = vmul.f32 %v2739_v12, %v10350_v2  ;;  %v1637_v4 = vadd.f32 %v1605_v26, %v1522_v13  ;;  %v1638_v10 = vadd.f32 %v1606_v19, %v1523_v41  ;;  %v10502_v47 = vmul.f32 %v2740_v49, %v10366_v31  ;;  %v16288_v13 = vld [vmem:[#allocation28_spill] sm:$0xff]  ;;  %v16293_v26 = vld [vmem:[#allocation22_spill] sm:$0xff] }
 0x138   : > { %v1530_v62 = vadd.f32 %v16282_v35, %v1352_v38  ;;  %v1641_v52 = vadd.f32 %v1609_v11, %v1526_v21  ;;  %v1642_v27 = vadd.f32 %v1610_v28, %v1527_v55  ;;  %v1671_v30 = vmul.f32 %v10074_v17, %v10032_v51  ;;  %v16295_v12 = vld [vmem:[#allocation26_spill] sm:$0xff] }
 0x139   : > { %16283 = vst [vmem:[#allocation34_spill] sm:$0xff] %v10499_v56  ;;  %v1643_v32 = vadd.f32 %v1611_v60, %v1528_v40  ;;  %v1644_v43 = vadd.f32 %v10111_v44, %v1529_v8  ;;  %v1673_v2 = vmul.f32 %v10074_v17, %v10368_v23  ;;  %v1769_v25 = vmul.f32 %v10040_v59, %v10032_v51 }
 0x13a   : > { %16284 = vst [vmem:[#allocation35_spill] sm:$0xff] %v10502_v47  ;;  %v1645_v31 = vadd.f32 %v1613_v16, %v1530_v62  ;;  %v1646_v33 = vadd.f32 %v10211_v14, %v1531_v45  ;;  %v1703_v57 = vrot.slane %v1671_v30, 1  ;;  %v1770_v22 = vmul.f32 %v10040_v59, %v1557_v53 }
 0x13b   : > { %2965 = vst.msk [vmem:[#allocation2 + $0x1c9] sm:$0x80] %vm16170_vm7, %v10499_v56  ;;  %v1705_v7 = vrot.slane %v1673_v2, 1  ;;  %v1773_v54 = vmul.f32 %v10040_v59, %v10368_v23  ;;  %v1774_v44 = vmul.f32 %v10040_v59, %v1563_v1  ;;  %v1833_v39 = vrot.slane %v1769_v25, 2 }
 0x13c   : > { %2966 = vst.msk [vmem:[#allocation2 + $0x1d1] sm:$0x7f] %vm16169_vm8, %v10502_v47  ;;  %v1845_v17 = vrot.slane %v1777_v18, 2  ;;  %v1735_v24 = vadd.f32 %v1703_v57, %v1637_v4  ;;  %v1736_v38 = vadd.f32 %v1703_v57, %v1638_v10  ;;  %v1834_v51 = vrot.slane %v1770_v22, 2 }
 0x13d   : > { %v1739_v42 = vadd.f32 %v1705_v7, %v1641_v52  ;;  %v16286_v29 = vrot.slane %v16285_v3, 1  ;;  %v1839_v20 = vrot.slane %v1773_v54, 2  ;;  %v1840_v14 = vrot.slane %v1774_v44, 2 }
 0x13e   : > { %v1740_v50 = vadd.f32 %v1705_v7, %v1642_v27  ;;  %v1835_v34 = vsel %vm1051_vm2, %v1833_v39, %v1834_v51  ;;  %v1913_v23 = vadd.f32 %v1833_v39, %v1735_v24  ;;  %v16289_v59 = vrot.slane %v16288_v13, 1 }
 0x13f   : > { %v1741_v36 = vadd.f32 %v16286_v29, %v1643_v32  ;;  %v16287_v48 = vmov %v16286_v29  ;;  %v1841_v55 = vsel %vm1051_vm2, %v1839_v20, %v1840_v14  ;;  %v1914_v40 = vadd.f32 %v1835_v34, %v1736_v38 }
 0x140   : > { %v1742_v46 = vadd.f32 %v16287_v48, %v1644_v43  ;;  %v1743_v41 = vadd.f32 %v16289_v59, %v1645_v31  ;;  %v16290_v63 = vmov %v16289_v59  ;;  %v16292_v37 = vrot.slane %v16291_v15, 2 }
 0x141   : > { %v1744_v21 = vadd.f32 %v16290_v63, %v1646_v33  ;;  %v16294_v19 = vrot.slane %v16293_v26, 2  ;;  %v16296_v8 = vrot.slane %v16295_v12, 2  ;;  %v1917_v60 = vadd.f32 %v1839_v20, %v1739_v42 }
 0x142   : > { %v1918_v62 = vadd.f32 %v1841_v55, %v1740_v50  ;;  %v1977_v16 = vmul.f32 0.70710677, %v1913_v23  ;;  %v1978_v18 = vmul.f32 0.70710677, %v1914_v40  ;;  %v10542_v53 = vadd.f32 %v1845_v17, %v1743_v41 }
 0x143   : > { %v1844_v11 = vsel %vm1051_vm2, %v16294_v19, %v16292_v37  ;;  %v1847_v28 = vsel %vm1051_vm2, %v1845_v17, %v16296_v8  ;;  %v16297_v49 = vmov %v16294_v19  ;;  %v10546_v10 = vmul.f32 0.5, %v1913_v23 }
 0x144   : > { %v1919_v35 = vadd.f32 %v16297_v49, %v1741_v36  ;;  %v10540_v45 = vadd.f32 %v1844_v11, %v1742_v46  ;;  %v10544_v4 = vadd.f32 %v1847_v28, %v1744_v21  ;;  %v1981_v1 = vmul.f32 0.70710677, %v1917_v60 }
 0x145   : > { %vm2009_vm11 = vcmp.ge.f32.partialorder %v1977_v16, 0.0  ;;  %vm2010_vm12 = vcmp.ge.f32.partialorder %v1978_v18, 0.0  ;;  %v10548_v52 = vmul.f32 0.70710677, %v1918_v62  ;;  %v10555_v32 = vmul.f32 0.5, %v1914_v40 }
 0x146   : > { %v10550_v27 = vmul.f32 0.70710677, %v1919_v35  ;;  %v10553_v30 = vmul.f32 0.70710677, %v10540_v45  ;;  %v10557_v43 = vmul.f32 0.5, %v1919_v35  ;;  %v10565_v31 = vmul.f32 0.5, %v1917_v60 }
 0x147   : > { %v10560_v2 = vmul.f32 0.70710677, %v10542_v53  ;;  %v10563_v25 = vmul.f32 0.70710677, %v10544_v4  ;;  %v10567_v33 = vmul.f32 0.5, %v1918_v62  ;;  %v10570_v57 = vsel %vm2009_vm11, 1.0, %v16276_v6 }
 0x148   : > { %v10573_v22 = vsel %vm2010_vm12, 1.0, %v16276_v6  ;;  %v2073_v7 = vand.u32 2147483647, %v1977_v16  ;;  %v2074_v54 = vand.u32 2147483647, %v1978_v18  ;;  %vm2013_vm13 = vcmp.ge.f32.partialorder %v1981_v1, 0.0 }
 0x149   : > { %v2077_v44 = vand.u32 2147483647, %v1981_v1  ;;  %v2078_v39 = vand.u32 2147483647, %v10548_v52  ;;  %v2079_v17 = vand.u32 2147483647, %v10550_v27 }
 0x14a   : > { %v2080_v24 = vand.u32 2147483647, %v10553_v30  ;;  %v2081_v38 = vand.u32 2147483647, %v10560_v2  ;;  %v2082_v51 = vand.u32 2147483647, %v10563_v25 }
 0x14b   : > { %v2105_v42 = vmul.f32 0.3275911, %v2073_v7  ;;  %vm2014_vm14 = vcmp.ge.f32.partialorder %v10548_v52, 0.0  ;;  %v2106_v3 = vmul.f32 0.3275911, %v2074_v54  ;;  %v2489_v55 = vsub.f32 0.0, %v2073_v7 }
 0x14c   : > { %v2109_v29 = vmul.f32 0.3275911, %v2077_v44  ;;  %v2110_v36 = vmul.f32 0.3275911, %v2078_v39  ;;  %v2111_v20 = vmul.f32 0.3275911, %v2079_v17 }
 0x14d   : > { %v2112_v14 = vmul.f32 0.3275911, %v2080_v24  ;;  %v2113_v50 = vmul.f32 0.3275911, %v2081_v38  ;;  %v2114_v48 = vmul.f32 0.3275911, %v2082_v51  ;;  %v2521_v8 = vmul.f32 %v2489_v55, %v2073_v7 }
 0x14e   : > { %v2137_v46 = vadd.f32 1.0, %v2105_v42  ;;  %v2138_v34 = vadd.f32 1.0, %v2106_v3  ;;  %v2141_v23 = vadd.f32 1.0, %v2109_v29  ;;  %v2142_v13 = vadd.f32 1.0, %v2110_v36 }
 0x14f   : > { %v2143_v59 = vadd.f32 1.0, %v2111_v20  ;;  %v2144_v41 = vadd.f32 1.0, %v2112_v14  ;;  %v2145_v63 = vadd.f32 1.0, %v2113_v50  ;;  %v2146_v21 = vadd.f32 1.0, %v2114_v48 }
 0x150   : > { %9064 = vrcp.f32 %v2137_v46  ;;  %v2490_v40 = vsub.f32 0.0, %v2074_v54  ;;  %v2493_v15 = vsub.f32 0.0, %v2077_v44  ;;  %v2494_v37 = vsub.f32 0.0, %v2078_v39 }
 0x151   : > { %9066 = vrcp.f32 %v2138_v34  ;;  %v2495_v26 = vsub.f32 0.0, %v2079_v17  ;;  %v2496_v19 = vsub.f32 0.0, %v2080_v24  ;;  %v2497_v11 = vsub.f32 0.0, %v2081_v38 }
 0x152   : > { %9068 = vrcp.f32 %v2141_v23  ;;  %v2498_v12 = vsub.f32 0.0, %v2082_v51  ;;  %v2522_v28 = vmul.f32 %v2490_v40, %v2074_v54  ;;  %v2525_v60 = vmul.f32 %v2493_v15, %v2077_v44 }
 0x153   : > { %9070 = vrcp.f32 %v2142_v13  ;;  %v2526_v49 = vmul.f32 %v2494_v37, %v2078_v39  ;;  %v2527_v35 = vmul.f32 %v2495_v26, %v2079_v17  ;;  %v2528_v62 = vmul.f32 %v2496_v19, %v2080_v24 }
 0x154   : > { %9072 = vrcp.f32 %v2143_v59  ;;  %v10583_v16 = vsel %vm2013_vm13, 1.0, %v16276_v6  ;;  %v2529_v18 = vmul.f32 %v2497_v11, %v2081_v38  ;;  %v2553_v42 = vmul.f32 1.442695, %v2521_v8 }
 0x155   : > { %9074 = vrcp.f32 %v2144_v41  ;;  %v2530_v29 = vmul.f32 %v2498_v12, %v2082_v51  ;;  %v2555_v36 = vmul.f32 1.442695, %v2522_v28  ;;  %v2561_v20 = vmul.f32 1.442695, %v2525_v60 }
 0x156   : > { %v10585_v3 = vpop.eup %9064  ;;  %9076 = vrcp.f32 %v2145_v63  ;;  %v10592_v54 = vsel %vm2014_vm14, 1.0, %v16276_v6  ;;  %v2563_v44 = vmul.f32 1.442695, %v2526_v49  ;;  %v2565_v24 = vmul.f32 1.442695, %v2527_v35 }
 0x157   : > { %v10587_v7 = vpop.eup %9066  ;;  %9078 = vrcp.f32 %v2146_v21  ;;  %v2201_v1 = vmul.f32 1.0614054, %v10585_v3  ;;  %v10598_v38 = vmul.f32 1.442695, %v2528_v62  ;;  %v10603_v52 = vmul.f32 1.442695, %v2529_v18 }
 0x158   : > { %v10595_v39 = vpop.eup %9068  ;;  %v2202_v17 = vmul.f32 1.0614054, %v10587_v7  ;;  %9080 = vpow2.f32 %v2553_v42  ;;  %v10608_v23 = vmul.f32 1.442695, %v2530_v29  ;;  %vm2015_vm15 = vcmp.ge.f32.partialorder %v10550_v27, 0.0 }
 0x159   : > { %v10600_v51 = vpop.eup %9070  ;;  %v2205_v14 = vmul.f32 1.0614054, %v10595_v39  ;;  %v2233_v50 = vadd.f32 -1.4531521, %v2201_v1  ;;  %9082 = vpow2.f32 %v2555_v36  ;;  %vm2016_vm1 = vcmp.ge.f32.partialorder %v10553_v30, 0.0 }
 0x15a   : > { %v10605_v48 = vpop.eup %9072  ;;  %v2206_v46 = vmul.f32 1.0614054, %v10600_v51  ;;  %v2234_v34 = vadd.f32 -1.4531521, %v2202_v17  ;;  %9084 = vpow2.f32 %v2561_v20  ;;  %vm2017_vm3 = vcmp.ge.f32.partialorder %v10560_v2, 0.0 }
 0x15b   : > { %v10610_v13 = vpop.eup %9074  ;;  %v2207_v59 = vmul.f32 1.0614054, %v10605_v48  ;;  %v2237_v41 = vadd.f32 -1.4531521, %v2205_v14  ;;  %v2265_v63 = vmul.f32 %v10585_v3, %v2233_v50  ;;  %9086 = vpow2.f32 %v2563_v44 }
 0x15c   : > { %v10614_v21 = vpop.eup %9076  ;;  %v2208_v55 = vmul.f32 1.0614054, %v10610_v13  ;;  %v2238_v40 = vadd.f32 -1.4531521, %v2206_v46  ;;  %v2266_v15 = vmul.f32 %v10587_v7, %v2234_v34  ;;  %9088 = vpow2.f32 %v2565_v24 }
 0x15d   : > { %v10618_v37 = vpop.eup %9078  ;;  %v2209_v26 = vmul.f32 1.0614054, %v10614_v21  ;;  %v2239_v19 = vadd.f32 -1.4531521, %v2207_v59  ;;  %v2269_v11 = vmul.f32 %v10595_v39, %v2237_v41  ;;  %v2297_v12 = vadd.f32 1.4214138, %v2265_v63 }
 0x15e   : > { %v10622_v8 = vpop.eup %9080  ;;  %v2210_v28 = vmul.f32 1.0614054, %v10618_v37  ;;  %v2240_v60 = vadd.f32 -1.4531521, %v2208_v55  ;;  %v2270_v49 = vmul.f32 %v10600_v51, %v2238_v40  ;;  %v2298_v35 = vadd.f32 1.4214138, %v2266_v15 }
 0x15f   : > { %v9083_v62 = vpop.eup %9082  ;;  %v2241_v18 = vadd.f32 -1.4531521, %v2209_v26  ;;  %v2271_v42 = vmul.f32 %v10605_v48, %v2239_v19  ;;  %v2301_v29 = vadd.f32 1.4214138, %v2269_v11  ;;  %v2329_v36 = vmul.f32 %v10585_v3, %v2297_v12 }
 0x160   : > { %v9085_v20 = vpop.eup %9084  ;;  %v2242_v1 = vadd.f32 -1.4531521, %v2210_v28  ;;  %v2272_v44 = vmul.f32 %v10610_v13, %v2240_v60  ;;  %v2302_v17 = vadd.f32 1.4214138, %v2270_v49  ;;  %v2330_v24 = vmul.f32 %v10587_v7, %v2298_v35 }
 0x161   : > { %v9087_v14 = vpop.eup %9086  ;;  %v2273_v50 = vmul.f32 %v10614_v21, %v2241_v18  ;;  %v2303_v46 = vadd.f32 1.4214138, %v2271_v42  ;;  %v2333_v34 = vmul.f32 %v10595_v39, %v2301_v29  ;;  %v2361_v59 = vadd.f32 -0.28449672, %v2329_v36 }
 0x162   : > { %v9089_v41 = vpop.eup %9088  ;;  %v2274_v63 = vmul.f32 %v10618_v37, %v2242_v1  ;;  %v2304_v55 = vadd.f32 1.4214138, %v2272_v44  ;;  %v2334_v40 = vmul.f32 %v10600_v51, %v2302_v17  ;;  %v2362_v15 = vadd.f32 -0.28449672, %v2330_v24 }
 0x163   : > { %v2305_v26 = vadd.f32 1.4214138, %v2273_v50  ;;  %v2335_v19 = vmul.f32 %v10605_v48, %v2303_v46  ;;  %v2365_v11 = vadd.f32 -0.28449672, %v2333_v34  ;;  %v2393_v12 = vmul.f32 %v10585_v3, %v2361_v59 }
 0x164   : > { %v2306_v28 = vadd.f32 1.4214138, %v2274_v63  ;;  %v2336_v60 = vmul.f32 %v10610_v13, %v2304_v55  ;;  %v2366_v49 = vadd.f32 -0.28449672, %v2334_v40  ;;  %v2394_v35 = vmul.f32 %v10587_v7, %v2362_v15 }
 0x165   : > { %v2337_v18 = vmul.f32 %v10614_v21, %v2305_v26  ;;  %v2367_v42 = vadd.f32 -0.28449672, %v2335_v19  ;;  %v2397_v29 = vmul.f32 %v10595_v39, %v2365_v11  ;;  %v2425_v36 = vadd.f32 0.2548296, %v2393_v12 }
 0x166   : > { %v2338_v1 = vmul.f32 %v10618_v37, %v2306_v28  ;;  %v2368_v44 = vadd.f32 -0.28449672, %v2336_v60  ;;  %v2398_v17 = vmul.f32 %v10600_v51, %v2366_v49  ;;  %v2426_v24 = vadd.f32 0.2548296, %v2394_v35 }
 0x167   : > { %v2369_v50 = vadd.f32 -0.28449672, %v2337_v18  ;;  %v2399_v46 = vmul.f32 %v10605_v48, %v2367_v42  ;;  %v2429_v34 = vadd.f32 0.2548296, %v2397_v29  ;;  %v2457_v59 = vmul.f32 %v10585_v3, %v2425_v36 }
 0x168   : > { %v2370_v63 = vadd.f32 -0.28449672, %v2338_v1  ;;  %v2400_v55 = vmul.f32 %v10610_v13, %v2368_v44  ;;  %v2430_v40 = vadd.f32 0.2548296, %v2398_v17  ;;  %v2458_v15 = vmul.f32 %v10587_v7, %v2426_v24 }
 0x169   : > { %v2401_v26 = vmul.f32 %v10614_v21, %v2369_v50  ;;  %v2431_v19 = vadd.f32 0.2548296, %v2399_v46  ;;  %v2461_v11 = vmul.f32 %v10595_v39, %v2429_v34  ;;  %9090 = vpow2.f32 %v10598_v38 }
 0x16a   : > { %vm2018_vm4 = vcmp.ge.f32.partialorder %v10563_v25, 0.0  ;;  %v2402_v12 = vmul.f32 %v10618_v37, %v2370_v63  ;;  %v2432_v28 = vadd.f32 0.2548296, %v2400_v55  ;;  %v2462_v3 = vmul.f32 %v10600_v51, %v2430_v40 }
 0x16b   : > { %9092 = vpow2.f32 %v10603_v52  ;;  %v2433_v60 = vadd.f32 0.2548296, %v2401_v26  ;;  %v2463_v49 = vmul.f32 %v10605_v48, %v2431_v19  ;;  %v2617_v7 = vmul.f32 %v10622_v8, %v2457_v59 }
 0x16c   : > { %9094 = vpow2.f32 %v10608_v23  ;;  %v2434_v35 = vadd.f32 0.2548296, %v2402_v12  ;;  %v2464_v39 = vmul.f32 %v10610_v13, %v2432_v28  ;;  %v2618_v38 = vmul.f32 %v9083_v62, %v2458_v15 }
 0x16d   : > { %v2621_v18 = vmul.f32 %v9085_v20, %v2461_v11  ;;  %v2465_v42 = vmul.f32 %v10614_v21, %v2433_v60  ;;  %v2622_v29 = vmul.f32 %v9087_v14, %v2462_v3  ;;  %v2623_v36 = vmul.f32 %v9089_v41, %v2463_v49 }
 0x16e   : > { %v2649_v1 = vsub.f32 1.0, %v2617_v7  ;;  %v2047_v51 = vsel %vm2015_vm15, 1.0, %v16276_v6  ;;  %v2466_v52 = vmul.f32 %v10618_v37, %v2434_v35  ;;  %v2650_v48 = vsub.f32 1.0, %v2618_v38  ;;  %v1590_v7 = vld [vmem:[#allocation2 + $0x1c0] sm:$0x3] }
 0x16f   : > { %v2653_v23 = vsub.f32 1.0, %v2621_v18  ;;  %v9091_v44 = vpop.eup %9090  ;;  %v2048_v13 = vsel %vm2016_vm1, 1.0, %v16276_v6  ;;  %v2654_v8 = vsub.f32 1.0, %v2622_v29  ;;  %v2655_v62 = vsub.f32 1.0, %v2623_v36  ;;  %v1593_v35 = vld [vmem:[#allocation2 + $0x1d8] sm:$0x3] }
 0x170   : > { %v2681_v21 = vmul.f32 %v2649_v1, %v10570_v57  ;;  %v2049_v14 = vsel %vm2017_vm3, 1.0, %v16276_v6  ;;  %v2624_v27 = vmul.f32 %v9091_v44, %v2464_v39  ;;  %v2682_v41 = vmul.f32 %v2650_v48, %v10573_v22  ;;  %v10721_v39 = vld [vmem:[%s16003_s7 + $0x2] ss:$0 sm:$0xff]  ;;  %v10727_v18 = vld [vmem:[%s16003_s7 + $0x5] ss:$0 sm:$0xff] }
 0x171   : > { %v9093_v20 = vpop.eup %9092  ;;  %v2685_v37 = vmul.f32 %v2653_v23, %v10583_v16  ;;  %v2686_v50 = vmul.f32 %v2654_v8, %v10592_v54  ;;  %v2687_v30 = vmul.f32 %v2655_v62, %v2047_v51  ;;  %v2050_v54 = vsel %vm2018_vm4, 1.0, %v16276_v6  ;;  %v9309_v1 = vld [vmem:[%s16003_s7 + $0x8] ss:$0 sm:$0xff]  ;;  %v817_v23 = vld [vmem:[#allocation2 + $0x1d8] sm:$0x3] }
 0x172   : > { %v9095_v17 = vpop.eup %9094  ;;  %v2625_v24 = vmul.f32 %v9093_v20, %v2465_v42  ;;  %v2713_v46 = vadd.f32 1.0, %v2681_v21  ;;  %v2656_v59 = vsub.f32 1.0, %v2624_v27  ;;  %v2714_v63 = vadd.f32 1.0, %v2682_v41  ;;  %v9308_v42 = vld [vmem:[#allocation2 + $0x1b8] sm:$0xff]  ;;  %v10743_v44 = vld [vmem:[%s16003_s7] ss:$0 sm:$0xff] }
 0x173   : > { %v2626_v34 = vmul.f32 %v9095_v17, %v2466_v52  ;;  %v2717_v57 = vadd.f32 1.0, %v2685_v37  ;;  %v2718_v40 = vadd.f32 1.0, %v2686_v50  ;;  %v2719_v15 = vadd.f32 1.0, %v2687_v30  ;;  %v10750_v8 = vld [vmem:[%s16003_s7 + $0x4] ss:$0 sm:$0xff] }
 0x174   : > { %v2657_v55 = vsub.f32 1.0, %v2625_v24  ;;  %v10676_v2 = vmul.f32 %v2713_v46, %v10546_v10  ;;  %v2688_v22 = vmul.f32 %v2656_v59, %v2048_v13  ;;  %v10679_v16 = vmul.f32 %v2714_v63, %v10555_v32  ;;  %v9312_v21 = vld [vmem:[#allocation2 + $0xc0] sm:$0xff] }
 0x175   : > { %v2658_v26 = vsub.f32 1.0, %v2626_v34  ;;  %v10682_v19 = vmul.f32 %v2717_v57, %v10565_v31  ;;  %v10688_v12 = vmul.f32 %v2718_v40, %v10567_v33  ;;  %v10691_v28 = vmul.f32 %v2719_v15, %v10557_v43  ;;  %v9313_v37 = vld [vmem:[%s16003_s7 + $0x7] ss:$0 sm:$0xff]  ;;  %v9314_v46 = vld [vmem:[%s16003_s7 + $0x1] ss:$0 sm:$0xff]  ;;  %v9315_v34 = vld [vmem:[#allocation2 + $0xc8] sm:$0xff] }
 0x176   : > { %16298 = vst [vmem:[#allocation20_spill] sm:$0xff] %v10676_v2  ;;  %v2689_v11 = vmul.f32 %v2657_v55, %v2049_v14  ;;  %v1952_v10 = vmul.f32 0.5, %v10540_v45  ;;  %v2720_v3 = vadd.f32 1.0, %v2688_v22  ;;  %v1953_v25 = vmul.f32 0.5, %v10542_v53  ;;  %v793_v53 = vld [vmem:[#allocation2 + $0xb8] sm:$0x3] }
 0x177   : > { %16299 = vst [vmem:[#allocation28_spill] sm:$0xff] %v10679_v16  ;;  %v2690_v32 = vmul.f32 %v2658_v26, %v2050_v54  ;;  %v1954_v33 = vmul.f32 0.5, %v10544_v4  ;;  %v1202_v4 = vld [vmem:[#allocation2 + $0x1c0] sm:$0x3]  ;;  %v1000_v38 = vmul.f32 %v10721_v39, %v793_v53  ;;  %v10730_v29 = vmul.f32 %v9308_v42, %v10727_v18  ;;  %v9316_v63 = vld [vmem:[%s16003_s7 + $0x3] ss:$0 sm:$0xff] }
 0x178   : > { %16300 = vst [vmem:[#allocation18_spill] sm:$0xff] %v10682_v19  ;;  %v2721_v31 = vadd.f32 1.0, %v2689_v11  ;;  %v10702_v60 = vmul.f32 %v2720_v3, %v1952_v10  ;;  %v1403_v36 = vmul.f32 %v10727_v18, %v1202_v4  ;;  %v10736_v51 = vmul.f32 %v9309_v1, %v9308_v42  ;;  %v9317_v55 = vld [vmem:[%s16003_s7 + $0x6] ss:$0 sm:$0xff]  ;;  %v16312_v15 = vld [vmem:[#allocation19_spill] sm:$0xff] }
 0x179   : > { %16301 = vst [vmem:[#allocation22_spill] sm:$0xff] %v10688_v12  ;;  %v2722_v43 = vadd.f32 1.0, %v2690_v32  ;;  %v1792_v52 = vmul.f32 %v9309_v1, %v1590_v7  ;;  %v10738_v48 = vmul.f32 %v9309_v1, %v1593_v35  ;;  %v836_v13 = vmul.f32 %v10743_v44, %v10063_v9  ;;  %v16314_v54 = vld [vmem:[#allocation23_spill] sm:$0xff] }
 0x17a   : > { %16302 = vst [vmem:[#allocation26_spill] sm:$0xff] %v10691_v28  ;;  %v10706_v45 = vmul.f32 %v2721_v31, %v1953_v25  ;;  %v10753_v62 = vmul.f32 %v10750_v8, %v9308_v42  ;;  %v837_v20 = vmul.f32 %v9312_v21, %v10743_v44  ;;  %v1071_v14 = vrot.slane %v1000_v38, 2  ;;  %v807_v10 = vld [vmem:[#allocation2 + $0x188] sm:$0xff]  ;;  %v16316_v25 = vld [vmem:[#allocation21_spill] sm:$0xff] }
 0x17b   : > { %2938 = vst.msk [vmem:[#allocation2 + $0x31] sm:$0x80] %vm16170_vm7, %v10676_v2  ;;  %v10710_v49 = vmul.f32 %v2722_v43, %v1954_v33  ;;  %v16042_v27 = vrot.slane %v10730_v29, 2  ;;  %v1479_v41 = vrot.slane %v1403_v36, 2  ;;  %v10760_v9 = vmul.f32 %v9313_v37, %v9308_v42 }
 0x17c   : > { %2940 = vst.msk [vmem:[#allocation2 + $0x39] sm:$0x7f] %vm16169_vm8, %v10679_v16  ;;  %v1016_v17 = vmul.f32 %v10721_v39, %v817_v23  ;;  %v16041_v24 = vrot.slane %v10736_v51, 2  ;;  %v1867_v50 = vrot.slane %v1792_v52, 2  ;;  %v1870_v30 = vrot.slane %v10738_v48, 2  ;;  %v16321_v23 = vld [vmem:[#allocation25_spill] sm:$0xff] }
 0x17d   : > { %2943 = vst.msk [vmem:[#allocation2 + $0x61] sm:$0x80] %vm16170_vm7, %v10682_v19  ;;  %v10768_v59 = vmul.f32 %v9315_v34, %v9314_v46  ;;  %v10773_v57 = vmul.f32 %v9316_v63, %v9308_v42  ;;  %v10778_v40 = vmul.f32 %v9317_v55, %v9308_v42  ;;  %v16313_v26 = vrot.slane %v16312_v15, 1 }
 0x17e   : > { %16303 = vst [vmem:[#allocation36_spill] sm:$0xff] %v10702_v60  ;;  %v852_v11 = vmul.f32 %v10743_v44, %v16314_v54  ;;  %v10786_v3 = vmul.f32 %v9313_v37, %v16314_v54  ;;  %v16317_v31 = vrot.slane %v16316_v25, 2  ;;  %v1286_v43 = vmul.f32 %v9315_v34, %v10750_v8  ;;  %v806_v37 = vld [vmem:[#allocation2 + $0x180] sm:$0xff] }
 0x17f   : > { %2944 = vst.msk [vmem:[#allocation2 + $0x69] sm:$0x7f] %vm16169_vm8, %v10688_v12  ;;  %v966_v22 = vadd.f32 %v16313_v26, %v836_v13  ;;  %v10795_v53 = vsel %vm1051_vm2, %v16042_v27, %v1479_v41  ;;  %v10799_v7 = vmul.f32 %v9309_v1, %v16314_v54  ;;  %v1095_v35 = vrot.slane %v1016_v17, 2  ;;  %v9318_v1 = vld [vmem:[#allocation2 + $0x1e8] sm:$0xff]  ;;  %v16328_v27 = vld [vmem:[#allocation24_spill] sm:$0xff] }
 0x180   : > { %16304 = vst [vmem:[#allocation37_spill] sm:$0xff] %v10706_v45  ;;  %v1072_v33 = vsel %vm1051_vm2, %v16317_v31, %v1071_v14  ;;  %v10804_v38 = vsel %vm1051_vm2, %v16041_v24, %v1867_v50  ;;  %v928_v42 = vrot.slane %v10768_v59, 1  ;;  %v10808_v36 = vmul.f32 %v9315_v34, %v10721_v39  ;;  %v9319_v24 = vld [vmem:[#allocation2 + $0x1e0] sm:$0xff] }
 0x181   : > { %2945 = vst.msk [vmem:[#allocation2 + $0x79] sm:$0x80] %vm16170_vm7, %v10691_v28  ;;  %v900_v52 = vmul.f32 %v9314_v46, %v807_v10  ;;  %v16322_v13 = vrot.slane %v16321_v23, 1  ;;  %v1145_v14 = vadd.f32 %v1072_v33, %v966_v22  ;;  %v1227_v41 = vmul.f32 %v9316_v63, %v9315_v34  ;;  %v16325_v22 = vld [vmem:[#allocation27_spill] sm:$0xff] }
 0x182   : > { %16305 = vst [vmem:[#allocation38_spill] sm:$0xff] %v10710_v49  ;;  %v904_v15 = vmul.f32 %v9318_v1, %v9314_v46  ;;  %v10813_v17 = vmul.f32 %v9317_v55, %v16314_v54  ;;  %v1318_v26 = vrot.slane %v1286_v43, 1  ;;  %v10817_v59 = vmul.f32 %v9315_v34, %v10727_v18 }
 0x183   : > { %2946 = vst.msk [vmem:[#allocation2 + $0x81] sm:$0x7f] %vm16169_vm8, %v10702_v60  ;;  %v982_v21 = vadd.f32 %v16322_v13, %v852_v11  ;;  %v16046_v25 = vrot.slane %v10799_v7, 2  ;;  %v838_v31 = vmul.f32 %v9315_v34, %v10743_v44  ;;  %v10822_v11 = vmul.f32 %v10721_v39, %v807_v10 }
 0x184   : > { %2947 = vst.msk [vmem:[#allocation2 + $0x91] sm:$0x80] %vm16170_vm7, %v10706_v45  ;;  %v16326_v33 = vrot.slane %v16325_v22, 2  ;;  %v967_v23 = vadd.f32 %v928_v42, %v837_v20  ;;  %v845_v54 = vmul.f32 %v10743_v44, %v806_v37  ;;  %v932_v43 = vrot.slane %v900_v52, 1  ;;  %v9012_v22 = vld [vmem:[%s16004_s8 + $0x1] ss:$0 sm:$0xff] }
 0x185   : > { %2948 = vst.msk [vmem:[#allocation2 + $0x99] sm:$0x7f] %vm16169_vm8, %v10710_v49  ;;  %v1259_v13 = vadd.f32 %v1227_v41, %v1145_v14  ;;  %v853_v4 = vmul.f32 %v9319_v24, %v10743_v44  ;;  %v936_v50 = vrot.slane %v904_v15, 1  ;;  %v10831_v34 = vmul.f32 %v9318_v1, %v10721_v39  ;;  %v10839_v52 = vld [vmem:[#allocation2 + $0x50] sm:$0xff]  ;;  %v9320_v39 = vld [vmem:[#allocation2 + $0x18] sm:$0xff]  ;;  %v10845_v15 = vld [vmem:[#allocation2 + $0x20] sm:$0xff] }
 0x186   : > { %16306 = vst [vmem:[#allocation39_spill] sm:$0xff] %v10730_v29  ;;  %v1096_v46 = vsel %vm1051_vm2, %v16326_v33, %v1095_v35  ;;  %v1356_v35 = vadd.f32 %v1318_v26, %v16328_v27  ;;  %v846_v33 = vmul.f32 %v10743_v44, %v807_v10  ;;  %v10843_v24 = vmul.f32 %v9318_v1, %v10750_v8  ;;  %v9322_v45 = vld [vmem:[#allocation2 + $0x78] sm:$0xff] }
 0x187   : > { %16307 = vst [vmem:[#allocation40_spill] sm:$0xff] %v10736_v51  ;;  %v1161_v37 = vadd.f32 %v1096_v46, %v982_v21  ;;  %v3089_v41 = vmul.f32 %v9320_v39, %v9012_v22  ;;  %v3090_v32 = vmul.f32 %v10845_v15, %v9012_v22  ;;  %v975_v55 = vadd.f32 %v932_v43, %v845_v54  ;;  %v2985_v51 = vld [vmem:[#allocation2 + $0x70] sm:$0x3] }
 0x188   : > { %16308 = vst [vmem:[#allocation41_spill] sm:$0xff] %v10753_v62  ;;  %v854_v27 = vmul.f32 %v9318_v1, %v10743_v44  ;;  %v1243_v20 = vmul.f32 %v9318_v1, %v9316_v63  ;;  %v10850_v10 = vmul.f32 %v9318_v1, %v10727_v18  ;;  %v983_v21 = vadd.f32 %v936_v50, %v853_v4 }
 0x189   : > { %16309 = vst [vmem:[#allocation42_spill] sm:$0xff] %v10760_v9  ;;  %v3093_v14 = vmul.f32 %v9012_v22, %v10477_v61  ;;  %v3094_v8 = vmul.f32 %v9012_v22, %v10839_v52  ;;  %v10860_v47 = vsel %vm1051_vm2, %v16046_v25, %v1870_v30  ;;  %v10862_v54 = vadd.f32 %v928_v42, %v838_v31 }
 0x18a   : > { %16310 = vst [vmem:[#allocation43_spill] sm:$0xff] %v10773_v57  ;;  %v16331_v44 = vrot.slane %v10808_v36, 2  ;;  %v10868_v63 = vadd.f32 %v1318_v26, %v1259_v13  ;;  %v16332_v4 = vrot.slane %v10817_v59, 2  ;;  %v16051_v46 = vrot.slane %v10843_v24, 1  ;;  %v10885_v26 = vld [vmem:[#allocation2 + $0x38] sm:$0xff] }
 0x18b   : > { %16311 = vst [vmem:[#allocation44_spill] sm:$0xff] %v10778_v40  ;;  %v3155_v48 = vrot.slane %v3089_v41, 1  ;;  %v3156_v56 = vrot.slane %v3090_v32, 1  ;;  %v10875_v49 = vadd.f32 %v932_v43, %v846_v33  ;;  %v16334_v30 = vrot.slane %v10822_v11, 2  ;;  %v9011_v13 = vld [vmem:[%s16004_s8] ss:$0 sm:$0xff] }
 0x18c   : > { %16315 = vst [vmem:[#allocation19_spill] sm:$0xff] %v10786_v3  ;;  %v10866_v18 = vadd.f32 %v16331_v44, %v967_v23  ;;  %v10872_v1 = vadd.f32 %v16332_v4, %v1356_v35  ;;  %v10881_v31 = vadd.f32 %v936_v50, %v854_v27  ;;  %v10883_v23 = vadd.f32 %v1243_v20, %v1161_v37  ;;  %v9013_v32 = vld [vmem:[%s16004_s8 + $0x2] ss:$0 sm:$0xff]  ;;  %v10900_v20 = vld [vmem:[#allocation2 + $0x68] sm:$0xff] }
 0x18d   : > { %16318 = vst [vmem:[#allocation23_spill] sm:$0xff] %v10795_v53  ;;  %v10879_v42 = vadd.f32 %v16334_v30, %v975_v55  ;;  %v16337_v43 = vrot.slane %v10831_v34, 2  ;;  %v10898_v50 = vld [vmem:[#allocation2 + $0x60] sm:$0xff]  ;;  %v3161_v33 = vrot.slane %v3093_v14, 1  ;;  %v3162_v37 = vrot.slane %v3094_v8, 1 }
 0x18e   : > { %16319 = vst [vmem:[#allocation21_spill] sm:$0xff] %v10799_v7  ;;  %v10902_v41 = vld [vmem:[#allocation2 + $0x80] sm:$0xff]  ;;  %v3023_v27 = vmul.f32 %v9320_v39, %v9011_v13  ;;  %v3024_v44 = vmul.f32 %v10845_v15, %v9011_v13  ;;  %vm3151_vm5 = vcmask 1046528   ;;  %v3267_v4 = vmul.f32 %v10845_v15, %v9013_v32 }
 0x18f   : > { %16320 = vst [vmem:[#allocation45_spill] sm:$0xff] %v10804_v38  ;;  %v10895_v35 = vadd.f32 %v16337_v43, %v983_v21  ;;  %v16339_v30 = vld [vmem:[#allocation29_spill] sm:$0xff]  ;;  %v3091_v43 = vmul.f32 %v9012_v22, %v10408_v5  ;;  %v3092_v25 = vmul.f32 %v9012_v22, %v10885_v26  ;;  %v3157_v14 = vsel %vm3151_vm5, %v3155_v48, %v3156_v56  ;;  %v2982_v38 = vld [vmem:[#allocation2 + $0x58] sm:$0x3] }
 0x190   : > { %16323 = vst [vmem:[#allocation25_spill] sm:$0xff] %v10813_v17  ;;  %v10909_v21 = vadd.f32 %v16051_v46, %v16339_v30  ;;  %v3025_v8 = vmul.f32 %v9011_v13, %v10408_v5  ;;  %v3027_v39 = vmul.f32 %v9011_v13, %v10477_v61  ;;  %v3095_v55 = vmul.f32 %v9012_v22, %v10898_v50  ;;  %v2979_v7 = vld [vmem:[#allocation2 + $0x40] sm:$0x3] }
 0x191   : > { %16324 = vst [vmem:[#allocation46_spill] sm:$0xff] %v10822_v11  ;;  %v3096_v0 = vmul.f32 %v9012_v22, %v10900_v20  ;;  %v3028_v58 = vmul.f32 %v9011_v13, %v10839_v52  ;;  %v3097_v60 = vmul.f32 %v9322_v45, %v9012_v22  ;;  %v3098_v30 = vmul.f32 %v9012_v22, %v10902_v41 }
 0x192   : > { %16327 = vst [vmem:[#allocation27_spill] sm:$0xff] %v10831_v34  ;;  %v3163_v46 = vsel %vm3151_vm5, %v3161_v33, %v3162_v37  ;;  %v3234_v28 = vadd.f32 %v3157_v14, %v3023_v27  ;;  %v3235_v12 = vadd.f32 %v3156_v56, %v3024_v44  ;;  %v3269_v48 = vmul.f32 %v9013_v32, %v10839_v52 }
 0x193   : > { %16329 = vst [vmem:[#allocation24_spill] sm:$0xff] %v10850_v10  ;;  %v3299_v19 = vrot.slane %v3267_v4, 2  ;;  %v3029_v5 = vmul.f32 %v9011_v13, %v10898_v50  ;;  %v3031_v61 = vmul.f32 %v9322_v45, %v9011_v13  ;;  %v3158_v16 = vrot.slane %v3091_v43, 1 }
 0x194   : > { %16330 = vst [vmem:[#allocation47_spill] sm:$0xff] %v10860_v47  ;;  %v3159_v2 = vrot.slane %v3092_v25, 1  ;;  %v3164_v34 = vrot.slane %v3095_v55, 1  ;;  %v3165_v47 = vrot.slane %v3096_v0, 1  ;;  %v3238_v22 = vadd.f32 %v3163_v46, %v3027_v39 }
 0x195   : > { %16333 = vst [vmem:[#allocation48_spill] sm:$0xff] %v10875_v49  ;;  %v3268_v33 = vmul.f32 %v9013_v32, %v10885_v26  ;;  %v3167_v27 = vrot.slane %v3097_v60, 1  ;;  %v3168_v56 = vrot.slane %v3098_v30, 1  ;;  %v3239_v44 = vadd.f32 %v3162_v37, %v3028_v58 }
 0x196   : > { %16335 = vst [vmem:[#allocation49_spill] sm:$0xff] %v10879_v42  ;;  %v3026_v45 = vmul.f32 %v9011_v13, %v10885_v26  ;;  %v3301_v43 = vrot.slane %v3269_v48, 2  ;;  %v3332_v25 = vadd.f32 %v3299_v19, %v3234_v28  ;;  %v10931_v14 = vadd.f32 %v3299_v19, %v3235_v12 }
 0x197   : > { %16336 = vst [vmem:[#allocation50_spill] sm:$0xff] %v10881_v31  ;;  %v2976_v31 = vld [vmem:[#allocation2 + $0x28] sm:$0x3]  ;;  %v3030_v55 = vmul.f32 %v9011_v13, %v10900_v20  ;;  %v3160_v0 = vsel %vm3151_vm5, %v3158_v16, %v3159_v2  ;;  %v3270_v46 = vmul.f32 %v9013_v32, %v10900_v20  ;;  %v3166_v58 = vsel %vm3151_vm5, %v3164_v34, %v3165_v47 }
 0x198   : > { %16338 = vst [vmem:[#allocation51_spill] sm:$0xff] %v10895_v35  ;;  %v9014_v35 = vld [vmem:[%s16004_s8 + $0x3] ss:$0 sm:$0xff]  ;;  %v3271_v37 = vmul.f32 %v9013_v32, %v10902_v41  ;;  %v3300_v39 = vrot.slane %v3268_v33, 2  ;;  %v10938_v30 = vadd.f32 %v3301_v43, %v3238_v22  ;;  %v3032_v28 = vmul.f32 %v9011_v13, %v10902_v41 }
 0x199   : > { %v10928_v4 = vmul.f32 %v10845_v15, %v9014_v35  ;;  %v3367_v60 = vmul.f32 %v9014_v35, %v2976_v31  ;;  %v3169_v19 = vsel %vm3151_vm5, %v3167_v27, %v3168_v56  ;;  %v10942_v12 = vadd.f32 %v3301_v43, %v3239_v44  ;;  %v2988_v27 = vld [vmem:[#allocation2 + $0x88] sm:$0x3] }
 0x19a   : > { %v3368_v48 = vmul.f32 %v9014_v35, %v10885_v26  ;;  %v3236_v16 = vadd.f32 %v3160_v0, %v3025_v8  ;;  %v3369_v9 = vmul.f32 %v9014_v35, %v2979_v7  ;;  %v3370_v3 = vmul.f32 %v9014_v35, %v10839_v52 }
 0x19b   : > { %v3371_v40 = vmul.f32 %v9014_v35, %v2982_v38  ;;  %v3237_v34 = vadd.f32 %v3159_v2, %v3026_v45  ;;  %v3240_v17 = vadd.f32 %v3166_v58, %v3029_v5  ;;  %v3241_v32 = vadd.f32 %v3165_v47, %v3030_v55 }
 0x19c   : > { %v3302_v33 = vrot.slane %v3270_v46, 2  ;;  %v3242_v22 = vadd.f32 %v3169_v19, %v3031_v61  ;;  %v3243_v53 = vadd.f32 %v3168_v56, %v3032_v28  ;;  %v3303_v29 = vrot.slane %v3271_v37, 2  ;;  %v9015_v61 = vld [vmem:[%s16004_s8 + $0x4] ss:$0 sm:$0xff] }
 0x19d   : > { %v3372_v13 = vmul.f32 %v9014_v35, %v10900_v20  ;;  %v3373_v44 = vmul.f32 %v9014_v35, %v2985_v51  ;;  %v3374_v43 = vmul.f32 %v9014_v35, %v10902_v41  ;;  %v3432_v62 = vrot.slane %v10928_v4, 3 }
 0x19e   : > { %v3433_v8 = vrot.slane %v3367_v60, 3  ;;  %v3435_v0 = vrot.slane %v3368_v48, 3  ;;  %v3436_v57 = vrot.slane %v3369_v9, 3  ;;  %v3438_v42 = vrot.slane %v3370_v3, 3 }
 0x19f   : > { %v3439_v49 = vrot.slane %v3371_v40, 3  ;;  %v3334_v2 = vadd.f32 %v3300_v39, %v3236_v16  ;;  %v3335_v5 = vadd.f32 %v3300_v39, %v3237_v34  ;;  %v3338_v47 = vadd.f32 %v3302_v33, %v3240_v17 }
 0x1a0   : > { %v3339_v45 = vadd.f32 %v3302_v33, %v3241_v32  ;;  %v3340_v56 = vadd.f32 %v3303_v29, %v3242_v22  ;;  %v3341_v55 = vadd.f32 %v3303_v29, %v3243_v53  ;;  %v3375_v46 = vmul.f32 %v9014_v35, %v2988_v27 }
 0x1a1   : > { %vm3428_vm6 = vcmask 1044480   ;;  %v3441_v4 = vrot.slane %v3372_v13, 3  ;;  %v3545_v60 = vmul.f32 %v10845_v15, %v9015_v61  ;;  %v3546_v9 = vmul.f32 %v9015_v61, %v2976_v31 }
 0x1a2   : > { %v3434_v58 = vsel %vm3428_vm6, %v3432_v62, %v3433_v8  ;;  %v3437_v40 = vsel %vm3428_vm6, %v3435_v0, %v3436_v57  ;;  %v3440_v3 = vsel %vm3428_vm6, %v3438_v42, %v3439_v49  ;;  %v3442_v17 = vrot.slane %v3373_v44, 3 }
 0x1a3   : > { %v3444_v37 = vrot.slane %v3374_v43, 3  ;;  %v3547_v39 = vmul.f32 %v9015_v61, %v10885_v26  ;;  %v3548_v28 = vmul.f32 %v9015_v61, %v2979_v7  ;;  %v3549_v19 = vmul.f32 %v9015_v61, %v10839_v52 }
 0x1a4   : > { %v3550_v29 = vmul.f32 %v9015_v61, %v2982_v38  ;;  %v3445_v53 = vrot.slane %v3375_v46, 3  ;;  %v3511_v35 = vadd.f32 %v3432_v62, %v3332_v25  ;;  %v3551_v48 = vmul.f32 %v9015_v61, %v10900_v20 }
 0x1a5   : > { %v3552_v16 = vmul.f32 %v9015_v61, %v2985_v51  ;;  %v3553_v15 = vmul.f32 %v9015_v61, %v10902_v41  ;;  %v3554_v31 = vmul.f32 %v9015_v61, %v2988_v27  ;;  %v3611_v34 = vrot.slane %v3545_v60, 4 }
 0x1a6   : > { %v3612_v57 = vrot.slane %v3546_v9, 4  ;;  %v3443_v49 = vsel %vm3428_vm6, %v3441_v4, %v3442_v17  ;;  %v3512_v32 = vadd.f32 %v3434_v58, %v10931_v14  ;;  %v3513_v33 = vadd.f32 %v3435_v0, %v3334_v2 }
 0x1a7   : > { %v3514_v22 = vadd.f32 %v3437_v40, %v3335_v5  ;;  %v3614_v7 = vrot.slane %v3547_v39, 4  ;;  %v3615_v13 = vrot.slane %v3548_v28, 4  ;;  %v3617_v44 = vrot.slane %v3549_v19, 4 }
 0x1a8   : > { %v3618_v38 = vrot.slane %v3550_v29, 4  ;;  %v3515_v62 = vadd.f32 %v3438_v42, %v10938_v30  ;;  %vm3607_vm9 = vcmask 1043456   ;;  %v3620_v25 = vrot.slane %v3551_v48, 4 }
 0x1a9   : > { %v3621_v51 = vrot.slane %v3552_v16, 4  ;;  %v3516_v43 = vadd.f32 %v3440_v3, %v10942_v12  ;;  %v3613_v27 = vsel %vm3607_vm9, %v3611_v34, %v3612_v57  ;;  %v3623_v8 = vrot.slane %v3553_v15, 4  ;;  %v10985_v16 = vld [vmem:[#allocation2 + $0x98] sm:$0xff]  ;;  %v9324_v15 = vld [vmem:[#allocation2 + $0x48] sm:$0xff] }
 0x1aa   : > { %v3624_v61 = vrot.slane %v3554_v31, 4  ;;  %v16340_v14 = vrot.slane %v10843_v24, 1  ;;  %v3446_v2 = vsel %vm3428_vm6, %v3444_v37, %v3445_v53  ;;  %v3517_v5 = vadd.f32 %v3441_v4, %v3338_v47  ;;  %v9017_v24 = vld [vmem:[%s16004_s8 + $0x6] ss:$0 sm:$0xff]  ;;  %v10982_v53 = vld [vmem:[#allocation2 + $0x78] sm:$0xff] }
 0x1ab   : > { %v3518_v46 = vadd.f32 %v3443_v49, %v3339_v45  ;;  %v3519_v58 = vadd.f32 %v3444_v37, %v3340_v56  ;;  %v3520_v42 = vadd.f32 %v3446_v2, %v3341_v55  ;;  %v3616_v30 = vsel %vm3607_vm9, %v3614_v7, %v3615_v13  ;;  %v9016_v56 = vld [vmem:[%s16004_s8 + $0x5] ss:$0 sm:$0xff]  ;;  %v9323_v37 = vld [vmem:[#allocation2 + $0x30] sm:$0xff] }
 0x1ac   : > { %v10968_v0 = vadd.f32 %v16340_v14, %v10883_v23  ;;  %v3619_v60 = vsel %vm3607_vm9, %v3617_v44, %v3618_v38  ;;  %v3622_v12 = vsel %vm3607_vm9, %v3620_v25, %v3621_v51  ;;  %v3690_v9 = vadd.f32 %v3611_v34, %v3511_v35 }
 0x1ad   : > { %v3691_v40 = vadd.f32 %v3613_v27, %v3512_v32  ;;  %v3692_v3 = vadd.f32 %v3614_v7, %v3513_v33  ;;  %v3625_v23 = vsel %vm3607_vm9, %v3623_v8, %v3624_v61  ;;  %v3693_v17 = vadd.f32 %v3616_v30, %v3514_v22 }
 0x1ae   : > { %16341 = vst [vmem:[#allocation29_spill] sm:$0xff] %v10968_v0  ;;  %v3694_v47 = vadd.f32 %v3617_v44, %v3515_v62  ;;  %v3695_v45 = vadd.f32 %v3619_v60, %v3516_v43  ;;  %v3696_v55 = vadd.f32 %v3620_v25, %v3517_v5  ;;  %v3697_v4 = vadd.f32 %v3622_v12, %v3518_v46  ;;  %v9325_v43 = vld [vmem:[#allocation2 + $0x90] sm:$0xff] }
 0x1af   : > { %v3838_v39 = vmul.f32 %v9323_v37, %v9017_v24  ;;  %v3839_v28 = vmul.f32 %v9017_v24, %v10885_v26  ;;  %v3698_v19 = vadd.f32 %v3623_v8, %v3519_v58  ;;  %v3699_v29 = vadd.f32 %v3625_v23, %v3520_v42 }
 0x1b0   : > { %v3772_v35 = vmul.f32 %v9323_v37, %v9016_v56  ;;  %v3773_v48 = vmul.f32 %v9016_v56, %v10885_v26  ;;  %v3774_v31 = vmul.f32 %v9324_v15, %v9016_v56  ;;  %v3775_v34 = vmul.f32 %v9016_v56, %v10839_v52 }
 0x1b1   : > { %v3776_v57 = vmul.f32 %v9016_v56, %v10898_v50  ;;  %v3777_v49 = vmul.f32 %v9016_v56, %v10900_v20  ;;  %v3840_v32 = vmul.f32 %v9324_v15, %v9017_v24  ;;  %v3841_v33 = vmul.f32 %v9017_v24, %v10839_v52 }
 0x1b2   : > { %v3842_v22 = vmul.f32 %v9017_v24, %v10898_v50  ;;  %v3843_v7 = vmul.f32 %v9017_v24, %v10900_v20  ;;  %v3844_v13 = vmul.f32 %v9017_v24, %v10982_v53  ;;  %v3845_v44 = vmul.f32 %v9017_v24, %v10902_v41 }
 0x1b3   : > { %v3903_v38 = vrot.slane %v3838_v39, 1  ;;  %v3904_v62 = vrot.slane %v3839_v28, 1  ;;  %v3778_v25 = vmul.f32 %v9016_v56, %v10982_v53  ;;  %v3779_v51 = vmul.f32 %v9016_v56, %v10902_v41 }
 0x1b4   : > { %v3846_v27 = vmul.f32 %v9325_v43, %v9017_v24  ;;  %v3847_v8 = vmul.f32 %v9017_v24, %v10985_v16  ;;  %v3780_v61 = vmul.f32 %v9325_v43, %v9016_v56  ;;  %v3781_v14 = vmul.f32 %v9016_v56, %v10985_v16 }
 0x1b5   : > { %v3804_v2 = vadd.f32 %v3772_v35, %v3690_v9  ;;  %v3805_v5 = vadd.f32 %v3773_v48, %v3691_v40  ;;  %v3906_v46 = vrot.slane %v3840_v32, 1  ;;  %v3907_v58 = vrot.slane %v3841_v33, 1  ;;  %v9018_v9 = vld [vmem:[%s16004_s8 + $0x7] ss:$0 sm:$0xff]  ;;  %v9019_v33 = vld [vmem:[%s16004_s8 + $0x8] ss:$0 sm:$0xff] }
 0x1b6   : > { %v3909_v42 = vrot.slane %v3842_v22, 1  ;;  %v3910_v30 = vrot.slane %v3843_v7, 1  ;;  %v3806_v60 = vadd.f32 %v3774_v31, %v3692_v3  ;;  %v3905_v12 = vsel %vm3151_vm5, %v3903_v38, %v3904_v62  ;;  %v3728_v22 = vld [vmem:[#allocation2 + $0x58] sm:$0x3] }
 0x1b7   : > { %v3912_v23 = vrot.slane %v3844_v13, 1  ;;  %v3913_v37 = vrot.slane %v3845_v44, 1  ;;  %v3807_v39 = vadd.f32 %v3775_v34, %v3693_v17  ;;  %v3808_v28 = vadd.f32 %v3776_v57, %v3694_v47 }
 0x1b8   : > { %v3915_v15 = vrot.slane %v3846_v27, 1  ;;  %v3916_v0 = vrot.slane %v3847_v8, 1  ;;  %v3809_v11 = vadd.f32 %v3777_v49, %v3695_v45  ;;  %v3810_v24 = vadd.f32 %v3778_v25, %v3696_v55  ;;  %v3725_v55 = vld [vmem:[#allocation2 + $0x40] sm:$0x3]  ;;  %v3734_v25 = vld [vmem:[#allocation2 + $0x88] sm:$0x3] }
 0x1b9   : > { %v3811_v43 = vadd.f32 %v3779_v51, %v3697_v4  ;;  %v3812_v6 = vadd.f32 %v3780_v61, %v3698_v19  ;;  %v3813_v40 = vadd.f32 %v3781_v14, %v3699_v29  ;;  %v3908_v56 = vsel %vm3151_vm5, %v3906_v46, %v3907_v58  ;;  %v3737_v14 = vld [vmem:[#allocation2 + $0xa0] sm:$0x3] }
 0x1ba   : > { %v3911_v3 = vsel %vm3151_vm5, %v3909_v42, %v3910_v30  ;;  %v3982_v35 = vadd.f32 %v3905_v12, %v3804_v2  ;;  %v3914_v48 = vsel %vm3151_vm5, %v3912_v23, %v3913_v37  ;;  %v3983_v17 = vadd.f32 %v3904_v62, %v3805_v5  ;;  %v3731_v62 = vld [vmem:[#allocation2 + $0x70] sm:$0x3] }
 0x1bb   : > { %v4015_v47 = vmul.f32 %v9018_v9, %v10885_v26  ;;  %v4016_v45 = vmul.f32 %v9018_v9, %v10839_v52  ;;  %v3917_v4 = vsel %vm3151_vm5, %v3915_v15, %v3916_v0  ;;  %v4017_v19 = vmul.f32 %v9018_v9, %v10900_v20 }
 0x1bc   : > { %v4018_v31 = vmul.f32 %v9018_v9, %v10902_v41  ;;  %v4019_v29 = vmul.f32 %v9018_v9, %v10985_v16  ;;  %v3984_v34 = vadd.f32 %v3908_v56, %v3806_v60  ;;  %v3985_v57 = vadd.f32 %v3907_v58, %v3807_v39 }
 0x1bd   : > { %v3986_v49 = vadd.f32 %v3911_v3, %v3808_v28  ;;  %v3987_v32 = vadd.f32 %v3910_v30, %v3809_v11  ;;  %v3988_v7 = vadd.f32 %v3914_v48, %v3810_v24  ;;  %v3989_v13 = vadd.f32 %v3913_v37, %v3811_v43 }
 0x1be   : > { %v3990_v44 = vadd.f32 %v3917_v4, %v3812_v6  ;;  %v3991_v38 = vadd.f32 %v3916_v0, %v3813_v40  ;;  %v4047_v51 = vrot.slane %v4015_v47, 2  ;;  %v4048_v27 = vrot.slane %v4016_v45, 2 }
 0x1bf   : > { %v4114_v8 = vmul.f32 %v9019_v33, %v10885_v26  ;;  %v4115_v61 = vmul.f32 %v9019_v33, %v3725_v55  ;;  %v4049_v2 = vrot.slane %v4017_v19, 2  ;;  %v4050_v5 = vrot.slane %v4018_v31, 2  ;;  %v9020_v19 = vld [vmem:[%s16004_s8 + $0x9] ss:$0 sm:$0xff] }
 0x1c0   : > { %v4051_v11 = vrot.slane %v4019_v29, 2  ;;  %v4116_v46 = vmul.f32 %v9019_v33, %v10839_v52  ;;  %v4080_v58 = vadd.f32 %v4047_v51, %v3982_v35  ;;  %v4081_v42 = vadd.f32 %v4047_v51, %v3983_v17 }
 0x1c1   : > { %v4082_v30 = vadd.f32 %v4048_v27, %v3984_v34  ;;  %v4117_v60 = vmul.f32 %v9019_v33, %v3728_v22  ;;  %v4118_v6 = vmul.f32 %v9019_v33, %v10900_v20  ;;  %v4119_v0 = vmul.f32 %v9019_v33, %v3731_v62 }
 0x1c2   : > { %v4120_v12 = vmul.f32 %v9019_v33, %v10902_v41  ;;  %v4121_v23 = vmul.f32 %v9019_v33, %v3734_v25  ;;  %v4122_v37 = vmul.f32 %v9019_v33, %v10985_v16  ;;  %v4123_v39 = vmul.f32 %v9019_v33, %v3737_v14 }
 0x1c3   : > { %v4179_v28 = vrot.slane %v4114_v8, 3  ;;  %v4180_v15 = vrot.slane %v4115_v61, 3  ;;  %v4083_v24 = vadd.f32 %v4048_v27, %v3985_v57  ;;  %v4084_v43 = vadd.f32 %v4049_v2, %v3986_v49 }
 0x1c4   : > { %v4085_v9 = vadd.f32 %v4049_v2, %v3987_v32  ;;  %v4086_v40 = vadd.f32 %v4050_v5, %v3988_v7  ;;  %v4087_v56 = vadd.f32 %v4050_v5, %v3989_v13  ;;  %v4088_v3 = vadd.f32 %v4051_v11, %v3990_v44 }
 0x1c5   : > { %v4089_v35 = vadd.f32 %v4051_v11, %v3991_v38  ;;  %v4182_v48 = vrot.slane %v4116_v46, 3  ;;  %v4183_v17 = vrot.slane %v4117_v60, 3  ;;  %v4185_v47 = vrot.slane %v4118_v6, 3 }
 0x1c6   : > { %v4186_v45 = vrot.slane %v4119_v0, 3  ;;  %v4188_v4 = vrot.slane %v4120_v12, 3  ;;  %v4181_v31 = vsel %vm3428_vm6, %v4179_v28, %v4180_v15  ;;  %v4189_v29 = vrot.slane %v4121_v23, 3 }
 0x1c7   : > { %v4191_v34 = vrot.slane %v4122_v37, 3  ;;  %v4192_v57 = vrot.slane %v4123_v39, 3  ;;  %v4292_v49 = vmul.f32 %v9020_v19, %v10885_v26  ;;  %v4293_v32 = vmul.f32 %v9020_v19, %v3725_v55 }
 0x1c8   : > { %v4294_v33 = vmul.f32 %v9020_v19, %v10839_v52  ;;  %v4295_v7 = vmul.f32 %v9020_v19, %v3728_v22  ;;  %v4296_v13 = vmul.f32 %v9020_v19, %v10900_v20  ;;  %v4297_v44 = vmul.f32 %v9020_v19, %v3731_v62 }
 0x1c9   : > { %v4298_v38 = vmul.f32 %v9020_v19, %v10902_v41  ;;  %v4299_v51 = vmul.f32 %v9020_v19, %v3734_v25  ;;  %v4184_v27 = vsel %vm3428_vm6, %v4182_v48, %v4183_v17  ;;  %v4187_v8 = vsel %vm3428_vm6, %v4185_v47, %v4186_v45 }
 0x1ca   : > { %v4300_v61 = vmul.f32 %v9020_v19, %v10985_v16  ;;  %v4301_v2 = vmul.f32 %v9020_v19, %v3737_v14  ;;  %v4190_v5 = vsel %vm3428_vm6, %v4188_v4, %v4189_v29  ;;  %v4193_v26 = vsel %vm3428_vm6, %v4191_v34, %v4192_v57 }
 0x1cb   : > { %v4258_v55 = vadd.f32 %v4179_v28, %v4080_v58  ;;  %v4259_v11 = vadd.f32 %v4181_v31, %v4081_v42  ;;  %v4357_v22 = vrot.slane %v4292_v49, 4  ;;  %v4358_v46 = vrot.slane %v4293_v32, 4  ;;  %v9022_v49 = vld [vmem:[%s16004_s8 + $0xb] ss:$0 sm:$0xff] }
 0x1cc   : > { %v4360_v60 = vrot.slane %v4294_v33, 4  ;;  %v4361_v62 = vrot.slane %v4295_v7, 4  ;;  %v4363_v6 = vrot.slane %v4296_v13, 4  ;;  %v4364_v0 = vrot.slane %v4297_v44, 4  ;;  %v11052_v44 = vld [vmem:[#allocation2 + $0x90] sm:$0xff] }
 0x1cd   : > { %v4366_v25 = vrot.slane %v4298_v38, 4  ;;  %v4367_v12 = vrot.slane %v4299_v51, 4  ;;  %v4260_v23 = vadd.f32 %v4182_v48, %v4082_v30  ;;  %v4261_v37 = vadd.f32 %v4184_v27, %v4083_v24  ;;  %v11054_v38 = vld [vmem:[#allocation2 + $0xb0] sm:$0xff] }
 0x1ce   : > { %v4369_v39 = vrot.slane %v4300_v61, 4  ;;  %v4370_v15 = vrot.slane %v4301_v2, 4  ;;  %v4262_v17 = vadd.f32 %v4185_v47, %v4084_v43  ;;  %v4263_v14 = vadd.f32 %v4187_v8, %v4085_v9  ;;  %v4469_v47 = vld [vmem:[#allocation2 + $0x48] sm:$0xff] }
 0x1cf   : > { %v4264_v45 = vadd.f32 %v4188_v4, %v4086_v40  ;;  %v4265_v19 = vadd.f32 %v4190_v5, %v4087_v56  ;;  %v16342_v58 = vrot.slane %v10850_v10, 2  ;;  %v4266_v28 = vadd.f32 %v4191_v34, %v4088_v3  ;;  %v11059_v2 = vld [vmem:[#allocation2 + $0xa8] sm:$0xff] }
 0x1d0   : > { %v4267_v31 = vadd.f32 %v4193_v26, %v4089_v35  ;;  %v4359_v29 = vsel %vm3607_vm9, %v4357_v22, %v4358_v46  ;;  %v4362_v57 = vsel %vm3607_vm9, %v4360_v60, %v4361_v62  ;;  %v4365_v30 = vsel %vm3607_vm9, %v4363_v6, %v4364_v0 }
 0x1d1   : > { %v11036_v42 = vadd.f32 %v16342_v58, %v10909_v21  ;;  %v4368_v24 = vsel %vm3607_vm9, %v4366_v25, %v4367_v12  ;;  %v4436_v48 = vadd.f32 %v4357_v22, %v4258_v55  ;;  %v4371_v43 = vsel %vm3607_vm9, %v4369_v39, %v4370_v15  ;;  %v9021_v21 = vld [vmem:[%s16004_s8 + $0xa] ss:$0 sm:$0xff] }
 0x1d2   : > { %v4437_v9 = vadd.f32 %v4359_v29, %v4259_v11  ;;  %v4438_v40 = vadd.f32 %v4360_v60, %v4260_v23  ;;  %v4439_v56 = vadd.f32 %v4362_v57, %v4261_v37  ;;  %v4440_v3 = vadd.f32 %v4363_v6, %v4262_v17 }
 0x1d3   : > { %16343 = vst [vmem:[#allocation52_spill] sm:$0xff] %v11036_v42  ;;  %v4441_v35 = vadd.f32 %v4365_v30, %v4263_v14  ;;  %v4442_v4 = vadd.f32 %v4366_v25, %v4264_v45  ;;  %v4443_v34 = vadd.f32 %v4368_v24, %v4265_v19  ;;  %v4444_v32 = vadd.f32 %v4369_v39, %v4266_v28 }
 0x1d4   : > { %v11049_v33 = vadd.f32 %v4371_v43, %v4267_v31  ;;  %v4518_v7 = vmul.f32 %v9021_v21, %v4469_v47  ;;  %v4519_v13 = vmul.f32 %v9021_v21, %v10839_v52  ;;  %v4520_v51 = vmul.f32 %v9021_v21, %v10898_v50 }
 0x1d5   : > { %v4521_v27 = vmul.f32 %v9021_v21, %v10900_v20  ;;  %v4584_v8 = vmul.f32 %v9022_v49, %v4469_v47  ;;  %v4585_v61 = vmul.f32 %v9022_v49, %v10839_v52  ;;  %v4586_v5 = vmul.f32 %v9022_v49, %v10898_v50 }
 0x1d6   : > { %v4587_v26 = vmul.f32 %v9022_v49, %v10900_v20  ;;  %v4588_v55 = vmul.f32 %v9022_v49, %v10982_v53  ;;  %v4589_v11 = vmul.f32 %v9022_v49, %v10902_v41  ;;  %v4522_v22 = vmul.f32 %v9021_v21, %v10982_v53 }
 0x1d7   : > { %v4523_v46 = vmul.f32 %v9021_v21, %v10902_v41  ;;  %v4524_v60 = vmul.f32 %v9021_v21, %v11052_v44  ;;  %v4525_v62 = vmul.f32 %v9021_v21, %v10985_v16  ;;  %v4526_v6 = vmul.f32 %v9021_v21, %v11059_v2 }
 0x1d8   : > { %v11071_v0 = vmul.f32 %v9021_v21, %v11054_v38  ;;  %v4590_v25 = vmul.f32 %v9022_v49, %v11052_v44  ;;  %v4591_v12 = vmul.f32 %v9022_v49, %v10985_v16  ;;  %v4550_v23 = vadd.f32 %v4518_v7, %v4436_v48  ;;  %v9023_v48 = vld [vmem:[%s16004_s8 + $0xc] ss:$0 sm:$0xff] }
 0x1d9   : > { %v11076_v37 = vmul.f32 %v9022_v49, %v11059_v2  ;;  %v4649_v39 = vrot.slane %v4584_v8, 1  ;;  %v4650_v15 = vrot.slane %v4585_v61, 1  ;;  %v4652_v17 = vrot.slane %v4586_v5, 1 }
 0x1da   : > { %v4653_v14 = vrot.slane %v4587_v26, 1  ;;  %v4655_v45 = vrot.slane %v4588_v55, 1  ;;  %v4656_v19 = vrot.slane %v4589_v11, 1  ;;  %v4551_v58 = vadd.f32 %v4519_v13, %v4437_v9  ;;  %v9024_v26 = vld [vmem:[%s16004_s8 + $0xd] ss:$0 sm:$0xff] }
 0x1db   : > { %v4552_v28 = vadd.f32 %v4520_v51, %v4438_v40  ;;  %v4553_v31 = vadd.f32 %v4521_v27, %v4439_v56  ;;  %v11079_v29 = vmul.f32 %v9022_v49, %v11054_v38  ;;  %v4554_v57 = vadd.f32 %v4522_v22, %v4440_v3  ;;  %v4477_v55 = vld [vmem:[#allocation2 + $0x88] sm:$0x3] }
 0x1dc   : > { %v4555_v30 = vadd.f32 %v4523_v46, %v4441_v35  ;;  %v4658_v24 = vrot.slane %v4590_v25, 1  ;;  %v4659_v43 = vrot.slane %v4591_v12, 1  ;;  %v4556_v47 = vadd.f32 %v4524_v60, %v4442_v4  ;;  %v4471_v35 = vld [vmem:[#allocation2 + $0x58] sm:$0x3] }
 0x1dd   : > { %16344 = vst [vmem:[#allocation53_spill] sm:$0xff] %v11079_v29  ;;  %v4557_v21 = vadd.f32 %v4525_v62, %v4443_v34  ;;  %v11084_v7 = vadd.f32 %v4526_v6, %v4444_v32  ;;  %v4651_v8 = vsel %vm3151_vm5, %v4649_v39, %v4650_v15  ;;  %v4654_v9 = vsel %vm3151_vm5, %v4652_v17, %v4653_v14  ;;  %v4474_v34 = vld [vmem:[#allocation2 + $0x70] sm:$0x3] }
 0x1de   : > { %v4657_v40 = vsel %vm3151_vm5, %v4655_v45, %v4656_v19  ;;  %v4761_v3 = vmul.f32 %v9023_v48, %v10839_v52  ;;  %v16069_v49 = vrot.slane %v11079_v29, 1  ;;  %v4728_v13 = vadd.f32 %v4651_v8, %v4550_v23  ;;  %v4480_v45 = vld [vmem:[#allocation2 + $0xa0] sm:$0x3]  ;;  %v9025_v8 = vld [vmem:[%s16004_s8 + $0xe] ss:$0 sm:$0xff] }
 0x1df   : > { %v4762_v51 = vmul.f32 %v9023_v48, %v10900_v20  ;;  %v4763_v4 = vmul.f32 %v9023_v48, %v10902_v41  ;;  %v4660_v32 = vsel %vm3151_vm5, %v4658_v24, %v4659_v43  ;;  %v4729_v27 = vadd.f32 %v4650_v15, %v4551_v58 }
 0x1e0   : > { %v4730_v61 = vadd.f32 %v4654_v9, %v4552_v28  ;;  %v4764_v5 = vmul.f32 %v9023_v48, %v10985_v16  ;;  %v4731_v11 = vadd.f32 %v4653_v14, %v4553_v31  ;;  %v4732_v22 = vadd.f32 %v4657_v40, %v4554_v57 }
 0x1e1   : > { %v4733_v46 = vadd.f32 %v4656_v19, %v4555_v30  ;;  %v4734_v60 = vadd.f32 %v4660_v32, %v4556_v47  ;;  %v4735_v62 = vadd.f32 %v4659_v43, %v4557_v21  ;;  %v4793_v6 = vrot.slane %v4761_v3, 2 }
 0x1e2   : > { %v4860_v25 = vmul.f32 %v9024_v26, %v10839_v52  ;;  %v4861_v12 = vmul.f32 %v9024_v26, %v4471_v35  ;;  %v4794_v23 = vrot.slane %v4762_v51, 2  ;;  %v4795_v39 = vrot.slane %v4763_v4, 2 }
 0x1e3   : > { %v4862_v15 = vmul.f32 %v9024_v26, %v10900_v20  ;;  %v4863_v17 = vmul.f32 %v9024_v26, %v4474_v34  ;;  %v4796_v58 = vrot.slane %v4764_v5, 2  ;;  %v4826_v28 = vadd.f32 %v4793_v6, %v4728_v13 }
 0x1e4   : > { %v4864_v24 = vmul.f32 %v9024_v26, %v10902_v41  ;;  %v4865_v48 = vmul.f32 %v9024_v26, %v4477_v55  ;;  %v4827_v14 = vadd.f32 %v4793_v6, %v4729_v27  ;;  %v4828_v31 = vadd.f32 %v4794_v23, %v4730_v61 }
 0x1e5   : > { %v4829_v19 = vadd.f32 %v4794_v23, %v4731_v11  ;;  %v4830_v57 = vadd.f32 %v4795_v39, %v4732_v22  ;;  %v4831_v30 = vadd.f32 %v4795_v39, %v4733_v46  ;;  %v4832_v43 = vadd.f32 %v4796_v58, %v4734_v60 }
 0x1e6   : > { %v4925_v47 = vrot.slane %v4860_v25, 3  ;;  %v4926_v21 = vrot.slane %v4861_v12, 3  ;;  %v4866_v9 = vmul.f32 %v9024_v26, %v10985_v16  ;;  %v4867_v40 = vmul.f32 %v9024_v26, %v4480_v45 }
 0x1e7   : > { %v4928_v3 = vrot.slane %v4862_v15, 3  ;;  %v4929_v13 = vrot.slane %v4863_v17, 3  ;;  %v4931_v51 = vrot.slane %v4864_v24, 3  ;;  %v4932_v4 = vrot.slane %v4865_v48, 3 }
 0x1e8   : > { %v5038_v32 = vmul.f32 %v9025_v8, %v10839_v52  ;;  %v5039_v27 = vmul.f32 %v9025_v8, %v4471_v35  ;;  %v5040_v61 = vmul.f32 %v9025_v8, %v10900_v20  ;;  %v5041_v5 = vmul.f32 %v9025_v8, %v4474_v34 }
 0x1e9   : > { %v5042_v11 = vmul.f32 %v9025_v8, %v10902_v41  ;;  %v5043_v22 = vmul.f32 %v9025_v8, %v4477_v55  ;;  %v4833_v46 = vadd.f32 %v4796_v58, %v4735_v62  ;;  %v4927_v60 = vsel %vm3428_vm6, %v4925_v47, %v4926_v21 }
 0x1ea   : > { %v5044_v6 = vmul.f32 %v9025_v8, %v10985_v16  ;;  %v5045_v25 = vmul.f32 %v9025_v8, %v4480_v45  ;;  %v4930_v26 = vsel %vm3428_vm6, %v4928_v3, %v4929_v13  ;;  %v4934_v12 = vrot.slane %v4866_v9, 3 }
 0x1eb   : > { %v4935_v23 = vrot.slane %v4867_v40, 3  ;;  %v5004_v39 = vadd.f32 %v4925_v47, %v4826_v28  ;;  %v4933_v52 = vsel %vm3428_vm6, %v4931_v51, %v4932_v4  ;;  %v5005_v35 = vadd.f32 %v4927_v60, %v4827_v14 }
 0x1ec   : > { %v5103_v15 = vrot.slane %v5038_v32, 4  ;;  %v5104_v17 = vrot.slane %v5039_v27, 4  ;;  %v5106_v34 = vrot.slane %v5040_v61, 4  ;;  %v5107_v24 = vrot.slane %v5041_v5, 4 }
 0x1ed   : > { %v5109_v48 = vrot.slane %v5042_v11, 4  ;;  %v5110_v55 = vrot.slane %v5043_v22, 4  ;;  %v5006_v62 = vadd.f32 %v4928_v3, %v4828_v31  ;;  %v5007_v58 = vadd.f32 %v4930_v26, %v4829_v19  ;;  %v1184_v22 = vld [vmem:[#allocation2 + $0xd0] sm:$0x3] }
 0x1ee   : > { %v5112_v21 = vrot.slane %v5044_v6, 4  ;;  %v5113_v56 = vrot.slane %v5045_v25, 4  ;;  %v16345_v45 = vrot.slane %v11076_v37, 1  ;;  %v4936_v28 = vsel %vm3428_vm6, %v4934_v12, %v4935_v23  ;;  %v9327_v25 = vld [vmem:[%s16003_s7 + $0x2] ss:$0 sm:$0xff] }
 0x1ef   : > { %v5008_v47 = vadd.f32 %v4931_v51, %v4830_v57  ;;  %v5009_v14 = vadd.f32 %v4933_v52, %v4831_v30  ;;  %v11121_v9 = vadd.f32 %v11071_v0, %v11049_v33  ;;  %v5010_v31 = vadd.f32 %v4934_v12, %v4832_v43  ;;  %v9026_v57 = vld [vmem:[%s16004_s8 + $0xf] ss:$0 sm:$0xff]  ;;  %v613_v30 = vpop.f32.mrf.mxu1  ;;  %v796_v51 = vld [vmem:[#allocation2 + $0xd0] sm:$0x3] }
 0x1f0   : > { %v4663_v8 = vsel %vm3151_vm5, %v16345_v45, %v16069_v49  ;;  %v5011_v19 = vadd.f32 %v4936_v28, %v4833_v46  ;;  %v5105_v3 = vsel %vm3607_vm9, %v5103_v15, %v5104_v17  ;;  %v5108_v13 = vsel %vm3607_vm9, %v5106_v34, %v5107_v24  ;;  %v9027_v43 = vld [vmem:[%s16004_s8 + $0x10] ss:$0 sm:$0xff]  ;;  %v9328_v17 = vld [vmem:[%s16003_s7 + $0x5] ss:$0 sm:$0xff] }
 0x1f1   : > { %16346 = vst [vmem:[#allocation54_spill] sm:$0xff] %v11121_v9  ;;  %v11124_v40 = vadd.f32 %v4663_v8, %v11084_v7  ;;  %v5111_v37 = vsel %vm3607_vm9, %v5109_v48, %v5110_v55  ;;  %v5182_v4 = vadd.f32 %v5103_v15, %v5004_v39  ;;  %v5114_v33 = vsel %vm3607_vm9, %v5112_v21, %v5113_v56  ;;  %v11142_v56 = vld [vmem:[#allocation6] ss:$0 sm:$0xff] }
 0x1f2   : > { %v5183_v0 = vadd.f32 %v5105_v3, %v5005_v35  ;;  %v5184_v7 = vadd.f32 %v5106_v34, %v5006_v62  ;;  %v5185_v32 = vadd.f32 %v5108_v13, %v5007_v58  ;;  %v5186_v27 = vadd.f32 %v5109_v48, %v5008_v47  ;;  %v11171_v58 = vld [vmem:[%s16004_s8 + $0x11] ss:$0 sm:$0xff]  ;;  %v1187_v47 = vld [vmem:[#allocation2 + $0xe8] sm:$0x3] }
 0x1f3   : > { %16347 = vst [vmem:[#allocation55_spill] sm:$0xff] %v11124_v40  ;;  %v5187_v61 = vadd.f32 %v5111_v37, %v5009_v14  ;;  %v5264_v5 = vmul.f32 %v9026_v57, %v10898_v50  ;;  %v5266_v11 = vmul.f32 %v9026_v57, %v10982_v53  ;;  %v5330_v46 = vmul.f32 %v9027_v43, %v10898_v50 }
 0x1f4   : > { %v11140_v60 = vmul.f32 %v9027_v43, %v10900_v20  ;;  %v614_v6 = vadd.f32 %v11142_v56, %v613_v30  ;;  %v1002_v26 = vmul.f32 %v9327_v25, %v796_v51  ;;  %v11148_v12 = vadd.f32 %v5112_v21, %v5010_v31  ;;  %v11173_v21 = vld [vmem:[#allocation2 + $0xd8] sm:$0xff]  ;;  %v9329_v51 = vld [vmem:[%s16003_s7 + $0x3] ss:$0 sm:$0xff] }
 0x1f5   : > { %v11150_v23 = vadd.f32 %v5114_v33, %v5011_v19  ;;  %v5265_v39 = vmul.f32 %v9026_v57, %v10900_v20  ;;  %v5267_v50 = vmul.f32 %v9026_v57, %v10902_v41  ;;  %v5268_v52 = vmul.f32 %v9026_v57, %v11052_v44  ;;  %16348 = vst [vmem:[#allocation56_spill] sm:$0xff] %v11173_v21 }
 0x1f6   : > { %v5269_v35 = vmul.f32 %v9026_v57, %v10985_v16  ;;  %763 = vst.msk [vmem:[#allocation2 + $0xe0] sm:$0xff] %vm562_vm0, %v614_v6  ;;  %v1074_v15 = vrot.slane %v1002_v26, 2  ;;  %v1391_v34 = vmul.f32 %v9328_v17, %v1184_v22  ;;  %v11161_v24 = vmul.f32 %v9026_v57, %v11059_v2 }
 0x1f7   : > { %v11164_v48 = vmul.f32 %v9026_v57, %v11054_v38  ;;  %v5296_v55 = vadd.f32 %v5264_v5, %v5182_v4  ;;  %v11166_v62 = vadd.f32 %v5265_v39, %v5183_v0  ;;  %v11175_v45 = vadd.f32 %v5266_v11, %v5184_v7  ;;  %v1577_v39 = vld [vmem:[#allocation2 + $0xf8] sm:$0xff] }
 0x1f8   : > { %v5395_v8 = vrot.slane %v5330_v46, 1  ;;  %v16070_v28 = vrot.slane %v11140_v60, 1  ;;  %v1461_v14 = vrot.slane %v1391_v34, 2  ;;  %v11178_v31 = vadd.f32 %v5267_v50, %v5185_v32 }
 0x1f9   : > { %v11181_v19 = vmul.f32 %v9027_v43, %v10982_v53  ;;  %v11185_v3 = vmul.f32 %v11171_v58, %v10900_v20  ;;  %v16349_v13 = vrot.slane %v10808_v36, 2  ;;  %v11190_v4 = vadd.f32 %v5268_v52, %v5186_v27 }
 0x1fa   : > { %v11192_v57 = vadd.f32 %v5269_v35, %v5187_v61  ;;  %v11195_v30 = vmul.f32 %v9027_v43, %v10902_v41  ;;  %v1228_v33 = vmul.f32 %v9329_v51, %v11173_v21  ;;  %v11202_v0 = vmul.f32 %v9027_v43, %v11052_v44  ;;  %v11213_v41 = vld [vmem:[%s16004_s8 + $0x12] ss:$0 sm:$0xff]  ;;  %v9331_v35 = vld [vmem:[%s16003_s7 + $0x6] ss:$0 sm:$0xff] }
 0x1fb   : > { %v1075_v37 = vsel %vm1051_vm2, %v16349_v13, %v1074_v15  ;;  %v11205_v36 = vmul.f32 %v9027_v43, %v10985_v16  ;;  %v11208_v7 = vmul.f32 %v9027_v43, %v11059_v2  ;;  %v1393_v32 = vmul.f32 %v9328_v17, %v1187_v47 }
 0x1fc   : > { %v11216_v27 = vmul.f32 %v9027_v43, %v11054_v38  ;;  %v5397_v61 = vsel %vm3151_vm5, %v5395_v8, %v16070_v28  ;;  %v1147_v5 = vadd.f32 %v1075_v37, %v10862_v54  ;;  %v16350_v11 = vrot.slane %v10817_v59, 2  ;;  %v9330_v59 = vld [vmem:[%s16003_s7 + $0x4] ss:$0 sm:$0xff]  ;;  %v1576_v8 = vld [vmem:[#allocation2 + $0xf0] sm:$0xff]  ;;  %v9332_v37 = vld [vmem:[%s16003_s7 + $0x7] ss:$0 sm:$0xff] }
 0x1fd   : > { %v5474_v6 = vadd.f32 %v5397_v61, %v5296_v55  ;;  %v16071_v25 = vrot.slane %v11185_v3, 2  ;;  %v11229_v26 = vmul.f32 %v11213_v41, %v10900_v20  ;;  %v1186_v43 = vld [vmem:[#allocation2 + $0xe0] sm:$0xff]  ;;  %v1260_v52 = vadd.f32 %v1228_v33, %v10866_v18 }
 0x1fe   : > { %v1462_v22 = vsel %vm1051_vm2, %v16350_v11, %v1461_v14  ;;  %v1229_v50 = vmul.f32 %v9329_v51, %v1186_v43  ;;  %v1287_v54 = vmul.f32 %v9330_v59, %v1186_v43  ;;  %v1617_v15 = vmul.f32 %v9331_v35, %v11173_v21  ;;  %v1578_v59 = vld [vmem:[#allocation2 + $0x100] sm:$0x3] }
 0x1ff   : > { %v1392_v34 = vmul.f32 %v9328_v17, %v1186_v43  ;;  %v1464_v55 = vrot.slane %v1393_v32, 2  ;;  %v1535_v20 = vadd.f32 %v1462_v22, %v10868_v63  ;;  %v1618_v47 = vmul.f32 %v9331_v35, %v1186_v43  ;;  %v1575_v22 = vld [vmem:[#allocation2 + $0xe8] sm:$0x3] }
 0x200   : > { %v1261_v18 = vadd.f32 %v1229_v50, %v1147_v5  ;;  %v1319_v13 = vrot.slane %v1287_v54, 1  ;;  %v1678_v51 = vmul.f32 %v9332_v37, %v1577_v39  ;;  %v5401_v33 = vrot.slane %v11202_v0, 1  ;;  %v11253_v0 = vld [vmem:[%s16004_s8 + $0x13] ss:$0 sm:$0xff] }
 0x201   : > { %v5572_v61 = vadd.f32 %v16071_v25, %v5474_v6  ;;  %v16075_v17 = vrot.slane %v11229_v26, 3  ;;  %v1463_v32 = vrot.slane %v1392_v34, 2  ;;  %v1619_v49 = vmul.f32 %v9331_v35, %v1576_v8 }
 0x202   : > { %v1358_v63 = vadd.f32 %v1319_v13, %v1260_v52  ;;  %v1359_v11 = vadd.f32 %v1319_v13, %v1261_v18  ;;  %v1620_v5 = vmul.f32 %v9331_v35, %v1577_v39  ;;  %v1649_v54 = vadd.f32 %v1617_v15, %v10872_v1  ;;  %v9333_v52 = vld [vmem:[%s16003_s7 + $0x8] ss:$0 sm:$0xff] }
 0x203   : > { %v1465_v50 = vsel %vm1051_vm2, %v1463_v32, %v1464_v55  ;;  %v1650_v28 = vadd.f32 %v1618_v47, %v1535_v20  ;;  %v1677_v46 = vmul.f32 %v9332_v37, %v1186_v43  ;;  %v1710_v34 = vrot.slane %v1678_v51, 1  ;;  %v9334_v1 = vld [vmem:[#allocation2 + $0x68] sm:$0xff] }
 0x204   : > { %v1536_v6 = vadd.f32 %v1463_v32, %v1358_v63  ;;  %v1537_v25 = vadd.f32 %v1465_v50, %v1359_v11  ;;  %v1781_v8 = vmul.f32 %v9333_v52, %v1186_v43  ;;  %v1782_v18 = vmul.f32 %v9333_v52, %v1575_v22  ;;  %v11263_v50 = vld [vmem:[#allocation2 + $0x80] sm:$0xff] }
 0x205   : > { %v1709_v35 = vrot.slane %v1677_v46, 1  ;;  %v1783_v55 = vmul.f32 %v9333_v52, %v1577_v39  ;;  %v1784_v13 = vmul.f32 %v9333_v52, %v1578_v59  ;;  %v11259_v15 = vmul.f32 %v9334_v1, %v11253_v0 }
 0x206   : > { %v1651_v20 = vadd.f32 %v1619_v49, %v1536_v6  ;;  %v1652_v47 = vadd.f32 %v1620_v5, %v1537_v25  ;;  %v1851_v37 = vrot.slane %v1781_v8, 2  ;;  %v1852_v63 = vrot.slane %v1782_v18, 2  ;;  %v11270_v49 = vld [vmem:[%s16004_s8 + $0x15] ss:$0 sm:$0xff]  ;;  %v11279_v5 = vld [vmem:[%s16004_s8 + $0x14] ss:$0 sm:$0xff] }
 0x207   : > { %v1747_v14 = vadd.f32 %v1709_v35, %v1649_v54  ;;  %v1748_v32 = vadd.f32 %v1709_v35, %v1650_v28  ;;  %v1854_v51 = vrot.slane %v1783_v55, 2  ;;  %v5750_v11 = vadd.f32 %v16075_v17, %v5572_v61 }
 0x208   : > { %v1749_v46 = vadd.f32 %v1710_v34, %v1651_v20  ;;  %v1750_v43 = vadd.f32 %v1710_v34, %v1652_v47  ;;  %v1855_v39 = vrot.slane %v1784_v13, 2  ;;  %v5402_v22 = vrot.slane %v11205_v36, 1 }
 0x209   : > { %v5404_v59 = vrot.slane %v11208_v7, 1  ;;  %v1853_v28 = vsel %vm1051_vm2, %v1851_v37, %v1852_v63  ;;  %v11273_v25 = vadd.f32 %v1851_v37, %v1747_v14  ;;  %v16072_v61 = vrot.slane %v11259_v15, 4 }
 0x20a   : > { %v1856_v36 = vsel %vm1051_vm2, %v1854_v51, %v1855_v39  ;;  %v11282_v54 = vadd.f32 %v1853_v28, %v1748_v32  ;;  %v11284_v7 = vadd.f32 %v1854_v51, %v1749_v46  ;;  %v6077_v6 = vmul.f32 %v11270_v49, %v10982_v53  ;;  %v623_v46 = vpop.f32.mrf.mxu2 }
 0x20b   : > { %v11290_v14 = vmul.f32 %v11270_v49, %v11263_v50  ;;  %v11292_v34 = vadd.f32 %v1856_v36, %v1750_v43  ;;  %v11295_v52 = vmul.f32 0.70710677, %v11273_v25  ;;  %v5405_v8 = vrot.slane %v11216_v27, 1  ;;  %v11351_v36 = vld [vmem:[#allocation2 + $0x80] sm:$0xff] }
 0x20c   : > { %v5928_v35 = vadd.f32 %v16072_v61, %v5750_v11  ;;  %v6011_v18 = vmul.f32 %v11279_v5, %v10982_v53  ;;  %v11303_v55 = vmul.f32 0.70710677, %v11282_v54  ;;  %v5302_v13 = vadd.f32 %v11161_v24, %v11148_v12 }
 0x20d   : > { %v5303_v1 = vadd.f32 %v11164_v48, %v11150_v23  ;;  %v11310_v20 = vmul.f32 0.70710677, %v11284_v7  ;;  %v11313_v27 = vmul.f32 0.70710677, %v11292_v34  ;;  %v16351_v47 = vrot.slane %v11195_v30, 1 }
 0x20e   : > { %v16352_v37 = vrot.slane %v11181_v19, 1  ;;  %v5403_v32 = vsel %vm3151_vm5, %v5401_v33, %v5402_v22  ;;  %v16353_v12 = vrot.slane %v11140_v60, 1  ;;  %v11325_v23 = vand.u32 2147483647, %v11295_v52 }
 0x20f   : > { %v16354_v48 = vmov %v16351_v47  ;;  %v6142_v51 = vrot.slane %v6077_v6, 1  ;;  %v16073_v11 = vrot.slane %v11290_v14, 1  ;;  %v11332_v19 = vand.u32 2147483647, %v11303_v55 }
 0x210   : > { %v5400_v53 = vsel %vm3151_vm5, %v16352_v37, %v16351_v47  ;;  %v5475_v24 = vadd.f32 %v16353_v12, %v11166_v62  ;;  %v5477_v63 = vadd.f32 %v16354_v48, %v11178_v31  ;;  %v5406_v33 = vsel %vm3151_vm5, %v5404_v59, %v5405_v8  ;;  %v11339_v62 = vld [vmem:[%s16004_s8 + $0x16] ss:$0 sm:$0xff] }
 0x211   : > { %v5476_v43 = vadd.f32 %v5400_v53, %v11175_v45  ;;  %v6043_v60 = vadd.f32 %v6011_v18, %v5928_v35  ;;  %v11342_v30 = vand.u32 2147483647, %v11310_v20  ;;  %v11345_v31 = vand.u32 2147483647, %v11313_v27 }
 0x212   : > { %v2117_v39 = vmul.f32 0.3275911, %v11325_v23  ;;  %v2118_v28 = vmul.f32 0.3275911, %v11332_v19  ;;  %v624_v59 = vadd.f32 %v11142_v56, %v623_v46  ;;  %v5478_v45 = vadd.f32 %v5403_v32, %v11190_v4  ;;  %v5217_v4 = vld [vmem:[#allocation2 + $0x70] sm:$0x3] }
 0x213   : > { %v5508_v6 = vmul.f32 %v11351_v36, %v11171_v58  ;;  %v11357_v35 = vmul.f32 %v11339_v62, %v11263_v50  ;;  %v2119_v18 = vmul.f32 0.3275911, %v11342_v30  ;;  %v6144_v47 = vsel %vm3151_vm5, %v6142_v51, %v16073_v11  ;;  %v11371_v46 = vld [vmem:[%s16004_s8 + $0x17] ss:$0 sm:$0xff]  ;;  %v11373_v51 = vld [vmem:[#allocation2 + $0x88] sm:$0x3] }
 0x214   : > { %v2120_v37 = vmul.f32 0.3275911, %v11345_v31  ;;  %v2149_v56 = vadd.f32 1.0, %v2117_v39  ;;  %v2150_v53 = vadd.f32 1.0, %v2118_v28  ;;  %767 = vst.msk [vmem:[#allocation2 + $0x1a0] sm:$0xff] %vm562_vm0, %v624_v59  ;;  %v5479_v32 = vadd.f32 %v5402_v22, %v11192_v57 }
 0x215   : > { %16355 = vst [vmem:[#allocation57_spill] sm:$0xff] %v11357_v35  ;;  %v5509_v12 = vmul.f32 %v11171_v58, %v10985_v16  ;;  %v6221_v48 = vadd.f32 %v6144_v47, %v6043_v60  ;;  %v2151_v61 = vadd.f32 1.0, %v2119_v18  ;;  %v11375_v11 = vadd.f32 %v5406_v33, %v5302_v13  ;;  %v11381_v57 = vld [vmem:[#allocation2 + $0xa0] sm:$0x3] }
 0x216   : > { %v11379_v39 = vmul.f32 %v11171_v58, %v11054_v38  ;;  %v2152_v28 = vadd.f32 1.0, %v2120_v37  ;;  %9096 = vrcp.f32 %v2149_v56  ;;  %v11383_v22 = vadd.f32 %v5405_v8, %v5303_v1  ;;  %v11400_v1 = vld [vmem:[%s16004_s8 + $0x18] ss:$0 sm:$0xff] }
 0x217   : > { %v16074_v60 = vrot.slane %v11357_v35, 2  ;;  %v11388_v59 = vmul.f32 %v11371_v46, %v11263_v50  ;;  %9098 = vrcp.f32 %v2150_v53  ;;  %v5540_v18 = vrot.slane %v5508_v6, 2  ;;  %16359 = vst [vmem:[#allocation61_spill] sm:$0xff] %v11400_v1 }
 0x218   : > { %16356 = vst [vmem:[#allocation58_spill] sm:$0xff] %v11379_v39  ;;  %v5607_v13 = vmul.f32 %v11213_v41, %v5217_v4  ;;  %v5608_v38 = vmul.f32 %v11351_v36, %v11213_v41  ;;  %9100 = vrcp.f32 %v2151_v61  ;;  %v5541_v58 = vrot.slane %v5509_v12, 2 }
 0x219   : > { %16357 = vst [vmem:[#allocation59_spill] sm:$0xff] %v11383_v22  ;;  %v5609_v33 = vmul.f32 %v11213_v41, %v11373_v51  ;;  %v6319_v8 = vadd.f32 %v16074_v60, %v6221_v48  ;;  %9102 = vrcp.f32 %v2152_v28  ;;  %v16360_v47 = vrot.slane %v11185_v3, 2 }
 0x21a   : > { %16358 = vst [vmem:[#allocation60_spill] sm:$0xff] %v11388_v59  ;;  %v5610_v61 = vmul.f32 %v11213_v41, %v10985_v16  ;;  %v5611_v56 = vmul.f32 %v11213_v41, %v11381_v57  ;;  %v5574_v53 = vadd.f32 %v5540_v18, %v5476_v43  ;;  %v11411_v12 = vadd.f32 %v5540_v18, %v5477_v63 }
 0x21b   : > { %v11405_v37 = vadd.f32 %v16360_v47, %v5475_v24  ;;  %v16077_v48 = vrot.slane %v11388_v59, 3  ;;  %v11416_v28 = vmul.f32 %v11400_v1, %v11263_v50  ;;  %v5576_v3 = vadd.f32 %v5541_v58, %v5478_v45 }
 0x21c   : > { %v11418_v60 = vpop.eup %9096  ;;  %v11420_v24 = vadd.f32 %v5541_v58, %v5479_v32  ;;  %v5672_v47 = vrot.slane %v5607_v13, 3  ;;  %v2501_v16 = vsub.f32 0.0, %v11325_v23  ;;  %v5674_v41 = vrot.slane %v5608_v38, 3 }
 0x21d   : > { %v11423_v6 = vpop.eup %9098  ;;  %v6497_v63 = vadd.f32 %v16077_v48, %v6319_v8  ;;  %v2213_v43 = vmul.f32 1.0614054, %v11418_v60  ;;  %v2502_v18 = vsub.f32 0.0, %v11332_v19  ;;  %v5675_v22 = vrot.slane %v5609_v33, 3 }
 0x21e   : > { %v11429_v17 = vpop.eup %9100  ;;  %v5677_v42 = vrot.slane %v5610_v61, 3  ;;  %v2214_v45 = vmul.f32 1.0614054, %v11423_v6  ;;  %v2503_v32 = vsub.f32 0.0, %v11342_v30  ;;  %v6596_v58 = vrot.slane %v11416_v28, 4 }
 0x21f   : > { %v11433_v13 = vpop.eup %9102  ;;  %v2215_v38 = vmul.f32 1.0614054, %v11429_v17  ;;  %v2245_v10 = vadd.f32 -1.4531521, %v2213_v43  ;;  %v2504_v8 = vsub.f32 0.0, %v11345_v31  ;;  %v5678_v48 = vrot.slane %v5611_v56, 3 }
 0x220   : > { %v2216_v40 = vmul.f32 1.0614054, %v11433_v13  ;;  %v2246_v29 = vadd.f32 -1.4531521, %v2214_v45  ;;  %v2533_v33 = vmul.f32 %v2501_v16, %v11325_v23  ;;  %v11442_v61 = vadd.f32 %v6596_v58, %v6497_v63 }
 0x221   : > { %v2247_v9 = vadd.f32 -1.4531521, %v2215_v38  ;;  %v2277_v21 = vmul.f32 %v11418_v60, %v2245_v10  ;;  %v2534_v59 = vmul.f32 %v2502_v18, %v11332_v19  ;;  %v11447_v1 = vmul.f32 %v11253_v0, %v5217_v4 }
 0x222   : > { %v2248_v43 = vadd.f32 -1.4531521, %v2216_v40  ;;  %v2278_v56 = vmul.f32 %v11423_v6, %v2246_v29  ;;  %v2535_v35 = vmul.f32 %v2503_v32, %v11342_v30  ;;  %v16361_v45 = vrot.slane %v11229_v26, 3 }
 0x223   : > { %v2279_v16 = vmul.f32 %v11429_v17, %v2247_v9  ;;  %v2309_v63 = vadd.f32 1.4214138, %v2277_v21  ;;  %v2536_v38 = vmul.f32 %v2504_v8, %v11345_v31  ;;  %v5676_v10 = vsel %vm3428_vm6, %v5674_v41, %v5675_v22 }
 0x224   : > { %v5673_v23 = vsel %vm3428_vm6, %v16361_v45, %v5672_v47  ;;  %v2280_v19 = vmul.f32 %v11433_v13, %v2248_v43  ;;  %v2310_v4 = vadd.f32 1.4214138, %v2278_v56  ;;  %v2577_v18 = vmul.f32 1.442695, %v2533_v33 }
 0x225   : > { %v11459_v40 = vmul.f32 0.70710677, %v11442_v61  ;;  %v2311_v29 = vadd.f32 1.4214138, %v2279_v16  ;;  %v2341_v30 = vmul.f32 %v11418_v60, %v2309_v63  ;;  %v2579_v26 = vmul.f32 1.442695, %v2534_v59 }
 0x226   : > { %v11462_v32 = vadd.f32 %v5674_v41, %v5574_v53  ;;  %v2312_v47 = vadd.f32 1.4214138, %v2280_v19  ;;  %v2342_v9 = vmul.f32 %v11423_v6, %v2310_v4  ;;  %v2581_v21 = vmul.f32 1.442695, %v2535_v35 }
 0x227   : > { %v11465_v31 = vadd.f32 %v5677_v42, %v5576_v3  ;;  %v2343_v22 = vmul.f32 %v11429_v17, %v2311_v29  ;;  %v2373_v8 = vadd.f32 -0.28449672, %v2341_v30  ;;  %v2583_v43 = vmul.f32 1.442695, %v2536_v38  ;;  %v11496_v30 = vld [vmem:[#allocation2 + $0x98] sm:$0xff] }
 0x228   : > { %v5679_v33 = vsel %vm3428_vm6, %v5677_v42, %v5678_v48  ;;  %v2344_v56 = vmul.f32 %v11433_v13, %v2312_v47  ;;  %v2374_v45 = vadd.f32 -0.28449672, %v2342_v9  ;;  %9104 = vpow2.f32 %v2577_v18 }
 0x229   : > { %v11471_v59 = vand.u32 2147483647, %v11459_v40  ;;  %v2375_v53 = vadd.f32 -0.28449672, %v2343_v22  ;;  %v2405_v41 = vmul.f32 %v11418_v60, %v2373_v8  ;;  %9106 = vpow2.f32 %v2579_v26 }
 0x22a   : > { %v11475_v35 = vadd.f32 %v5673_v23, %v11405_v37  ;;  %v2376_v3 = vadd.f32 -0.28449672, %v2344_v56  ;;  %v2406_v16 = vmul.f32 %v11423_v6, %v2374_v45  ;;  %9108 = vpow2.f32 %v2581_v21 }
 0x22b   : > { %v11479_v42 = vadd.f32 %v5676_v10, %v11411_v12  ;;  %v2407_v48 = vmul.f32 %v11429_v17, %v2375_v53  ;;  %v2437_v63 = vadd.f32 0.2548296, %v2405_v41  ;;  %9110 = vpow2.f32 %v2583_v43 }
 0x22c   : > { %v11483_v38 = vadd.f32 %v5679_v33, %v11420_v24  ;;  %v11487_v19 = vmul.f32 %v11351_v36, %v11253_v0  ;;  %v2408_v37 = vmul.f32 %v11433_v13, %v2376_v3  ;;  %v2438_v23 = vadd.f32 0.2548296, %v2406_v16 }
 0x22d   : > { %v11492_v4 = vmul.f32 %v11253_v0, %v11373_v51  ;;  %v6867_v12 = vmul.f32 0.3275911, %v11471_v59  ;;  %v2439_v10 = vadd.f32 0.2548296, %v2407_v48  ;;  %v2469_v18 = vmul.f32 %v11418_v60, %v2437_v63 }
 0x22e   : > { %v9105_v29 = vpop.eup %9104  ;;  %v11500_v24 = vmul.f32 %v11496_v30, %v11253_v0  ;;  %v11504_v36 = vmul.f32 %v11253_v0, %v11381_v57  ;;  %v2440_v26 = vadd.f32 0.2548296, %v2408_v37  ;;  %v2470_v51 = vmul.f32 %v11423_v6, %v2438_v23 }
 0x22f   : > { %v9107_v47 = vpop.eup %9106  ;;  %v5850_v9 = vrot.slane %v11447_v1, 4  ;;  %vm2021_vm10 = vcmp.ge.f32.partialorder %v11295_v52, 0.0  ;;  %v2471_v60 = vmul.f32 %v11429_v17, %v2439_v10  ;;  %v2629_v21 = vmul.f32 %v9105_v29, %v2469_v18  ;;  %v2989_v10 = vld [vmem:[#allocation2 + $0x90] sm:$0xff]  ;;  %v11523_v18 = vld [vmem:[#allocation2 + $0x98] sm:$0xff] }
 0x230   : > { %v9109_v22 = vpop.eup %9108  ;;  %v5852_v8 = vrot.slane %v11487_v19, 4  ;;  %vm2022_vm11 = vcmp.ge.f32.partialorder %v11303_v55, 0.0  ;;  %v2472_v43 = vmul.f32 %v11433_v13, %v2440_v26  ;;  %v2630_v0 = vmul.f32 %v9107_v47, %v2470_v51 }
 0x231   : > { %v9111_v57 = vpop.eup %9110  ;;  %v6899_v33 = vadd.f32 1.0, %v6867_v12  ;;  %vm2023_vm12 = vcmp.ge.f32.partialorder %v11310_v20, 0.0  ;;  %v2631_v6 = vmul.f32 %v9109_v22, %v2471_v60  ;;  %v2661_v56 = vsub.f32 1.0, %v2629_v21  ;;  %v11535_v22 = vld [vmem:[#allocation2 + $0xa8] sm:$0xff] }
 0x232   : > { %vm2024_vm13 = vcmp.ge.f32.partialorder %v11313_v27, 0.0  ;;  %v16362_v52 = vmov -1.0   ;;  %v2632_v17 = vmul.f32 %v9111_v57, %v2472_v43  ;;  %v2662_v45 = vsub.f32 1.0, %v2630_v0  ;;  %v11537_v43 = vld [vmem:[#allocation2 + $0xb0] sm:$0xff] }
 0x233   : > { %v2053_v1 = vsel %vm2021_vm10, 1.0, %v16362_v52  ;;  %v5853_v53 = vrot.slane %v11492_v4, 4  ;;  %v2054_v41 = vsel %vm2022_vm11, 1.0, %v16362_v52  ;;  %v2663_v55 = vsub.f32 1.0, %v2631_v6 }
 0x234   : > { %v2693_v3 = vmul.f32 %v2661_v56, %v2053_v1  ;;  %v5855_v13 = vrot.slane %v11500_v24, 4  ;;  %v2055_v16 = vsel %vm2023_vm12, 1.0, %v16362_v52  ;;  %v2664_v48 = vsub.f32 1.0, %v2632_v17  ;;  %v5964_v56 = vld [vmem:[#allocation2 + $0x88] sm:$0x3] }
 0x235   : > { %v2694_v20 = vmul.f32 %v2662_v45, %v2054_v41  ;;  %v1957_v63 = vmul.f32 0.5, %v11273_v25  ;;  %v2056_v27 = vsel %vm2024_vm13, 1.0, %v16362_v52  ;;  %v2695_v19 = vmul.f32 %v2663_v55, %v2055_v16 }
 0x236   : > { %v2725_v37 = vadd.f32 1.0, %v2693_v3  ;;  %9112 = vrcp.f32 %v6899_v33  ;;  %v1958_v23 = vmul.f32 0.5, %v11282_v54  ;;  %v2696_v4 = vmul.f32 %v2664_v48, %v2056_v27 }
 0x237   : > { %v2726_v12 = vadd.f32 1.0, %v2694_v20  ;;  %v5856_v29 = vrot.slane %v11504_v36, 4  ;;  %v1959_v24 = vmul.f32 0.5, %v11284_v7  ;;  %v2727_v26 = vadd.f32 1.0, %v2695_v19 }
 0x238   : > { %v11527_v51 = vmul.f32 %v2725_v37, %v1957_v63  ;;  %v16364_v25 = vrot.slane %v11259_v15, 4  ;;  %v1960_v60 = vmul.f32 0.5, %v11292_v34  ;;  %v2728_v21 = vadd.f32 1.0, %v2696_v4  ;;  %v9337_v15 = vld [vmem:[%s16004_s8 + $0x1] ss:$0 sm:$0xff] }
 0x239   : > { %v11533_v54 = vmul.f32 %v2726_v12, %v1958_v23  ;;  %v11540_v0 = vmul.f32 %v2727_v26, %v1959_v24  ;;  %v3099_v7 = vmul.f32 %v9337_v15, %v2989_v10  ;;  %v3100_v34 = vmul.f32 %v9337_v15, %v11523_v18  ;;  %v9338_v4 = vld [vmem:[%s16004_s8] ss:$0 sm:$0xff] }
 0x23a   : > { %16363 = vst [vmem:[#allocation62_spill] sm:$0xff] %v11527_v51  ;;  %v5851_v47 = vsel %vm3607_vm9, %v16364_v25, %v5850_v9  ;;  %v5854_v9 = vsel %vm3607_vm9, %v5852_v8, %v5853_v53  ;;  %v5930_v57 = vadd.f32 %v5852_v8, %v11462_v32  ;;  %v6013_v33 = vmul.f32 %v11279_v5, %v11052_v44 }
 0x23b   : > { %16365 = vst [vmem:[#allocation63_spill] sm:$0xff] %v11533_v54  ;;  %v5929_v36 = vadd.f32 %v5851_v47, %v11475_v35  ;;  %v11552_v35 = vmul.f32 %v2728_v21, %v1960_v60  ;;  %v5931_v6 = vadd.f32 %v5854_v9, %v11479_v42  ;;  %v6012_v1 = vmul.f32 %v11279_v5, %v11263_v50 }
 0x23c   : > { %16366 = vst [vmem:[#allocation64_spill] sm:$0xff] %v11540_v0  ;;  %v3101_v17 = vmul.f32 %v9337_v15, %v11535_v22  ;;  %v3102_v32 = vmul.f32 %v9337_v15, %v11537_v43  ;;  %v11563_v8 = vpop.eup %9112  ;;  %v5857_v45 = vsel %vm3607_vm9, %v5855_v13, %v5856_v29  ;;  %v5932_v53 = vadd.f32 %v5855_v13, %v11465_v31 }
 0x23d   : > { %2951 = vst.msk [vmem:[#allocation2 + $0xc1] sm:$0x80] %vm16170_vm7, %v11527_v51  ;;  %v6014_v42 = vmul.f32 %v11496_v30, %v11279_v5  ;;  %v6015_v41 = vmul.f32 %v11279_v5, %v11059_v2  ;;  %v6044_v50 = vadd.f32 %v6012_v1, %v5929_v36  ;;  %v11575_v55 = vmul.f32 %v11270_v49, %v11052_v44  ;;  %v16374_v1 = vld [vmem:[#allocation57_spill] sm:$0xff] }
 0x23e   : > { %16367 = vst [vmem:[#allocation65_spill] sm:$0xff] %v11552_v35  ;;  %v3170_v3 = vrot.slane %v3099_v7, 1  ;;  %v3171_v16 = vrot.slane %v3100_v34, 1  ;;  %v16368_v48 = vrot.slane %v11379_v39, 2  ;;  %v11583_v13 = vadd.f32 %v5857_v45, %v11483_v38  ;;  %v2991_v38 = vld [vmem:[#allocation2 + $0xa0] sm:$0x3] }
 0x23f   : > { %2952 = vst.msk [vmem:[#allocation2 + $0xc9] sm:$0x7f] %vm16169_vm8, %v11533_v54  ;;  %v11585_v20 = vadd.f32 %v6013_v33, %v5930_v57  ;;  %v6354_v5 = vmul.f32 %v11371_v46, %v5964_v56  ;;  %v11588_v63 = vadd.f32 %v6014_v42, %v5931_v6  ;;  %v6963_v27 = vmul.f32 1.0614054, %v11563_v8  ;;  %v16376_v45 = vld [vmem:[#allocation61_spill] sm:$0xff] }
 0x240   : > { %2953 = vst.msk [vmem:[#allocation2 + $0xd9] sm:$0x80] %vm16170_vm7, %v11540_v0  ;;  %v11580_v31 = vadd.f32 %v16368_v48, %v11375_v11  ;;  %v3173_v44 = vrot.slane %v3101_v17, 1  ;;  %v3174_v19 = vrot.slane %v3102_v32, 1  ;;  %v11591_v37 = vadd.f32 %v6015_v41, %v5932_v53  ;;  %v11812_v54 = vld [vmem:[#allocation2 + $0xd8] sm:$0xff]  ;;  %v16400_v0 = vld [vmem:[#allocation43_spill] sm:$0xff] }
 0x241   : > { %2954 = vst.msk [vmem:[#allocation2 + $0xe1] sm:$0x7f] %vm16169_vm8, %v11552_v35  ;;  %v11595_v23 = vmul.f32 %v11496_v30, %v11270_v49  ;;  %v11599_v11 = vmul.f32 %v11270_v49, %v11059_v2  ;;  %v3033_v12 = vmul.f32 %v9338_v4, %v2989_v10  ;;  %v6145_v29 = vrot.slane %v11575_v55, 1  ;;  %v2994_v2 = vld [vmem:[#allocation2 + $0xb8] sm:$0x3] }
 0x242   : > { %16369 = vst [vmem:[#allocation66_spill] sm:$0xff] %v11580_v31  ;;  %v16373_v24 = vrot.slane %v11290_v14, 1  ;;  %v11609_v25 = vmul.f32 %v11496_v30, %v11339_v62  ;;  %v3172_v47 = vsel %vm3151_vm5, %v3170_v3, %v3171_v16  ;;  %v6419_v60 = vrot.slane %v6354_v5, 3  ;;  %v9339_v10 = vld [vmem:[%s16004_s8 + $0x2] ss:$0 sm:$0xff] }
 0x243   : > { %16370 = vst [vmem:[#allocation67_spill] sm:$0xff] %v11583_v13  ;;  %v3034_v49 = vmul.f32 %v9338_v4, %v11523_v18  ;;  %v3035_v21 = vmul.f32 %v9338_v4, %v11535_v22  ;;  %v3272_v36 = vmul.f32 %v9339_v10, %v11523_v18  ;;  %v6995_v14 = vadd.f32 -1.4531521, %v6963_v27  ;;  %v9340_v62 = vld [vmem:[%s16004_s8 + $0x3] ss:$0 sm:$0xff] }
 0x244   : > { %16371 = vst [vmem:[#allocation68_spill] sm:$0xff] %v11591_v37  ;;  %v6222_v26 = vadd.f32 %v16373_v24, %v6044_v50  ;;  %v3175_v15 = vsel %vm3151_vm5, %v3173_v44, %v3174_v19  ;;  %v3376_v7 = vmul.f32 %v9340_v62, %v11523_v18  ;;  %v3377_v34 = vmul.f32 %v9340_v62, %v2991_v38  ;;  %v16377_v50 = vld [vmem:[#allocation60_spill] sm:$0xff] }
 0x245   : > { %16372 = vst [vmem:[#allocation69_spill] sm:$0xff] %v11599_v11  ;;  %v3036_v9 = vmul.f32 %v9338_v4, %v11537_v43  ;;  %v3244_v57 = vadd.f32 %v3172_v47, %v3033_v12  ;;  %v3245_v33 = vadd.f32 %v3171_v16, %v3034_v49  ;;  %v3273_v6 = vmul.f32 %v9339_v10, %v11537_v43  ;;  %v9341_v16 = vld [vmem:[%s16004_s8 + $0x4] ss:$0 sm:$0xff] }
 0x246   : > { %v16375_v17 = vrot.slane %v16374_v1, 2  ;;  %v6532_v53 = vmul.f32 %v16376_v45, %v5964_v56  ;;  %v3378_v42 = vmul.f32 %v9340_v62, %v11537_v43  ;;  %v3379_v41 = vmul.f32 %v9340_v62, %v2994_v2 }
 0x247   : > { %v16378_v55 = vrot.slane %v16377_v50, 3  ;;  %v3246_v48 = vadd.f32 %v3175_v15, %v3035_v21  ;;  %v3247_v5 = vadd.f32 %v3174_v19, %v3036_v9  ;;  %v3304_v27 = vrot.slane %v3272_v36, 2 }
 0x248   : > { %v6320_v32 = vadd.f32 %v16375_v17, %v6222_v26  ;;  %v3447_v44 = vrot.slane %v3376_v7, 3  ;;  %v3448_v4 = vrot.slane %v3377_v34, 3  ;;  %v3555_v12 = vmul.f32 %v9341_v16, %v11523_v18 }
 0x249   : > { %v6420_v3 = vsel %vm3428_vm6, %v16378_v55, %v6419_v60  ;;  %v3556_v24 = vmul.f32 %v9341_v16, %v2991_v38  ;;  %v7027_v56 = vmul.f32 %v11563_v8, %v6995_v14  ;;  %v3305_v26 = vrot.slane %v3273_v6, 2 }
 0x24a   : > { %v3342_v47 = vadd.f32 %v3304_v27, %v3244_v57  ;;  %v3343_v49 = vadd.f32 %v3304_v27, %v3245_v33  ;;  %v3450_v10 = vrot.slane %v3378_v42, 3  ;;  %v3451_v62 = vrot.slane %v3379_v41, 3 }
 0x24b   : > { %v3557_v60 = vmul.f32 %v9341_v16, %v11537_v43  ;;  %v3558_v19 = vmul.f32 %v9341_v16, %v2994_v2  ;;  %v6146_v21 = vrot.slane %v11595_v23, 1  ;;  %v6498_v36 = vadd.f32 %v6420_v3, %v6320_v32 }
 0x24c   : > { %v6597_v15 = vrot.slane %v6532_v53, 4  ;;  %v3345_v7 = vadd.f32 %v3305_v26, %v3247_v5  ;;  %v3344_v34 = vadd.f32 %v3305_v26, %v3246_v48  ;;  %v3449_v9 = vsel %vm3428_vm6, %v3447_v44, %v3448_v4  ;;  %v11655_v48 = vld [vmem:[#allocation2 + $0xc0] sm:$0xff]  ;;  %v11657_v5 = vld [vmem:[#allocation2 + $0xc8] sm:$0xff] }
 0x24d   : > { %v3626_v18 = vrot.slane %v3555_v12, 4  ;;  %v3627_v38 = vrot.slane %v3556_v24, 4  ;;  %v7059_v6 = vadd.f32 1.4214138, %v7027_v56  ;;  %v3521_v57 = vadd.f32 %v3447_v44, %v3342_v47  ;;  %v9343_v44 = vld [vmem:[%s16004_s8 + $0x6] ss:$0 sm:$0xff] }
 0x24e   : > { %v3522_v33 = vadd.f32 %v3449_v9, %v3343_v49  ;;  %v6287_v1 = vrot.slane %v11609_v25, 2  ;;  %v3452_v17 = vsel %vm3428_vm6, %v3450_v10, %v3451_v62  ;;  %v3629_v2 = vrot.slane %v3557_v60, 4 }
 0x24f   : > { %v3630_v45 = vrot.slane %v3558_v19, 4  ;;  %v6147_v23 = vsel %vm3151_vm5, %v6145_v29, %v6146_v21  ;;  %v11646_v32 = vmul.f32 %v11496_v30, %v11371_v46  ;;  %v6598_v53 = vsel %vm3607_vm9, %v6596_v58, %v6597_v15  ;;  %v3740_v19 = vld [vmem:[#allocation2 + $0xb8] sm:$0x3] }
 0x250   : > { %v3524_v42 = vadd.f32 %v3452_v17, %v3345_v7  ;;  %v6223_v41 = vadd.f32 %v6147_v23, %v11585_v20  ;;  %v11652_v50 = vadd.f32 %v6598_v53, %v6498_v36  ;;  %v3523_v55 = vadd.f32 %v3450_v10, %v3344_v34  ;;  %v9342_v20 = vld [vmem:[%s16004_s8 + $0x5] ss:$0 sm:$0xff] }
 0x251   : > { %16379 = vst [vmem:[#allocation57_spill] sm:$0xff] %v11646_v32  ;;  %v3628_v3 = vsel %vm3607_vm9, %v3626_v18, %v3627_v38  ;;  %v7091_v29 = vmul.f32 %v11563_v8, %v7059_v6  ;;  %v7251_v46 = vsub.f32 0.0, %v11471_v59  ;;  %v3700_v30 = vadd.f32 %v3626_v18, %v3521_v57  ;;  %v9344_v57 = vld [vmem:[%s16004_s8 + $0x7] ss:$0 sm:$0xff] }
 0x252   : > { %v3701_v28 = vadd.f32 %v3628_v3, %v3522_v33  ;;  %v3631_v58 = vsel %vm3607_vm9, %v3629_v2, %v3630_v45  ;;  %v3782_v27 = vmul.f32 %v9342_v20, %v11535_v22  ;;  %v3848_v4 = vmul.f32 %v9343_v44, %v11535_v22 }
 0x253   : > { %v3849_v16 = vmul.f32 %v9343_v44, %v11537_v43  ;;  %v3703_v12 = vadd.f32 %v3631_v58, %v3524_v42  ;;  %v3783_v24 = vmul.f32 %v9342_v20, %v11537_v43  ;;  %v3850_v56 = vmul.f32 %v9343_v44, %v11655_v48 }
 0x254   : > { %v3851_v26 = vmul.f32 %v9343_v44, %v11657_v5  ;;  %v6224_v47 = vadd.f32 %v6146_v21, %v11588_v63  ;;  %v11676_v49 = vmul.f32 0.70710677, %v11652_v50  ;;  %v3702_v10 = vadd.f32 %v3629_v2, %v3523_v55  ;;  %v3743_v63 = vld [vmem:[#allocation2 + $0xd0] sm:$0x3]  ;;  %v9345_v2 = vld [vmem:[%s16004_s8 + $0x8] ss:$0 sm:$0xff] }
 0x255   : > { %v3784_v62 = vmul.f32 %v9342_v20, %v11655_v48  ;;  %v7123_v60 = vadd.f32 -0.28449672, %v7091_v29  ;;  %v7283_v22 = vmul.f32 %v7251_v46, %v11471_v59  ;;  %v3785_v36 = vmul.f32 %v9342_v20, %v11657_v5 }
 0x256   : > { %16380 = vst [vmem:[#allocation61_spill] sm:$0xff] %v11676_v49  ;;  %v3815_v15 = vadd.f32 %v3783_v24, %v3701_v28  ;;  %v6321_v7 = vadd.f32 %v6287_v1, %v6223_v41  ;;  %v3814_v34 = vadd.f32 %v3782_v27, %v3700_v30  ;;  %v3918_v9 = vrot.slane %v3848_v4, 1  ;;  %v9346_v30 = vld [vmem:[%s16004_s8 + $0x9] ss:$0 sm:$0xff] }
 0x257   : > { %v3919_v18 = vrot.slane %v3849_v16, 1  ;;  %v3817_v21 = vadd.f32 %v3785_v36, %v3703_v12  ;;  %v3921_v38 = vrot.slane %v3850_v56, 1  ;;  %v3922_v6 = vrot.slane %v3851_v26, 1 }
 0x258   : > { %v4020_v59 = vmul.f32 %v9344_v57, %v11537_v43  ;;  %v6836_v33 = vand.u32 2147483647, %v11676_v49  ;;  %v3816_v17 = vadd.f32 %v3784_v62, %v3702_v10  ;;  %v4124_v45 = vmul.f32 %v9345_v2, %v11537_v43 }
 0x259   : > { %v4125_v23 = vmul.f32 %v9345_v2, %v3740_v19  ;;  %v7155_v53 = vmul.f32 %v11563_v8, %v7123_v60  ;;  %v7317_v42 = vmul.f32 1.442695, %v7283_v22  ;;  %v3993_v41 = vadd.f32 %v3919_v18, %v3815_v15 }
 0x25a   : > { %v4021_v55 = vmul.f32 %v9344_v57, %v11657_v5  ;;  %v3920_v3 = vsel %vm3151_vm5, %v3918_v9, %v3919_v18  ;;  %v4126_v29 = vmul.f32 %v9345_v2, %v11657_v5  ;;  %v4127_v46 = vmul.f32 %v9345_v2, %v3743_v63 }
 0x25b   : > { %v4302_v28 = vmul.f32 %v9346_v30, %v11537_v43  ;;  %v3923_v58 = vsel %vm3151_vm5, %v3921_v38, %v3922_v6  ;;  %v3992_v20 = vadd.f32 %v3920_v3, %v3814_v34  ;;  %v3995_v27 = vadd.f32 %v3922_v6, %v3817_v21 }
 0x25c   : > { %v4052_v44 = vrot.slane %v4020_v59, 2  ;;  %v3994_v4 = vadd.f32 %v3923_v58, %v3816_v17  ;;  %v4194_v16 = vrot.slane %v4124_v45, 3  ;;  %v4195_v12 = vrot.slane %v4125_v23, 3  ;;  %v9348_v58 = vld [vmem:[%s16004_s8 + $0xa] ss:$0 sm:$0xff] }
 0x25d   : > { %v4303_v24 = vmul.f32 %v9346_v30, %v3740_v19  ;;  %v7187_v56 = vadd.f32 0.2548296, %v7155_v53  ;;  %v7252_v26 = vsub.f32 0.0, %v6836_v33  ;;  %v4053_v10 = vrot.slane %v4021_v55, 2 }
 0x25e   : > { %v4091_v62 = vadd.f32 %v4052_v44, %v3993_v41  ;;  %v4197_v60 = vrot.slane %v4126_v29, 3  ;;  %v4198_v22 = vrot.slane %v4127_v46, 3  ;;  %v4304_v36 = vmul.f32 %v9346_v30, %v11657_v5 }
 0x25f   : > { %v4305_v15 = vmul.f32 %v9346_v30, %v3743_v63  ;;  %v6868_v9 = vmul.f32 0.3275911, %v6836_v33  ;;  %9114 = vpow2.f32 %v7317_v42  ;;  %v4090_v43 = vadd.f32 %v4052_v44, %v3992_v20 }
 0x260   : > { %v4093_v18 = vadd.f32 %v4053_v10, %v3995_v27  ;;  %v4092_v34 = vadd.f32 %v4053_v10, %v3994_v4  ;;  %v4196_v21 = vsel %vm3428_vm6, %v4194_v16, %v4195_v12  ;;  %v4372_v38 = vrot.slane %v4302_v28, 4  ;;  %v16384_v27 = vld [vmem:[#allocation56_spill] sm:$0xff] }
 0x261   : > { %v4373_v6 = vrot.slane %v4303_v24, 4  ;;  %v11705_v19 = vadd.f32 %v6287_v1, %v6224_v47  ;;  %v16084_v57 = vrot.slane %v11646_v32, 3  ;;  %v7284_v59 = vmul.f32 %v7252_v26, %v6836_v33  ;;  %v16407_v32 = vld [vmem:[#allocation23_spill] sm:$0xff] }
 0x262   : > { %v4269_v17 = vadd.f32 %v4196_v21, %v4091_v62  ;;  %v7219_v2 = vmul.f32 %v11563_v8, %v7187_v56  ;;  %v4199_v63 = vsel %vm3428_vm6, %v4197_v60, %v4198_v22  ;;  %v4375_v45 = vrot.slane %v4304_v36, 4  ;;  %v11719_v8 = vld [vmem:[#allocation2 + $0xe0] sm:$0xff]  ;;  %v4486_v21 = vld [vmem:[#allocation2 + $0xd0] sm:$0x3] }
 0x263   : > { %16381 = vst [vmem:[#allocation60_spill] sm:$0xff] %v11705_v19  ;;  %v4376_v23 = vrot.slane %v4305_v15, 4  ;;  %v11712_v53 = vadd.f32 %v16084_v57, %v6321_v7  ;;  %v11715_v42 = vmul.f32 0.5, %v11442_v61  ;;  %v4268_v25 = vadd.f32 %v4194_v16, %v4090_v43  ;;  %v9347_v7 = vld [vmem:[%s16004_s8 + $0xb] ss:$0 sm:$0xff] }
 0x264   : > { %v4271_v1 = vadd.f32 %v4199_v63, %v4093_v18  ;;  %vm6771_vm14 = vcmp.ge.f32.partialorder %v11459_v40, 0.0  ;;  %v6900_v47 = vadd.f32 1.0, %v6868_v9  ;;  %v4270_v33 = vadd.f32 %v4197_v60, %v4092_v34  ;;  %v4483_v43 = vld [vmem:[#allocation2 + $0xb8] sm:$0x3]  ;;  %v9349_v18 = vld [vmem:[#allocation2 + $0xb0] sm:$0xff]  ;;  %v16387_v40 = vld [vmem:[#allocation53_spill] sm:$0xff] }
 0x265   : > { %16382 = vst [vmem:[#allocation70_spill] sm:$0xff] %v11712_v53  ;;  %v4374_v41 = vsel %vm3607_vm9, %v4372_v38, %v4373_v6  ;;  %v9115_v55 = vpop.eup %9114  ;;  %v7319_v3 = vmul.f32 1.442695, %v7284_v59  ;;  %v4594_v61 = vmul.f32 %v9347_v7, %v11655_v48  ;;  %v4595_v46 = vmul.f32 %v9347_v7, %v11657_v5 }
 0x266   : > { %16383 = vst [vmem:[#allocation71_spill] sm:$0xff] %v11715_v42  ;;  %v4447_v29 = vadd.f32 %v4374_v41, %v4269_v17  ;;  %v7379_v30 = vmul.f32 %v9115_v55, %v7219_v2  ;;  %v4377_v28 = vsel %vm3607_vm9, %v4375_v45, %v4376_v23  ;;  %v4528_v20 = vmul.f32 %v9348_v58, %v11655_v48 }
 0x267   : > { %v4596_v44 = vmul.f32 %v9347_v7, %v16384_v27  ;;  %v4446_v4 = vadd.f32 %v4372_v38, %v4268_v25  ;;  %v4449_v16 = vadd.f32 %v4377_v28, %v4271_v1  ;;  %v4529_v12 = vmul.f32 %v9348_v58, %v11657_v5  ;;  %v11745_v38 = vld [vmem:[#allocation2 + $0xe8] sm:$0x3] }
 0x268   : > { %v4597_v24 = vmul.f32 %v9347_v7, %v11719_v8  ;;  %v11735_v56 = vmul.f32 0.5, %v11652_v50  ;;  %9116 = vrcp.f32 %v6900_v47  ;;  %v4448_v26 = vadd.f32 %v4375_v45, %v4270_v33  ;;  %v9350_v50 = vld [vmem:[%s16004_s8 + $0xc] ss:$0 sm:$0xff]  ;;  %v16386_v45 = vld [vmem:[#allocation54_spill] sm:$0xff]  ;;  %v9351_v47 = vld [vmem:[%s16004_s8 + $0xd] ss:$0 sm:$0xff] }
 0x269   : > { %v4530_v10 = vmul.f32 %v9348_v58, %v16384_v27  ;;  %v4531_v62 = vmul.f32 %v9348_v58, %v11719_v8  ;;  %v4561_v60 = vadd.f32 %v4529_v12, %v4447_v29  ;;  %v4664_v22 = vrot.slane %v4594_v61, 1  ;;  %v803_v7 = vld [vmem:[#allocation2 + $0x168] sm:$0xff] }
 0x26a   : > { %16385 = vst [vmem:[#allocation56_spill] sm:$0xff] %v11735_v56  ;;  %v4665_v36 = vrot.slane %v4595_v46, 1  ;;  %v6803_v15 = vsel %vm6771_vm14, 1.0, %v16362_v52  ;;  %9118 = vpow2.f32 %v7319_v3  ;;  %v7411_v9 = vsub.f32 1.0, %v7379_v30 }
 0x26b   : > { %v4765_v34 = vmul.f32 %v9350_v50, %v9349_v18  ;;  %v4560_v6 = vadd.f32 %v4528_v20, %v4446_v4  ;;  %v4563_v59 = vadd.f32 %v4531_v62, %v4449_v16  ;;  %v4667_v17 = vrot.slane %v4596_v44, 1 }
 0x26c   : > { %v4668_v2 = vrot.slane %v4597_v24, 1  ;;  %v4562_v63 = vadd.f32 %v4530_v10, %v4448_v26  ;;  %v16388_v23 = vrot.slane %v16387_v40, 1  ;;  %v4766_v1 = vmul.f32 %v9350_v50, %v11657_v5  ;;  %v9352_v10 = vld [vmem:[%s16003_s7] ss:$0 sm:$0xff] }
 0x26d   : > { %v4868_v33 = vmul.f32 %v9351_v47, %v9349_v18  ;;  %v4666_v41 = vsel %vm3151_vm5, %v4664_v22, %v4665_v36  ;;  %v4739_v55 = vadd.f32 %v4665_v36, %v4561_v60  ;;  %v4767_v3 = vmul.f32 %v9350_v50, %v11719_v8  ;;  %v16391_v22 = vld [vmem:[#allocation55_spill] sm:$0xff] }
 0x26e   : > { %v4737_v25 = vadd.f32 %v16388_v23, %v16386_v45  ;;  %v4869_v29 = vmul.f32 %v9351_v47, %v4483_v43  ;;  %v11756_v61 = vpop.eup %9116  ;;  %v4870_v46 = vmul.f32 %v9351_v47, %v11657_v5  ;;  %v4871_v30 = vmul.f32 %v9351_v47, %v4486_v21 }
 0x26f   : > { %16389 = vst [vmem:[#allocation54_spill] sm:$0xff] %v11756_v61  ;;  %v4872_v28 = vmul.f32 %v9351_v47, %v11719_v8  ;;  %v4873_v58 = vmul.f32 %v9351_v47, %v11745_v38  ;;  %v4669_v20 = vsel %vm3151_vm5, %v4667_v17, %v4668_v2  ;;  %v4738_v27 = vadd.f32 %v4666_v41, %v4560_v6  ;;  %v16405_v61 = vld [vmem:[#allocation39_spill] sm:$0xff] }
 0x270   : > { %v4741_v44 = vadd.f32 %v4668_v2, %v4563_v59  ;;  %v4797_v4 = vrot.slane %v4765_v34, 2  ;;  %v11762_v16 = vpop.eup %9118  ;;  %v7443_v12 = vmul.f32 %v7411_v9, %v6803_v15  ;;  %v4740_v24 = vadd.f32 %v4669_v20, %v4562_v63  ;;  %v804_v2 = vld [vmem:[#allocation2 + $0x170] sm:$0xff] }
 0x271   : > { %16390 = vst [vmem:[#allocation53_spill] sm:$0xff] %v11762_v16  ;;  %v4798_v26 = vrot.slane %v4766_v1, 2  ;;  %v11767_v62 = vmul.f32 %v9352_v10, %v803_v7  ;;  %v4799_v60 = vrot.slane %v4767_v3, 2  ;;  %v4937_v50 = vrot.slane %v4868_v33, 3  ;;  %v9353_v1 = vld [vmem:[%s16004_s8 + $0xe] ss:$0 sm:$0xff] }
 0x272   : > { %v4834_v36 = vadd.f32 %v4797_v4, %v16391_v22  ;;  %v4938_v45 = vrot.slane %v4869_v29, 3  ;;  %v4940_v17 = vrot.slane %v4870_v46, 3  ;;  %v4941_v6 = vrot.slane %v4871_v30, 3 }
 0x273   : > { %v4943_v59 = vrot.slane %v4872_v28, 3  ;;  %v4944_v34 = vrot.slane %v4873_v58, 3  ;;  %v4835_v40 = vadd.f32 %v4797_v4, %v4737_v25  ;;  %v4836_v15 = vadd.f32 %v4798_v26, %v4738_v27  ;;  %v11780_v58 = vld [vmem:[#allocation2 + $0x1a0] sm:$0xff] }
 0x274   : > { %v4837_v9 = vadd.f32 %v4798_v26, %v4739_v55  ;;  %v4839_v63 = vadd.f32 %v4799_v60, %v4741_v44  ;;  %v4838_v23 = vadd.f32 %v4799_v60, %v4740_v24  ;;  %v5046_v47 = vmul.f32 %v9353_v1, %v9349_v18  ;;  %v805_v44 = vld [vmem:[#allocation2 + $0x178] sm:$0x3] }
 0x275   : > { %v5047_v41 = vmul.f32 %v9353_v1, %v4483_v43  ;;  %v844_v3 = vmul.f32 %v9352_v10, %v804_v2  ;;  %v11773_v7 = vadd.f32 1.0, %v7443_v12  ;;  %v4939_v33 = vsel %vm3428_vm6, %v4937_v50, %v4938_v45  ;;  %v811_v45 = vld [vmem:[#allocation2 + $0x1a8] sm:$0x3] }
 0x276   : > { %v5048_v29 = vmul.f32 %v9353_v1, %v11657_v5  ;;  %v5049_v46 = vmul.f32 %v9353_v1, %v4486_v21  ;;  %v4942_v25 = vsel %vm3428_vm6, %v4940_v17, %v4941_v6  ;;  %v4945_v55 = vsel %vm3428_vm6, %v4943_v59, %v4944_v34  ;;  %v808_v21 = vld [vmem:[#allocation2 + $0x190] sm:$0x3]  ;;  %v11791_v34 = vld [vmem:[#allocation2 + $0x198] sm:$0xff] }
 0x277   : > { %16392 = vst [vmem:[#allocation55_spill] sm:$0xff] %v11773_v7  ;;  %v5012_v30 = vadd.f32 %v4937_v50, %v4834_v36  ;;  %v5050_v28 = vmul.f32 %v9353_v1, %v11719_v8  ;;  %v5013_v20 = vadd.f32 %v4939_v33, %v4835_v40  ;;  %v5014_v18 = vadd.f32 %v4940_v17, %v4836_v15  ;;  %v9354_v36 = vld [vmem:[%s16003_s7 + $0x1] ss:$0 sm:$0xff]  ;;  %v11796_v40 = vld [vmem:[%s16003_s7 + $0x2] ss:$0 sm:$0xff] }
 0x278   : > { %v5015_v43 = vadd.f32 %v4942_v25, %v4837_v9  ;;  %v5017_v27 = vadd.f32 %v4945_v55, %v4839_v63  ;;  %v5016_v4 = vadd.f32 %v4943_v59, %v4838_v23  ;;  %v5051_v12 = vmul.f32 %v9353_v1, %v11745_v38  ;;  %v9355_v59 = vld [vmem:[%s16004_s8 + $0xf] ss:$0 sm:$0xff] }
 0x279   : > { %v5115_v24 = vrot.slane %v5046_v47, 4  ;;  %v5116_v26 = vrot.slane %v5047_v41, 4  ;;  %v5118_v60 = vrot.slane %v5048_v29, 4  ;;  %v5119_v22 = vrot.slane %v5049_v46, 4 }
 0x27a   : > { %v899_v50 = vmul.f32 %v9354_v36, %v804_v2  ;;  %v901_v6 = vmul.f32 %v9354_v36, %v11780_v58  ;;  %v5121_v17 = vrot.slane %v5050_v28, 4  ;;  %v5272_v38 = vmul.f32 %v9355_v59, %v11655_v48 }
 0x27b   : > { %v1007_v15 = vmul.f32 %v11796_v40, %v804_v2  ;;  %v1008_v9 = vmul.f32 %v11796_v40, %v805_v44  ;;  %v847_v63 = vmul.f32 %v9352_v10, %v11791_v34  ;;  %v1010_v1 = vmul.f32 %v11796_v40, %v808_v21 }
 0x27c   : > { %v931_v23 = vrot.slane %v899_v50, 1  ;;  %v1011_v47 = vmul.f32 %v11796_v40, %v11780_v58  ;;  %v848_v41 = vmul.f32 %v9352_v10, %v11780_v58  ;;  %v933_v33 = vrot.slane %v901_v6, 1 }
 0x27d   : > { %v1012_v29 = vmul.f32 %v11796_v40, %v811_v45  ;;  %v1082_v46 = vrot.slane %v1007_v15, 2  ;;  %v5117_v25 = vsel %vm3607_vm9, %v5115_v24, %v5116_v26  ;;  %v5122_v55 = vrot.slane %v5051_v12, 4  ;;  %v1194_v26 = vld [vmem:[#allocation2 + $0x180] sm:$0xff] }
 0x27e   : > { %v5190_v2 = vadd.f32 %v5115_v24, %v5012_v30  ;;  %v5273_v28 = vmul.f32 %v9355_v59, %v11657_v5  ;;  %v5120_v44 = vsel %vm3607_vm9, %v5118_v60, %v5119_v22  ;;  %v11809_v36 = vadd.f32 %v5118_v60, %v5014_v18  ;;  %v16393_v22 = vld [vmem:[#allocation46_spill] sm:$0xff] }
 0x27f   : > { %v973_v21 = vadd.f32 %v931_v23, %v11767_v62  ;;  %v1083_v50 = vrot.slane %v1008_v9, 2  ;;  %v974_v57 = vadd.f32 %v931_v23, %v844_v3  ;;  %v1086_v14 = vrot.slane %v1010_v1, 2 }
 0x280   : > { %v1088_v10 = vrot.slane %v1011_v47, 2  ;;  %v1089_v6 = vrot.slane %v1012_v29, 2  ;;  %v11815_v45 = vmul.f32 %v11812_v54, %v9355_v59  ;;  %v977_v12 = vadd.f32 %v933_v33, %v847_v63  ;;  %v11832_v63 = vld [vmem:[%s16004_s8 + $0x10] ss:$0 sm:$0xff] }
 0x281   : > { %v978_v30 = vadd.f32 %v933_v33, %v848_v41  ;;  %v1084_v24 = vsel %vm1051_vm2, %v1082_v46, %v1083_v50  ;;  %v5123_v18 = vsel %vm3607_vm9, %v5121_v17, %v5122_v55  ;;  %v5191_v60 = vadd.f32 %v5117_v25, %v5013_v20  ;;  %v11838_v47 = vld [vmem:[#allocation2 + $0x1b0] sm:$0xff]  ;;  %v11854_v55 = vld [vmem:[#allocation2 + $0x188] sm:$0xff] }
 0x282   : > { %v16394_v62 = vrot.slane %v16393_v22, 2  ;;  %v1090_v15 = vsel %vm1051_vm2, %v1088_v10, %v1089_v6  ;;  %v11823_v9 = vadd.f32 %v5120_v44, %v5015_v43  ;;  %v11825_v23 = vadd.f32 %v5121_v17, %v5016_v4  ;;  %16396 = vst [vmem:[#allocation46_spill] sm:$0xff] %v11854_v55  ;;  %v11864_v50 = vld [vmem:[#allocation2 + $0xf0] sm:$0xff] }
 0x283   : > { %v11827_v1 = vadd.f32 %v5123_v18, %v5017_v27  ;;  %v11836_v20 = vmul.f32 %v11832_v63, %v11655_v48  ;;  %v1152_v43 = vadd.f32 %v1082_v46, %v973_v21  ;;  %v1153_v4 = vadd.f32 %v1084_v24, %v974_v57  ;;  %v11847_v27 = vld [vmem:[%s16003_s7 + $0x3] ss:$0 sm:$0xff]  ;;  %v16395_v48 = vld [vmem:[#allocation48_spill] sm:$0xff] }
 0x284   : > { %v1087_v3 = vsel %vm1051_vm2, %v16394_v62, %v1086_v14  ;;  %v11842_v14 = vmul.f32 %v11832_v63, %v11657_v5  ;;  %v1234_v17 = vmul.f32 %v11847_v27, %v1194_v26  ;;  %v11851_v41 = vmul.f32 %v9355_v59, %v11719_v8  ;;  %16397 = vst [vmem:[#allocation48_spill] sm:$0xff] %v11864_v50  ;;  %v1196_v26 = vld [vmem:[#allocation2 + $0x190] sm:$0x3] }
 0x285   : > { %v1155_v33 = vadd.f32 %v1087_v3, %v16395_v48  ;;  %v1156_v29 = vadd.f32 %v1088_v10, %v977_v12  ;;  %v1157_v25 = vadd.f32 %v1090_v15, %v978_v30  ;;  %v1235_v46 = vmul.f32 %v11847_v27, %v11854_v55  ;;  %v11869_v10 = vld [vmem:[#allocation2 + $0xf8] sm:$0xff]  ;;  %v1199_v15 = vld [vmem:[#allocation2 + $0x1a8] sm:$0x3] }
 0x286   : > { %v1236_v57 = vmul.f32 %v11847_v27, %v11791_v34  ;;  %v1237_v44 = vmul.f32 %v11847_v27, %v11780_v58  ;;  %v1238_v21 = vmul.f32 %v11847_v27, %v11838_v47  ;;  %v11867_v6 = vmul.f32 %v11864_v50, %v9355_v59  ;;  %16398 = vst [vmem:[#allocation72_spill] sm:$0xff] %v11869_v10  ;;  %v16399_v48 = vld [vmem:[#allocation49_spill] sm:$0xff] }
 0x287   : > { %v11872_v12 = vmul.f32 %v11869_v10, %v9355_v59  ;;  %v11874_v30 = vadd.f32 %v5272_v38, %v5190_v2  ;;  %v11876_v24 = vadd.f32 %v5273_v28, %v5191_v60  ;;  %v1266_v62 = vadd.f32 %v1234_v17, %v1152_v43  ;;  %v11885_v59 = vld [vmem:[%s16003_s7 + $0x4] ss:$0 sm:$0xff]  ;;  %v11894_v60 = vld [vmem:[%s16003_s7 + $0x5] ss:$0 sm:$0xff]  ;;  %v16402_v17 = vld [vmem:[#allocation41_spill] sm:$0xff] }
 0x288   : > { %v1267_v3 = vadd.f32 %v1235_v46, %v1153_v4  ;;  %v1268_v51 = vadd.f32 %v1236_v57, %v16399_v48  ;;  %v1270_v35 = vadd.f32 %v1238_v21, %v1156_v29  ;;  %v1271_v56 = vadd.f32 %v16400_v0, %v1157_v25  ;;  %16401 = vst [vmem:[#allocation49_spill] sm:$0xff] %v11894_v60 }
 0x289   : > { %v1290_v38 = vmul.f32 %v11885_v59, %v11854_v55  ;;  %v1269_v2 = vadd.f32 %v1237_v44, %v1155_v33  ;;  %v1291_v28 = vmul.f32 %v11885_v59, %v11780_v58  ;;  %v1398_v0 = vmul.f32 %v11894_v60, %v11854_v55 }
 0x28a   : > { %v1399_v43 = vmul.f32 %v11894_v60, %v1196_v26  ;;  %v16403_v29 = vrot.slane %v16402_v17, 1  ;;  %v1400_v57 = vmul.f32 %v11894_v60, %v11780_v58  ;;  %v1401_v21 = vmul.f32 %v11894_v60, %v1199_v15  ;;  %v11913_v15 = vld [vmem:[%s16003_s7 + $0x6] ss:$0 sm:$0xff] }
 0x28b   : > { %v1322_v4 = vrot.slane %v1290_v38, 1  ;;  %v1323_v44 = vrot.slane %v1291_v28, 1  ;;  %v1472_v48 = vrot.slane %v1398_v0, 2  ;;  %v16406_v26 = vrot.slane %v16405_v61, 2  ;;  %16408 = vst [vmem:[#allocation43_spill] sm:$0xff] %v11913_v15  ;;  %v16409_v0 = vld [vmem:[#allocation25_spill] sm:$0xff] }
 0x28c   : > { %v1368_v25 = vadd.f32 %v16403_v29, %v1270_v35  ;;  %v16404_v46 = vmov %v16403_v29  ;;  %v1473_v18 = vrot.slane %v1399_v43, 2  ;;  %v1475_v55 = vrot.slane %v1400_v57, 2 }
 0x28d   : > { %v1369_v33 = vadd.f32 %v16404_v46, %v1271_v56  ;;  %v1364_v22 = vadd.f32 %v1322_v4, %v1266_v62  ;;  %v1365_v16 = vadd.f32 %v1322_v4, %v1267_v3  ;;  %v1366_v53 = vadd.f32 %v1323_v44, %v1268_v51  ;;  %v1591_v56 = vld [vmem:[#allocation2 + $0x1c8] sm:$0xff]  ;;  %v633_v4 = vpop.f32.mrf.mxu3 }
 0x28e   : > { %v1546_v38 = vadd.f32 %v16406_v26, %v1368_v25  ;;  %v1367_v19 = vadd.f32 %v1323_v44, %v1269_v2  ;;  %v1474_v35 = vsel %vm1051_vm2, %v1472_v48, %v1473_v18  ;;  %v1476_v17 = vrot.slane %v1401_v21, 2  ;;  %v1587_v3 = vld [vmem:[#allocation2 + $0x1a8] sm:$0x3]  ;;  %v16413_v21 = vld [vmem:[#allocation19_spill] sm:$0xff] }
 0x28f   : > { %v1542_v29 = vadd.f32 %v1472_v48, %v1364_v22  ;;  %v1543_v46 = vadd.f32 %v1474_v35, %v1365_v16  ;;  %v1547_v28 = vadd.f32 %v16407_v32, %v1369_v33  ;;  %v1625_v62 = vmul.f32 %v11913_v15, %v11791_v34 }
 0x290   : > { %v1477_v61 = vsel %vm1051_vm2, %v1475_v55, %v1476_v17  ;;  %v1544_v51 = vadd.f32 %v1475_v55, %v1366_v53  ;;  %v1626_v18 = vmul.f32 %v11913_v15, %v11780_v58  ;;  %v1627_v16 = vmul.f32 %v11913_v15, %v11838_v47  ;;  %v11927_v53 = vld [vmem:[%s16003_s7 + $0x7] ss:$0 sm:$0xff]  ;;  %v16412_v55 = vld [vmem:[#allocation44_spill] sm:$0xff] }
 0x291   : > { %v1545_v22 = vadd.f32 %v1477_v61, %v1367_v19  ;;  %v1629_v32 = vmul.f32 %v11913_v15, %v1591_v56  ;;  %v1657_v2 = vadd.f32 %v1625_v62, %v1542_v29  ;;  %v1662_v43 = vadd.f32 %v16409_v0, %v1547_v28  ;;  %16410 = vst [vmem:[#allocation41_spill] sm:$0xff] %v11927_v53  ;;  %v11934_v19 = vld [vmem:[%s16003_s7 + $0x8] ss:$0 sm:$0xff]  ;;  %v9367_v62 = vld [vmem:[#allocation6] ss:$0 sm:$0xff] }
 0x292   : > { %v1658_v25 = vadd.f32 %v1626_v18, %v1543_v46  ;;  %v1659_v33 = vadd.f32 %v1627_v16, %v1544_v51  ;;  %v1681_v34 = vmul.f32 %v11927_v53, %v11780_v58  ;;  %16411 = vst [vmem:[#allocation39_spill] sm:$0xff] %v11934_v19  ;;  %v1789_v47 = vmul.f32 %v11934_v19, %v11780_v58  ;;  %v16415_v56 = vld [vmem:[#allocation42_spill] sm:$0xff] }
 0x293   : > { %v1660_v57 = vadd.f32 %v16412_v55, %v1545_v22  ;;  %v1661_v44 = vadd.f32 %v1629_v32, %v1546_v38  ;;  %v16414_v48 = vrot.slane %v16413_v21, 1  ;;  %v1790_v35 = vmul.f32 %v11934_v19, %v1587_v3  ;;  %v11959_v32 = vld [vmem:[%s16004_s8 + $0x11] ss:$0 sm:$0xff]  ;;  %v16422_v55 = vld [vmem:[#allocation21_spill] sm:$0xff] }
 0x294   : > { %v1713_v17 = vrot.slane %v1681_v34, 1  ;;  %v16416_v29 = vrot.slane %v16415_v56, 1  ;;  %v1863_v28 = vrot.slane %v1789_v47, 2  ;;  %v634_v61 = vadd.f32 %v9367_v62, %v633_v4 }
 0x295   : > { %v1760_v26 = vadd.f32 %v16414_v48, %v1662_v43  ;;  %v11946_v51 = vadd.f32 %v11815_v45, %v11809_v36  ;;  %v16418_v38 = vmov %v16414_v48  ;;  %v1864_v22 = vrot.slane %v1790_v35, 2  ;;  %v5229_v43 = vld [vmem:[#allocation2 + $0xd0] sm:$0x3] }
 0x296   : > { %v1757_v46 = vadd.f32 %v16416_v29, %v1659_v33  ;;  %v16417_v58 = vmov %v16416_v29  ;;  %v1759_v16 = vadd.f32 %v16418_v38, %v1661_v44  ;;  %v11954_v3 = vadd.f32 %v11851_v41, %v11823_v9  ;;  %771 = vst.msk [vmem:[#allocation2 + $0x200] sm:$0xff] %vm562_vm0, %v634_v61  ;;  %v16419_v33 = vld [vmem:[#allocation40_spill] sm:$0xff]  ;;  %v16421_v9 = vld [vmem:[#allocation45_spill] sm:$0xff] }
 0x297   : > { %v1758_v18 = vadd.f32 %v16417_v58, %v1660_v57  ;;  %v5511_v36 = vmul.f32 %v11959_v32, %v11657_v5  ;;  %v1755_v45 = vadd.f32 %v1713_v17, %v1657_v2  ;;  %v1756_v0 = vadd.f32 %v1713_v17, %v1658_v25  ;;  %v16426_v17 = vld [vmem:[#allocation47_spill] sm:$0xff] }
 0x298   : > { %v1865_v4 = vsel %vm1051_vm2, %v1863_v28, %v1864_v22  ;;  %v16420_v34 = vrot.slane %v16419_v33, 2  ;;  %v16423_v57 = vrot.slane %v16422_v55, 2  ;;  %v16424_v21 = vrot.slane %v11842_v14, 1 }
 0x299   : > { %v11970_v41 = vadd.f32 %v16421_v9, %v1758_v18  ;;  %v16425_v2 = vrot.slane %v11836_v20, 1  ;;  %v11981_v48 = vadd.f32 %v1863_v28, %v1755_v45  ;;  %v11983_v35 = vadd.f32 %v1865_v4, %v1756_v0  ;;  %v12000_v20 = vld [vmem:[%s16004_s8 + $0x12] ss:$0 sm:$0xff]  ;;  %v12046_v9 = vld [vmem:[%s16004_s8 + $0x13] ss:$0 sm:$0xff] }
 0x29a   : > { %v11967_v47 = vadd.f32 %v16420_v34, %v1757_v46  ;;  %v11974_v44 = vadd.f32 %v16423_v57, %v1759_v16  ;;  %v11986_v56 = vadd.f32 %v16426_v17, %v1760_v26  ;;  %v11990_v29 = vadd.f32 %v11867_v6, %v11825_v23  ;;  %16427 = vst [vmem:[#allocation23_spill] sm:$0xff] %v12000_v20 }
 0x29b   : > { %v5409_v25 = vsel %vm3151_vm5, %v16425_v2, %v16424_v21  ;;  %v11994_v46 = vmul.f32 %v11832_v63, %v11812_v54  ;;  %v5614_v28 = vmul.f32 %v12000_v20, %v11657_v5  ;;  %v5543_v26 = vrot.slane %v5511_v36, 2  ;;  %16429 = vst [vmem:[#allocation25_spill] sm:$0xff] %v12046_v9 }
 0x29c   : > { %v5482_v62 = vadd.f32 %v5409_v25, %v11874_v30  ;;  %v5615_v61 = vmul.f32 %v12000_v20, %v5229_v43  ;;  %v12006_v23 = vmul.f32 0.70710677, %v11981_v48  ;;  %v12009_v6 = vmul.f32 0.70710677, %v11983_v35 }
 0x29d   : > { %v12013_v30 = vadd.f32 %v11872_v12, %v11827_v1  ;;  %v12016_v58 = vmul.f32 0.70710677, %v11967_v47  ;;  %v12019_v18 = vmul.f32 0.70710677, %v11970_v41  ;;  %v12022_v38 = vmul.f32 0.70710677, %v11974_v44 }
 0x29e   : > { %v12026_v16 = vmul.f32 %v11832_v63, %v11719_v8  ;;  %v12030_v22 = vmul.f32 %v11864_v50, %v11832_v63  ;;  %v16428_v1 = vmov %v16424_v21  ;;  %v12036_v36 = vmul.f32 0.70710677, %v11986_v56 }
 0x29f   : > { %v5483_v12 = vadd.f32 %v16428_v1, %v11876_v24  ;;  %v12040_v45 = vmul.f32 %v11869_v10, %v11832_v63  ;;  %v5580_v4 = vadd.f32 %v5543_v26, %v5482_v62  ;;  %v5683_v33 = vrot.slane %v5614_v28, 3 }
 0x2a0   : > { %v5684_v34 = vrot.slane %v5615_v61, 3  ;;  %v5792_v14 = vmul.f32 %v12046_v9, %v11657_v5  ;;  %v2093_v24 = vand.u32 2147483647, %v12006_v23  ;;  %v2094_v55 = vand.u32 2147483647, %v12009_v6 }
 0x2a1   : > { %v5793_v63 = vmul.f32 %v12046_v9, %v5229_v43  ;;  %v2095_v57 = vand.u32 2147483647, %v12016_v58  ;;  %v12055_v21 = vand.u32 2147483647, %v12019_v18  ;;  %v12058_v2 = vand.u32 2147483647, %v12022_v38 }
 0x2a2   : > { %v5581_v25 = vadd.f32 %v5543_v26, %v5483_v12  ;;  %v12061_v17 = vand.u32 2147483647, %v12036_v36  ;;  %v2125_v62 = vmul.f32 0.3275911, %v2093_v24  ;;  %v2126_v5 = vmul.f32 0.3275911, %v2094_v55 }
 0x2a3   : > { %v12065_v28 = vmul.f32 %v11959_v32, %v11719_v8  ;;  %v2127_v61 = vmul.f32 0.3275911, %v2095_v57  ;;  %v2128_v43 = vmul.f32 0.3275911, %v12055_v21  ;;  %v2129_v1 = vmul.f32 0.3275911, %v12058_v2 }
 0x2a4   : > { %v5685_v0 = vsel %vm3428_vm6, %v5683_v33, %v5684_v34  ;;  %v2130_v37 = vmul.f32 0.3275911, %v12061_v17  ;;  %v2157_v13 = vadd.f32 1.0, %v2125_v62  ;;  %v2158_v26 = vadd.f32 1.0, %v2126_v5 }
 0x2a5   : > { %v5861_v12 = vrot.slane %v5792_v14, 4  ;;  %v5862_v31 = vrot.slane %v5793_v63, 4  ;;  %v2159_v39 = vadd.f32 1.0, %v2127_v61  ;;  %v2160_v11 = vadd.f32 1.0, %v2128_v43 }
 0x2a6   : > { %v5758_v7 = vadd.f32 %v5683_v33, %v5580_v4  ;;  %v5759_v42 = vadd.f32 %v5685_v0, %v5581_v25  ;;  %v2161_v49 = vadd.f32 1.0, %v2129_v1  ;;  %9120 = vrcp.f32 %v2157_v13  ;;  %v12082_v13 = vld [vmem:[%s16004_s8 + $0x14] ss:$0 sm:$0xff]  ;;  %v820_v4 = vld [vmem:[#allocation2 + $0x1f0] sm:$0x3] }
 0x2a7   : > { %v2162_v19 = vadd.f32 1.0, %v2130_v37  ;;  %9122 = vrcp.f32 %v2158_v26  ;;  %v12076_v62 = vmul.f32 %v11959_v32, %v11869_v10  ;;  %v2509_v14 = vsub.f32 0.0, %v2093_v24 }
 0x2a8   : > { %9124 = vrcp.f32 %v2159_v39  ;;  %v5863_v63 = vsel %vm3607_vm9, %v5861_v12, %v5862_v31  ;;  %v12086_v0 = vmul.f32 %v12082_v13, %v11812_v54  ;;  %v2510_v37 = vsub.f32 0.0, %v2094_v55  ;;  %v12095_v31 = vld [vmem:[%s16004_s8 + $0x15] ss:$0 sm:$0xff] }
 0x2a9   : > { %16430 = vst [vmem:[#allocation44_spill] sm:$0xff] %v12076_v62  ;;  %9126 = vrcp.f32 %v2160_v11  ;;  %v12088_v33 = vadd.f32 %v5861_v12, %v5758_v7  ;;  %v12090_v32 = vadd.f32 %v5863_v63, %v5759_v42  ;;  %v2511_v39 = vsub.f32 0.0, %v2095_v57 }
 0x2aa   : > { %9128 = vrcp.f32 %v2161_v49  ;;  %16431 = vst [vmem:[#allocation19_spill] sm:$0xff] %v12095_v31  ;;  %v12099_v25 = vmul.f32 %v12095_v31, %v11812_v54  ;;  %v2512_v11 = vsub.f32 0.0, %v12055_v21  ;;  %v2513_v5 = vsub.f32 0.0, %v12058_v2 }
 0x2ab   : > { %9130 = vrcp.f32 %v2162_v19  ;;  %v12107_v49 = vmul.f32 %v12095_v31, %v11719_v8  ;;  %v2514_v42 = vsub.f32 0.0, %v12061_v17  ;;  %v2541_v61 = vmul.f32 %v2509_v14, %v2093_v24 }
 0x2ac   : > { %v12103_v7 = vpop.eup %9120  ;;  %v12111_v43 = vmul.f32 %v11796_v40, %v820_v4  ;;  %v12116_v54 = vmul.f32 0.5, %v11967_v47  ;;  %v12119_v19 = vmul.f32 0.5, %v11986_v56  ;;  %v2542_v12 = vmul.f32 %v2510_v37, %v2094_v55 }
 0x2ad   : > { %v12113_v1 = vpop.eup %9122  ;;  %v2221_v26 = vmul.f32 1.0614054, %v12103_v7  ;;  %v12125_v9 = vmul.f32 0.5, %v11981_v48  ;;  %v12128_v24 = vmul.f32 0.5, %v11983_v35  ;;  %v2543_v14 = vmul.f32 %v2511_v39, %v2095_v57 }
 0x2ae   : > { %v12122_v63 = vpop.eup %9124  ;;  %v2222_v40 = vmul.f32 1.0614054, %v12113_v1  ;;  %v2544_v34 = vmul.f32 %v2512_v11, %v12055_v21  ;;  %v2545_v55 = vmul.f32 %v2513_v5, %v12058_v2  ;;  %v2546_v35 = vmul.f32 %v2514_v42, %v12061_v17 }
 0x2af   : > { %v12131_v4 = vpop.eup %9126  ;;  %v2223_v47 = vmul.f32 1.0614054, %v12122_v63  ;;  %v2253_v56 = vadd.f32 -1.4531521, %v2221_v26  ;;  %v2593_v31 = vmul.f32 1.442695, %v2541_v61 }
 0x2b0   : > { %v12136_v37 = vpop.eup %9128  ;;  %v2224_v48 = vmul.f32 1.0614054, %v12131_v4  ;;  %v2254_v50 = vadd.f32 -1.4531521, %v2222_v40  ;;  %v2595_v26 = vmul.f32 1.442695, %v2542_v12 }
 0x2b1   : > { %v12140_v53 = vpop.eup %9130  ;;  %v2225_v57 = vmul.f32 1.0614054, %v12136_v37  ;;  %v2255_v39 = vadd.f32 -1.4531521, %v2223_v47  ;;  %v2285_v15 = vmul.f32 %v12103_v7, %v2253_v56  ;;  %v2597_v5 = vmul.f32 1.442695, %v2543_v14 }
 0x2b2   : > { %v2226_v21 = vmul.f32 1.0614054, %v12140_v53  ;;  %v2256_v11 = vadd.f32 -1.4531521, %v2224_v48  ;;  %v2286_v2 = vmul.f32 %v12113_v1, %v2254_v50  ;;  %v2599_v17 = vmul.f32 1.442695, %v2544_v34 }
 0x2b3   : > { %v2257_v10 = vadd.f32 -1.4531521, %v2225_v57  ;;  %v2287_v40 = vmul.f32 %v12122_v63, %v2255_v39  ;;  %v2317_v20 = vadd.f32 1.4214138, %v2285_v15  ;;  %vm2031_vm15 = vcmp.ge.f32.partialorder %v12016_v58, 0.0 }
 0x2b4   : > { %v2258_v42 = vadd.f32 -1.4531521, %v2226_v21  ;;  %v2288_v61 = vmul.f32 %v12131_v4, %v2256_v11  ;;  %v2318_v47 = vadd.f32 1.4214138, %v2286_v2  ;;  %v2601_v62 = vmul.f32 1.442695, %v2545_v55 }
 0x2b5   : > { %v2289_v12 = vmul.f32 %v12136_v37, %v2257_v10  ;;  %v2319_v56 = vadd.f32 1.4214138, %v2287_v40  ;;  %v2349_v48 = vmul.f32 %v12103_v7, %v2317_v20  ;;  %v2603_v60 = vmul.f32 1.442695, %v2546_v35 }
 0x2b6   : > { %v2290_v50 = vmul.f32 %v12140_v53, %v2258_v42  ;;  %v2320_v14 = vadd.f32 1.4214138, %v2288_v61  ;;  %v2350_v57 = vmul.f32 %v12113_v1, %v2318_v47  ;;  %9132 = vpow2.f32 %v2593_v31 }
 0x2b7   : > { %v2321_v15 = vadd.f32 1.4214138, %v2289_v12  ;;  %v2351_v34 = vmul.f32 %v12122_v63, %v2319_v56  ;;  %v2381_v39 = vadd.f32 -0.28449672, %v2349_v48  ;;  %9134 = vpow2.f32 %v2595_v26 }
 0x2b8   : > { %vm2032_vm1 = vcmp.ge.f32.partialorder %v12019_v18, 0.0  ;;  %v2322_v55 = vadd.f32 1.4214138, %v2290_v50  ;;  %v2352_v10 = vmul.f32 %v12131_v4, %v2320_v14  ;;  %v2382_v21 = vadd.f32 -0.28449672, %v2350_v57 }
 0x2b9   : > { %9136 = vpow2.f32 %v2597_v5  ;;  %v2353_v20 = vmul.f32 %v12136_v37, %v2321_v15  ;;  %v2383_v35 = vadd.f32 -0.28449672, %v2351_v34  ;;  %v2413_v11 = vmul.f32 %v12103_v7, %v2381_v39 }
 0x2ba   : > { %9138 = vpow2.f32 %v2599_v17  ;;  %v2354_v31 = vmul.f32 %v12140_v53, %v2322_v55  ;;  %v2384_v2 = vadd.f32 -0.28449672, %v2352_v10  ;;  %v2414_v40 = vmul.f32 %v12113_v1, %v2382_v21 }
 0x2bb   : > { %9140 = vpow2.f32 %v2601_v62  ;;  %v2385_v26 = vadd.f32 -0.28449672, %v2353_v20  ;;  %v2415_v42 = vmul.f32 %v12122_v63, %v2383_v35  ;;  %v2445_v61 = vadd.f32 0.2548296, %v2413_v11 }
 0x2bc   : > { %9142 = vpow2.f32 %v2603_v60  ;;  %v9133_v47 = vpop.eup %9132  ;;  %vm2033_vm3 = vcmp.ge.f32.partialorder %v12022_v38, 0.0  ;;  %v2386_v5 = vadd.f32 -0.28449672, %v2354_v31  ;;  %v2416_v12 = vmul.f32 %v12131_v4, %v2384_v2 }
 0x2bd   : > { %v2446_v56 = vadd.f32 0.2548296, %v2414_v40  ;;  %v9135_v48 = vpop.eup %9134  ;;  %vm2029_vm4 = vcmp.ge.f32.partialorder %v12006_v23, 0.0  ;;  %v2417_v17 = vmul.f32 %v12136_v37, %v2385_v26  ;;  %v2447_v50 = vadd.f32 0.2548296, %v2415_v42 }
 0x2be   : > { %v2477_v62 = vmul.f32 %v12103_v7, %v2445_v61  ;;  %vm2030_vm10 = vcmp.ge.f32.partialorder %v12009_v6, 0.0  ;;  %v2418_v60 = vmul.f32 %v12140_v53, %v2386_v5  ;;  %v2448_v57 = vadd.f32 0.2548296, %v2416_v12 }
 0x2bf   : > { %v9137_v14 = vpop.eup %9136  ;;  %v2478_v15 = vmul.f32 %v12113_v1, %v2446_v56  ;;  %v2063_v39 = vsel %vm2031_vm15, 1.0, %v16362_v52  ;;  %v2449_v55 = vadd.f32 0.2548296, %v2417_v17  ;;  %v2479_v23 = vmul.f32 %v12122_v63, %v2447_v50 }
 0x2c0   : > { %v9139_v34 = vpop.eup %9138  ;;  %v2637_v10 = vmul.f32 %v9133_v47, %v2477_v62  ;;  %v2061_v7 = vsel %vm2029_vm4, 1.0, %v16362_v52  ;;  %v2450_v20 = vadd.f32 0.2548296, %v2418_v60  ;;  %v2480_v6 = vmul.f32 %v12131_v4, %v2448_v57  ;;  %v12187_v60 = vpop.f32.mrf.mxu1 }
 0x2c1   : > { %v9141_v21 = vpop.eup %9140  ;;  %v2638_v35 = vmul.f32 %v9135_v48, %v2478_v15  ;;  %v2062_v31 = vsel %vm2030_vm10, 1.0, %v16362_v52  ;;  %v2481_v1 = vmul.f32 %v12136_v37, %v2449_v55  ;;  %v2639_v2 = vmul.f32 %v9137_v14, %v2479_v23 }
 0x2c2   : > { %v9143_v11 = vpop.eup %9142  ;;  %v2669_v40 = vsub.f32 1.0, %v2637_v10  ;;  %vm2034_vm11 = vcmp.ge.f32.partialorder %v12036_v36, 0.0  ;;  %v2482_v58 = vmul.f32 %v12140_v53, %v2450_v20  ;;  %v2640_v63 = vmul.f32 %v9139_v34, %v2480_v6 }
 0x2c3   : > { %v2670_v26 = vsub.f32 1.0, %v2638_v35  ;;  %v2064_v42 = vsel %vm2032_vm1, 1.0, %v16362_v52  ;;  %v2641_v61 = vmul.f32 %v9141_v21, %v2481_v1  ;;  %v2671_v4 = vsub.f32 1.0, %v2639_v2 }
 0x2c4   : > { %v2701_v47 = vmul.f32 %v2669_v40, %v2061_v7  ;;  %v2065_v5 = vsel %vm2033_vm3, 1.0, %v16362_v52  ;;  %v2642_v37 = vmul.f32 %v9143_v11, %v2482_v58  ;;  %v2672_v12 = vsub.f32 1.0, %v2640_v63 }
 0x2c5   : > { %v2702_v56 = vmul.f32 %v2670_v26, %v2062_v31  ;;  %v2066_v36 = vsel %vm2034_vm11, 1.0, %v16362_v52  ;;  %v2673_v48 = vsub.f32 1.0, %v2641_v61  ;;  %v2703_v53 = vmul.f32 %v2671_v4, %v2063_v39  ;;  %v12239_v26 = vld [vmem:[#allocation2 + $0x1f8] sm:$0xff] }
 0x2c6   : > { %v2733_v17 = vadd.f32 1.0, %v2701_v47  ;;  %v1968_v50 = vmul.f32 0.5, %v11970_v41  ;;  %v2674_v62 = vsub.f32 1.0, %v2642_v37  ;;  %v2704_v18 = vmul.f32 %v2672_v12, %v2064_v42  ;;  %v12241_v42 = vld [vmem:[#allocation2 + $0x200] sm:$0xff] }
 0x2c7   : > { %v2734_v14 = vadd.f32 1.0, %v2702_v56  ;;  %v1969_v57 = vmul.f32 0.5, %v11974_v44  ;;  %v2705_v15 = vmul.f32 %v2673_v48, %v2065_v5  ;;  %v2735_v38 = vadd.f32 1.0, %v2703_v53 }
 0x2c8   : > { %v12191_v34 = vmul.f32 %v2733_v17, %v12125_v9  ;;  %v2706_v55 = vmul.f32 %v2674_v62, %v2066_v36  ;;  %v2736_v23 = vadd.f32 1.0, %v2704_v18  ;;  %v1098_v39 = vrot.slane %v12111_v43, 2  ;;  %v16447_v36 = vld [vmem:[#allocation50_spill] sm:$0xff] }
 0x2c9   : > { %v12194_v10 = vmul.f32 %v2734_v14, %v12128_v24  ;;  %v16434_v41 = vrot.slane %v12026_v16, 1  ;;  %v16435_v21 = vrot.slane %v11994_v46, 1  ;;  %v16436_v44 = vrot.slane %v12040_v45, 1  ;;  %v5976_v16 = vld [vmem:[#allocation2 + $0xe8] sm:$0x3]  ;;  %v12277_v14 = vpop.f32.mrf.mxu1 }
 0x2ca   : > { %16432 = vst [vmem:[#allocation42_spill] sm:$0xff] %v12191_v34  ;;  %v16437_v20 = vrot.slane %v12030_v22, 1  ;;  %v2737_v6 = vadd.f32 1.0, %v2705_v15  ;;  %v12208_v35 = vmul.f32 %v2735_v38, %v12116_v54  ;;  %v6020_v46 = vmul.f32 %v12082_v13, %v11719_v8  ;;  %v9374_v45 = vld [vmem:[%s16004_s8 + $0x17] ss:$0 sm:$0xff] }
 0x2cb   : > { %16433 = vst [vmem:[#allocation40_spill] sm:$0xff] %v12194_v10  ;;  %v5412_v7 = vsel %vm3151_vm5, %v16435_v21, %v16434_v41  ;;  %v16439_v43 = vmov %v16434_v41  ;;  %v2738_v11 = vadd.f32 1.0, %v2706_v55  ;;  %v12217_v31 = vmul.f32 %v2736_v23, %v1968_v50  ;;  %v16449_v55 = vld [vmem:[#allocation51_spill] sm:$0xff] }
 0x2cc   : > { %v5415_v9 = vsel %vm3151_vm5, %v16437_v20, %v16436_v44  ;;  %16438 = vst [vmem:[#allocation45_spill] sm:$0xff] %v12208_v35  ;;  %v5485_v24 = vadd.f32 %v16439_v43, %v11954_v3  ;;  %v5484_v22 = vadd.f32 %v5412_v7, %v11946_v51  ;;  %v6154_v54 = vrot.slane %v12099_v25, 1  ;;  %v1208_v3 = vld [vmem:[#allocation2 + $0x1f0] sm:$0x3]  ;;  %v12289_v20 = vld [vmem:[#allocation2 + $0x100] sm:$0x3] }
 0x2cd   : > { %2959 = vst.msk [vmem:[#allocation2 + $0x181] sm:$0x80] %vm16170_vm7, %v12191_v34  ;;  %v6155_v1 = vrot.slane %v12107_v49, 1  ;;  %v12224_v2 = vmul.f32 %v2737_v6, %v1969_v57  ;;  %v6051_v40 = vadd.f32 %v12086_v0, %v12088_v33  ;;  %v6052_v58 = vadd.f32 %v6020_v46, %v12090_v32  ;;  %v16443_v51 = vld [vmem:[#allocation27_spill] sm:$0xff]  ;;  %v1211_v32 = vld [vmem:[#allocation2 + $0x208] sm:$0x3] }
 0x2ce   : > { %16440 = vst [vmem:[#allocation21_spill] sm:$0xff] %v12217_v31  ;;  %v12232_v63 = vmul.f32 %v2738_v11, %v12119_v19  ;;  %v16444_v25 = vrot.slane %v16443_v51, 2  ;;  %v5486_v61 = vadd.f32 %v5415_v9, %v11990_v29  ;;  %v16445_v0 = vmov %v16436_v44  ;;  %v12257_v29 = vld [vmem:[%s16004_s8 + $0x16] ss:$0 sm:$0xff]  ;;  %v16450_v41 = vld [vmem:[#allocation23_spill] sm:$0xff] }
 0x2cf   : > { %2960 = vst.msk [vmem:[#allocation2 + $0x189] sm:$0x7f] %vm16169_vm8, %v12194_v10  ;;  %v5487_v33 = vadd.f32 %v16445_v0, %v12013_v30  ;;  %v1244_v19 = vmul.f32 %v11847_v27, %v12239_v26  ;;  %v1295_v4 = vmul.f32 %v11885_v59, %v12241_v42  ;;  %v5544_v47 = vrot.slane %v12065_v28, 2  ;;  %v16446_v59 = vld [vmem:[#allocation49_spill] sm:$0xff]  ;;  %v12268_v28 = vld [vmem:[#allocation2 + $0xe8] sm:$0x3] }
 0x2d0   : > { %16441 = vst [vmem:[#allocation47_spill] sm:$0xff] %v12224_v2  ;;  %v1099_v49 = vsel %vm1051_vm2, %v16444_v25, %v1098_v39  ;;  %v6258_v30 = vmul.f32 %v12257_v29, %v11719_v8  ;;  %v6361_v5 = vmul.f32 %v9374_v45, %v11719_v8  ;;  %v1407_v37 = vmul.f32 %v16446_v59, %v1208_v3  ;;  %v16448_v57 = vld [vmem:[#allocation44_spill] sm:$0xff] }
 0x2d1   : > { %2961 = vst.msk [vmem:[#allocation2 + $0x199] sm:$0x80] %vm16170_vm7, %v12208_v35  ;;  %v6156_v12 = vsel %vm3151_vm5, %v6154_v54, %v6155_v1  ;;  %v6362_v56 = vmul.f32 %v9374_v45, %v5976_v16  ;;  %v1163_v48 = vadd.f32 %v1099_v49, %v16447_v36  ;;  %v1245_v53 = vmul.f32 %v11847_v27, %v12241_v42  ;;  %v9375_v43 = vld [vmem:[%s16004_s8 + $0x18] ss:$0 sm:$0xff]  ;;  %v12308_v36 = vpop.f32.mrf.mxu1 }
 0x2d2   : > { %16442 = vst [vmem:[#allocation73_spill] sm:$0xff] %v12232_v63  ;;  %v6229_v17 = vadd.f32 %v6156_v12, %v6051_v40  ;;  %v6230_v50 = vadd.f32 %v6155_v1, %v6052_v58  ;;  %v1408_v62 = vmul.f32 %v16446_v59, %v12241_v42  ;;  %v1409_v18 = vmul.f32 %v16446_v59, %v1211_v32  ;;  %v16451_v0 = vld [vmem:[#allocation72_spill] sm:$0xff] }
 0x2d3   : > { %2962 = vst.msk [vmem:[#allocation2 + $0x1a1] sm:$0x7f] %vm16169_vm8, %v12217_v31  ;;  %v5545_v15 = vrot.slane %v16448_v57, 2  ;;  %v5582_v38 = vadd.f32 %v5544_v47, %v5484_v22  ;;  %v1276_v23 = vadd.f32 %v1244_v19, %v16449_v55  ;;  %v1327_v39 = vrot.slane %v1295_v4, 1  ;;  %v16452_v4 = vld [vmem:[#allocation24_spill] sm:$0xff]  ;;  %v16456_v55 = vld [vmem:[#allocation41_spill] sm:$0xff] }
 0x2d4   : > { %2963 = vst.msk [vmem:[#allocation2 + $0x1b1] sm:$0x80] %vm16170_vm7, %v12224_v2  ;;  %v12283_v21 = vmul.f32 %v16450_v41, %v11719_v8  ;;  %v12287_v27 = vmul.f32 %v16450_v41, %v12268_v28  ;;  %v6290_v7 = vrot.slane %v6258_v30, 2  ;;  %v1485_v44 = vrot.slane %v1407_v37, 2 }
 0x2d5   : > { %2964 = vst.msk [vmem:[#allocation2 + $0x1b9] sm:$0x7f] %vm16169_vm8, %v12232_v63  ;;  %v6430_v9 = vrot.slane %v6361_v5, 3  ;;  %v6431_v6 = vrot.slane %v6362_v56, 3  ;;  %v6539_v46 = vmul.f32 %v9375_v43, %v11719_v8  ;;  %v1277_v11 = vadd.f32 %v1245_v53, %v1163_v48  ;;  %v1599_v56 = vld [vmem:[#allocation2 + $0x208] sm:$0x3] }
 0x2d6   : > { %v6327_v22 = vadd.f32 %v6290_v7, %v6229_v17  ;;  %v6328_v54 = vadd.f32 %v6290_v7, %v6230_v50  ;;  %v1487_v1 = vrot.slane %v1408_v62, 2  ;;  %v1488_v3 = vrot.slane %v1409_v18, 2  ;;  %v16454_v53 = vld [vmem:[#allocation29_spill] sm:$0xff]  ;;  %v16455_v62 = vld [vmem:[#allocation43_spill] sm:$0xff] }
 0x2d7   : > { %v5583_v40 = vadd.f32 %v5544_v47, %v5485_v24  ;;  %v5584_v58 = vadd.f32 %v5545_v15, %v5486_v61  ;;  %v6540_v51 = vmul.f32 %v9375_v43, %v5976_v16  ;;  %v1374_v25 = vadd.f32 %v1327_v39, %v1276_v23  ;;  %v1600_v61 = vld [vmem:[#allocation2 + $0x210] sm:$0xff] }
 0x2d8   : > { %v12295_v49 = vadd.f32 %v5545_v15, %v5487_v33  ;;  %v5618_v32 = vmul.f32 %v16450_v41, %v16451_v0  ;;  %v5619_v19 = vmul.f32 %v16450_v41, %v12289_v20  ;;  %v16453_v30 = vrot.slane %v16452_v4, 2  ;;  %v1601_v33 = vld [vmem:[#allocation2 + $0x218] sm:$0xff] }
 0x2d9   : > { %v5686_v45 = vrot.slane %v12283_v21, 3  ;;  %v5687_v5 = vrot.slane %v12287_v27, 3  ;;  %v6432_v24 = vsel %vm3428_vm6, %v6430_v9, %v6431_v6  ;;  %v1375_v16 = vadd.f32 %v1327_v39, %v1277_v11  ;;  %v16457_v27 = vld [vmem:[#allocation39_spill] sm:$0xff]  ;;  %v16458_v11 = vld [vmem:[#allocation25_spill] sm:$0xff] }
 0x2da   : > { %v1486_v8 = vsel %vm1051_vm2, %v16453_v30, %v1485_v44  ;;  %v6505_v47 = vadd.f32 %v6430_v9, %v6327_v22  ;;  %v6506_v59 = vadd.f32 %v6432_v24, %v6328_v54  ;;  %v6608_v37 = vrot.slane %v6539_v46, 4  ;;  %v9376_v46 = vld [vmem:[#allocation2 + $0xe0] sm:$0xff] }
 0x2db   : > { %v1489_v12 = vsel %vm1051_vm2, %v1487_v1, %v1488_v3  ;;  %v6609_v48 = vrot.slane %v6540_v51, 4  ;;  %v1551_v17 = vadd.f32 %v1486_v8, %v16454_v53  ;;  %v1552_v50 = vadd.f32 %v1487_v1, %v1374_v25  ;;  %v1602_v3 = vld [vmem:[#allocation2 + $0x220] sm:$0x3]  ;;  %v16459_v51 = vld [vmem:[#allocation52_spill] sm:$0xff]  ;;  %v12345_v53 = vld [vmem:[#allocation8] ss:$0 sm:$0xff] }
 0x2dc   : > { %v1633_v18 = vmul.f32 %v16455_v62, %v12239_v26  ;;  %v1634_v57 = vmul.f32 %v16455_v62, %v12241_v42  ;;  %v1635_v15 = vmul.f32 %v16455_v62, %v1600_v61  ;;  %v1685_v23 = vmul.f32 %v16456_v55, %v12241_v42 }
 0x2dd   : > { %v1686_v39 = vmul.f32 %v16456_v55, %v1601_v33  ;;  %v1553_v41 = vadd.f32 %v1489_v12, %v1375_v16  ;;  %v1636_v21 = vmul.f32 %v16455_v62, %v1601_v33  ;;  %v1797_v7 = vmul.f32 %v16457_v27, %v12241_v42  ;;  %v16461_v62 = vld [vmem:[#allocation48_spill] sm:$0xff] }
 0x2de   : > { %v1798_v44 = vmul.f32 %v16457_v27, %v1599_v56  ;;  %v5689_v9 = vrot.slane %v5618_v32, 3  ;;  %v5690_v26 = vrot.slane %v5619_v19, 3  ;;  %v5760_v6 = vadd.f32 %v5686_v45, %v5582_v38 }
 0x2df   : > { %v12323_v43 = vadd.f32 %v6608_v37, %v6505_v47  ;;  %v5794_v22 = vmul.f32 %v9376_v46, %v16458_v11  ;;  %v5795_v54 = vmul.f32 %v16458_v11, %v12268_v28  ;;  %v6610_v1 = vsel %vm3607_vm9, %v6608_v37, %v6609_v48  ;;  %v12338_v37 = vpop.f32.mrf.mxu1 }
 0x2e0   : > { %v1665_v25 = vadd.f32 %v1633_v18, %v16459_v51  ;;  %v1666_v4 = vadd.f32 %v1634_v57, %v1551_v17  ;;  %v1667_v42 = vadd.f32 %v1635_v15, %v1552_v50  ;;  %v1717_v30 = vrot.slane %v1685_v23, 1  ;;  %v16462_v18 = vld [vmem:[#allocation19_spill] sm:$0xff] }
 0x2e1   : > { %v1718_v8 = vrot.slane %v1686_v39, 1  ;;  %v12330_v32 = vadd.f32 %v6610_v1, %v6506_v59  ;;  %v1668_v38 = vadd.f32 %v1636_v21, %v1553_v41  ;;  %v1875_v19 = vrot.slane %v1797_v7, 2 }
 0x2e2   : > { %v1876_v24 = vrot.slane %v1798_v44, 2  ;;  %v5688_v16 = vsel %vm3428_vm6, %v5686_v45, %v5687_v5  ;;  %v12334_v61 = vmul.f32 0.70710677, %v12323_v43  ;;  %v1799_v28 = vmul.f32 %v16457_v27, %v1601_v33 }
 0x2e3   : > { %16460 = vst [vmem:[#allocation27_spill] sm:$0xff] %v12330_v32  ;;  %v1800_v47 = vmul.f32 %v16457_v27, %v1602_v3  ;;  %v12341_v12 = vsel %vm3428_vm6, %v5689_v9, %v5690_v26  ;;  %v12343_v56 = vadd.f32 %v5689_v9, %v5584_v58  ;;  %v5864_v59 = vrot.slane %v5794_v22, 4  ;;  %v16464_v22 = vld [vmem:[#allocation61_spill] sm:$0xff] }
 0x2e4   : > { %v5865_v48 = vrot.slane %v5795_v54, 4  ;;  %v5761_v17 = vadd.f32 %v5688_v16, %v5583_v40  ;;  %v1763_v45 = vadd.f32 %v1717_v30, %v1665_v25  ;;  %v1764_v5 = vadd.f32 %v1717_v30, %v1666_v4 }
 0x2e5   : > { %v1765_v50 = vadd.f32 %v1718_v8, %v1667_v42  ;;  %v6087_v33 = vmul.f32 %v16462_v18, %v16461_v62  ;;  %v12350_v57 = vmul.f32 0.70710677, %v12330_v32  ;;  %v1766_v15 = vadd.f32 %v1718_v8, %v1668_v38 }
 0x2e6   : > { %v1877_v55 = vsel %vm1051_vm2, %v1875_v19, %v1876_v24  ;;  %v12355_v58 = vmul.f32 %v16462_v18, %v16451_v0  ;;  %v6843_v23 = vand.u32 2147483647, %v12334_v61  ;;  %v1878_v39 = vrot.slane %v1799_v28, 2 }
 0x2e7   : > { %16463 = vst [vmem:[#allocation49_spill] sm:$0xff] %v12350_v57  ;;  %v1879_v40 = vrot.slane %v1800_v47, 2  ;;  %v5866_v41 = vsel %vm3607_vm9, %v5864_v59, %v5865_v48  ;;  %v5938_v21 = vadd.f32 %v5864_v59, %v5760_v6  ;;  %v6021_v27 = vmul.f32 %v12082_v13, %v16461_v62  ;;  %v12380_v42 = vpop.f32.mrf.mxu1 }
 0x2e8   : > { %v658_v7 = vadd.f32 %v12345_v53, %v12187_v60  ;;  %v12364_v9 = vadd.f32 %v1875_v19, %v1763_v45  ;;  %v12366_v26 = vadd.f32 %v1877_v55, %v1764_v5  ;;  %v12368_v46 = vadd.f32 %v1878_v39, %v1765_v50 }
 0x2e9   : > { %v1880_v44 = vsel %vm1051_vm2, %v1878_v39, %v1879_v40  ;;  %vm6772_vm12 = vcmp.ge.f32.partialorder %v16464_v22, 0.0  ;;  %v6844_v54 = vand.u32 2147483647, %v12350_v57  ;;  %v6157_v6 = vrot.slane %v6087_v33, 1 }
 0x2ea   : > { %v12372_v1 = vadd.f32 %v1880_v44, %v1766_v15  ;;  %v6158_v3 = vrot.slane %v12355_v58, 1  ;;  %v6875_v51 = vmul.f32 0.3275911, %v6843_v23  ;;  %v12376_v60 = vmul.f32 0.70710677, %v12364_v9 }
 0x2eb   : > { %v16119_v25 = vmov 2   ;;  %v16117_v4 = vmov 1   ;;  %v6022_v30 = vmul.f32 %v12082_v13, %v16451_v0  ;;  %v12385_v8 = vmul.f32 0.70710677, %v12366_v26 }
 0x2ec   : > { %8969 = vset.pattern.permute.xlu2 %v16119_v25  ;;  %8967 = vset.pattern.permute.xlu0 %v16117_v4  ;;  %v12388_v38 = vmul.f32 0.70710677, %v12368_v46  ;;  %v5939_v19 = vadd.f32 %v5866_v41, %v5761_v17  ;;  %v7259_v24 = vsub.f32 0.0, %v6843_v23  ;;  %v12391_v16 = vmul.f32 0.70710677, %v12372_v1 }
 0x2ed   : > { %7995 = vperm.xlu2 %8969, %v658_v7   ;;  %7538 = vperm.xlu0 %8967, %v658_v7   ;;  %v12394_v28 = vand.u32 2147483647, %v12376_v60  ;;  %v16125_v47 = vmov 0   ;;  %v12399_v13 = vmul.f32 %v16458_v11, %v16451_v0  ;;  %v12403_v59 = vmul.f32 %v12257_v29, %v16451_v0 }
 0x2ee   : > { %8968 = vset.pattern.permute.xlu1 %v16125_v47  ;;  %v7260_v48 = vsub.f32 0.0, %v6844_v54  ;;  %v12406_v17 = vand.u32 2147483647, %v12385_v8  ;;  %v6053_v45 = vadd.f32 %v6021_v27, %v5938_v21  ;;  %v6159_v5 = vsel %vm3151_vm5, %v6157_v6, %v6158_v3 }
 0x2ef   : > { %16465 = vst [vmem:[#allocation50_spill] sm:$0xff] %v12403_v59  ;;  %2779 = vperm.xlu1 %8968, %v658_v7   ;;  %v6907_v50 = vadd.f32 1.0, %v6875_v51  ;;  %v12410_v62 = vand.u32 2147483647, %v12388_v38  ;;  %v6876_v18 = vmul.f32 0.3275911, %v6844_v54  ;;  %v660_v29 = vadd.f32 %v12345_v53, %v12277_v14 }
 0x2f0   : > { %v12413_v11 = vand.u32 2147483647, %v12391_v16  ;;  %v2133_v33 = vmul.f32 0.3275911, %v12394_v28  ;;  %v6054_v0 = vadd.f32 %v6022_v30, %v5939_v19  ;;  %v7291_v15 = vmul.f32 %v7259_v24, %v6843_v23  ;;  %v12423_v23 = vpop.f32.mrf.mxu1  ;;  %v16467_v30 = vld [vmem:[#allocation71_spill] sm:$0xff] }
 0x2f1   : > { %v2134_v55 = vmul.f32 0.3275911, %v12406_v17  ;;  %v2135_v58 = vmul.f32 0.3275911, %v12410_v62  ;;  %v16115_v39 = vrot.slane %v12403_v59, 2  ;;  %v7292_v40 = vmul.f32 %v7260_v48, %v6844_v54  ;;  %v16468_v19 = vld [vmem:[#allocation55_spill] sm:$0xff] }
 0x2f2   : > { %v2136_v41 = vmul.f32 0.3275911, %v12413_v11  ;;  %v2165_v21 = vadd.f32 1.0, %v2133_v33  ;;  %v6231_v27 = vadd.f32 %v6159_v5, %v6053_v45  ;;  %9144 = vrcp.f32 %v6907_v50 }
 0x2f3   : > { %v2166_v7 = vadd.f32 1.0, %v2134_v55  ;;  %v2167_v44 = vadd.f32 1.0, %v2135_v58  ;;  %v16116_v6 = vrot.slane %v12399_v13, 4  ;;  %v6908_v51 = vadd.f32 1.0, %v6876_v18  ;;  %v12466_v55 = vld [vmem:[#allocation2 + $0x198] sm:$0xff] }
 0x2f4   : > { %v2168_v14 = vadd.f32 1.0, %v2136_v41  ;;  %9146 = vrcp.f32 %v2165_v21  ;;  %v12428_v54 = vsel %vm6772_vm12, 1.0, %v16362_v52  ;;  %v12432_v24 = vmul.f32 %v16468_v19, %v16467_v30 }
 0x2f5   : > { %7999 = vperm.xlu2 %8969, %v660_v29   ;;  %7541 = vperm.xlu0 %8967, %v660_v29   ;;  %16466 = vst [vmem:[#allocation44_spill] sm:$0xff] %v12428_v54  ;;  %v7333_v48 = vmul.f32 1.442695, %v7291_v15  ;;  %9148 = vrcp.f32 %v2166_v7  ;;  %v12436_v45 = vadd.f32 %v12341_v12, %v12295_v49  ;;  %v12441_v5 = vadd.f32 %v16116_v6, %v12343_v56  ;;  %v3009_v49 = vld [vmem:[#allocation2 + $0x190] sm:$0x3]  ;;  %v9378_v56 = vld [vmem:[#allocation2 + $0x180] sm:$0xff] }
 0x2f6   : > { %16469 = vst [vmem:[#allocation51_spill] sm:$0xff] %v12432_v24  ;;  %v7335_v50 = vmul.f32 1.442695, %v7292_v40  ;;  %9150 = vrcp.f32 %v2167_v44  ;;  %v12443_v22 = vadd.f32 %v6158_v3, %v6054_v0  ;;  %v12447_v18 = vadd.f32 %v16115_v39, %v6231_v27  ;;  %v12453_v12 = vld [vmem:[%s16004_s8 + $0x1] ss:$0 sm:$0xff] }
 0x2f7   : > { %2783 = vperm.xlu1 %8968, %v660_v29   ;;  %vm6779_vm13 = vcmp.ge.f32.partialorder %v12334_v61, 0.0  ;;  %9152 = vrcp.f32 %v2168_v14  ;;  %v12456_v33 = vmul.f32 %v9378_v56, %v12453_v12  ;;  %v2517_v3 = vsub.f32 0.0, %v12394_v28  ;;  %v3012_v44 = vld [vmem:[#allocation2 + $0x1a8] sm:$0x3]  ;;  %v12498_v61 = vld [vmem:[%s16004_s8 + $0x3] ss:$0 sm:$0xff] }
 0x2f8   : > { %16470 = vst [vmem:[#allocation23_spill] sm:$0xff] %v12443_v22  ;;  %9154 = vrcp.f32 %v6908_v51  ;;  %v663_v29 = vadd.f32 %v12345_v53, %v12308_v36  ;;  %v12461_v0 = vpop.eup %9144  ;;  %v12464_v15 = vmul.f32 0.5, %v12323_v43  ;;  %v12470_v58 = vmul.f32 %v12466_v55, %v12453_v12  ;;  %v12483_v43 = vld [vmem:[%s16004_s8] ss:$0 sm:$0xff]  ;;  %v12532_v34 = vpop.f32.mrf.mxu1 }
 0x2f9   : > { %16471 = vst [vmem:[#allocation72_spill] sm:$0xff] %v12447_v18  ;;  %9156 = vpow2.f32 %v7333_v48  ;;  %v2518_v40 = vsub.f32 0.0, %v12406_v17  ;;  %v12478_v36 = vsel %vm6779_vm13, 1.0, %v16362_v52  ;;  %v12486_v21 = vmul.f32 %v12483_v43, %v9378_v56  ;;  %v12511_v56 = vld [vmem:[%s16004_s8 + $0x4] ss:$0 sm:$0xff] }
 0x2fa   : > { %16472 = vst [vmem:[#allocation24_spill] sm:$0xff] %v12461_v0  ;;  %v12473_v41 = vpop.eup %9146  ;;  %9158 = vpow2.f32 %v7335_v50  ;;  %v2519_v27 = vsub.f32 0.0, %v12410_v62  ;;  %v12493_v51 = vmul.f32 %v12483_v43, %v12466_v55  ;;  %v12501_v14 = vmul.f32 %v12498_v61, %v3009_v49 }
 0x2fb   : > { %16473 = vst [vmem:[#allocation29_spill] sm:$0xff] %v12464_v15  ;;  %v12489_v7 = vpop.eup %9148  ;;  %v2229_v30 = vmul.f32 1.0614054, %v12473_v41  ;;  %v2520_v19 = vsub.f32 0.0, %v12413_v11  ;;  %v12514_v39 = vmul.f32 %v12511_v56, %v3009_v49  ;;  %v2549_v4 = vmul.f32 %v2517_v3, %v12394_v28 }
 0x2fc   : > { %16474 = vst [vmem:[#allocation43_spill] sm:$0xff] %v12478_v36  ;;  %v12505_v48 = vpop.eup %9150  ;;  %v2230_v6 = vmul.f32 1.0614054, %v12489_v7  ;;  %v2550_v2 = vmul.f32 %v2518_v40, %v12406_v17  ;;  %v12527_v49 = vmul.f32 %v12498_v61, %v3012_v44  ;;  %v16476_v10 = vmov 2  }
 0x2fd   : > { %8970 = vset.pattern.permute.xlu2 %v16125_v47  ;;  %7544 = vperm.xlu0 %8967, %v663_v29   ;;  %v12519_v25 = vpop.eup %9152  ;;  %v2231_v50 = vmul.f32 1.0614054, %v12505_v48  ;;  %v2261_v31 = vadd.f32 -1.4531521, %v2229_v30  ;;  %v2551_v47 = vmul.f32 %v2519_v27, %v12410_v62  ;;  %v2552_v15 = vmul.f32 %v2520_v19, %v12413_v11 }
 0x2fe   : > { %2787 = vperm.xlu2 %8970, %v663_v29   ;;  %v12524_v35 = vpop.eup %9154  ;;  %v2232_v28 = vmul.f32 1.0614054, %v12519_v25  ;;  %v2262_v3 = vadd.f32 -1.4531521, %v2230_v6  ;;  %v2609_v27 = vmul.f32 1.442695, %v2549_v4  ;;  %v12549_v30 = vmul.f32 %v12511_v56, %v3012_v44 }
 0x2ff   : > { %16475 = vst [vmem:[#allocation41_spill] sm:$0xff] %v12524_v35  ;;  %8971 = vset.pattern.permute.xlu1 %v16476_v10  ;;  %v12534_v63 = vpop.eup %9156  ;;  %v2263_v17 = vadd.f32 -1.4531521, %v2231_v50  ;;  %v2293_v40 = vmul.f32 %v12473_v41, %v2261_v31  ;;  %v665_v50 = vadd.f32 %v12345_v53, %v12338_v37  ;;  %v2613_v19 = vmul.f32 1.442695, %v2551_v47  ;;  %v2971_v44 = vld [vmem:[#allocation2] sm:$0xff] }
 0x300   : > { %16477 = vst [vmem:[#allocation39_spill] sm:$0xff] %v12534_v63  ;;  %8003 = vperm.xlu1 %8971, %v663_v29   ;;  %v12539_v24 = vpop.eup %9158  ;;  %v2264_v36 = vadd.f32 -1.4531521, %v2232_v28  ;;  %v2294_v62 = vmul.f32 %v12489_v7, %v2262_v3  ;;  %v2611_v63 = vmul.f32 1.442695, %v2550_v2  ;;  %9160 = vpow2.f32 %v2609_v27  ;;  %v12572_v27 = vld [vmem:[#allocation2 + $0x8] sm:$0xff] }
 0x301   : > { %16478 = vst [vmem:[#allocation25_spill] sm:$0xff] %v12539_v24  ;;  %v2295_v54 = vmul.f32 %v12505_v48, %v2263_v17  ;;  %v2325_v35 = vadd.f32 1.4214138, %v2293_v40  ;;  %v2615_v4 = vmul.f32 1.442695, %v2552_v15  ;;  %v16480_v47 = vmov 0  }
 0x302   : > { %v2296_v11 = vmul.f32 %v12519_v25, %v2264_v36  ;;  %v2326_v29 = vadd.f32 1.4214138, %v2294_v62  ;;  %v12555_v2 = vld [vmem:[%s16004_s8 + $0x6] ss:$0 sm:$0xff]  ;;  %9162 = vpow2.f32 %v2611_v63  ;;  %v12569_v40 = vmul.f32 0.5, %v12366_v26 }
 0x303   : > { %v2327_v28 = vadd.f32 1.4214138, %v2295_v54  ;;  %v2357_v3 = vmul.f32 %v12473_v41, %v2325_v35  ;;  %v12559_v37 = vmul.f32 %v12555_v2, %v12466_v55  ;;  %v12564_v54 = vmul.f32 0.5, %v12364_v9 }
 0x304   : > { %v2328_v17 = vadd.f32 1.4214138, %v2296_v11  ;;  %v2358_v36 = vmul.f32 %v12489_v7, %v2326_v29  ;;  %9164 = vpow2.f32 %v2613_v19  ;;  %v12575_v9 = vmul.f32 0.5, %v12368_v46 }
 0x305   : > { %16479 = vst [vmem:[#allocation52_spill] sm:$0xff] %v12559_v37  ;;  %8973 = vset.pattern.permute.xlu0 %v16480_v47  ;;  %v2359_v35 = vmul.f32 %v12505_v48, %v2327_v28  ;;  %v2389_v15 = vadd.f32 -0.28449672, %v2357_v3  ;;  %9166 = vpow2.f32 %v2615_v4  ;;  %v16481_v28 = vmov 1  }
 0x306   : > { %2791 = vperm.xlu0 %8973, %v665_v50   ;;  %8974 = vset.pattern.permute.xlu2 %v16476_v10  ;;  %v2360_v62 = vmul.f32 %v12519_v25, %v2328_v17  ;;  %v2390_v11 = vadd.f32 -0.28449672, %v2358_v36  ;;  %vm2037_vm14 = vcmp.ge.f32.partialorder %v12376_v60, 0.0  ;;  %v12581_v17 = vpop.f32.mrf.mxu1  ;;  %v3087_v19 = vmul.f32 %v12453_v12, %v2971_v44 }
 0x307   : > { %8007 = vperm.xlu2 %8974, %v665_v50   ;;  %v2391_v29 = vadd.f32 -0.28449672, %v2359_v35  ;;  %v2421_v63 = vmul.f32 %v12473_v41, %v2389_v15  ;;  %v668_v35 = vadd.f32 %v12345_v53, %v12380_v42  ;;  %v3088_v4 = vmul.f32 %v12453_v12, %v12572_v27  ;;  %v9161_v15 = vpop.eup %9160 }
 0x308   : > { %8972 = vset.pattern.permute.xlu1 %v16481_v28  ;;  %v2392_v26 = vadd.f32 -0.28449672, %v2360_v62  ;;  %v2422_v3 = vmul.f32 %v12489_v7, %v2390_v11  ;;  %v12590_v6 = vmul.f32 0.5, %v12372_v1  ;;  %vm2038_vm15 = vcmp.ge.f32.partialorder %v12385_v8, 0.0  ;;  %v9163_v11 = vpop.eup %9162 }
 0x309   : > { %7547 = vperm.xlu1 %8972, %v665_v50   ;;  %v2423_v36 = vmul.f32 %v12505_v48, %v2391_v29  ;;  %v2453_v46 = vadd.f32 0.2548296, %v2421_v63  ;;  %vm2039_vm1 = vcmp.ge.f32.partialorder %v12388_v38, 0.0  ;;  %v2069_v29 = vsel %vm2037_vm14, 1.0, %v16362_v52 }
 0x30a   : > { %v2424_v50 = vmul.f32 %v12519_v25, %v2392_v26  ;;  %v2454_v62 = vadd.f32 0.2548296, %v2422_v3  ;;  %v9165_v31 = vpop.eup %9164  ;;  %v3152_v0 = vrot.slane %v3087_v19, 1  ;;  %v3153_v57 = vrot.slane %v3088_v4, 1 }
 0x30b   : > { %v2455_v42 = vadd.f32 0.2548296, %v2423_v36  ;;  %v2485_v63 = vmul.f32 %v12473_v41, %v2453_v46  ;;  %v9167_v8 = vpop.eup %9166  ;;  %vm2040_vm3 = vcmp.ge.f32.partialorder %v12391_v16, 0.0  ;;  %v2070_v26 = vsel %vm2038_vm15, 1.0, %v16362_v52 }
 0x30c   : > { %v2456_v24 = vadd.f32 0.2548296, %v2424_v50  ;;  %v2486_v1 = vmul.f32 %v12489_v7, %v2454_v62  ;;  %v2071_v60 = vsel %vm2039_vm1, 1.0, %v16362_v52  ;;  %v12608_v7 = vld [vmem:[%s16004_s8 + $0x2] ss:$0 sm:$0xff] }
 0x30d   : > { %v2487_v38 = vmul.f32 %v12505_v48, %v2455_v42  ;;  %v2645_v3 = vmul.f32 %v9161_v15, %v2485_v63  ;;  %v3266_v19 = vmul.f32 %v12608_v7, %v12572_v27  ;;  %v2973_v50 = vld [vmem:[#allocation2 + $0x10] sm:$0x3]  ;;  %v3021_v48 = vmul.f32 %v12483_v43, %v2971_v44 }
 0x30e   : > { %2795 = vperm.xlu0 %8973, %v668_v35   ;;  %v2488_v36 = vmul.f32 %v12519_v25, %v2456_v24  ;;  %v2646_v41 = vmul.f32 %v9163_v11, %v2486_v1  ;;  %v3022_v15 = vmul.f32 %v12483_v43, %v12572_v27  ;;  %v2072_v25 = vsel %vm2040_vm3, 1.0, %v16362_v52 }
 0x30f   : > { %8011 = vperm.xlu2 %8974, %v668_v35   ;;  %v2647_v46 = vmul.f32 %v9165_v31, %v2487_v38  ;;  %v2677_v4 = vsub.f32 1.0, %v2645_v3  ;;  %v3154_v11 = vsel %vm3151_vm5, %v3152_v0, %v3153_v57  ;;  %v670_v31 = vadd.f32 %v12345_v53, %v12423_v23  ;;  %v12623_v3 = vpop.f32.mrf.mxu1 }
 0x310   : > { %v2648_v24 = vmul.f32 %v9167_v8, %v2488_v36  ;;  %v2678_v62 = vsub.f32 1.0, %v2646_v41  ;;  %v3364_v44 = vmul.f32 %v12498_v61, %v12572_v27  ;;  %v3298_v32 = vrot.slane %v3266_v19, 2  ;;  %v3008_v8 = vld [vmem:[#allocation2 + $0x188] sm:$0xff] }
 0x311   : > { %7550 = vperm.xlu1 %8972, %v668_v35   ;;  %v2679_v42 = vsub.f32 1.0, %v2647_v46  ;;  %v2709_v63 = vmul.f32 %v2677_v4, %v2069_v29  ;;  %v3365_v16 = vmul.f32 %v12498_v61, %v2973_v50  ;;  %v3232_v41 = vadd.f32 %v3154_v11, %v3021_v48  ;;  %v12641_v48 = vld [vmem:[%s16004_s8 + $0x5] ss:$0 sm:$0xff] }
 0x312   : > { %v2680_v1 = vsub.f32 1.0, %v2648_v24  ;;  %v2710_v38 = vmul.f32 %v2678_v62, %v2070_v26  ;;  %v3233_v0 = vadd.f32 %v3153_v57, %v3022_v15  ;;  %v3429_v4 = vrot.slane %v3364_v44, 3  ;;  %v9386_v62 = vld [vmem:[#allocation2 + $0x1b0] sm:$0xff] }
 0x313   : > { %v2711_v36 = vmul.f32 %v2679_v42, %v2071_v60  ;;  %v2741_v35 = vadd.f32 1.0, %v2709_v63  ;;  %v12628_v23 = vmul.f32 %v12511_v56, %v12572_v27  ;;  %v3430_v19 = vrot.slane %v3365_v16, 3  ;;  %v12635_v60 = vld [vmem:[#allocation2 + $0x1a0] sm:$0xff] }
 0x314   : > { %v2712_v46 = vmul.f32 %v2680_v1, %v2072_v25  ;;  %v2742_v29 = vadd.f32 1.0, %v2710_v38  ;;  %v3544_v24 = vmul.f32 %v12511_v56, %v2973_v50  ;;  %v3112_v57 = vmul.f32 %v12453_v12, %v3008_v8  ;;  %v3758_v25 = vld [vmem:[#allocation2 + $0x1a8] sm:$0x3] }
 0x315   : > { %v2743_v18 = vadd.f32 1.0, %v2711_v36  ;;  %v12631_v26 = vmul.f32 %v2741_v35, %v12564_v54  ;;  %v12645_v27 = vmul.f32 %v12641_v48, %v12466_v55  ;;  %v12653_v11 = vmul.f32 %v9386_v62, %v12641_v48  ;;  %v12676_v36 = vld [vmem:[#allocation2 + $0x20] sm:$0xff] }
 0x316   : > { %8977 = vset.pattern.permute.xlu0 %v16476_v10  ;;  %v2744_v54 = vadd.f32 1.0, %v2712_v46  ;;  %v12648_v15 = vmul.f32 %v2742_v29, %v12569_v40  ;;  %v3330_v55 = vadd.f32 %v3298_v32, %v3232_v41  ;;  %v12661_v40 = vmul.f32 %v9386_v62, %v12555_v2 }
 0x317   : > { %16482 = vst [vmem:[#allocation48_spill] sm:$0xff] %v12631_v26  ;;  %8975 = vset.pattern.permute.xlu2 %v16481_v28  ;;  %8015 = vperm.xlu0 %8977, %v670_v31   ;;  %v12656_v42 = vmul.f32 %v2743_v18, %v12575_v9  ;;  %v3331_v18 = vadd.f32 %v3298_v32, %v3233_v0  ;;  %v3608_v38 = vrot.slane %v12628_v23, 4  ;;  %v3609_v16 = vrot.slane %v3544_v24, 4  ;;  %v9387_v0 = vld [vmem:[%s16004_s8 + $0x8] ss:$0 sm:$0xff] }
 0x318   : > { %16483 = vst [vmem:[#allocation19_spill] sm:$0xff] %v12645_v27  ;;  %7553 = vperm.xlu2 %8975, %v670_v31   ;;  %v12665_v44 = vmul.f32 %v2744_v54, %v12590_v6  ;;  %v3114_v9 = vmul.f32 %v12453_v12, %v12635_v60  ;;  %v3431_v1 = vsel %vm3428_vm6, %v3429_v4, %v3430_v19  ;;  %v3720_v6 = vld [vmem:[#allocation2 + $0x18] sm:$0xff]  ;;  %v3189_v35 = vrot.slane %v3112_v57, 1  ;;  %v679_v57 = vpop.f32.mrf.mxu1 }
 0x319   : > { %16484 = vst [vmem:[#allocation61_spill] sm:$0xff] %v12648_v15  ;;  %8976 = vset.pattern.permute.xlu1 %v16480_v47  ;;  %v3278_v41 = vmul.f32 %v12608_v7, %v3008_v8  ;;  %v12680_v32 = vmul.f32 %v12498_v61, %v3008_v8  ;;  %v12685_v46 = vmul.f32 %v9387_v0, %v3758_v25 }
 0x31a   : > { %16485 = vst [vmem:[#allocation71_spill] sm:$0xff] %v12653_v11  ;;  %2799 = vperm.xlu1 %8976, %v670_v31   ;;  %v3046_v31 = vmul.f32 %v12483_v43, %v3008_v8  ;;  %v12691_v29 = vmul.f32 %v12511_v56, %v3008_v8  ;;  %v12695_v23 = vadd.f32 %v12345_v53, %v12581_v17  ;;  %v3192_v50 = vrot.slane %v3114_v9, 1 }
 0x31b   : > { %16486 = vst [vmem:[#allocation55_spill] sm:$0xff] %v12656_v42  ;;  %v3509_v19 = vadd.f32 %v3429_v4, %v3330_v55  ;;  %v12699_v24 = vadd.f32 %v12345_v53, %v12532_v34  ;;  %v3510_v54 = vadd.f32 %v3431_v1, %v3331_v18  ;;  %v3836_v62 = vmul.f32 %v12555_v2, %v3720_v6 }
 0x31c   : > { %2967 = vst.msk [vmem:[#allocation2 + $0x1e1] sm:$0x80] %vm16170_vm7, %v12631_v26  ;;  %v3837_v63 = vmul.f32 %v12555_v2, %v12676_v36  ;;  %v3048_v8 = vmul.f32 %v12483_v43, %v12635_v60  ;;  %v3279_v17 = vmul.f32 %v12608_v7, %v12635_v60  ;;  %v3610_v4 = vsel %vm3607_vm9, %v3608_v38, %v3609_v16 }
 0x31d   : > { %16487 = vst [vmem:[#allocation74_spill] sm:$0xff] %v12661_v40  ;;  %v16490_v55 = vrot.slane %v12456_v33, 1  ;;  %v12714_v18 = vmul.f32 %v12498_v61, %v12635_v60  ;;  %v3465_v1 = vrot.slane %v12680_v32, 3  ;;  %v3257_v43 = vadd.f32 %v3189_v35, %v3046_v31 }
 0x31e   : > { %16488 = vst [vmem:[#allocation75_spill] sm:$0xff] %v12665_v44  ;;  %v12720_v9 = vmul.f32 %v12511_v56, %v12635_v60  ;;  %v3688_v7 = vadd.f32 %v3608_v38, %v3509_v19  ;;  %v3770_v33 = vmul.f32 %v12641_v48, %v3720_v6  ;;  %v3689_v16 = vadd.f32 %v3610_v4, %v3510_v54  ;;  %v9388_v56 = vld [vmem:[%s16004_s8 + $0x9] ss:$0 sm:$0xff] }
 0x31f   : > { %2968 = vst.msk [vmem:[#allocation2 + $0x1e9] sm:$0x7f] %vm16169_vm8, %v12648_v15  ;;  %v3190_v34 = vsel %vm3151_vm5, %v16490_v55, %v3189_v35  ;;  %v3310_v15 = vrot.slane %v3278_v41, 2  ;;  %8019 = vperm.xlu0 %8977, %v12699_v24   ;;  %v3771_v41 = vmul.f32 %v12641_v48, %v12676_v36  ;;  %v3900_v61 = vrot.slane %v3836_v62, 1 }
 0x320   : > { %2969 = vst.msk [vmem:[#allocation2 + $0x1f9] sm:$0x80] %vm16170_vm7, %v12656_v42  ;;  %7559 = vperm.xlu2 %8975, %v12695_v23   ;;  %v3901_v55 = vrot.slane %v3837_v63, 1  ;;  %v16492_v32 = vrot.slane %v12470_v58, 1  ;;  %v3256_v35 = vadd.f32 %v3190_v34, %v12486_v21  ;;  %v3311_v31 = vrot.slane %v3279_v17, 2 }
 0x321   : > { %16489 = vst [vmem:[#allocation76_spill] sm:$0xff] %v12685_v46  ;;  %v12733_v38 = vmul.f32 %v9388_v56, %v3758_v25  ;;  %v3259_v6 = vadd.f32 %v3192_v50, %v3048_v8  ;;  %v16494_v19 = vrot.slane %v12501_v14, 3  ;;  %v3468_v58 = vrot.slane %v12714_v18, 3  ;;  %v3722_v21 = vld [vmem:[#allocation2 + $0x28] sm:$0x3] }
 0x322   : > { %2970 = vst.msk [vmem:[#allocation2 + $0x201] sm:$0x7f] %vm16169_vm8, %v12665_v44  ;;  %v3193_v26 = vsel %vm3151_vm5, %v16492_v32, %v3192_v50  ;;  %8978 = vset.pattern.permute.xlu1 %v16481_v28  ;;  %v3644_v54 = vrot.slane %v12691_v29, 4  ;;  %v3355_v62 = vadd.f32 %v3310_v15, %v3257_v43  ;;  %v12743_v17 = vadd.f32 %v12345_v53, %v679_v57  ;;  %v9389_v50 = vld [vmem:[%s16004_s8 + $0x7] ss:$0 sm:$0xff]  ;;  %v3760_v43 = vld [vmem:[#allocation2 + $0x1b8] sm:$0xff] }
 0x323   : > { %16491 = vst [vmem:[#allocation77_spill] sm:$0xff] %v12720_v9  ;;  %v3467_v63 = vsel %vm3428_vm6, %v3465_v1, %v16494_v19  ;;  %7556 = vperm.xlu1 %8978, %v12699_v24   ;;  %v3802_v25 = vadd.f32 %v3770_v33, %v3688_v7  ;;  %v4014_v14 = vmul.f32 %v9389_v50, %v12676_v36  ;;  %v16138_v4 = vrot.slane %v12720_v9, 4  ;;  %v5226_v18 = vld [vmem:[#allocation2 + $0xb8] sm:$0x3]  ;;  %v12951_v46 = vld [vmem:[%s16004_s8 + $0x16] ss:$0 sm:$0xff] }
 0x324   : > { %16493 = vst [vmem:[#allocation78_spill] sm:$0xff] %v12733_v38  ;;  %v3258_v8 = vadd.f32 %v3193_v26, %v12493_v51  ;;  %v3803_v34 = vadd.f32 %v3771_v41, %v3689_v16  ;;  %v3902_v29 = vsel %vm3151_vm5, %v3900_v61, %v3901_v55  ;;  %v4112_v57 = vmul.f32 %v9387_v0, %v12676_v36  ;;  %v682_v26 = vpop.f32.mrf.mxu1  ;;  %v12862_v51 = vld [vmem:[%s16004_s8 + $0xa] ss:$0 sm:$0xff] }
 0x325   : > { %v4113_v7 = vmul.f32 %v9387_v0, %v3722_v21  ;;  %v3354_v33 = vadd.f32 %v3310_v15, %v3256_v35  ;;  %v3357_v32 = vadd.f32 %v3311_v31, %v3259_v6  ;;  %v16495_v19 = vrot.slane %v12527_v49, 3  ;;  %16513 = vst [vmem:[#allocation93_spill] sm:$0xff] %v12951_v46 }
 0x326   : > { %v3534_v16 = vadd.f32 %v3467_v63, %v3355_v62  ;;  %v16496_v41 = vrot.slane %v12514_v39, 4  ;;  %v3980_v15 = vadd.f32 %v3902_v29, %v3802_v25  ;;  %v4046_v0 = vrot.slane %v4014_v14, 2  ;;  %v3017_v62 = vld [vmem:[#allocation2 + $0x1d0] sm:$0xff] }
 0x327   : > { %v3470_v44 = vsel %vm3428_vm6, %v3468_v58, %v16495_v19  ;;  %8985 = vset.pattern.permute.xlu0 %v16481_v28  ;;  %v3356_v49 = vadd.f32 %v3311_v31, %v3258_v8  ;;  %v16497_v35 = vrot.slane %v12549_v30, 4  ;;  %v12772_v63 = vmul.f32 %v12641_v48, %v12635_v60 }
 0x328   : > { %v3646_v61 = vsel %vm3607_vm9, %v3644_v54, %v16496_v41  ;;  %8980 = vset.pattern.permute.xlu2 %v16480_v47  ;;  %7565 = vperm.xlu0 %8985, %v12743_v17   ;;  %v3981_v39 = vadd.f32 %v3901_v55, %v3803_v34  ;;  %v4176_v19 = vrot.slane %v4112_v57, 3  ;;  %v4177_v41 = vrot.slane %v4113_v7, 3  ;;  %v4468_v34 = vld [vmem:[#allocation2 + $0x40] sm:$0x3] }
 0x329   : > { %v3649_v6 = vsel %vm3607_vm9, %v16138_v4, %v16497_v35  ;;  %16498 = vst [vmem:[#allocation79_spill] sm:$0xff] %v12772_v63  ;;  %2807 = vperm.xlu2 %8980, %v12695_v23   ;;  %v4290_v25 = vmul.f32 %v9388_v56, %v12676_v36  ;;  %v4291_v14 = vmul.f32 %v9388_v56, %v3722_v21  ;;  %v12796_v56 = vld [vmem:[#allocation2 + $0x1c8] sm:$0xff] }
 0x32a   : > { %v3533_v31 = vadd.f32 %v3465_v1, %v3354_v33  ;;  %v3536_v8 = vadd.f32 %v3470_v44, %v3357_v32  ;;  %v12777_v30 = vmul.f32 %v12641_v48, %v3760_v43  ;;  %v12781_v29 = vmul.f32 %v12555_v2, %v12635_v60  ;;  %v4466_v48 = vld [vmem:[#allocation2 + $0x30] sm:$0xff]  ;;  %16504 = vst [vmem:[#allocation85_spill] sm:$0xff] %v12796_v56 }
 0x32b   : > { %8979 = vset.pattern.permute.xlu1 %v16480_v47  ;;  %v12785_v35 = vmul.f32 %v12555_v2, %v3760_v43  ;;  %v12788_v55 = vmul.f32 %v9389_v50, %v12635_v60  ;;  %v12792_v36 = vadd.f32 %v12345_v53, %v682_v26  ;;  %v4078_v44 = vadd.f32 %v4046_v0, %v3980_v15 }
 0x32c   : > { %16499 = vst [vmem:[#allocation80_spill] sm:$0xff] %v12777_v30  ;;  %2803 = vperm.xlu1 %8979, %v12699_v24   ;;  %v12794_v1 = vmul.f32 %v9389_v50, %v3760_v43  ;;  %v12800_v21 = vmul.f32 %v12796_v56, %v12453_v12  ;;  %v12803_v2 = vmul.f32 %v12453_v12, %v3017_v62  ;;  %v4354_v7 = vrot.slane %v4290_v25, 4  ;;  %v12819_v12 = vld [vmem:[%s16004_s8 + $0xb] ss:$0 sm:$0xff]  ;;  %v12917_v25 = vld [vmem:[%s16004_s8 + $0x15] ss:$0 sm:$0xff] }
 0x32d   : > { %16500 = vst [vmem:[#allocation81_spill] sm:$0xff] %v12781_v29  ;;  %v4079_v60 = vadd.f32 %v4046_v0, %v3981_v39  ;;  %v12807_v24 = vadd.f32 %v12345_v53, %v12623_v3  ;;  %v4178_v57 = vsel %vm3428_vm6, %v4176_v19, %v4177_v41  ;;  %v4355_v50 = vrot.slane %v4291_v14, 4  ;;  %v684_v39 = vpop.f32.mrf.mxu1 }
 0x32e   : > { %16501 = vst [vmem:[#allocation82_spill] sm:$0xff] %v12785_v35  ;;  %v12810_v43 = vadd.f32 %v3468_v58, %v3356_v49  ;;  %v12812_v33 = vadd.f32 %v3644_v54, %v3533_v31  ;;  %v12814_v32 = vadd.f32 %v3646_v61, %v3534_v16  ;;  %v12822_v26 = vmul.f32 %v12819_v12, %v4466_v48  ;;  %v12829_v58 = vld [vmem:[%s16004_s8 + $0xd] ss:$0 sm:$0xff]  ;;  %v12837_v16 = vld [vmem:[%s16004_s8 + $0xe] ss:$0 sm:$0xff]  ;;  %v12872_v31 = vld [vmem:[#allocation2 + $0x110] sm:$0xff] }
 0x32f   : > { %16502 = vst [vmem:[#allocation83_spill] sm:$0xff] %v12788_v55  ;;  %v4256_v15 = vadd.f32 %v4176_v19, %v4078_v44  ;;  %v12832_v54 = vmul.f32 %v12829_v58, %v4468_v34  ;;  %v12840_v61 = vmul.f32 %v12837_v16, %v4468_v34  ;;  %v4257_v62 = vadd.f32 %v4178_v57, %v4079_v60  ;;  %v12848_v19 = vld [vmem:[%s16004_s8 + $0x13] ss:$0 sm:$0xff]  ;;  %v5212_v34 = vld [vmem:[#allocation2 + $0x48] sm:$0xff]  ;;  %v5214_v49 = vld [vmem:[#allocation2 + $0x58] sm:$0x3] }
 0x330   : > { %16503 = vst [vmem:[#allocation84_spill] sm:$0xff] %v12794_v1  ;;  %7568 = vperm.xlu0 %8985, %v12792_v36   ;;  %v5797_v41 = vmul.f32 %v12848_v19, %v12289_v20  ;;  %v4356_v44 = vsel %vm3607_vm9, %v4354_v7, %v4355_v50  ;;  %v5980_v60 = vld [vmem:[#allocation2 + $0x108] sm:$0xff]  ;;  %v12857_v57 = vadd.f32 %v3649_v6, %v3536_v8  ;;  %v12910_v8 = vld [vmem:[#allocation2 + $0xb0] sm:$0xff]  ;;  %v5971_v55 = vld [vmem:[#allocation2 + $0xc0] sm:$0xff] }
 0x331   : > { %16505 = vst [vmem:[#allocation86_spill] sm:$0xff] %v12800_v21  ;;  %8982 = vset.pattern.permute.xlu2 %v16481_v28  ;;  %v4516_v20 = vmul.f32 %v12862_v51, %v4466_v48  ;;  %v12868_v50 = vadd.f32 %v12345_v53, %v684_v39  ;;  %v4434_v14 = vadd.f32 %v4354_v7, %v4256_v15  ;;  %v16511_v53 = vrot.slane %v12399_v13, 4  ;;  %v12891_v15 = vld [vmem:[%s16004_s8 + $0x14] ss:$0 sm:$0xff]  ;;  %v12897_v39 = vld [vmem:[%s16004_s8 + $0x12] ss:$0 sm:$0xff] }
 0x332   : > { %16506 = vst [vmem:[#allocation87_spill] sm:$0xff] %v12803_v2  ;;  %7562 = vperm.xlu2 %8982, %v12807_v24   ;;  %v5868_v0 = vrot.slane %v5797_v41, 4  ;;  %v12875_v48 = vadd.f32 %v4356_v44, %v4257_v62  ;;  %v12880_v41 = vld [vmem:[%s16004_s8 + $0x10] ss:$0 sm:$0xff]  ;;  %v12900_v62 = vmul.f32 %v12897_v39, %v5214_v49  ;;  %v6024_v6 = vmul.f32 %v12891_v15, %v12872_v31 }
 0x333   : > { %16507 = vst [vmem:[#allocation88_spill] sm:$0xff] %v12810_v43  ;;  %v12883_v3 = vmul.f32 %v12880_v41, %v5212_v34  ;;  %v9399_v44 = vld [vmem:[#allocation2 + $0xb0] sm:$0xff]  ;;  %v6089_v42 = vmul.f32 %v12917_v25, %v5980_v60  ;;  %v6090_v38 = vmul.f32 %v12917_v25, %v12872_v31  ;;  %v6083_v21 = vmul.f32 %v12917_v25, %v5971_v55 }
 0x334   : > { %16508 = vst [vmem:[#allocation89_spill] sm:$0xff] %v12812_v33  ;;  %8981 = vset.pattern.permute.xlu1 %v16476_v10  ;;  %v5869_v7 = vsel %vm3607_vm9, %v16511_v53, %v5868_v0  ;;  %v12903_v13 = vmul.f32 %v9399_v44, %v12897_v39  ;;  %v5613_v0 = vmul.f32 %v12897_v39, %v5226_v18  ;;  %v13007_v33 = vld [vmem:[#allocation2 + $0xb8] sm:$0x3] }
 0x335   : > { %16509 = vst [vmem:[#allocation90_spill] sm:$0xff] %v12814_v32  ;;  %8023 = vperm.xlu1 %8981, %v12695_v23   ;;  %v6023_v23 = vmul.f32 %v12891_v15, %v5980_v60  ;;  %v12907_v53 = vmul.f32 %v12848_v19, %v5214_v49  ;;  %v5941_v4 = vadd.f32 %v5869_v7, %v12436_v45  ;;  %v12928_v45 = vld [vmem:[%s16004_s8 + $0xf] ss:$0 sm:$0xff]  ;;  %v6160_v11 = vrot.slane %v6089_v42, 1 }
 0x336   : > { %16510 = vst [vmem:[#allocation91_spill] sm:$0xff] %v12857_v57  ;;  %v12923_v49 = vadd.f32 %v4516_v20, %v4434_v14  ;;  %v12931_v7 = vmul.f32 %v12928_v45, %v5212_v34  ;;  %v12934_v1 = vmul.f32 %v9399_v44, %v12848_v19  ;;  %v5791_v60 = vmul.f32 %v12848_v19, %v5226_v18  ;;  %v12939_v14 = vld [vmem:[#allocation2 + $0xc8] sm:$0xff]  ;;  %v5959_v44 = vld [vmem:[#allocation2 + $0x60] sm:$0xff]  ;;  %v5982_v57 = vld [vmem:[#allocation2 + $0x118] sm:$0x3] }
 0x337   : > { %v6055_v20 = vadd.f32 %v6023_v23, %v12441_v5  ;;  %v6161_v40 = vrot.slane %v6090_v38, 1  ;;  %v5681_v35 = vrot.slane %v5613_v0, 3  ;;  %v12946_v18 = vmul.f32 %v12917_v25, %v12910_v8 }
 0x338   : > { %8990 = vset.pattern.permute.xlu0 %v16480_v47  ;;  %v6260_v5 = vmul.f32 %v12951_v46, %v12872_v31  ;;  %v6056_v23 = vadd.f32 %v6024_v6, %v5941_v4  ;;  %v5859_v30 = vrot.slane %v5791_v60, 4  ;;  %v12963_v2 = vmul.f32 %v12917_v25, %v12939_v14 }
 0x339   : > { %2823 = vperm.xlu0 %8990, %v12868_v50   ;;  %16512 = vst [vmem:[#allocation92_spill] sm:$0xff] %v12946_v18  ;;  %v6162_v0 = vsel %vm3151_vm5, %v6160_v11, %v6161_v40  ;;  %v12967_v56 = vmul.f32 %v12891_v15, %v5959_v44  ;;  %v12970_v38 = vmul.f32 %v12917_v25, %v5959_v44  ;;  %v16517_v6 = vrot.slane %v12903_v13, 3  ;;  %v12986_v44 = vld [vmem:[%s16004_s8 + $0x17] ss:$0 sm:$0xff] }
 0x33a   : > { %8986 = vset.pattern.permute.xlu2 %v16480_v47  ;;  %16514 = vst [vmem:[#allocation94_spill] sm:$0xff] %v12963_v2  ;;  %v6233_v4 = vadd.f32 %v6162_v0, %v6055_v20  ;;  %v6292_v11 = vrot.slane %v6260_v5, 2  ;;  %v12980_v42 = vmul.f32 %v12891_v15, %v12910_v8  ;;  %v6365_v20 = vmul.f32 %v12986_v44, %v12872_v31  ;;  %v12990_v5 = vld [vmem:[#allocation2 + $0x70] sm:$0x3]  ;;  %v12992_v0 = vld [vmem:[#allocation2 + $0xa0] sm:$0x3] }
 0x33b   : > { %2815 = vperm.xlu2 %8986, %v12743_v17   ;;  %16515 = vst [vmem:[#allocation95_spill] sm:$0xff] %v12967_v56  ;;  %v12976_v60 = vsel %vm3428_vm6, %v16517_v6, %v5681_v35  ;;  %v12995_v35 = vmul.f32 %v12891_v15, %v5971_v55  ;;  %v6234_v6 = vadd.f32 %v6161_v40, %v6056_v23  ;;  %v16522_v29 = vrot.slane %v12934_v1, 4  ;;  %v13014_v23 = vld [vmem:[#allocation2 + $0xd0] sm:$0x3] }
 0x33c   : > { %16516 = vst [vmem:[#allocation96_spill] sm:$0xff] %v12970_v38  ;;  %v12999_v37 = vmul.f32 %v12951_v46, %v12910_v8  ;;  %v6366_v34 = vmul.f32 %v12986_v44, %v5982_v57  ;;  %v13011_v9 = vmul.f32 %v12891_v15, %v12939_v14  ;;  %v6151_v55 = vrot.slane %v6083_v21, 1 }
 0x33d   : > { %8983 = vset.pattern.permute.xlu1 %v16480_v47  ;;  %16518 = vst [vmem:[#allocation97_spill] sm:$0xff] %v12980_v42  ;;  %v13005_v27 = vsel %vm3607_vm9, %v16522_v29, %v5859_v30  ;;  %v16163_v40 = vrot.slane %v12963_v2, 1  ;;  %v6331_v63 = vadd.f32 %v6292_v11, %v6233_v4  ;;  %v6436_v32 = vrot.slane %v6365_v20, 3  ;;  %v16525_v30 = vld [vmem:[#allocation69_spill] sm:$0xff] }
 0x33e   : > { %2811 = vperm.xlu1 %8983, %v12807_v24   ;;  %16519 = vst [vmem:[#allocation98_spill] sm:$0xff] %v12986_v44  ;;  %v6437_v59 = vrot.slane %v6366_v34, 3  ;;  %v16524_v22 = vrot.slane %v12946_v18, 1  ;;  %v16526_v29 = vrot.slane %v16525_v30, 1  ;;  %v13030_v21 = vmul.f32 %v12986_v44, %v12990_v5  ;;  %v13037_v34 = vld [vmem:[#allocation2 + $0x100] sm:$0x3] }
 0x33f   : > { %16520 = vst [vmem:[#allocation99_spill] sm:$0xff] %v12995_v35  ;;  %v13034_v4 = vmul.f32 %v12986_v44, %v12992_v0  ;;  %v13042_v30 = vmul.f32 %v12986_v44, %v12910_v8  ;;  %v13049_v43 = vsel %vm3151_vm5, %v6151_v55, %v16163_v40  ;;  %v13053_v18 = vmul.f32 %v12986_v44, %v12939_v14  ;;  %v13068_v55 = vld [vmem:[%s16004_s8 + $0x18] ss:$0 sm:$0xff] }
 0x340   : > { %16521 = vst [vmem:[#allocation100_spill] sm:$0xff] %v12999_v37  ;;  %v13022_v52 = vsel %vm3151_vm5, %v16526_v29, %v16524_v22  ;;  %v6332_v22 = vadd.f32 %v6292_v11, %v6234_v6  ;;  %v6358_v29 = vmul.f32 %v12986_v44, %v13007_v33  ;;  %v6360_v20 = vmul.f32 %v12986_v44, %v13014_v23  ;;  %v13059_v6 = vld [vmem:[#allocation2 + $0xf8] sm:$0xff] }
 0x341   : > { %16523 = vst [vmem:[#allocation101_spill] sm:$0xff] %v13011_v9  ;;  %v13026_v9 = vmul.f32 %v12951_v46, %v12939_v14  ;;  %v6438_v11 = vsel %vm3428_vm6, %v6436_v32, %v6437_v59  ;;  %v13063_v37 = vmul.f32 %v13059_v6, %v12986_v44  ;;  %v6509_v2 = vadd.f32 %v6436_v32, %v6331_v63  ;;  %v4467_v59 = vld [vmem:[#allocation2 + $0x38] sm:$0xff] }
 0x342   : > { %16527 = vst [vmem:[#allocation69_spill] sm:$0xff] %v13022_v52  ;;  %v6543_v40 = vmul.f32 %v13068_v55, %v12872_v31  ;;  %v6364_v52 = vmul.f32 %v12986_v44, %v13037_v34  ;;  %v6424_v38 = vrot.slane %v13042_v30, 3  ;;  %v6425_v46 = vrot.slane %v6358_v29, 3 }
 0x343   : > { %16528 = vst [vmem:[#allocation102_spill] sm:$0xff] %v13026_v9  ;;  %8987 = vset.pattern.permute.xlu2 %v16476_v10  ;;  %v6510_v31 = vadd.f32 %v6438_v11, %v6332_v22  ;;  %v4517_v56 = vmul.f32 %v12862_v51, %v4467_v59  ;;  %v6428_v9 = vrot.slane %v6360_v20, 3  ;;  %v16530_v20 = vrot.slane %v12822_v26, 1 }
 0x344   : > { %16529 = vst [vmem:[#allocation103_spill] sm:$0xff] %v13049_v43  ;;  %8031 = vperm.xlu2 %8987, %v12743_v17   ;;  %v6544_v43 = vmul.f32 %v13068_v55, %v5982_v57  ;;  %v6614_v35 = vrot.slane %v6543_v40, 4  ;;  %v4583_v17 = vmul.f32 %v12819_v12, %v4467_v59  ;;  %v6434_v51 = vrot.slane %v6364_v52, 3 }
 0x345   : > { %v4549_v40 = vadd.f32 %v4517_v56, %v12875_v48  ;;  %v13106_v52 = vsel %vm3428_vm6, %v6424_v38, %v6425_v46  ;;  %v13110_v56 = vmul.f32 %v13068_v55, %v12990_v5  ;;  %v13126_v46 = vmul.f32 %v13068_v55, %v12992_v0 }
 0x346   : > { %8984 = vset.pattern.permute.xlu1 %v16476_v10  ;;  %v6615_v42 = vrot.slane %v6544_v43, 4  ;;  %v13085_v63 = vadd.f32 %v6614_v35, %v6509_v2  ;;  %v4647_v29 = vrot.slane %v4583_v17, 1  ;;  %v4858_v43 = vmul.f32 %v12829_v58, %v4467_v59 }
 0x347   : > { %8027 = vperm.xlu1 %8984, %v12807_v24   ;;  %v9406_v24 = vld [vmem:[%s16004_s8 + $0xc] ss:$0 sm:$0xff]  ;;  %v16533_v0 = vrot.slane %v13063_v37, 3  ;;  %v16571_v30 = vrot.slane %v13034_v4, 3 }
 0x348   : > { %v4760_v32 = vmul.f32 %v9406_v24, %v4467_v59  ;;  %v6616_v22 = vsel %vm3607_vm9, %v6614_v35, %v6615_v42  ;;  %v13096_v12 = vmul.f32 0.70710677, %v13085_v63  ;;  %v4648_v44 = vsel %vm3151_vm5, %v16530_v20, %v4647_v29 }
 0x349   : > { %v13093_v11 = vadd.f32 %v6616_v22, %v6510_v31  ;;  %v4727_v57 = vadd.f32 %v4647_v29, %v4549_v40  ;;  %v4922_v24 = vrot.slane %v4858_v43, 3  ;;  %v5036_v42 = vmul.f32 %v12837_v16, %v4467_v59  ;;  %v5213_v22 = vld [vmem:[#allocation2 + $0x50] sm:$0xff] }
 0x34a   : > { %v4792_v2 = vrot.slane %v4760_v32, 2  ;;  %v13116_v26 = vand.u32 2147483647, %v13096_v12  ;;  %v16531_v16 = vrot.slane %v13053_v18, 3  ;;  %v4726_v5 = vadd.f32 %v4648_v44, %v12923_v49 }
 0x34b   : > { %v13113_v58 = vmul.f32 0.70710677, %v13093_v11  ;;  %v13131_v59 = vmul.f32 %v13068_v55, %v12910_v8  ;;  %v16532_v31 = vrot.slane %v12832_v54, 3  ;;  %v13144_v49 = vsel %vm3428_vm6, %v16533_v0, %v6434_v51 }
 0x34c   : > { %8988 = vset.pattern.permute.xlu2 %v16480_v47  ;;  %v13122_v48 = vsel %vm3428_vm6, %v16531_v16, %v6428_v9  ;;  %v4825_v35 = vadd.f32 %v4792_v2, %v4727_v57  ;;  %v6879_v32 = vmul.f32 0.3275911, %v13116_v26  ;;  %v4824_v44 = vadd.f32 %v4792_v2, %v4726_v5 }
 0x34d   : > { %2819 = vperm.xlu2 %8988, %v12792_v36   ;;  %v13134_v17 = vand.u32 2147483647, %v13113_v58  ;;  %v4924_v9 = vsel %vm3428_vm6, %v4922_v24, %v16532_v31  ;;  %v5100_v57 = vrot.slane %v5036_v42, 4  ;;  %v13148_v40 = vmul.f32 %v13068_v55, %v13007_v33 }
 0x34e   : > { %v5003_v8 = vadd.f32 %v4924_v9, %v4825_v35  ;;  %v13152_v54 = vmul.f32 %v13068_v55, %v12939_v14  ;;  %v6911_v43 = vadd.f32 1.0, %v6879_v32  ;;  %v13161_v51 = vmul.f32 %v13068_v55, %v13059_v6 }
 0x34f   : > { %8035 = vperm.xlu1 %8984, %v12792_v36   ;;  %v6880_v29 = vmul.f32 0.3275911, %v13134_v17  ;;  %v13157_v36 = vmul.f32 %v13068_v55, %v13014_v23  ;;  %v5002_v2 = vadd.f32 %v4922_v24, %v4824_v44  ;;  %v5329_v20 = vmul.f32 %v12880_v41, %v5213_v22  ;;  %v9407_v23 = vld [vmem:[%s16004_s8 + $0x11] ss:$0 sm:$0xff] }
 0x350   : > { %9168 = vrcp.f32 %v6911_v43  ;;  %v16534_v42 = vrot.slane %v12840_v61, 4  ;;  %v5263_v16 = vmul.f32 %v12928_v45, %v5213_v22  ;;  %v5506_v6 = vmul.f32 %v9407_v23, %v5213_v22 }
 0x351   : > { %v6912_v33 = vadd.f32 1.0, %v6880_v29  ;;  %v5180_v5 = vadd.f32 %v5100_v57, %v5002_v2  ;;  %v5393_v32 = vrot.slane %v5329_v20, 1  ;;  %v13173_v24 = vmul.f32 %v13068_v55, %v13037_v34  ;;  %v13189_v20 = vld [vmem:[#allocation2 + $0x68] sm:$0xff] }
 0x352   : > { %v5102_v14 = vsel %vm3607_vm9, %v5100_v57, %v16534_v42  ;;  %v6594_v41 = vrot.slane %v13110_v56, 4  ;;  %v5604_v61 = vmul.f32 %v12897_v39, %v5213_v22  ;;  %v6600_v45 = vrot.slane %v13126_v46, 4 }
 0x353   : > { %v5181_v35 = vadd.f32 %v5102_v14, %v5003_v8  ;;  %9170 = vrcp.f32 %v6912_v33  ;;  %v5294_v31 = vadd.f32 %v12931_v7, %v5180_v5  ;;  %v5782_v0 = vmul.f32 %v12848_v19, %v5213_v22 }
 0x354   : > { %v6602_v44 = vrot.slane %v13131_v59, 4  ;;  %v6603_v34 = vrot.slane %v13148_v40, 4  ;;  %v7263_v8 = vsub.f32 0.0, %v13116_v26  ;;  %v16535_v57 = vrot.slane %v12883_v3, 1 }
 0x355   : > { %8991 = vset.pattern.permute.xlu2 %v16476_v10  ;;  %v5295_v9 = vadd.f32 %v5263_v16, %v5181_v35  ;;  %v5538_v7 = vrot.slane %v5506_v6, 2  ;;  %v5668_v2 = vrot.slane %v5604_v61, 3  ;;  %v6611_v3 = vrot.slane %v13161_v51, 4  ;;  %v16537_v6 = vld [vmem:[#allocation58_spill] sm:$0xff] }
 0x356   : > { %8039 = vperm.xlu2 %8991, %v12868_v50   ;;  %v5394_v39 = vsel %vm3151_vm5, %v16535_v57, %v5393_v32  ;;  %v13192_v19 = vpop.eup %9168  ;;  %v7264_v42 = vsub.f32 0.0, %v13134_v17  ;;  %v5846_v35 = vrot.slane %v5782_v0, 4  ;;  %v7295_v23 = vmul.f32 %v7263_v8, %v13116_v26  ;;  %v16589_v51 = vld [vmem:[#allocation90_spill] sm:$0xff] }
 0x357   : > { %8989 = vset.pattern.permute.xlu1 %v16481_v28  ;;  %v5472_v29 = vadd.f32 %v5394_v39, %v5294_v31  ;;  %v5473_v43 = vadd.f32 %v5393_v32, %v5295_v9  ;;  %v6975_v14 = vmul.f32 1.0614054, %v13192_v19  ;;  %v16538_v61 = vrot.slane %v16537_v6, 2  ;;  %v16539_v9 = vld [vmem:[#allocation66_spill] sm:$0xff] }
 0x358   : > { %7571 = vperm.xlu1 %8989, %v12868_v50   ;;  %v16536_v50 = vld [vmem:[#allocation59_spill] sm:$0xff]  ;;  %v16540_v57 = vrot.slane %v12903_v13, 3  ;;  %v6076_v22 = vmul.f32 %v12917_v25, %v13189_v20  ;;  %v16541_v0 = vrot.slane %v12900_v62, 3  ;;  %v7296_v26 = vmul.f32 %v7264_v42, %v13134_v17 }
 0x359   : > { %v5570_v16 = vadd.f32 %v5538_v7, %v5472_v29  ;;  %v5571_v5 = vadd.f32 %v5538_v7, %v5473_v43  ;;  %v13199_v32 = vpop.eup %9170  ;;  %v5579_v31 = vadd.f32 %v16538_v61, %v16536_v50  ;;  %v7007_v29 = vadd.f32 -1.4531521, %v6975_v14 }
 0x35a   : > { %v5756_v39 = vadd.f32 %v16540_v57, %v16539_v9  ;;  %v6976_v33 = vmul.f32 1.0614054, %v13199_v32  ;;  %v5670_v43 = vsel %vm3428_vm6, %v5668_v2, %v16541_v0  ;;  %v16542_v6 = vrot.slane %v12934_v1, 4  ;;  %v16547_v0 = vld [vmem:[#allocation99_spill] sm:$0xff] }
 0x35b   : > { %v5748_v7 = vadd.f32 %v5668_v2, %v5570_v16  ;;  %v5749_v8 = vadd.f32 %v5670_v43, %v5571_v5  ;;  %v5757_v50 = vadd.f32 %v12976_v60, %v5579_v31  ;;  %v7039_v9 = vmul.f32 %v13192_v19, %v7007_v29  ;;  %v16545_v5 = vld [vmem:[#allocation67_spill] sm:$0xff]  ;;  %v16546_v31 = vld [vmem:[#allocation97_spill] sm:$0xff] }
 0x35c   : > { %v5934_v13 = vadd.f32 %v16542_v6, %v5756_v39  ;;  %v7008_v61 = vadd.f32 -1.4531521, %v6976_v33  ;;  %v16543_v25 = vrot.slane %v12907_v53, 4  ;;  %v6010_v17 = vmul.f32 %v12891_v15, %v13189_v20  ;;  %v16544_v33 = vld [vmem:[#allocation95_spill] sm:$0xff] }
 0x35d   : > { %v5926_v57 = vadd.f32 %v5846_v35, %v5748_v7  ;;  %v5935_v2 = vadd.f32 %v13005_v27, %v5757_v50  ;;  %v6140_v60 = vrot.slane %v6076_v22, 1  ;;  %v7071_v42 = vadd.f32 1.4214138, %v7039_v9  ;;  %v16549_v22 = vld [vmem:[#allocation93_spill] sm:$0xff] }
 0x35e   : > { %v5848_v14 = vsel %vm3607_vm9, %v5846_v35, %v16543_v25  ;;  %8992 = vset.pattern.permute.xlu2 %v16481_v28  ;;  %v7040_v1 = vmul.f32 %v13199_v32, %v7008_v61  ;;  %v6048_v53 = vadd.f32 %v16546_v31, %v16545_v5  ;;  %v6612_v39 = vrot.slane %v13173_v24, 4  ;;  %v16550_v61 = vld [vmem:[#allocation96_spill] sm:$0xff] }
 0x35f   : > { %v5927_v62 = vadd.f32 %v5848_v14, %v5749_v8  ;;  %v6041_v16 = vadd.f32 %v16544_v33, %v5926_v57  ;;  %v7341_v35 = vmul.f32 1.442695, %v7295_v23  ;;  %v6049_v43 = vadd.f32 %v16547_v0, %v5934_v13  ;;  %v16548_v8 = vld [vmem:[#allocation101_spill] sm:$0xff]  ;;  %v16552_v24 = vld [vmem:[#allocation68_spill] sm:$0xff]  ;;  %v16556_v33 = vld [vmem:[#allocation103_spill] sm:$0xff] }
 0x360   : > { %v7072_v7 = vadd.f32 1.4214138, %v7040_v1  ;;  %v7103_v27 = vmul.f32 %v13192_v19, %v7071_v42  ;;  %v6050_v15 = vadd.f32 %v16548_v8, %v5935_v2  ;;  %v6253_v50 = vmul.f32 %v16549_v22, %v13189_v20  ;;  %v16553_v23 = vld [vmem:[#allocation69_spill] sm:$0xff]  ;;  %v16558_v22 = vld [vmem:[#allocation94_spill] sm:$0xff] }
 0x361   : > { %v6042_v29 = vadd.f32 %v6010_v17, %v5927_v62  ;;  %vm6783_vm4 = vcmp.ge.f32.partialorder %v13096_v12, 0.0  ;;  %v7343_v6 = vmul.f32 1.442695, %v7296_v26  ;;  %v16551_v9 = vrot.slane %v16550_v61, 1  ;;  %v16554_v17 = vld [vmem:[#allocation92_spill] sm:$0xff]  ;;  %v16557_v26 = vld [vmem:[#allocation98_spill] sm:$0xff] }
 0x362   : > { %v6225_v14 = vadd.f32 %v16553_v23, %v16552_v24  ;;  %v7104_v13 = vmul.f32 %v13199_v32, %v7072_v7  ;;  %v7135_v57 = vadd.f32 -0.28449672, %v7103_v27  ;;  %v16555_v1 = vrot.slane %v16554_v17, 1 }
 0x363   : > { %v6141_v25 = vsel %vm3151_vm5, %v16551_v9, %v6140_v60  ;;  %9172 = vpow2.f32 %v7341_v35  ;;  %v6220_v42 = vadd.f32 %v6140_v60, %v6042_v29  ;;  %v6227_v5 = vadd.f32 %v16556_v33, %v6049_v43  ;;  %v16567_v33 = vld [vmem:[#allocation23_spill] sm:$0xff] }
 0x364   : > { %v6219_v62 = vadd.f32 %v6141_v25, %v6041_v16  ;;  %v6226_v2 = vadd.f32 %v16555_v1, %v6048_v53  ;;  %v6351_v31 = vmul.f32 %v16557_v26, %v13189_v20  ;;  %v7136_v0 = vadd.f32 -0.28449672, %v7104_v13  ;;  %v16560_v53 = vld [vmem:[#allocation100_spill] sm:$0xff]  ;;  %v16564_v13 = vld [vmem:[#allocation102_spill] sm:$0xff] }
 0x365   : > { %v7167_v8 = vmul.f32 %v13192_v19, %v7135_v57  ;;  %v16559_v61 = vrot.slane %v16558_v22, 1  ;;  %v6285_v24 = vrot.slane %v6253_v50, 2  ;;  %v6604_v16 = vsel %vm3607_vm9, %v6602_v44, %v6603_v34 }
 0x366   : > { %v6613_v60 = vsel %vm3607_vm9, %v6611_v3, %v6612_v39  ;;  %9174 = vpow2.f32 %v7343_v6  ;;  %v16561_v35 = vrot.slane %v16560_v53, 2  ;;  %v7168_v43 = vmul.f32 %v13199_v32, %v7136_v0 }
 0x367   : > { %v6228_v9 = vadd.f32 %v16559_v61, %v6050_v15  ;;  %v7199_v7 = vadd.f32 0.2548296, %v7167_v8  ;;  %v6317_v27 = vadd.f32 %v6285_v24, %v6219_v62  ;;  %vm6784_vm10 = vcmp.ge.f32.partialorder %v13113_v58, 0.0 }
 0x368   : > { %v6323_v29 = vadd.f32 %v16561_v35, %v6225_v14  ;;  %v16562_v15 = vmov %v16561_v35  ;;  %v16563_v40 = vmov -1.0   ;;  %v6318_v25 = vadd.f32 %v6285_v24, %v6220_v42 }
 0x369   : > { %v6324_v50 = vadd.f32 %v16562_v15, %v6226_v2  ;;  %v6815_v34 = vsel %vm6783_vm4, 1.0, %v16563_v40  ;;  %v6415_v23 = vrot.slane %v6351_v31, 3  ;;  %v7200_v39 = vadd.f32 0.2548296, %v7168_v43  ;;  %v9173_v1 = vpop.eup %9172  ;;  %v16568_v2 = vld [vmem:[#allocation50_spill] sm:$0xff]  ;;  %v9408_v31 = vld [vmem:[#allocation2 + $0x98] sm:$0xff] }
 0x36a   : > { %v7231_v6 = vmul.f32 %v13192_v19, %v7199_v7  ;;  %v16565_v14 = vrot.slane %v16564_v13, 2  ;;  %v16569_v26 = vrot.slane %v16568_v2, 2  ;;  %v6501_v12 = vadd.f32 %v6424_v38, %v6323_v29  ;;  %v16572_v38 = vld [vmem:[#allocation57_spill] sm:$0xff]  ;;  %v16574_v15 = vld [vmem:[#allocation60_spill] sm:$0xff] }
 0x36b   : > { %v6529_v42 = vmul.f32 %v13068_v55, %v13189_v20  ;;  %v6533_v19 = vmul.f32 %v9408_v31, %v13068_v55  ;;  %v7232_v8 = vmul.f32 %v13199_v32, %v7200_v39  ;;  %v6495_v22 = vadd.f32 %v6415_v23, %v6317_v27  ;;  %v16576_v39 = vld [vmem:[#allocation72_spill] sm:$0xff] }
 0x36c   : > { %v6325_v57 = vadd.f32 %v16565_v14, %v6227_v5  ;;  %v16566_v17 = vmov %v16565_v14  ;;  %v6330_v0 = vadd.f32 %v16569_v26, %v16567_v33  ;;  %v7391_v5 = vmul.f32 %v9173_v1, %v7231_v6  ;;  %v16578_v14 = vld [vmem:[#allocation70_spill] sm:$0xff] }
 0x36d   : > { %v6326_v62 = vadd.f32 %v16566_v17, %v6228_v9  ;;  %v6502_v61 = vadd.f32 %v13106_v52, %v6324_v50  ;;  %v9175_v9 = vpop.eup %9174  ;;  %v16570_v24 = vrot.slane %v13030_v21, 3  ;;  %v16573_v35 = vrot.slane %v16572_v38, 3 }
 0x36e   : > { %v6593_v29 = vrot.slane %v6529_v42, 4  ;;  %v6599_v43 = vrot.slane %v6533_v19, 4  ;;  %v7392_v55 = vmul.f32 %v9175_v9, %v7232_v8  ;;  %v7423_v7 = vsub.f32 1.0, %v7391_v5  ;;  %v16593_v9 = vld [vmem:[#allocation77_spill] sm:$0xff] }
 0x36f   : > { %v6417_v53 = vsel %vm3428_vm6, %v6415_v23, %v16570_v24  ;;  %v6423_v20 = vsel %vm3428_vm6, %v16573_v35, %v16571_v30  ;;  %v16575_v52 = vrot.slane %v13053_v18, 3  ;;  %v6504_v21 = vadd.f32 %v13122_v48, %v6326_v62 }
 0x370   : > { %v6496_v32 = vadd.f32 %v6417_v53, %v6318_v25  ;;  %v6500_v27 = vadd.f32 %v6423_v20, %v16574_v15  ;;  %v16577_v23 = vrot.slane %v13063_v37, 3  ;;  %v6508_v6 = vadd.f32 %v13144_v49, %v6330_v0 }
 0x371   : > { %v6503_v50 = vadd.f32 %v16575_v52, %v6325_v57  ;;  %v6673_v13 = vadd.f32 %v6593_v29, %v6495_v22  ;;  %v6677_v17 = vadd.f32 %v6599_v43, %v16578_v14  ;;  %v6679_v1 = vadd.f32 %v6602_v44, %v6501_v12  ;;  %v16604_v14 = vld [vmem:[#allocation19_spill] sm:$0xff] }
 0x372   : > { %v6507_v4 = vadd.f32 %v16577_v23, %v16576_v39  ;;  %v6680_v25 = vadd.f32 %v6604_v16, %v6502_v61  ;;  %v7424_v33 = vsub.f32 1.0, %v7392_v55  ;;  %v7455_v2 = vmul.f32 %v7423_v7, %v6815_v34  ;;  %v16592_v61 = vld [vmem:[#allocation88_spill] sm:$0xff] }
 0x373   : > { %v6595_v18 = vsel %vm3607_vm9, %v6593_v29, %v6594_v41  ;;  %v6601_v37 = vsel %vm3607_vm9, %v6599_v43, %v6600_v45  ;;  %v16579_v48 = vrot.slane %v13157_v36, 4  ;;  %v16580_v49 = vrot.slane %v13152_v54, 4 }
 0x374   : > { %v13314_v59 = vmul.f32 0.5, %v13085_v63  ;;  %v6674_v44 = vadd.f32 %v6595_v18, %v6496_v32  ;;  %v6678_v16 = vadd.f32 %v6601_v37, %v6500_v27  ;;  %v13317_v34 = vmul.f32 0.5, %v13093_v11  ;;  %v16599_v32 = vld [vmem:[#allocation27_spill] sm:$0xff] }
 0x375   : > { %v6607_v57 = vsel %vm3607_vm9, %v16580_v49, %v16579_v48  ;;  %v6816_v56 = vsel %vm6784_vm10, 1.0, %v16563_v40  ;;  %v16582_v46 = vmov %v16580_v49  ;;  %v6685_v45 = vadd.f32 %v6611_v3, %v6507_v4  ;;  %v16590_v3 = vld [vmem:[#allocation79_spill] sm:$0xff]  ;;  %v16606_v49 = vld [vmem:[#allocation81_spill] sm:$0xff] }
 0x376   : > { %16581 = vst [vmem:[#allocation59_spill] sm:$0xff] %v13317_v34  ;;  %v6681_v41 = vadd.f32 %v16582_v46, %v6503_v50  ;;  %v6682_v36 = vadd.f32 %v6607_v57, %v6504_v21  ;;  %v6686_v62 = vadd.f32 %v6613_v60, %v6508_v6  ;;  %v13326_v26 = vmul.f32 0.5, %v6673_v13  ;;  %v16602_v50 = vld [vmem:[#allocation49_spill] sm:$0xff] }
 0x377   : > { %v13328_v63 = vmul.f32 0.5, %v6677_v17  ;;  %v7456_v0 = vmul.f32 %v7424_v33, %v6816_v56  ;;  %v13330_v12 = vadd.f32 1.0, %v7455_v2  ;;  %v13332_v11 = vmul.f32 0.5, %v6679_v1 }
 0x378   : > { %16583 = vst [vmem:[#allocation58_spill] sm:$0xff] %v13326_v26  ;;  %v13334_v42 = vmul.f32 0.5, %v6680_v25  ;;  %v13336_v58 = vmul.f32 0.5, %v6674_v44  ;;  %v13338_v54 = vmul.f32 0.5, %v6678_v16  ;;  %v6737_v31 = vmul.f32 0.70710677, %v6673_v13 }
 0x379   : > { %16584 = vst [vmem:[#allocation66_spill] sm:$0xff] %v13328_v63  ;;  %v6738_v19 = vmul.f32 0.70710677, %v6674_v44  ;;  %v13342_v60 = vadd.f32 %v16590_v3, %v16589_v51  ;;  %v6741_v8 = vmul.f32 0.70710677, %v6677_v17  ;;  %v16594_v24 = vrot.slane %v16593_v9, 4 }
 0x37a   : > { %16585 = vst [vmem:[#allocation95_spill] sm:$0xff] %v13332_v11  ;;  %v6742_v5 = vmul.f32 0.70710677, %v6678_v16  ;;  %v6743_v22 = vmul.f32 0.70710677, %v6679_v1  ;;  %v13349_v20 = vmul.f32 0.5, %v6681_v41 }
 0x37b   : > { %16586 = vst [vmem:[#allocation67_spill] sm:$0xff] %v13334_v42  ;;  %v13347_v53 = vadd.f32 %v16594_v24, %v16592_v61  ;;  %v6744_v30 = vmul.f32 0.70710677, %v6680_v25  ;;  %v6745_v38 = vmul.f32 0.70710677, %v6681_v41  ;;  %v13351_v29 = vmul.f32 0.5, %v6682_v36 }
 0x37c   : > { %16587 = vst [vmem:[#allocation97_spill] sm:$0xff] %v13336_v58  ;;  %v6746_v35 = vmul.f32 0.70710677, %v6682_v36  ;;  %v6749_v43 = vmul.f32 0.70710677, %v6685_v45  ;;  %v13353_v7 = vadd.f32 1.0, %v7456_v0 }
 0x37d   : > { %16588 = vst [vmem:[#allocation99_spill] sm:$0xff] %v13338_v54  ;;  %v6750_v55 = vmul.f32 0.70710677, %v6686_v62  ;;  %v13356_v15 = vmul.f32 0.5, %v16599_v32  ;;  %v13358_v27 = vmul.f32 0.5, %v6685_v45  ;;  %vm6769_vm11 = vcmp.ge.f32.partialorder %v6737_v31, 0.0 }
 0x37e   : > { %16591 = vst [vmem:[#allocation101_spill] sm:$0xff] %v13342_v60  ;;  %v13360_v52 = vmul.f32 0.5, %v6686_v62  ;;  %vm6770_vm12 = vcmp.ge.f32.partialorder %v6738_v19, 0.0  ;;  %vm6773_vm13 = vcmp.ge.f32.partialorder %v6741_v8, 0.0  ;;  %vm6774_vm14 = vcmp.ge.f32.partialorder %v6742_v5, 0.0  ;;  %v16603_v13 = vld [vmem:[#allocation89_spill] sm:$0xff] }
 0x37f   : > { %16595 = vst [vmem:[#allocation93_spill] sm:$0xff] %v13347_v53  ;;  %vm6775_vm15 = vcmp.ge.f32.partialorder %v6743_v22, 0.0  ;;  %vm6776_vm1 = vcmp.ge.f32.partialorder %v6744_v30, 0.0  ;;  %vm6777_vm3 = vcmp.ge.f32.partialorder %v6745_v38, 0.0  ;;  %vm6778_vm4 = vcmp.ge.f32.partialorder %v6746_v35, 0.0  ;;  %v16608_v44 = vld [vmem:[#allocation52_spill] sm:$0xff] }
 0x380   : > { %16596 = vst [vmem:[#allocation96_spill] sm:$0xff] %v13349_v20  ;;  %vm6780_vm10 = vcmp.ge.f32.partialorder %v16602_v50, 0.0  ;;  %vm6781_vm8 = vcmp.ge.f32.partialorder %v6749_v43, 0.0  ;;  %vm6782_vm7 = vcmp.ge.f32.partialorder %v6750_v55, 0.0  ;;  %v13364_v21 = vsel %vm6769_vm11, 1.0, %v16563_v40  ;;  %v16612_v62 = vld [vmem:[#allocation85_spill] sm:$0xff] }
 0x381   : > { %16597 = vst [vmem:[#allocation68_spill] sm:$0xff] %v13351_v29  ;;  %v13367_v39 = vsel %vm6770_vm12, 1.0, %v16563_v40  ;;  %v13370_v23 = vsel %vm6773_vm13, 1.0, %v16563_v40  ;;  %v13372_v4 = vand.u32 2147483647, %v6737_v31  ;;  %v13378_v17 = vadd.f32 %v16604_v14, %v16603_v13 }
 0x382   : > { %16598 = vst [vmem:[#allocation69_spill] sm:$0xff] %v13353_v7  ;;  %v13374_v6 = vand.u32 2147483647, %v6738_v19  ;;  %v13380_v1 = vand.u32 2147483647, %v6741_v8  ;;  %v13388_v2 = vsel %vm6774_vm14, 1.0, %v16563_v40 }
 0x383   : > { %16600 = vst [vmem:[#allocation92_spill] sm:$0xff] %v13358_v27  ;;  %v13382_v25 = vand.u32 2147483647, %v6742_v5  ;;  %v13384_v33 = vand.u32 2147483647, %v6743_v22  ;;  %v13392_v18 = vsel %vm6775_vm15, 1.0, %v16563_v40 }
 0x384   : > { %16601 = vst [vmem:[#allocation103_spill] sm:$0xff] %v13360_v52  ;;  %v13394_v37 = vand.u32 2147483647, %v6744_v30  ;;  %v13396_v48 = vand.u32 2147483647, %v6745_v38  ;;  %v16607_v57 = vrot.slane %v16606_v49, 1 }
 0x385   : > { %16605 = vst [vmem:[#allocation98_spill] sm:$0xff] %v13378_v17  ;;  %v16609_v16 = vrot.slane %v16608_v44, 1  ;;  %v13405_v46 = vand.u32 2147483647, %v6746_v35  ;;  %v13407_v41 = vand.u32 2147483647, %v6749_v43 }
 0x386   : > { %v6865_v36 = vmul.f32 0.3275911, %v13372_v4  ;;  %v13413_v45 = vld [vmem:[%s16004_s8] ss:$0 sm:$0xff]  ;;  %v6866_v31 = vmul.f32 0.3275911, %v13374_v6 }
 0x387   : > { %v13403_v56 = vsel %vm3151_vm5, %v16609_v16, %v16607_v57  ;;  %16611 = vst [vmem:[#allocation100_spill] sm:$0xff] %v13413_v45  ;;  %v13417_v0 = vmul.f32 %v13413_v45, %v16612_v62  ;;  %v6869_v19 = vmul.f32 0.3275911, %v13380_v1  ;;  %v6870_v51 = vmul.f32 0.3275911, %v13382_v25  ;;  %v16620_v43 = vld [vmem:[#allocation41_spill] sm:$0xff] }
 0x388   : > { %16610 = vst [vmem:[#allocation94_spill] sm:$0xff] %v13403_v56  ;;  %v13424_v3 = vsel %vm6776_vm1, 1.0, %v16563_v40  ;;  %v13428_v8 = vsel %vm6777_vm3, 1.0, %v16563_v40  ;;  %v13430_v5 = vand.u32 2147483647, %v6750_v55  ;;  %v13435_v61 = vsel %vm6778_vm4, 1.0, %v16563_v40 }
 0x389   : > { %16613 = vst [vmem:[#allocation102_spill] sm:$0xff] %v13417_v0  ;;  %v6871_v22 = vmul.f32 0.3275911, %v13384_v33  ;;  %v13440_v9 = vsel %vm6780_vm10, 1.0, %v16563_v40  ;;  %v6872_v24 = vmul.f32 0.3275911, %v13394_v37 }
 0x38a   : > { %16614 = vst [vmem:[#allocation23_spill] sm:$0xff] %v13428_v8  ;;  %v6873_v30 = vmul.f32 0.3275911, %v13396_v48  ;;  %v6874_v38 = vmul.f32 0.3275911, %v13405_v46  ;;  %v6897_v32 = vadd.f32 1.0, %v6865_v36 }
 0x38b   : > { %16615 = vst [vmem:[#allocation50_spill] sm:$0xff] %v13435_v61  ;;  %v6898_v13 = vadd.f32 1.0, %v6866_v31  ;;  %v6901_v14 = vadd.f32 1.0, %v6869_v19  ;;  %v13447_v57 = vsel %vm6781_vm8, 1.0, %v16563_v40  ;;  %v13451_v35 = vsel %vm6782_vm7, 1.0, %v16563_v40  ;;  %v16618_v56 = vld [vmem:[#allocation54_spill] sm:$0xff] }
 0x38c   : > { %16616 = vst [vmem:[#allocation57_spill] sm:$0xff] %v13447_v57  ;;  %v6877_v50 = vmul.f32 0.3275911, %v13407_v41  ;;  %v6902_v44 = vadd.f32 1.0, %v6870_v51  ;;  %v6878_v16 = vmul.f32 0.3275911, %v13430_v5  ;;  %9176 = vrcp.f32 %v6897_v32 }
 0x38d   : > { %16617 = vst [vmem:[#allocation60_spill] sm:$0xff] %v13451_v35  ;;  %v6903_v62 = vadd.f32 1.0, %v6871_v22  ;;  %v6964_v17 = vmul.f32 1.0614054, %v16618_v56  ;;  %v6904_v36 = vadd.f32 1.0, %v6872_v24  ;;  %9178 = vrcp.f32 %v6898_v13  ;;  %v16619_v31 = vld [vmem:[#allocation24_spill] sm:$0xff] }
 0x38e   : > { %v6971_v19 = vmul.f32 1.0614054, %v16619_v31  ;;  %v6972_v53 = vmul.f32 1.0614054, %v16620_v43  ;;  %v6905_v49 = vadd.f32 1.0, %v6873_v30  ;;  %v6906_v60 = vadd.f32 1.0, %v6874_v38 }
 0x38f   : > { %9180 = vrcp.f32 %v6901_v14  ;;  %v6996_v55 = vadd.f32 -1.4531521, %v6964_v17  ;;  %v6909_v40 = vadd.f32 1.0, %v6877_v50  ;;  %v6910_v45 = vadd.f32 1.0, %v6878_v16 }
 0x390   : > { %9182 = vrcp.f32 %v6902_v44  ;;  %v7003_v0 = vadd.f32 -1.4531521, %v6971_v19  ;;  %v7004_v51 = vadd.f32 -1.4531521, %v6972_v53  ;;  %vm7826_vm7 = vcmask 1041408  }
 0x391   : > { %9184 = vrcp.f32 %v6903_v62  ;;  %v7028_v22 = vmul.f32 %v16618_v56, %v6996_v55  ;;  %vm16234_vm8 = vcmask 1040384   ;;  %vm16733_vm15 = vcmask 130055  }
 0x392   : > { %9186 = vrcp.f32 %v6904_v36  ;;  %v7035_v24 = vmul.f32 %v16619_v31, %v7003_v0  ;;  %v7036_v13 = vmul.f32 %v16620_v43, %v7004_v51  ;;  %v13463_v38 = vpop.eup %9176  ;;  %vm16735_vm1 = vcmask 129024   ;;  %vm16736_vm3 = vmmov %vm16733_vm15 }
 0x393   : > { %9188 = vrcp.f32 %v6905_v49  ;;  %v7060_v17 = vadd.f32 1.4214138, %v7028_v22  ;;  %v13467_v50 = vpop.eup %9178  ;;  %v6961_v44 = vmul.f32 1.0614054, %v13463_v38  ;;  %vm16737_vm4 = vmmov %vm16735_vm1 }
 0x394   : > { %9190 = vrcp.f32 %v6906_v60  ;;  %v7067_v16 = vadd.f32 1.4214138, %v7035_v24  ;;  %v7068_v62 = vadd.f32 1.4214138, %v7036_v13  ;;  %v6962_v36 = vmul.f32 1.0614054, %v13467_v50 }
 0x395   : > { %v13470_v0 = vpop.eup %9180  ;;  %9192 = vrcp.f32 %v6909_v40  ;;  %v7092_v19 = vmul.f32 %v16618_v56, %v7060_v17  ;;  %v6993_v22 = vadd.f32 -1.4531521, %v6961_v44 }
 0x396   : > { %v13475_v55 = vpop.eup %9182  ;;  %9194 = vrcp.f32 %v6910_v45  ;;  %v6965_v51 = vmul.f32 1.0614054, %v13470_v0  ;;  %v7099_v60 = vmul.f32 %v16619_v31, %v7067_v16  ;;  %v6994_v13 = vadd.f32 -1.4531521, %v6962_v36 }
 0x397   : > { %v13479_v53 = vpop.eup %9184  ;;  %v6966_v24 = vmul.f32 1.0614054, %v13475_v55  ;;  %v7100_v40 = vmul.f32 %v16620_v43, %v7068_v62  ;;  %v7025_v45 = vmul.f32 %v13463_v38, %v6993_v22  ;;  %v7124_v32 = vadd.f32 -0.28449672, %v7092_v19 }
 0x398   : > { %v13484_v17 = vpop.eup %9186  ;;  %v6967_v49 = vmul.f32 1.0614054, %v13479_v53  ;;  %v6997_v30 = vadd.f32 -1.4531521, %v6965_v51  ;;  %v7026_v34 = vmul.f32 %v13467_v50, %v6994_v13  ;;  %v13492_v36 = vadd.f32 -0.28449672, %v7099_v60 }
 0x399   : > { %v13488_v44 = vpop.eup %9188  ;;  %v6968_v16 = vmul.f32 1.0614054, %v13484_v17  ;;  %v6998_v7 = vadd.f32 -1.4531521, %v6966_v24  ;;  %v7057_v51 = vadd.f32 1.4214138, %v7025_v45 }
 0x39a   : > { %v13494_v62 = vpop.eup %9190  ;;  %v6969_v14 = vmul.f32 1.0614054, %v13488_v44  ;;  %v6999_v52 = vadd.f32 -1.4531521, %v6967_v49  ;;  %v7029_v27 = vmul.f32 %v13470_v0, %v6997_v30  ;;  %v7058_v24 = vadd.f32 1.4214138, %v7026_v34 }
 0x39b   : > { %v13498_v29 = vpop.eup %9192  ;;  %v6970_v19 = vmul.f32 1.0614054, %v13494_v62  ;;  %v7000_v22 = vadd.f32 -1.4531521, %v6968_v16  ;;  %v7030_v28 = vmul.f32 %v13475_v55, %v6998_v7  ;;  %v7089_v34 = vmul.f32 %v13463_v38, %v7057_v51 }
 0x39c   : > { %v13502_v20 = vpop.eup %9194  ;;  %v6973_v60 = vmul.f32 1.0614054, %v13498_v29  ;;  %v7001_v13 = vadd.f32 -1.4531521, %v6969_v14  ;;  %v7031_v42 = vmul.f32 %v13479_v53, %v6999_v52  ;;  %v7061_v11 = vadd.f32 1.4214138, %v7029_v27 }
 0x39d   : > { %v6974_v49 = vmul.f32 1.0614054, %v13502_v20  ;;  %v7002_v30 = vadd.f32 -1.4531521, %v6970_v19  ;;  %v7032_v45 = vmul.f32 %v13484_v17, %v7000_v22  ;;  %v7062_v35 = vadd.f32 1.4214138, %v7030_v28 }
 0x39e   : > { %v7005_v54 = vadd.f32 -1.4531521, %v6973_v60  ;;  %v7033_v16 = vmul.f32 %v13488_v44, %v7001_v13  ;;  %v7063_v63 = vadd.f32 1.4214138, %v7031_v42  ;;  %v7090_v14 = vmul.f32 %v13467_v50, %v7058_v24 }
 0x39f   : > { %v7006_v7 = vadd.f32 -1.4531521, %v6974_v49  ;;  %v7034_v57 = vmul.f32 %v13494_v62, %v7002_v30  ;;  %v7064_v58 = vadd.f32 1.4214138, %v7032_v45  ;;  %v7093_v19 = vmul.f32 %v13470_v0, %v7061_v11 }
 0x3a0   : > { %v7037_v27 = vmul.f32 %v13498_v29, %v7005_v54  ;;  %v7065_v52 = vadd.f32 1.4214138, %v7033_v16  ;;  %v7094_v22 = vmul.f32 %v13475_v55, %v7062_v35  ;;  %v7095_v42 = vmul.f32 %v13479_v53, %v7063_v63 }
 0x3a1   : > { %v7038_v28 = vmul.f32 %v13502_v20, %v7006_v7  ;;  %v7066_v60 = vadd.f32 1.4214138, %v7034_v57  ;;  %v7096_v51 = vmul.f32 %v13484_v17, %v7064_v58  ;;  %v7121_v30 = vadd.f32 -0.28449672, %v7089_v34 }
 0x3a2   : > { %v7069_v13 = vadd.f32 1.4214138, %v7037_v27  ;;  %v7097_v49 = vmul.f32 %v13488_v44, %v7065_v52  ;;  %v7122_v45 = vadd.f32 -0.28449672, %v7090_v14  ;;  %v7125_v16 = vadd.f32 -0.28449672, %v7093_v19 }
 0x3a3   : > { %v7070_v24 = vadd.f32 1.4214138, %v7038_v28  ;;  %v7098_v54 = vmul.f32 %v13494_v62, %v7066_v60  ;;  %v7126_v61 = vadd.f32 -0.28449672, %v7094_v22  ;;  %v7127_v35 = vadd.f32 -0.28449672, %v7095_v42 }
 0x3a4   : > { %v7101_v11 = vmul.f32 %v13498_v29, %v7069_v13  ;;  %v7128_v26 = vadd.f32 -0.28449672, %v7096_v51  ;;  %v7129_v7 = vadd.f32 -0.28449672, %v7097_v49  ;;  %v7132_v8 = vadd.f32 -0.28449672, %v7100_v40 }
 0x3a5   : > { %v7102_v57 = vmul.f32 %v13502_v20, %v7070_v24  ;;  %v7130_v63 = vadd.f32 -0.28449672, %v7098_v54  ;;  %v7153_v58 = vmul.f32 %v13463_v38, %v7121_v30  ;;  %v7154_v34 = vmul.f32 %v13467_v50, %v7122_v45 }
 0x3a6   : > { %v7133_v27 = vadd.f32 -0.28449672, %v7101_v11  ;;  %v7156_v14 = vmul.f32 %v16618_v56, %v7124_v32  ;;  %v7157_v52 = vmul.f32 %v13470_v0, %v7125_v16  ;;  %v7158_v22 = vmul.f32 %v13475_v55, %v7126_v61 }
 0x3a7   : > { %v7134_v19 = vadd.f32 -0.28449672, %v7102_v57  ;;  %v7159_v28 = vmul.f32 %v13479_v53, %v7127_v35  ;;  %v7160_v60 = vmul.f32 %v13484_v17, %v7128_v26  ;;  %v7161_v42 = vmul.f32 %v13488_v44, %v7129_v7 }
 0x3a8   : > { %v7162_v40 = vmul.f32 %v13494_v62, %v7130_v63  ;;  %v7257_v51 = vsub.f32 0.0, %v13396_v48  ;;  %v7258_v13 = vsub.f32 0.0, %v13405_v46  ;;  %v7163_v32 = vmul.f32 %v16619_v31, %v13492_v36 }
 0x3a9   : > { %v7164_v49 = vmul.f32 %v16620_v43, %v7132_v8  ;;  %v7165_v30 = vmul.f32 %v13498_v29, %v7133_v27  ;;  %v7185_v61 = vadd.f32 0.2548296, %v7153_v58  ;;  %v7166_v45 = vmul.f32 %v13502_v20, %v7134_v19  ;;  %v13547_v27 = vpop.permute.xlu2 %7995 }
 0x3aa   : > { %v7186_v24 = vadd.f32 0.2548296, %v7154_v34  ;;  %v7188_v26 = vadd.f32 0.2548296, %v7156_v14  ;;  %v7189_v54 = vadd.f32 0.2548296, %v7157_v52  ;;  %v13540_v16 = vmul.f32 %v13330_v12, %v13314_v59  ;;  %v687_v12 = vpop.f32.mrf.mxu1 }
 0x3ab   : > { %v7190_v11 = vadd.f32 0.2548296, %v7158_v22  ;;  %v7191_v35 = vadd.f32 0.2548296, %v7159_v28  ;;  %v7192_v7 = vadd.f32 0.2548296, %v7160_v60  ;;  %v13550_v59 = vmul.f32 %v13463_v38, %v7185_v61 }
 0x3ac   : > { %16621 = vst [vmem:[#allocation72_spill] sm:$0xff] %v13540_v16  ;;  %v7193_v57 = vadd.f32 0.2548296, %v7161_v42  ;;  %v7261_v36 = vsub.f32 0.0, %v13407_v41  ;;  %v7262_v8 = vsub.f32 0.0, %v13430_v5  ;;  %v16622_v63 = vsub.f32 0.0, %v13372_v4 }
 0x3ad   : > { %16623 = vst [vmem:[#allocation70_spill] sm:$0xff] %v13547_v27  ;;  %v7194_v34 = vadd.f32 0.2548296, %v7162_v40  ;;  %v7195_v14 = vadd.f32 0.2548296, %v7163_v32  ;;  %v13553_v28 = vmul.f32 %v13467_v50, %v7186_v24  ;;  %v7220_v60 = vmul.f32 %v16618_v56, %v7188_v26 }
 0x3ae   : > { %v7281_v58 = vmul.f32 %v16622_v63, %v13372_v4  ;;  %v7196_v52 = vadd.f32 0.2548296, %v7164_v49  ;;  %v7197_v19 = vadd.f32 0.2548296, %v7165_v30  ;;  %v7198_v22 = vadd.f32 0.2548296, %v7166_v45 }
 0x3af   : > { %v13557_v42 = vmul.f32 %v13470_v0, %v7189_v54  ;;  %v13560_v4 = vmul.f32 %v13475_v55, %v7190_v11  ;;  %v13563_v40 = vmul.f32 %v13479_v53, %v7191_v35  ;;  %v13566_v38 = vmul.f32 %v13484_v17, %v7192_v7  ;;  %v16629_v35 = vld [vmem:[#allocation53_spill] sm:$0xff] }
 0x3b0   : > { %v16624_v32 = vsub.f32 0.0, %v13374_v6  ;;  %v16625_v50 = vsub.f32 0.0, %v13380_v1  ;;  %v16626_v0 = vsub.f32 0.0, %v13382_v25  ;;  %v16627_v55 = vsub.f32 0.0, %v13384_v33 }
 0x3b1   : > { %v13581_v61 = vmul.f32 %v13488_v44, %v7193_v57  ;;  %v7227_v17 = vmul.f32 %v16619_v31, %v7195_v14  ;;  %v7228_v45 = vmul.f32 %v16620_v43, %v7196_v52  ;;  %v7313_v26 = vmul.f32 1.442695, %v7281_v58  ;;  %v16632_v58 = vld [vmem:[#allocation25_spill] sm:$0xff]  ;;  %v13605_v52 = vpop.permute.xlu2 %7999 }
 0x3b2   : > { %v7282_v49 = vmul.f32 %v16624_v32, %v13374_v6  ;;  %v7285_v56 = vmul.f32 %v16625_v50, %v13380_v1  ;;  %v7286_v30 = vmul.f32 %v16626_v0, %v13382_v25  ;;  %v7287_v53 = vmul.f32 %v16627_v55, %v13384_v33  ;;  %v13600_v14 = vld [vmem:[#allocation8] ss:$0 sm:$0xff]  ;;  %16633 = vst [vmem:[#allocation79_spill] sm:$0xff] %v13605_v52  ;;  %v16634_v32 = vld [vmem:[#allocation44_spill] sm:$0xff] }
 0x3b3   : > { %v16628_v6 = vsub.f32 0.0, %v13394_v37  ;;  %v7289_v1 = vmul.f32 %v7257_v51, %v13396_v48  ;;  %v13590_v11 = vmul.f32 %v13494_v62, %v7194_v34  ;;  %v7290_v33 = vmul.f32 %v7258_v13, %v13405_v46  ;;  %v16631_v51 = vld [vmem:[#allocation39_spill] sm:$0xff]  ;;  %v689_v34 = vpop.f32.mrf.mxu1 }
 0x3b4   : > { %v7315_v54 = vmul.f32 1.442695, %v7282_v49  ;;  %v7321_v25 = vmul.f32 1.442695, %v7285_v56  ;;  %v7323_v44 = vmul.f32 1.442695, %v7286_v30  ;;  %v7380_v7 = vmul.f32 %v16629_v35, %v7220_v60 }
 0x3b5   : > { %v7288_v24 = vmul.f32 %v16628_v6, %v13394_v37  ;;  %v7293_v31 = vmul.f32 %v7261_v36, %v13407_v41  ;;  %v7294_v43 = vmul.f32 %v7262_v8, %v13430_v5  ;;  %9196 = vpow2.f32 %v7313_v26  ;;  %v13596_v37 = vpop.permute.xlu1 %2779  ;;  %v16635_v56 = vld [vmem:[#allocation43_spill] sm:$0xff]  ;;  %v16638_v35 = vld [vmem:[#allocation29_spill] sm:$0xff] }
 0x3b6   : > { %v7325_v57 = vmul.f32 1.442695, %v7287_v53  ;;  %16630 = vst [vmem:[#allocation90_spill] sm:$0xff] %v13596_v37  ;;  %9198 = vpow2.f32 %v7315_v54  ;;  %v7387_v63 = vmul.f32 %v16631_v51, %v7227_v17  ;;  %v7388_v62 = vmul.f32 %v16632_v58, %v7228_v45 }
 0x3b7   : > { %v7327_v48 = vmul.f32 1.442695, %v7288_v24  ;;  %9200 = vpow2.f32 %v7321_v25  ;;  %v7329_v46 = vmul.f32 1.442695, %v7289_v1  ;;  %v7412_v13 = vsub.f32 1.0, %v7380_v7 }
 0x3b8   : > { %v13603_v41 = vadd.f32 %v13600_v14, %v687_v12  ;;  %9202 = vpow2.f32 %v7323_v44  ;;  %v7331_v5 = vmul.f32 1.442695, %v7290_v33  ;;  %v7419_v36 = vsub.f32 1.0, %v7387_v63  ;;  %v16636_v33 = vld [vmem:[#allocation56_spill] sm:$0xff]  ;;  %v16637_v44 = vld [vmem:[#allocation51_spill] sm:$0xff] }
 0x3b9   : > { %v7420_v8 = vsub.f32 1.0, %v7388_v62  ;;  %9204 = vpow2.f32 %v7325_v57  ;;  %v7337_v60 = vmul.f32 1.442695, %v7293_v31  ;;  %v7444_v49 = vmul.f32 %v7412_v13, %v16634_v32  ;;  %v13646_v32 = vpop.permute.xlu2 %2787 }
 0x3ba   : > { %2827 = vperm.xlu0 %8990, %v13603_v41   ;;  %v690_v50 = vadd.f32 %v13600_v14, %v689_v34  ;;  %7574 = vperm.xlu1 %8989, %v13603_v41   ;;  %9206 = vpow2.f32 %v7327_v48  ;;  %v7339_v12 = vmul.f32 1.442695, %v7294_v43  ;;  %v7451_v0 = vmul.f32 %v7419_v36, %v16635_v56  ;;  %16640 = vst [vmem:[#allocation77_spill] sm:$0xff] %v13646_v32 }
 0x3bb   : > { %v7452_v30 = vmul.f32 %v7420_v8, %v13440_v9  ;;  %v9197_v55 = vpop.eup %9196  ;;  %v7229_v53 = vmul.f32 %v13498_v29, %v7197_v19  ;;  %v7230_v17 = vmul.f32 %v13502_v20, %v7198_v22  ;;  %9208 = vpow2.f32 %v7329_v46 }
 0x3bc   : > { %v7476_v45 = vadd.f32 1.0, %v7444_v49  ;;  %7577 = vperm.xlu2 %8992, %v690_v50   ;;  %v9199_v6 = vpop.eup %9198  ;;  %9210 = vpow2.f32 %v7331_v5  ;;  %v7377_v24 = vmul.f32 %v9197_v55, %v13550_v59  ;;  %v7483_v1 = vadd.f32 1.0, %v7451_v0  ;;  %v13625_v59 = vpop.permute.xlu0 %7538 }
 0x3bd   : > { %v7484_v26 = vadd.f32 1.0, %v7452_v30  ;;  %v9201_v54 = vpop.eup %9200  ;;  %9212 = vpow2.f32 %v7337_v60  ;;  %v7378_v25 = vmul.f32 %v9199_v6, %v13553_v28  ;;  %v7830_v29 = vrot.slane %v16637_v44, 6  ;;  %v13632_v51 = vpop.permute.xlu1 %2783 }
 0x3be   : > { %v13618_v9 = vmul.f32 %v7476_v45, %v16636_v33  ;;  %v9203_v19 = vpop.eup %9202  ;;  %9214 = vpow2.f32 %v7339_v12  ;;  %v7381_v20 = vmul.f32 %v9201_v54, %v13557_v42  ;;  %v7409_v22 = vsub.f32 1.0, %v7377_v24  ;;  %16639 = vst [vmem:[#allocation88_spill] sm:$0xff] %v13632_v51  ;;  %v16642_v54 = vld [vmem:[#allocation58_spill] sm:$0xff] }
 0x3bf   : > { %v13623_v7 = vmul.f32 %v7483_v1, %v16638_v35  ;;  %v9205_v31 = vpop.eup %9204  ;;  %v7382_v43 = vmul.f32 %v9203_v19, %v13560_v4  ;;  %v7410_v57 = vsub.f32 1.0, %v7378_v25  ;;  %v13629_v28 = vmul.f32 %v7484_v26, %v13356_v15  ;;  %v16641_v1 = vld [vmem:[#allocation23_spill] sm:$0xff] }
 0x3c0   : > { %v7831_v48 = vrot.slane %v13618_v9, 6  ;;  %v9207_v63 = vpop.eup %9206  ;;  %v7383_v42 = vmul.f32 %v9205_v31, %v13563_v40  ;;  %v7413_v58 = vsub.f32 1.0, %v7381_v20  ;;  %v7441_v62 = vmul.f32 %v7409_v22, %v13364_v21  ;;  %v16644_v20 = vld [vmem:[#allocation97_spill] sm:$0xff]  ;;  %v16647_v31 = vld [vmem:[#allocation66_spill] sm:$0xff] }
 0x3c1   : > { %v7842_v34 = vrot.slane %v13623_v7, 6  ;;  %v9209_v46 = vpop.eup %9208  ;;  %v7384_v13 = vmul.f32 %v9207_v63, %v13566_v38  ;;  %v7414_v4 = vsub.f32 1.0, %v7382_v43  ;;  %v7442_v5 = vmul.f32 %v7410_v57, %v13367_v39  ;;  %v16648_v43 = vld [vmem:[#allocation99_spill] sm:$0xff]  ;;  %v16649_v63 = vld [vmem:[#allocation60_spill] sm:$0xff] }
 0x3c2   : > { %v13640_v15 = vsel %vm7826_vm7, %v7830_v29, %v7831_v48  ;;  %8995 = vset.pattern.permute.xlu0 %v16476_v10  ;;  %8994 = vset.pattern.permute.xlu1 %v16480_v47  ;;  %v9211_v36 = vpop.eup %9210  ;;  %v7385_v40 = vmul.f32 %v9209_v46, %v13581_v61  ;;  %v7415_v8 = vsub.f32 1.0, %v7383_v42  ;;  %v7445_v21 = vmul.f32 %v7413_v58, %v13370_v23  ;;  %v16643_v29 = vld [vmem:[#allocation50_spill] sm:$0xff] }
 0x3c3   : > { %v7473_v60 = vadd.f32 1.0, %v7441_v62  ;;  %8047 = vperm.xlu0 %8995, %v690_v50   ;;  %2831 = vperm.xlu1 %8994, %v690_v50   ;;  %v9213_v38 = vpop.eup %9212  ;;  %v7386_v39 = vmul.f32 %v9211_v36, %v13590_v11  ;;  %v7416_v49 = vsub.f32 1.0, %v7384_v13  ;;  %v7446_v12 = vmul.f32 %v7414_v4, %v13388_v2  ;;  %v16650_v62 = vld [vmem:[#allocation95_spill] sm:$0xff]  ;;  %v16652_v36 = vld [vmem:[#allocation96_spill] sm:$0xff] }
 0x3c4   : > { %v7474_v56 = vadd.f32 1.0, %v7442_v5  ;;  %8993 = vset.pattern.permute.xlu2 %v16476_v10  ;;  %v9215_v0 = vpop.eup %9214  ;;  %v7389_v30 = vmul.f32 %v9213_v38, %v7229_v53  ;;  %v7417_v61 = vsub.f32 1.0, %v7385_v40  ;;  %v7447_v55 = vmul.f32 %v7415_v8, %v13392_v18  ;;  %v13667_v48 = vpop.permute.xlu0 %7541  ;;  %v16651_v13 = vld [vmem:[#allocation67_spill] sm:$0xff] }
 0x3c5   : > { %v7477_v23 = vadd.f32 1.0, %v7445_v21  ;;  %8043 = vperm.xlu2 %8993, %v13603_v41   ;;  %v7390_v45 = vmul.f32 %v9215_v0, %v7230_v17  ;;  %v7418_v6 = vsub.f32 1.0, %v7386_v39  ;;  %v7448_v50 = vmul.f32 %v7416_v49, %v13424_v3  ;;  %v13658_v22 = vpop.permute.xlu1 %8003  ;;  %v16646_v41 = vld [vmem:[#allocation57_spill] sm:$0xff]  ;;  %v16655_v49 = vld [vmem:[#allocation68_spill] sm:$0xff] }
 0x3c6   : > { %v7478_v24 = vadd.f32 1.0, %v7446_v12  ;;  %v7421_v11 = vsub.f32 1.0, %v7389_v30  ;;  %v7449_v26 = vmul.f32 %v7417_v61, %v16641_v1  ;;  %v7479_v2 = vadd.f32 1.0, %v7447_v55  ;;  %16645 = vst [vmem:[#allocation27_spill] sm:$0xff] %v13658_v22  ;;  %v692_v30 = vpop.f32.mrf.mxu1  ;;  %v16656_v61 = vld [vmem:[#allocation92_spill] sm:$0xff] }
 0x3c7   : > { %v7505_v25 = vmul.f32 %v7473_v60, %v16642_v54  ;;  %v7422_v33 = vsub.f32 1.0, %v7390_v45  ;;  %v7450_v53 = vmul.f32 %v7418_v6, %v16643_v29  ;;  %v7480_v19 = vadd.f32 1.0, %v7448_v50  ;;  %v13679_v60 = vpop.permute.xlu2 %8007  ;;  %v16658_v50 = vld [vmem:[#allocation103_spill] sm:$0xff] }
 0x3c8   : > { %v7506_v18 = vmul.f32 %v7474_v56, %v16644_v20  ;;  %v7453_v17 = vmul.f32 %v7421_v11, %v16646_v41  ;;  %v7481_v35 = vadd.f32 1.0, %v7449_v26  ;;  %v13662_v3 = vmul.f32 %v7477_v23, %v16647_v31  ;;  %16653 = vst [vmem:[#allocation49_spill] sm:$0xff] %v13679_v60  ;;  %v13705_v54 = vld [vmem:[#allocation2 + $0x1d0] sm:$0xff]  ;;  %v14082_v60 = vld [vmem:[#allocation2 + $0x200] sm:$0xff] }
 0x3c9   : > { %v13665_v57 = vmul.f32 %v7478_v24, %v16648_v43  ;;  %v7454_v42 = vmul.f32 %v7422_v33, %v16649_v63  ;;  %v7482_v58 = vadd.f32 1.0, %v7450_v53  ;;  %v13671_v46 = vmul.f32 %v7479_v2, %v16650_v62  ;;  %v13703_v2 = vld [vmem:[%s16004_s8 + $0x2] ss:$0 sm:$0xff]  ;;  %v16660_v29 = vld [vmem:[#allocation59_spill] sm:$0xff] }
 0x3ca   : > { %v13674_v4 = vmul.f32 %v7480_v19, %v16651_v13  ;;  %v7485_v5 = vadd.f32 1.0, %v7453_v17  ;;  %v13677_v40 = vmul.f32 %v7481_v35, %v16652_v36  ;;  %v7827_v8 = vrot.slane %v7505_v25, 6  ;;  %v16661_v53 = vld [vmem:[#allocation69_spill] sm:$0xff] }
 0x3cb   : > { %v7828_v21 = vrot.slane %v7506_v18, 6  ;;  %v16654_v38 = vmov 1   ;;  %v7486_v39 = vadd.f32 1.0, %v7454_v42  ;;  %v13683_v12 = vmul.f32 %v7482_v58, %v16655_v49 }
 0x3cc   : > { %8996 = vset.pattern.permute.xlu1 %v16654_v38  ;;  %v7833_v56 = vrot.slane %v13662_v3, 6  ;;  %v7834_v0 = vrot.slane %v13665_v57, 6  ;;  %v13688_v55 = vmul.f32 %v7485_v5, %v16656_v61  ;;  %v7836_v45 = vrot.slane %v13671_v46, 6  ;;  %v7545_v49 = vpop.permute.xlu0 %7544 }
 0x3cd   : > { %v7829_v23 = vsel %vm7826_vm7, %v7827_v8, %v7828_v21  ;;  %v7837_v6 = vrot.slane %v13674_v4, 6  ;;  %8998 = vset.pattern.permute.xlu2 %v16654_v38  ;;  %v13695_v24 = vmul.f32 %v7486_v39, %v16658_v50  ;;  %v7839_v1 = vrot.slane %v13677_v40, 6  ;;  %v7548_v8 = vpop.permute.xlu1 %7547 }
 0x3ce   : > { %16657 = vst [vmem:[#allocation89_spill] sm:$0xff] %v13688_v55  ;;  %v7835_v11 = vsel %vm7826_vm7, %v7833_v56, %v7834_v0  ;;  %v7840_v26 = vrot.slane %v13683_v12, 6  ;;  %v13709_v33 = vmul.f32 %v13705_v54, %v13703_v2  ;;  %v13713_v19 = vmul.f32 %v16661_v53, %v16660_v29  ;;  %v3018_v53 = vld [vmem:[#allocation2 + $0x1d8] sm:$0x3] }
 0x3cf   : > { %16659 = vst [vmem:[#allocation19_spill] sm:$0xff] %v13695_v24  ;;  %v7838_v20 = vsel %vm7826_vm7, %v7836_v45, %v7837_v6  ;;  %v7843_v41 = vrot.slane %v13629_v28, 6  ;;  %v7891_v35 = vsel %vm562_vm0, %v7829_v23, 0.0  ;;  %v7892_v31 = vsel %vm562_vm0, %v13640_v15, 0.0  ;;  %v13738_v50 = vpop.permute.xlu2 %8011 }
 0x3d0   : > { %16662 = vst [vmem:[#allocation52_spill] sm:$0xff] %v13713_v19  ;;  %v7841_v17 = vsel %vm7826_vm7, %v7839_v1, %v7840_v26  ;;  %v7894_v43 = vsel %vm562_vm0, %v7835_v11, 0.0  ;;  %v7845_v63 = vrot.slane %v13688_v55, 6  ;;  %v7846_v42 = vrot.slane %v13695_v24, 6 }
 0x3d1   : > { %v7893_v58 = vadd.f32 %v7892_v31, %v7891_v35  ;;  %v7848_v62 = vrot.slane %v13540_v16, 6  ;;  %v7844_v13 = vsel %vm7826_vm7, %v7842_v34, %v7843_v41  ;;  %v7896_v5 = vsel %vm562_vm0, %v7838_v20, 0.0  ;;  %v694_v34 = vpop.f32.mrf.mxu1  ;;  %16664 = vst [vmem:[#allocation54_spill] sm:$0xff] %v13738_v50  ;;  %v13898_v16 = vld [vmem:[#allocation2 + $0x168] sm:$0xff] }
 0x3d2   : > { %v7585_v36 = vrot.slane %v13625_v59, 2  ;;  %v7849_v15 = vrot.slane %v13713_v19, 6  ;;  %v7898_v38 = vsel %vm562_vm0, %v7841_v17, 0.0  ;;  %v693_v39 = vadd.f32 %v13600_v14, %v692_v30 }
 0x3d3   : > { %v7895_v21 = vadd.f32 %v7894_v43, %v7893_v58  ;;  %v7586_v61 = vrot.slane %v13667_v48, 2  ;;  %v7587_v23 = vrot.slane %v7545_v49, 2  ;;  %v7847_v45 = vsel %vm7826_vm7, %v7845_v63, %v7846_v42  ;;  %v16669_v43 = vld [vmem:[#allocation87_spill] sm:$0xff]  ;;  %v16671_v42 = vld [vmem:[#allocation86_spill] sm:$0xff] }
 0x3d4   : > { %v13733_v56 = vmul.f32 %v7585_v36, %v7505_v25  ;;  %v7618_v0 = vmul.f32 %v7585_v36, %v7506_v18  ;;  %v7900_v59 = vsel %vm562_vm0, %v7844_v13, 0.0  ;;  %8051 = vperm.xlu0 %8995, %v693_v39   ;;  %7580 = vperm.xlu1 %8996, %v693_v39   ;;  %v13750_v29 = vadd.f32 %v13600_v14, %v694_v34  ;;  %v16668_v14 = vld [vmem:[#allocation100_spill] sm:$0xff]  ;;  %v16677_v34 = vld [vmem:[#allocation82_spill] sm:$0xff] }
 0x3d5   : > { %v7897_v6 = vadd.f32 %v7896_v5, %v7895_v21  ;;  %v13742_v25 = vmul.f32 %v7586_v61, %v16637_v44  ;;  %v7620_v18 = vmul.f32 %v7586_v61, %v13618_v9  ;;  %v13746_v1 = vmul.f32 %v7587_v23, %v13662_v3  ;;  %v13772_v5 = vld [vmem:[%s16004_s8 + $0x3] ss:$0 sm:$0xff]  ;;  %v16676_v61 = vld [vmem:[#allocation80_spill] sm:$0xff] }
 0x3d6   : > { %16663 = vst [vmem:[#allocation85_spill] sm:$0xff] %v13733_v56  ;;  %v16179_v30 = vrot.slane %v13733_v56, 7  ;;  %v7683_v11 = vrot.slane %v7618_v0, 7  ;;  %v7622_v26 = vmul.f32 %v7587_v23, %v13665_v57  ;;  %v7902_v20 = vsel %vm562_vm0, %v7847_v45, 0.0  ;;  %7583 = vperm.xlu2 %8998, %v13750_v29   ;;  %v16675_v0 = vld [vmem:[#allocation91_spill] sm:$0xff] }
 0x3d7   : > { %16665 = vst [vmem:[#allocation24_spill] sm:$0xff] %v13742_v25  ;;  %v7899_v48 = vadd.f32 %v7898_v38, %v7897_v6  ;;  %v16178_v44 = vrot.slane %v13742_v25, 7  ;;  %v7686_v9 = vrot.slane %v7620_v18, 7  ;;  %v7850_v17 = vsel %vm7826_vm7, %v7848_v62, %v7849_v15  ;;  %v16679_v6 = vld [vmem:[#allocation74_spill] sm:$0xff] }
 0x3d8   : > { %16666 = vst [vmem:[#allocation41_spill] sm:$0xff] %v13746_v1  ;;  %v13756_v41 = vsel %vm16234_vm8, %v16179_v30, %v7683_v11  ;;  %v16177_v35 = vrot.slane %v13746_v1, 7  ;;  %v7689_v57 = vrot.slane %v7622_v26, 7  ;;  %v3052_v31 = vmul.f32 %v13705_v54, %v16668_v14  ;;  %v7551_v26 = vpop.permute.xlu1 %7550 }
 0x3d9   : > { %16667 = vst [vmem:[#allocation53_spill] sm:$0xff] %v13756_v41  ;;  %v7901_v3 = vadd.f32 %v7900_v59, %v7899_v48  ;;  %v16670_v63 = vrot.slane %v16669_v43, 1  ;;  %v16672_v58 = vrot.slane %v16671_v42, 1  ;;  %v13776_v62 = vmul.f32 %v13772_v5, %v13705_v54 }
 0x3da   : > { %v13781_v36 = vsel %vm16234_vm8, %v16178_v44, %v7686_v9  ;;  %v3395_v15 = vmul.f32 %v13772_v5, %v3018_v53  ;;  %v9636_v21 = vmov 64.0   ;;  %v13787_v49 = vsel %vm16234_vm8, %v16177_v35, %v7689_v57 }
 0x3db   : > { %v3199_v13 = vsel %vm3151_vm5, %v16672_v58, %v16670_v63  ;;  %16673 = vst [vmem:[#allocation39_spill] sm:$0xff] %v13781_v36  ;;  %9216 = vrcp.f32 %v9636_v21  ;;  %v7903_v38 = vadd.f32 %v7902_v20, %v7901_v3  ;;  %v13791_v23 = vadd.f32 %v16676_v61, %v16675_v0  ;;  %v16681_v20 = vld [vmem:[#allocation102_spill] sm:$0xff] }
 0x3dc   : > { %16674 = vst [vmem:[#allocation25_spill] sm:$0xff] %v13787_v49  ;;  %v16678_v45 = vrot.slane %v16677_v34, 1  ;;  %v16680_v59 = vrot.slane %v16679_v6, 1  ;;  %v7904_v18 = vsel %vm562_vm0, %v7850_v17, 0.0  ;;  %v7588_v48 = vrot.slane %v7548_v8, 2  ;;  %8997 = vset.pattern.permute.xlu1 %v16480_v47  ;;  %v13811_v17 = vld [vmem:[#allocation2 + $0x140] sm:$0xff] }
 0x3dd   : > { %v3262_v9 = vadd.f32 %v3199_v13, %v16681_v20  ;;  %v3313_v3 = vrot.slane %v13709_v33, 2  ;;  %v7905_v57 = vadd.f32 %v7904_v18, %v7903_v38  ;;  %v7589_v14 = vrot.slane %v7551_v26, 2  ;;  %2835 = vperm.xlu1 %8997, %v693_v39   ;;  %v13816_v33 = vld [vmem:[%s16004_s8 + $0x4] ss:$0 sm:$0xff]  ;;  %v7554_v39 = vpop.permute.xlu2 %7553  ;;  %v13832_v6 = vld [vmem:[#allocation2 + $0x158] sm:$0xff] }
 0x3de   : > { %v13798_v11 = vsel %vm3151_vm5, %v16680_v59, %v16678_v45  ;;  %v3263_v42 = vadd.f32 %v16670_v63, %v3052_v31  ;;  %v3474_v58 = vrot.slane %v13776_v62, 3  ;;  %v13808_v21 = vmul.f32 %v7588_v48, %v13671_v46  ;;  %8999 = vset.pattern.permute.xlu2 %v16480_v47  ;;  %v13845_v47 = vld [vmem:[#allocation2 + $0x138] sm:$0xff] }
 0x3df   : > { %v7624_v8 = vmul.f32 %v7588_v48, %v13674_v4  ;;  %v3475_v13 = vrot.slane %v3395_v15, 3  ;;  %v13820_v43 = vmul.f32 %v13816_v33, %v13705_v54  ;;  %v3574_v31 = vmul.f32 %v13816_v33, %v3018_v53  ;;  %2839 = vperm.xlu2 %8999, %v13750_v29  }
 0x3e0   : > { %16682 = vst [vmem:[#allocation44_spill] sm:$0xff] %v13808_v21  ;;  %v13824_v46 = vmul.f32 %v7589_v14, %v13677_v40  ;;  %v7906_v62 = vrot.slane %v7905_v57, 4  ;;  %v7590_v4 = vrot.slane %v7554_v39, 2  ;;  %v16175_v38 = vrot.slane %v13808_v21, 7  ;;  %v9415_v40 = vld [vmem:[%s16003_s7 + $0x1] ss:$0 sm:$0xff] }
 0x3e1   : > { %v7692_v15 = vrot.slane %v7624_v8, 7  ;;  %v13827_v0 = vpop.eup %9216  ;;  %v3360_v61 = vadd.f32 %v3313_v3, %v3262_v9  ;;  %v7626_v45 = vmul.f32 %v7589_v14, %v13683_v12  ;;  %v897_v53 = vmul.f32 %v9415_v40, %v13811_v17  ;;  %v3765_v14 = vld [vmem:[#allocation2 + $0x1e0] sm:$0xff]  ;;  %v3767_v21 = vld [vmem:[#allocation2 + $0x1f0] sm:$0x3] }
 0x3e2   : > { %16683 = vst [vmem:[#allocation43_spill] sm:$0xff] %v13824_v46  ;;  %v16174_v54 = vrot.slane %v13824_v46, 7  ;;  %v3361_v59 = vadd.f32 %v3313_v3, %v3263_v42  ;;  %v7628_v18 = vmul.f32 %v7590_v4, %v13629_v28  ;;  %v898_v12 = vmul.f32 %v9415_v40, %v13832_v6  ;;  %v9424_v46 = vld [vmem:[%s16003_s7 + $0x7] ss:$0 sm:$0xff] }
 0x3e3   : > { %v13842_v48 = vsel %vm16234_vm8, %v16175_v38, %v7692_v15  ;;  %v3476_v26 = vsel %vm3428_vm6, %v3474_v58, %v3475_v13  ;;  %v3653_v20 = vrot.slane %v13820_v43, 4  ;;  %v13851_v9 = vmul.f32 %v7590_v4, %v13623_v7  ;;  %v13860_v13 = vld [vmem:[#allocation2 + $0x150] sm:$0xff]  ;;  %v9416_v7 = vld [vmem:[%s16003_s7] ss:$0 sm:$0xff] }
 0x3e4   : > { %16684 = vst [vmem:[#allocation56_spill] sm:$0xff] %v13842_v48  ;;  %v7695_v3 = vrot.slane %v7626_v45, 7  ;;  %v3654_v28 = vrot.slane %v3574_v31, 4  ;;  %v7934_v63 = vmul.f32 64.0, %v13827_v0  ;;  %v7907_v42 = vadd.f32 %v7906_v62, %v7905_v57  ;;  %v799_v57 = vld [vmem:[#allocation2 + $0x148] sm:$0x3] }
 0x3e5   : > { %16685 = vst [vmem:[#allocation51_spill] sm:$0xff] %v13851_v9  ;;  %v7698_v8 = vrot.slane %v7628_v18, 7  ;;  %v16176_v39 = vrot.slane %v13851_v9, 7  ;;  %v839_v43 = vmul.f32 %v9416_v7, %v13845_v47  ;;  %v929_v31 = vrot.slane %v897_v53, 1  ;;  %9000 = vset.pattern.permute.xlu1 %v16476_v10  ;;  %v802_v53 = vld [vmem:[#allocation2 + $0x160] sm:$0x3] }
 0x3e6   : > { %v13858_v15 = vsel %vm16234_vm8, %v16174_v54, %v7695_v3  ;;  %v840_v62 = vmul.f32 %v9416_v7, %v13811_v17  ;;  %v841_v4 = vmul.f32 %v9416_v7, %v13860_v13  ;;  %v842_v45 = vmul.f32 %v9416_v7, %v13832_v6  ;;  %v13873_v54 = vld [vmem:[%s16004_s8 + $0x5] ss:$0 sm:$0xff]  ;;  %8055 = vperm.xlu1 %9000, %v13750_v29   ;;  %v9419_v29 = vld [vmem:[%s16003_s7 + $0x2] ss:$0 sm:$0xff]  ;;  %v13906_v48 = vld [vmem:[#allocation2 + $0x170] sm:$0xff] }
 0x3e7   : > { %16686 = vst [vmem:[#allocation29_spill] sm:$0xff] %v13858_v15  ;;  %v930_v40 = vrot.slane %v898_v12, 1  ;;  %v3539_v18 = vadd.f32 %v3474_v58, %v3360_v61  ;;  %v3540_v3 = vadd.f32 %v3476_v26, %v3361_v59  ;;  %v13876_v38 = vmul.f32 %v13873_v54, %v3765_v14  ;;  %v13888_v58 = vld [vmem:[%s16004_s8 + $0x6] ss:$0 sm:$0xff] }
 0x3e8   : > { %v13882_v10 = vsel %vm16234_vm8, %v16176_v39, %v7698_v8  ;;  %v3655_v12 = vsel %vm3607_vm9, %v3653_v20, %v3654_v28  ;;  %v13891_v61 = vmul.f32 %v13888_v58, %v3765_v14  ;;  %v7935_v59 = vsub.f32 1.0, %v7934_v63  ;;  %v9420_v63 = vld [vmem:[%s16003_s7 + $0x3] ss:$0 sm:$0xff] }
 0x3e9   : > { %16687 = vst [vmem:[#allocation23_spill] sm:$0xff] %v13882_v10  ;;  %v7908_v26 = vrot.slane %v7907_v42, 2  ;;  %v969_v7 = vadd.f32 %v929_v31, %v839_v43  ;;  %v1003_v8 = vmul.f32 %v9419_v29, %v13811_v17  ;;  %v1004_v39 = vmul.f32 %v9419_v29, %v799_v57 }
 0x3ea   : > { %v1005_v28 = vmul.f32 %v9419_v29, %v13832_v6  ;;  %v970_v35 = vadd.f32 %v929_v31, %v840_v62  ;;  %v971_v44 = vadd.f32 %v930_v40, %v841_v4  ;;  %v972_v30 = vadd.f32 %v930_v40, %v842_v45 }
 0x3eb   : > { %v1006_v24 = vmul.f32 %v9419_v29, %v802_v53  ;;  %v1076_v55 = vrot.slane %v1003_v8, 2  ;;  %v1077_v19 = vrot.slane %v1004_v39, 2  ;;  %v1230_v43 = vmul.f32 %v9420_v63, %v13860_v13 }
 0x3ec   : > { %v1079_v14 = vrot.slane %v1005_v28, 2  ;;  %v13904_v15 = vadd.f32 %v3653_v20, %v3539_v18  ;;  %v1231_v31 = vmul.f32 %v9420_v63, %v13832_v6  ;;  %v1232_v62 = vmul.f32 %v9420_v63, %v13898_v16 }
 0x3ed   : > { %v1080_v57 = vrot.slane %v1006_v24, 2  ;;  %v7936_v39 = vmul.f32 %v13827_v0, %v7935_v59  ;;  %v1078_v4 = vsel %vm1051_vm2, %v1076_v55, %v1077_v19  ;;  %v1148_v45 = vadd.f32 %v1076_v55, %v969_v7  ;;  %v9421_v24 = vld [vmem:[%s16003_s7 + $0x4] ss:$0 sm:$0xff]  ;;  %v1190_v59 = vld [vmem:[#allocation2 + $0x160] sm:$0x3]  ;;  %v13920_v19 = vld [vmem:[#allocation2 + $0x1e8] sm:$0xff] }
 0x3ee   : > { %v1233_v40 = vmul.f32 %v9420_v63, %v13906_v48  ;;  %v1149_v29 = vadd.f32 %v1078_v4, %v970_v35  ;;  %v1150_v8 = vadd.f32 %v1079_v14, %v971_v44  ;;  %v1288_v20 = vmul.f32 %v9421_v24, %v13832_v6 }
 0x3ef   : > { %v1081_v53 = vsel %vm1051_vm2, %v1079_v14, %v1080_v57  ;;  %v13918_v18 = vadd.f32 %v3655_v12, %v3540_v3  ;;  %v7909_v28 = vadd.f32 %v7908_v26, %v7907_v42  ;;  %v1262_v9 = vadd.f32 %v1230_v43, %v1148_v45  ;;  %v1193_v14 = vld [vmem:[#allocation2 + $0x178] sm:$0x3] }
 0x3f0   : > { %v1151_v10 = vadd.f32 %v1081_v53, %v972_v30  ;;  %v1263_v7 = vadd.f32 %v1231_v31, %v1149_v29  ;;  %v1264_v63 = vadd.f32 %v1232_v62, %v1150_v8  ;;  %v1289_v44 = vmul.f32 %v9421_v24, %v13906_v48  ;;  %v9422_v30 = vld [vmem:[%s16003_s7 + $0x5] ss:$0 sm:$0xff] }
 0x3f1   : > { %v7937_v35 = vadd.f32 %v13827_v0, %v7936_v39  ;;  %vm7938_vm11 = vweird.f32 %v13827_v0  ;;  %v1320_v3 = vrot.slane %v1288_v20, 1  ;;  %v1394_v42 = vmul.f32 %v9422_v30, %v13832_v6  ;;  %v13939_v29 = vld [vmem:[#allocation2 + $0x180] sm:$0xff] }
 0x3f2   : > { %v1265_v57 = vadd.f32 %v1233_v40, %v1151_v10  ;;  %v1321_v12 = vrot.slane %v1289_v44, 1  ;;  %v1395_v26 = vmul.f32 %v9422_v30, %v1190_v59  ;;  %v1396_v43 = vmul.f32 %v9422_v30, %v13906_v48 }
 0x3f3   : > { %v13933_v31 = vmul.f32 %v13873_v54, %v13920_v19  ;;  %v13937_v62 = vmul.f32 %v13888_v58, %v13920_v19  ;;  %v7910_v10 = vrot.slane %v7909_v28, 1  ;;  %v1360_v39 = vadd.f32 %v1320_v3, %v1262_v9  ;;  %v9423_v9 = vld [vmem:[%s16003_s7 + $0x6] ss:$0 sm:$0xff] }
 0x3f4   : > { %v1361_v4 = vadd.f32 %v1320_v3, %v1263_v7  ;;  %v1362_v45 = vadd.f32 %v1321_v12, %v1264_v63  ;;  %v1397_v40 = vmul.f32 %v9422_v30, %v1193_v14  ;;  %v1466_v53 = vrot.slane %v1394_v42, 2  ;;  %v1581_v42 = vld [vmem:[#allocation2 + $0x178] sm:$0x3] }
 0x3f5   : > { %v13944_v6 = vsel %vm7938_vm11, %v13827_v0, %v7937_v35  ;;  %v1363_v8 = vadd.f32 %v1321_v12, %v1265_v57  ;;  %v1467_v24 = vrot.slane %v1395_v26, 2  ;;  %v1469_v20 = vrot.slane %v1396_v43, 2  ;;  %v1584_v12 = vld [vmem:[#allocation2 + $0x190] sm:$0x3]  ;;  %v16689_v26 = vld [vmem:[#allocation46_spill] sm:$0xff] }
 0x3f6   : > { %16688 = vst [vmem:[#allocation58_spill] sm:$0xff] %v13944_v6  ;;  %v1470_v59 = vrot.slane %v1397_v40, 2  ;;  %v1538_v44 = vadd.f32 %v1466_v53, %v1360_v39  ;;  %v1621_v7 = vmul.f32 %v9423_v9, %v13898_v16  ;;  %v1622_v63 = vmul.f32 %v9423_v9, %v13906_v48 }
 0x3f7   : > { %v7911_v14 = vadd.f32 %v7910_v10, %v7909_v28  ;;  %v1468_v3 = vsel %vm1051_vm2, %v1466_v53, %v1467_v24  ;;  %v1540_v30 = vadd.f32 %v1469_v20, %v1362_v45  ;;  %v1623_v0 = vmul.f32 %v9423_v9, %v13939_v29  ;;  %v9425_v53 = vld [vmem:[%s16003_s7 + $0x8] ss:$0 sm:$0xff] }
 0x3f8   : > { %v1471_v35 = vsel %vm1051_vm2, %v1469_v20, %v1470_v59  ;;  %v1539_v57 = vadd.f32 %v1468_v3, %v1361_v4  ;;  %v1624_v43 = vmul.f32 %v9423_v9, %v16689_v26  ;;  %v1653_v39 = vadd.f32 %v1621_v7, %v1538_v44 }
 0x3f9   : > { %v1541_v40 = vadd.f32 %v1471_v35, %v1363_v8  ;;  %v1655_v55 = vadd.f32 %v1623_v0, %v1540_v30  ;;  %v1679_v28 = vmul.f32 %v9424_v46, %v13906_v48  ;;  %v1680_v10 = vmul.f32 %v9424_v46, %v16689_v26 }
 0x3fa   : > { %v1654_v45 = vadd.f32 %v1622_v63, %v1539_v57  ;;  %v1785_v4 = vmul.f32 %v9425_v53, %v13906_v48  ;;  %v1786_v24 = vmul.f32 %v9425_v53, %v1581_v42  ;;  %v1787_v20 = vmul.f32 %v9425_v53, %v16689_v26 }
 0x3fb   : > { %v1656_v8 = vadd.f32 %v1624_v43, %v1541_v40  ;;  %v1711_v59 = vrot.slane %v1679_v28, 1  ;;  %v1712_v44 = vrot.slane %v1680_v10, 1  ;;  %v1788_v9 = vmul.f32 %v9425_v53, %v1584_v12  ;;  %v13991_v10 = vld [vmem:[%s16004_s8 + $0x8] ss:$0 sm:$0xff] }
 0x3fc   : > { %v3946_v7 = vrot.slane %v13937_v62, 1  ;;  %v1857_v3 = vrot.slane %v1785_v4, 2  ;;  %v1858_v30 = vrot.slane %v1786_v24, 2  ;;  %v1860_v0 = vrot.slane %v1787_v20, 2  ;;  %v13975_v62 = vld [vmem:[%s16004_s8 + $0x7] ss:$0 sm:$0xff] }
 0x3fd   : > { %v1751_v46 = vadd.f32 %v1711_v59, %v1653_v39  ;;  %v1752_v63 = vadd.f32 %v1711_v59, %v1654_v45  ;;  %v1753_v35 = vadd.f32 %v1712_v44, %v1655_v55  ;;  %v1754_v57 = vadd.f32 %v1712_v44, %v1656_v8  ;;  %v13993_v45 = vld [vmem:[#allocation2 + $0x1a0] sm:$0xff]  ;;  %v16696_v59 = vld [vmem:[#allocation71_spill] sm:$0xff] }
 0x3fe   : > { %v3832_v48 = vadd.f32 %v13876_v38, %v13904_v15  ;;  %v13969_v42 = vmul.f32 %v13944_v6, %v7911_v14  ;;  %v1859_v26 = vsel %vm1051_vm2, %v1857_v3, %v1858_v30  ;;  %v1861_v43 = vrot.slane %v1788_v9, 2  ;;  %v16691_v38 = vld [vmem:[#allocation101_spill] sm:$0xff] }
 0x3ff   : > { %v4029_v12 = vmul.f32 %v13975_v62, %v13920_v19  ;;  %v13979_v55 = vadd.f32 %v1857_v3, %v1751_v46  ;;  %v13981_v39 = vadd.f32 %v1859_v26, %v1752_v63  ;;  %v13983_v40 = vadd.f32 %v1860_v0, %v1753_v35  ;;  %v16692_v15 = vld [vmem:[#allocation81_spill] sm:$0xff] }
 0x400   : > { %16690 = vst [vmem:[#allocation50_spill] sm:$0xff] %v13969_v42  ;;  %v16693_v14 = vrot.slane %v16692_v15, 1  ;;  %v13997_v53 = vmul.f32 %v13993_v45, %v13991_v10  ;;  %v16694_v4 = vrot.slane %v13891_v61, 1  ;;  %v1862_v20 = vsel %vm1051_vm2, %v1860_v0, %v1861_v43  ;;  %v16695_v8 = vld [vmem:[#allocation93_spill] sm:$0xff]  ;;  %v16699_v43 = vld [vmem:[#allocation94_spill] sm:$0xff] }
 0x401   : > { %v3828_v44 = vadd.f32 %v16696_v59, %v16695_v8  ;;  %v3833_v9 = vadd.f32 %v13933_v31, %v13918_v18  ;;  %v4143_v3 = vmul.f32 %v13991_v10, %v3767_v21  ;;  %v14008_v30 = vadd.f32 %v1862_v20, %v1754_v57  ;;  %v16698_v57 = vld [vmem:[#allocation98_spill] sm:$0xff] }
 0x402   : > { %v4005_v28 = vadd.f32 %v16693_v14, %v16691_v38  ;;  %v3947_v24 = vsel %vm3151_vm5, %v16694_v4, %v3946_v7  ;;  %v4142_v46 = vmul.f32 %v13991_v10, %v13920_v19  ;;  %v14013_v63 = vmul.f32 0.70710677, %v13969_v42  ;;  %v14032_v15 = vld [vmem:[%s16004_s8 + $0x9] ss:$0 sm:$0xff]  ;;  %v14050_v20 = vld [vmem:[%s16004_s8 + $0xa] ss:$0 sm:$0xff] }
 0x403   : > { %v14016_v61 = vmul.f32 0.70710677, %v13979_v55  ;;  %v14019_v0 = vmul.f32 0.70710677, %v13981_v39  ;;  %v4010_v35 = vadd.f32 %v3947_v24, %v3832_v48  ;;  %v4061_v26 = vrot.slane %v4029_v12, 2  ;;  %16700 = vst [vmem:[#allocation57_spill] sm:$0xff] %v14032_v15 }
 0x404   : > { %16697 = vst [vmem:[#allocation97_spill] sm:$0xff] %v14013_v63  ;;  %v14022_v18 = vmul.f32 0.70710677, %v13983_v40  ;;  %v14025_v31 = vmul.f32 0.70710677, %v14008_v30  ;;  %v4004_v38 = vadd.f32 %v16699_v43, %v16698_v57  ;;  %v14036_v14 = vmul.f32 %v14032_v15, %v13993_v45 }
 0x405   : > { %v4321_v48 = vmul.f32 %v14032_v15, %v3767_v21  ;;  %v14040_v12 = vand.u32 2147483647, %v14016_v61  ;;  %v16701_v4 = vrot.slane %v16677_v34, 1  ;;  %16702 = vst [vmem:[#allocation66_spill] sm:$0xff] %v14050_v20  ;;  %v14054_v8 = vmul.f32 %v14050_v20, %v13993_v45 }
 0x406   : > { %v4011_v59 = vadd.f32 %v3946_v7, %v3833_v9  ;;  %v4222_v57 = vrot.slane %v4143_v3, 3  ;;  %v4221_v21 = vrot.slane %v4142_v46, 3  ;;  %v4320_v43 = vmul.f32 %v14032_v15, %v13920_v19  ;;  %v14075_v19 = vld [vmem:[%s16004_s8 + $0xb] ss:$0 sm:$0xff] }
 0x407   : > { %v14045_v24 = vadd.f32 %v16701_v4, %v13791_v23  ;;  %16703 = vst [vmem:[#allocation99_spill] sm:$0xff] %v14054_v8  ;;  %v14059_v49 = vand.u32 2147483647, %v14013_v63  ;;  %v14062_v23 = vand.u32 2147483647, %v14019_v0  ;;  %v4108_v34 = vadd.f32 %v4061_v26, %v4010_v35 }
 0x408   : > { %v14065_v4 = vand.u32 2147483647, %v14022_v18  ;;  %v14068_v1 = vand.u32 2147483647, %v14025_v31  ;;  %v2121_v7 = vmul.f32 0.3275911, %v14040_v12  ;;  %v14079_v3 = vmul.f32 %v14075_v19, %v13993_v45 }
 0x409   : > { %16704 = vst [vmem:[#allocation60_spill] sm:$0xff] %v14059_v49  ;;  %v4212_v9 = vrot.slane %v13997_v53, 3  ;;  %v4400_v46 = vrot.slane %v4321_v48, 4  ;;  %v2122_v35 = vmul.f32 0.3275911, %v14062_v23  ;;  %v4109_v50 = vadd.f32 %v4061_v26, %v4011_v59  ;;  %v9432_v26 = vld [vmem:[#allocation2 + $0x1f8] sm:$0xff] }
 0x40a   : > { %16705 = vst [vmem:[#allocation95_spill] sm:$0xff] %v14075_v19  ;;  %v2123_v22 = vmul.f32 0.3275911, %v14065_v4  ;;  %v2124_v36 = vmul.f32 0.3275911, %v14068_v1  ;;  %v2153_v53 = vadd.f32 1.0, %v2121_v7  ;;  %v4223_v25 = vsel %vm3428_vm6, %v4221_v21, %v4222_v57 }
 0x40b   : > { %16706 = vst [vmem:[#allocation67_spill] sm:$0xff] %v14079_v3  ;;  %v4399_v41 = vrot.slane %v4320_v43, 4  ;;  %v7952_v56 = vmul.f32 0.3275911, %v14059_v49  ;;  %v2154_v32 = vadd.f32 1.0, %v2122_v35  ;;  %v4286_v52 = vadd.f32 %v4221_v21, %v4108_v34  ;;  %v16707_v7 = vld [vmem:[#allocation83_spill] sm:$0xff] }
 0x40c   : > { %v2155_v27 = vadd.f32 1.0, %v2123_v22  ;;  %v2156_v51 = vadd.f32 1.0, %v2124_v36  ;;  %9218 = vrcp.f32 %v2153_v53  ;;  %v4006_v48 = vadd.f32 %v13798_v11, %v3828_v44  ;;  %v16710_v22 = vld [vmem:[#allocation76_spill] sm:$0xff] }
 0x40d   : > { %v4612_v59 = vmul.f32 %v9432_v26, %v14075_v19  ;;  %v4613_v37 = vmul.f32 %v14075_v19, %v14082_v60  ;;  %9220 = vrcp.f32 %v2154_v32  ;;  %v16708_v42 = vrot.slane %v16707_v7, 2  ;;  %v9433_v32 = vld [vmem:[%s16004_s8 + $0xc] ss:$0 sm:$0xff] }
 0x40e   : > { %v4287_v35 = vadd.f32 %v4223_v25, %v4109_v50  ;;  %9222 = vrcp.f32 %v2155_v27  ;;  %v16711_v36 = vrot.slane %v16710_v22, 3  ;;  %v4401_v11 = vsel %vm3607_vm9, %v4399_v41, %v4400_v46  ;;  %v4513_v50 = vld [vmem:[#allocation2 + $0x208] sm:$0x3]  ;;  %v16713_v25 = vld [vmem:[#allocation84_spill] sm:$0xff] }
 0x40f   : > { %v4102_v57 = vadd.f32 %v16708_v42, %v4004_v38  ;;  %v16709_v43 = vmov %v16708_v42  ;;  %v7954_v44 = vadd.f32 1.0, %v7952_v56  ;;  %9224 = vrcp.f32 %v2156_v51 }
 0x410   : > { %v4103_v6 = vadd.f32 %v16709_v43, %v4005_v28  ;;  %v4214_v21 = vsel %vm3428_vm6, %v4212_v9, %v16711_v36  ;;  %v14105_v42 = vmul.f32 %v9433_v32, %v13993_v45  ;;  %v4464_v28 = vadd.f32 %v4399_v41, %v4286_v52  ;;  %v9434_v45 = vld [vmem:[%s16004_s8 + $0xd] ss:$0 sm:$0xff] }
 0x411   : > { %v4546_v27 = vmul.f32 %v9432_v26, %v14050_v20  ;;  %v16714_v38 = vrot.slane %v16713_v25, 2  ;;  %v4691_v51 = vrot.slane %v4612_v59, 1  ;;  %v4692_v46 = vrot.slane %v4613_v37, 1 }
 0x412   : > { %16712 = vst [vmem:[#allocation96_spill] sm:$0xff] %v14105_v42  ;;  %v14113_v7 = vpop.eup %9218  ;;  %v4280_v43 = vadd.f32 %v4212_v9, %v4102_v57  ;;  %v14115_v22 = vadd.f32 %v4214_v21, %v4103_v6  ;;  %v4465_v36 = vadd.f32 %v4401_v11, %v4287_v35  ;;  %v4547_v52 = vmul.f32 %v14050_v20, %v14082_v60 }
 0x413   : > { %v14110_v53 = vadd.f32 %v16714_v38, %v4006_v48  ;;  %v14119_v41 = vpop.eup %9220  ;;  %v4889_v48 = vmul.f32 %v9434_v45, %v4513_v50  ;;  %9226 = vrcp.f32 %v7954_v44  ;;  %v2217_v26 = vmul.f32 1.0614054, %v14113_v7  ;;  %v9435_v44 = vld [vmem:[%s16004_s8 + $0xe] ss:$0 sm:$0xff] }
 0x414   : > { %16716 = vst [vmem:[#allocation92_spill] sm:$0xff] %v14115_v22  ;;  %v2505_v37 = vsub.f32 0.0, %v14040_v12  ;;  %v14126_v59 = vpop.eup %9222  ;;  %v4578_v6 = vadd.f32 %v4546_v27, %v4464_v28  ;;  %v4775_v9 = vmul.f32 %v9433_v32, %v14082_v60  ;;  %v2218_v57 = vmul.f32 1.0614054, %v14119_v41 }
 0x415   : > { %16715 = vst [vmem:[#allocation68_spill] sm:$0xff] %v14110_v53  ;;  %v2506_v35 = vsub.f32 0.0, %v14062_v23  ;;  %v14131_v21 = vpop.eup %9224  ;;  %v4693_v11 = vsel %vm3151_vm5, %v4691_v51, %v4692_v46  ;;  %v5067_v38 = vmul.f32 %v9435_v44, %v4513_v50  ;;  %v2219_v56 = vmul.f32 1.0614054, %v14126_v59 }
 0x416   : > { %v2249_v34 = vadd.f32 -1.4531521, %v2217_v26  ;;  %v4579_v63 = vadd.f32 %v4547_v52, %v4465_v36  ;;  %v2220_v28 = vmul.f32 1.0614054, %v14131_v21  ;;  %v2250_v32 = vadd.f32 -1.4531521, %v2218_v57 }
 0x417   : > { %v2507_v27 = vsub.f32 0.0, %v14065_v4  ;;  %v4888_v49 = vmul.f32 %v9434_v45, %v14082_v60  ;;  %v2251_v42 = vadd.f32 -1.4531521, %v2219_v56  ;;  %v2537_v51 = vmul.f32 %v2505_v37, %v14040_v12  ;;  %v16718_v36 = vld [vmem:[#allocation78_spill] sm:$0xff] }
 0x418   : > { %v2281_v3 = vmul.f32 %v14113_v7, %v2249_v34  ;;  %v4756_v8 = vadd.f32 %v4693_v11, %v4578_v6  ;;  %v4807_v19 = vrot.slane %v4775_v9, 2  ;;  %v2508_v50 = vsub.f32 0.0, %v14068_v1 }
 0x419   : > { %v2538_v20 = vmul.f32 %v2506_v35, %v14062_v23  ;;  %v14145_v26 = vpop.eup %9226  ;;  %v16719_v52 = vrot.slane %v16718_v36, 4  ;;  %v16720_v57 = vrot.slane %v14036_v14, 4  ;;  %v5066_v56 = vmul.f32 %v9435_v44, %v14082_v60 }
 0x41a   : > { %16717 = vst [vmem:[#allocation103_spill] sm:$0xff] %v14145_v26  ;;  %v2252_v34 = vadd.f32 -1.4531521, %v2220_v28  ;;  %v2282_v12 = vmul.f32 %v14119_v41, %v2250_v32  ;;  %v4757_v45 = vadd.f32 %v4692_v46, %v4579_v63  ;;  %v2283_v37 = vmul.f32 %v14126_v59, %v2251_v42 }
 0x41b   : > { %v14152_v22 = vsel %vm3607_vm9, %v16720_v57, %v16719_v52  ;;  %v2313_v6 = vadd.f32 1.4214138, %v2281_v3  ;;  %v2539_v23 = vmul.f32 %v2507_v27, %v14065_v4  ;;  %v4967_v9 = vrot.slane %v4888_v49, 3  ;;  %v9436_v49 = vld [vmem:[%s16004_s8 + $0x10] ss:$0 sm:$0xff] }
 0x41c   : > { %v4968_v35 = vrot.slane %v4889_v48, 3  ;;  %v5146_v11 = vrot.slane %v5067_v38, 4  ;;  %v2585_v36 = vmul.f32 1.442695, %v2537_v51  ;;  %v4854_v53 = vadd.f32 %v4807_v19, %v4756_v8  ;;  %v9437_v48 = vld [vmem:[%s16004_s8 + $0xf] ss:$0 sm:$0xff] }
 0x41d   : > { %v7958_v15 = vmul.f32 1.0614054, %v14145_v26  ;;  %v2540_v52 = vmul.f32 %v2508_v50, %v14068_v1  ;;  %v2587_v57 = vmul.f32 1.442695, %v2538_v20  ;;  %v2284_v44 = vmul.f32 %v14131_v21, %v2252_v34 }
 0x41e   : > { %v2314_v28 = vadd.f32 1.4214138, %v2282_v12  ;;  %v2315_v32 = vadd.f32 1.4214138, %v2283_v37  ;;  %v2345_v63 = vmul.f32 %v14113_v7, %v2313_v6  ;;  %v4855_v42 = vadd.f32 %v4807_v19, %v4757_v45 }
 0x41f   : > { %v5145_v3 = vrot.slane %v5066_v56, 4  ;;  %v14166_v4 = vmul.f32 %v9436_v49, %v14082_v60  ;;  %v2589_v8 = vmul.f32 1.442695, %v2539_v23  ;;  %v16722_v46 = vrot.slane %v14036_v14, 4  ;;  %v2995_v49 = vld [vmem:[#allocation2 + $0x120] sm:$0xff] }
 0x420   : > { %v4969_v20 = vsel %vm3428_vm6, %v4967_v9, %v4968_v35  ;;  %v14177_v19 = vmul.f32 %v9437_v48, %v14082_v60  ;;  %9228 = vpow2.f32 %v2585_v36  ;;  %v5032_v38 = vadd.f32 %v4967_v9, %v4854_v53 }
 0x421   : > { %16721 = vst [vmem:[#allocation59_spill] sm:$0xff] %v14166_v4  ;;  %v14170_v1 = vadd.f32 %v16722_v46, %v4280_v43  ;;  %v7960_v27 = vadd.f32 -1.4531521, %v7958_v15  ;;  %9230 = vpow2.f32 %v2587_v57  ;;  %v2591_v51 = vmul.f32 1.442695, %v2540_v52 }
 0x422   : > { %16724 = vst [vmem:[#allocation100_spill] sm:$0xff] %v14177_v19  ;;  %v2316_v50 = vadd.f32 1.4214138, %v2284_v44  ;;  %v2346_v56 = vmul.f32 %v14119_v41, %v2314_v28  ;;  %v2347_v14 = vmul.f32 %v14126_v59, %v2315_v32  ;;  %v2377_v43 = vadd.f32 -0.28449672, %v2345_v63 }
 0x423   : > { %16723 = vst [vmem:[#allocation69_spill] sm:$0xff] %v14170_v1  ;;  %v14181_v34 = vadd.f32 %v4969_v20, %v4855_v42  ;;  %v14184_v12 = vsel %vm3607_vm9, %v5145_v3, %v5146_v11  ;;  %9232 = vpow2.f32 %v2589_v8  ;;  %v14189_v6 = vadd.f32 %v5145_v3, %v5032_v38  ;;  %v14203_v8 = vld [vmem:[#allocation2 + $0x128] sm:$0xff] }
 0x424   : > { %16726 = vst [vmem:[#allocation86_spill] sm:$0xff] %v14184_v12  ;;  %v2348_v60 = vmul.f32 %v14131_v21, %v2316_v50  ;;  %v2378_v53 = vadd.f32 -0.28449672, %v2346_v56  ;;  %v2379_v15 = vadd.f32 -0.28449672, %v2347_v14  ;;  %v2409_v37 = vmul.f32 %v14113_v7, %v2377_v43 }
 0x425   : > { %16725 = vst [vmem:[#allocation87_spill] sm:$0xff] %v14181_v34  ;;  %v7962_v23 = vmul.f32 %v14145_v26, %v7960_v27  ;;  %v14193_v9 = vmul.f32 0.5, %v13979_v55  ;;  %9234 = vpow2.f32 %v2591_v51  ;;  %v1962_v28 = vmul.f32 0.5, %v13981_v39 }
 0x426   : > { %16727 = vst [vmem:[#allocation91_spill] sm:$0xff] %v14189_v6  ;;  %v9229_v35 = vpop.eup %9228  ;;  %v2380_v11 = vadd.f32 -0.28449672, %v2348_v60  ;;  %v2410_v36 = vmul.f32 %v14119_v41, %v2378_v53  ;;  %v2411_v52 = vmul.f32 %v14126_v59, %v2379_v15  ;;  %v2441_v57 = vadd.f32 0.2548296, %v2409_v37  ;;  %v14227_v53 = vld [vmem:[#allocation2 + $0x1b0] sm:$0xff] }
 0x427   : > { %v9231_v44 = vpop.eup %9230  ;;  %v1963_v32 = vmul.f32 0.5, %v13983_v40  ;;  %vm2025_vm2 = vcmp.ge.f32.partialorder %v14016_v61, 0.0  ;;  %vm2026_vm12 = vcmp.ge.f32.partialorder %v14019_v0, 0.0  ;;  %v14205_v20 = vadd.f32 1.4214138, %v7962_v23  ;;  %v14229_v15 = vld [vmem:[#allocation2 + $0x1b8] sm:$0xff] }
 0x428   : > { %v2412_v55 = vmul.f32 %v14131_v21, %v2380_v11  ;;  %v2442_v63 = vadd.f32 0.2548296, %v2410_v36  ;;  %v2443_v42 = vadd.f32 0.2548296, %v2411_v52  ;;  %v2473_v3 = vmul.f32 %v14113_v7, %v2441_v57 }
 0x429   : > { %v9233_v46 = vpop.eup %9232  ;;  %16728 = vst [vmem:[#allocation80_spill] sm:$0xff] %v14205_v20  ;;  %v1964_v39 = vmul.f32 0.5, %v14008_v30  ;;  %vm2027_vm13 = vcmp.ge.f32.partialorder %v14022_v18, 0.0  ;;  %vm2028_vm14 = vcmp.ge.f32.partialorder %v14025_v31, 0.0  ;;  %v16729_v7 = vmov -1.0  }
 0x42a   : > { %v2444_v40 = vadd.f32 0.2548296, %v2412_v55  ;;  %v2474_v48 = vmul.f32 %v14119_v41, %v2442_v63  ;;  %v2475_v38 = vmul.f32 %v14126_v59, %v2443_v42  ;;  %v2633_v27 = vmul.f32 %v9229_v35, %v2473_v3  ;;  %v14221_v30 = vld [vmem:[%s16004_s8 + $0x1] ss:$0 sm:$0xff] }
 0x42b   : > { %v9235_v51 = vpop.eup %9234  ;;  %v2057_v50 = vsel %vm2025_vm2, 1.0, %v16729_v7  ;;  %v2058_v56 = vsel %vm2026_vm12, 1.0, %v16729_v7  ;;  %v3103_v14 = vmul.f32 %v14221_v30, %v2995_v49  ;;  %v3104_v41 = vmul.f32 %v14221_v30, %v14203_v8 }
 0x42c   : > { %v2476_v59 = vmul.f32 %v14131_v21, %v2444_v40  ;;  %v2634_v43 = vmul.f32 %v9231_v44, %v2474_v48  ;;  %v2635_v60 = vmul.f32 %v9233_v46, %v2475_v38  ;;  %v2665_v61 = vsub.f32 1.0, %v2633_v27  ;;  %v14250_v46 = vld [vmem:[%s16004_s8] ss:$0 sm:$0xff] }
 0x42d   : > { %v2059_v0 = vsel %vm2027_vm13, 1.0, %v16729_v7  ;;  %v2060_v37 = vsel %vm2028_vm14, 1.0, %v16729_v7  ;;  %v3105_v23 = vmul.f32 %v14221_v30, %v13845_v47  ;;  %v3106_v21 = vmul.f32 %v14221_v30, %v13811_v17 }
 0x42e   : > { %v2636_v35 = vmul.f32 %v9235_v51, %v2476_v59  ;;  %v2666_v11 = vsub.f32 1.0, %v2634_v43  ;;  %v2667_v36 = vsub.f32 1.0, %v2635_v60  ;;  %v2697_v52 = vmul.f32 %v2665_v61, %v2057_v50 }
 0x42f   : > { %v3115_v57 = vmul.f32 %v14221_v30, %v14227_v53  ;;  %v14245_v18 = vmul.f32 %v14221_v30, %v14229_v15  ;;  %v3176_v44 = vrot.slane %v3103_v14, 1  ;;  %v3177_v31 = vrot.slane %v3104_v41, 1 }
 0x430   : > { %v2668_v55 = vsub.f32 1.0, %v2636_v35  ;;  %v2698_v63 = vmul.f32 %v2666_v11, %v2058_v56  ;;  %v2699_v42 = vmul.f32 %v2667_v36, %v2059_v0  ;;  %v2729_v3 = vadd.f32 1.0, %v2697_v52  ;;  %v14258_v56 = vld [vmem:[#allocation2 + $0x130] sm:$0x3] }
 0x431   : > { %v3037_v40 = vmul.f32 %v14250_v46, %v2995_v49  ;;  %v3038_v48 = vmul.f32 %v14250_v46, %v14203_v8  ;;  %v3179_v38 = vrot.slane %v3105_v23, 1  ;;  %v3180_v27 = vrot.slane %v3106_v21, 1  ;;  %v14274_v23 = vld [vmem:[#allocation2 + $0x148] sm:$0x3] }
 0x432   : > { %v2700_v51 = vmul.f32 %v2668_v55, %v2060_v37  ;;  %v2730_v50 = vadd.f32 1.0, %v2698_v63  ;;  %v2731_v14 = vadd.f32 1.0, %v2699_v42  ;;  %v14256_v41 = vmul.f32 %v2729_v3, %v14193_v9  ;;  %v14303_v55 = vld [vmem:[#allocation2 + $0x1c0] sm:$0x3] }
 0x433   : > { %v3178_v59 = vsel %vm3151_vm5, %v3176_v44, %v3177_v31  ;;  %v3194_v43 = vrot.slane %v3115_v57, 1  ;;  %v3274_v60 = vmul.f32 %v13703_v2, %v14203_v8  ;;  %v14265_v49 = vmul.f32 %v13772_v5, %v14203_v8 }
 0x434   : > { %16730 = vst [vmem:[#allocation82_spill] sm:$0xff] %v14256_v41  ;;  %v2732_v61 = vadd.f32 1.0, %v2700_v51  ;;  %v14267_v0 = vmul.f32 %v2730_v50, %v1962_v28  ;;  %v14269_v37 = vmul.f32 %v2731_v14, %v1963_v32  ;;  %v3195_v9 = vrot.slane %v14245_v18, 1  ;;  %v3006_v14 = vld [vmem:[#allocation2 + $0x178] sm:$0x3] }
 0x435   : > { %2955 = vst.msk [vmem:[#allocation2 + $0x151] sm:$0x80] %vm16733_vm15, %v14256_v41  ;;  %v3039_v21 = vmul.f32 %v14250_v46, %v13845_v47  ;;  %v3040_v35 = vmul.f32 %v14250_v46, %v13811_v17  ;;  %v3249_v11 = vadd.f32 %v3177_v31, %v3038_v48  ;;  %v3381_v28 = vmul.f32 %v13772_v5, %v14258_v56  ;;  %v3003_v48 = vld [vmem:[#allocation2 + $0x160] sm:$0x3] }
 0x436   : > { %16731 = vst [vmem:[#allocation74_spill] sm:$0xff] %v14267_v0  ;;  %v14282_v36 = vmul.f32 %v2732_v61, %v1964_v39  ;;  %v3181_v32 = vsel %vm3151_vm5, %v3179_v38, %v3180_v27  ;;  %v3248_v52 = vadd.f32 %v3178_v59, %v3037_v40  ;;  %v3275_v57 = vmul.f32 %v13703_v2, %v13811_v17 }
 0x437   : > { %16732 = vst [vmem:[#allocation102_spill] sm:$0xff] %v14269_v37  ;;  %v14293_v18 = vmul.f32 %v14250_v46, %v13860_v13  ;;  %v3049_v39 = vmul.f32 %v14250_v46, %v14227_v53  ;;  %v3050_v44 = vmul.f32 %v14250_v46, %v14229_v15  ;;  %v3280_v31 = vmul.f32 %v13703_v2, %v14229_v15 }
 0x438   : > { %16734 = vst [vmem:[#allocation46_spill] sm:$0xff] %v14282_v36  ;;  %v3107_v63 = vmul.f32 %v14221_v30, %v13860_v13  ;;  %v3196_v42 = vsel %vm3151_vm5, %v3194_v43, %v3195_v9  ;;  %v3382_v3 = vmul.f32 %v13772_v5, %v13811_v17  ;;  %v3383_v40 = vmul.f32 %v13772_v5, %v14274_v23 }
 0x439   : > { %2956 = vst.msk [vmem:[#allocation2 + $0x159] sm:$0x7f] %vm16735_vm1, %v14267_v0  ;;  %v14314_v2 = vmul.f32 %v14250_v46, %v13898_v16  ;;  %v3109_v38 = vmul.f32 %v14221_v30, %v13898_v16  ;;  %v3250_v51 = vadd.f32 %v3181_v32, %v3039_v21  ;;  %v3306_v50 = vrot.slane %v3274_v60, 2 }
 0x43a   : > { %2957 = vst.msk [vmem:[#allocation2 + $0x169] sm:$0x80] %vm16736_vm3, %v14269_v37  ;;  %v3251_v59 = vadd.f32 %v3180_v27, %v3040_v35  ;;  %v3307_v61 = vrot.slane %v3275_v57, 2  ;;  %v3453_v43 = vrot.slane %v14265_v49, 3  ;;  %v3454_v45 = vrot.slane %v3381_v28, 3 }
 0x43b   : > { %2958 = vst.msk [vmem:[#allocation2 + $0x171] sm:$0x7f] %vm16737_vm4, %v14282_v36  ;;  %v3260_v36 = vadd.f32 %v3196_v42, %v3049_v39  ;;  %v3312_v0 = vrot.slane %v3280_v31, 2  ;;  %v14321_v41 = vmul.f32 %v13772_v5, %v14229_v15  ;;  %v3393_v37 = vmul.f32 %v13772_v5, %v14303_v55 }
 0x43c   : > { %v3182_v26 = vrot.slane %v3107_v63, 1  ;;  %v3261_v20 = vadd.f32 %v3195_v9, %v3050_v44  ;;  %v3456_v7 = vrot.slane %v3382_v3, 3  ;;  %v3457_v21 = vrot.slane %v3383_v40, 3 }
 0x43d   : > { %v3346_v27 = vadd.f32 %v3306_v50, %v3248_v52  ;;  %v3347_v35 = vadd.f32 %v3306_v50, %v3249_v11  ;;  %v3385_v49 = vmul.f32 %v13772_v5, %v3003_v48  ;;  %v14329_v28 = vmul.f32 %v13772_v5, %v3006_v14 }
 0x43e   : > { %v3185_v57 = vrot.slane %v3109_v38, 1  ;;  %v3348_v39 = vadd.f32 %v3307_v61, %v3250_v51  ;;  %v3455_v31 = vsel %vm3428_vm6, %v3453_v43, %v3454_v45  ;;  %v3349_v9 = vadd.f32 %v3307_v61, %v3251_v59 }
 0x43f   : > { %v3358_v44 = vadd.f32 %v3312_v0, %v3260_v36  ;;  %v3471_v42 = vrot.slane %v14321_v41, 3  ;;  %v3472_v52 = vrot.slane %v3393_v37, 3  ;;  %v3359_v40 = vadd.f32 %v3312_v0, %v3261_v20  ;;  %v9440_v41 = vld [vmem:[%s16004_s8 + $0x2] ss:$0 sm:$0xff] }
 0x440   : > { %v14325_v60 = vld [vmem:[#allocation2 + $0x158] sm:$0xff]  ;;  %v3458_v50 = vsel %vm3428_vm6, %v3456_v7, %v3457_v21  ;;  %v3460_v4 = vrot.slane %v3385_v49, 3  ;;  %v3463_v38 = vrot.slane %v14329_v28, 3  ;;  %v3525_v51 = vadd.f32 %v3453_v43, %v3346_v27 }
 0x441   : > { %v3108_v32 = vmul.f32 %v14221_v30, %v14325_v60  ;;  %v3526_v6 = vadd.f32 %v3455_v31, %v3347_v35  ;;  %v3042_v45 = vmul.f32 %v14250_v46, %v14325_v60  ;;  %v3276_v37 = vmul.f32 %v9440_v41, %v14325_v60 }
 0x442   : > { %v14334_v63 = vld [vmem:[#allocation2 + $0x170] sm:$0xff]  ;;  %v3527_v36 = vadd.f32 %v3456_v7, %v3348_v39  ;;  %v3559_v20 = vmul.f32 %v13816_v33, %v14203_v8  ;;  %v3384_v0 = vmul.f32 %v13772_v5, %v14325_v60  ;;  %v3473_v59 = vsel %vm3428_vm6, %v3471_v42, %v3472_v52 }
 0x443   : > { %v3110_v11 = vmul.f32 %v14221_v30, %v14334_v63  ;;  %v3183_v3 = vrot.slane %v3108_v32, 1  ;;  %v3528_v61 = vadd.f32 %v3458_v50, %v3349_v9  ;;  %v3560_v21 = vmul.f32 %v13816_v33, %v14258_v56 }
 0x444   : > { %v3561_v27 = vmul.f32 %v13816_v33, %v13811_v17  ;;  %v3562_v7 = vmul.f32 %v13816_v33, %v14274_v23  ;;  %v3044_v8 = vmul.f32 %v14250_v46, %v14334_v63  ;;  %v3277_v35 = vmul.f32 %v9440_v41, %v14334_v63 }
 0x445   : > { %v3186_v30 = vrot.slane %v3110_v11, 1  ;;  %v3184_v43 = vsel %vm3151_vm5, %v3182_v26, %v3183_v3  ;;  %v3564_v49 = vmul.f32 %v13816_v33, %v3003_v48  ;;  %v3566_v28 = vmul.f32 %v13816_v33, %v3006_v14 }
 0x446   : > { %v3253_v32 = vadd.f32 %v3183_v3, %v3042_v45  ;;  %v3308_v26 = vrot.slane %v3276_v37, 2  ;;  %v3386_v56 = vmul.f32 %v13772_v5, %v14334_v63  ;;  %v3571_v39 = vmul.f32 %v13816_v33, %v14229_v15 }
 0x447   : > { %v3187_v31 = vsel %vm3151_vm5, %v3185_v57, %v3186_v30  ;;  %v3252_v23 = vadd.f32 %v3184_v43, %v14293_v18  ;;  %v3459_v9 = vrot.slane %v3384_v0, 3  ;;  %v3563_v46 = vmul.f32 %v13816_v33, %v14325_v60 }
 0x448   : > { %v14374_v48 = vmul.f32 %v13816_v33, %v14334_v63  ;;  %v3572_v14 = vmul.f32 %v13816_v33, %v14303_v55  ;;  %v3632_v52 = vrot.slane %v3559_v20, 4  ;;  %v3633_v5 = vrot.slane %v3560_v21, 4 }
 0x449   : > { %v3255_v11 = vadd.f32 %v3186_v30, %v3044_v8  ;;  %v3309_v3 = vrot.slane %v3277_v35, 2  ;;  %v3635_v50 = vrot.slane %v3561_v27, 4  ;;  %v3636_v45 = vrot.slane %v3562_v7, 4 }
 0x44a   : > { %v3254_v57 = vadd.f32 %v3187_v31, %v14314_v2  ;;  %v3351_v18 = vadd.f32 %v3308_v26, %v3253_v32  ;;  %v3462_v41 = vrot.slane %v3386_v56, 3  ;;  %v3537_v37 = vadd.f32 %v3471_v42, %v3358_v44 }
 0x44b   : > { %v3350_v0 = vadd.f32 %v3308_v26, %v3252_v23  ;;  %v3461_v43 = vsel %vm3428_vm6, %v3459_v9, %v3460_v4  ;;  %v3638_v19 = vrot.slane %v3563_v46, 4  ;;  %v3639_v12 = vrot.slane %v3564_v49, 4  ;;  %v14391_v23 = vld [vmem:[#allocation2 + $0x188] sm:$0xff] }
 0x44c   : > { %v3641_v34 = vrot.slane %v14374_v48, 4  ;;  %v3642_v1 = vrot.slane %v3566_v28, 4  ;;  %v3650_v33 = vrot.slane %v3571_v39, 4  ;;  %v3651_v55 = vrot.slane %v3572_v14, 4 }
 0x44d   : > { %v3353_v20 = vadd.f32 %v3309_v3, %v3255_v11  ;;  %v3538_v30 = vadd.f32 %v3473_v59, %v3359_v40  ;;  %v3634_v21 = vsel %vm3607_vm9, %v3632_v52, %v3633_v5  ;;  %v3637_v27 = vsel %vm3607_vm9, %v3635_v50, %v3636_v45 }
 0x44e   : > { %v3352_v2 = vadd.f32 %v3309_v3, %v3254_v57  ;;  %v3464_v7 = vsel %vm3428_vm6, %v3462_v41, %v3463_v38  ;;  %v3530_v44 = vadd.f32 %v3461_v43, %v3351_v18  ;;  %v3704_v42 = vadd.f32 %v3632_v52, %v3525_v51 }
 0x44f   : > { %v3529_v8 = vadd.f32 %v3459_v9, %v3350_v0  ;;  %v3640_v4 = vsel %vm3607_vm9, %v3638_v19, %v3639_v12  ;;  %v3706_v35 = vadd.f32 %v3635_v50, %v3527_v36  ;;  %v3786_v49 = vmul.f32 %v13873_v54, %v13845_v47  ;;  %v14397_v9 = vld [vmem:[#allocation2 + $0x1c8] sm:$0xff] }
 0x450   : > { %v3643_v28 = vsel %vm3607_vm9, %v3641_v34, %v3642_v1  ;;  %v3652_v40 = vsel %vm3607_vm9, %v3650_v33, %v3651_v55  ;;  %v3705_v59 = vadd.f32 %v3634_v21, %v3526_v6  ;;  %v3707_v32 = vadd.f32 %v3637_v27, %v3528_v61  ;;  %v14399_v6 = vld [vmem:[#allocation2 + $0x1d0] sm:$0xff] }
 0x451   : > { %v3532_v26 = vadd.f32 %v3464_v7, %v3353_v20  ;;  %v3716_v56 = vadd.f32 %v3650_v33, %v3537_v37  ;;  %v3717_v39 = vadd.f32 %v3652_v40, %v3538_v30  ;;  %v3787_v38 = vmul.f32 %v13873_v54, %v13811_v17 }
 0x452   : > { %v3531_v51 = vadd.f32 %v3462_v41, %v3352_v2  ;;  %v3709_v31 = vadd.f32 %v3640_v4, %v3530_v44  ;;  %v3788_v12 = vmul.f32 %v13873_v54, %v13860_v13  ;;  %v3789_v1 = vmul.f32 %v13873_v54, %v14325_v60 }
 0x453   : > { %v3708_v36 = vadd.f32 %v3638_v19, %v3529_v8  ;;  %v3790_v61 = vmul.f32 %v13873_v54, %v13898_v16  ;;  %v3852_v46 = vmul.f32 %v13888_v58, %v13845_v47  ;;  %v3853_v48 = vmul.f32 %v13888_v58, %v13811_v17 }
 0x454   : > { %v3854_v14 = vmul.f32 %v13888_v58, %v13860_v13  ;;  %v3855_v52 = vmul.f32 %v13888_v58, %v14325_v60  ;;  %v3856_v19 = vmul.f32 %v13888_v58, %v13898_v16  ;;  %v3857_v5 = vmul.f32 %v13888_v58, %v14334_v63 }
 0x455   : > { %v3711_v11 = vadd.f32 %v3643_v28, %v3532_v26  ;;  %v3791_v3 = vmul.f32 %v13873_v54, %v14334_v63  ;;  %v3858_v47 = vmul.f32 %v13888_v58, %v13939_v29  ;;  %v3859_v17 = vmul.f32 %v13888_v58, %v14391_v23 }
 0x456   : > { %v3792_v13 = vmul.f32 %v13873_v54, %v13939_v29  ;;  %v3793_v50 = vmul.f32 %v13873_v54, %v14391_v23  ;;  %v3864_v16 = vmul.f32 %v13888_v58, %v14397_v9  ;;  %v3865_v45 = vmul.f32 %v13888_v58, %v14399_v6 }
 0x457   : > { %v3710_v57 = vadd.f32 %v3641_v34, %v3531_v51  ;;  %v3798_v18 = vmul.f32 %v13873_v54, %v14397_v9  ;;  %v3924_v41 = vrot.slane %v3852_v46, 1  ;;  %v3925_v37 = vrot.slane %v3853_v48, 1  ;;  %v14444_v48 = vld [vmem:[#allocation2 + $0x178] sm:$0x3] }
 0x458   : > { %v3927_v0 = vrot.slane %v3854_v14, 1  ;;  %v3928_v43 = vrot.slane %v3855_v52, 1  ;;  %v3930_v33 = vrot.slane %v3856_v19, 1  ;;  %v3931_v55 = vrot.slane %v3857_v5, 1 }
 0x459   : > { %v3799_v29 = vmul.f32 %v13873_v54, %v14399_v6  ;;  %v3818_v20 = vadd.f32 %v3786_v49, %v3704_v42  ;;  %v3933_v30 = vrot.slane %v3858_v47, 1  ;;  %v3934_v21 = vrot.slane %v3859_v17, 1  ;;  %v14437_v49 = vld [vmem:[#allocation2 + $0x140] sm:$0xff] }
 0x45a   : > { %v3819_v27 = vadd.f32 %v3787_v38, %v3705_v59  ;;  %v3820_v2 = vadd.f32 %v3788_v12, %v3706_v35  ;;  %v3942_v7 = vrot.slane %v3864_v16, 1  ;;  %v3943_v58 = vrot.slane %v3865_v45, 1  ;;  %v3746_v12 = vld [vmem:[#allocation2 + $0x148] sm:$0x3] }
 0x45b   : > { %v3821_v34 = vadd.f32 %v3789_v1, %v3707_v32  ;;  %v3822_v44 = vadd.f32 %v3790_v61, %v3708_v36  ;;  %v3823_v8 = vadd.f32 %v3791_v3, %v3709_v31  ;;  %v3926_v4 = vsel %vm3151_vm5, %v3924_v41, %v3925_v37 }
 0x45c   : > { %v3824_v28 = vadd.f32 %v3792_v13, %v3710_v57  ;;  %v3825_v40 = vadd.f32 %v3793_v50, %v3711_v11  ;;  %v3929_v26 = vsel %vm3151_vm5, %v3927_v0, %v3928_v43  ;;  %v3932_v51 = vsel %vm3151_vm5, %v3930_v33, %v3931_v55  ;;  %v3755_v11 = vld [vmem:[#allocation2 + $0x190] sm:$0x3]  ;;  %v3761_v50 = vld [vmem:[#allocation2 + $0x1c0] sm:$0x3] }
 0x45d   : > { %v3830_v46 = vadd.f32 %v3798_v18, %v3716_v56  ;;  %v3831_v54 = vadd.f32 %v3799_v29, %v3717_v39  ;;  %v3935_v42 = vsel %vm3151_vm5, %v3933_v30, %v3934_v21  ;;  %v4022_v35 = vmul.f32 %v14437_v49, %v13975_v62  ;;  %v3749_v39 = vld [vmem:[#allocation2 + $0x160] sm:$0x3]  ;;  %v9442_v30 = vld [vmem:[#allocation2 + $0x1b8] sm:$0xff] }
 0x45e   : > { %v3944_v59 = vsel %vm3151_vm5, %v3942_v7, %v3943_v58  ;;  %v3996_v32 = vadd.f32 %v3926_v4, %v3818_v20  ;;  %v3997_v38 = vadd.f32 %v3925_v37, %v3819_v27  ;;  %v4023_v31 = vmul.f32 %v13975_v62, %v14325_v60 }
 0x45f   : > { %v3998_v1 = vadd.f32 %v3929_v26, %v3820_v2  ;;  %v3999_v36 = vadd.f32 %v3928_v43, %v3821_v34  ;;  %v4000_v61 = vadd.f32 %v3932_v51, %v3822_v44  ;;  %v4001_v56 = vadd.f32 %v3931_v55, %v3823_v8  ;;  %v3764_v2 = vld [vmem:[#allocation2 + $0x1d8] sm:$0x3] }
 0x460   : > { %v4002_v14 = vadd.f32 %v3935_v42, %v3824_v28  ;;  %v4003_v52 = vadd.f32 %v3934_v21, %v3825_v40  ;;  %v4024_v19 = vmul.f32 %v13975_v62, %v14334_v63  ;;  %v4025_v5 = vmul.f32 %v13975_v62, %v14391_v23 }
 0x461   : > { %v4008_v3 = vadd.f32 %v3944_v59, %v3830_v46  ;;  %v4009_v47 = vadd.f32 %v3943_v58, %v3831_v54  ;;  %v4028_v17 = vmul.f32 %v13975_v62, %v14399_v6  ;;  %v4054_v13 = vrot.slane %v4022_v35, 2 }
 0x462   : > { %v4055_v16 = vrot.slane %v4023_v31, 2  ;;  %v16738_v45 = vrot.slane %v16713_v25, 2  ;;  %v4128_v18 = vmul.f32 %v14437_v49, %v13991_v10  ;;  %v4129_v41 = vmul.f32 %v13991_v10, %v3746_v12 }
 0x463   : > { %v4130_v37 = vmul.f32 %v13991_v10, %v14325_v60  ;;  %v4131_v0 = vmul.f32 %v13991_v10, %v3749_v39  ;;  %v4132_v62 = vmul.f32 %v13991_v10, %v14334_v63  ;;  %v4133_v43 = vmul.f32 %v13991_v10, %v14444_v48 }
 0x464   : > { %v14455_v57 = vadd.f32 %v16738_v45, %v14045_v24  ;;  %v4056_v33 = vrot.slane %v4024_v19, 2  ;;  %v4057_v25 = vrot.slane %v4025_v5, 2  ;;  %v14469_v24 = vmul.f32 %v13991_v10, %v14391_v23 }
 0x465   : > { %v4135_v55 = vmul.f32 %v13991_v10, %v3755_v11  ;;  %v4060_v29 = vrot.slane %v4028_v17, 2  ;;  %v4094_v20 = vadd.f32 %v4054_v13, %v3996_v32  ;;  %v14473_v21 = vmul.f32 %v9442_v30, %v13991_v10 }
 0x466   : > { %v4139_v27 = vmul.f32 %v13991_v10, %v3761_v50  ;;  %v4095_v7 = vadd.f32 %v4054_v13, %v3997_v38  ;;  %v4096_v58 = vadd.f32 %v4055_v16, %v3998_v1  ;;  %v4200_v34 = vrot.slane %v4128_v18, 3 }
 0x467   : > { %v4201_v44 = vrot.slane %v4129_v41, 3  ;;  %v4203_v8 = vrot.slane %v4130_v37, 3  ;;  %v4204_v4 = vrot.slane %v4131_v0, 3  ;;  %v4206_v28 = vrot.slane %v4132_v62, 3 }
 0x468   : > { %v4207_v40 = vrot.slane %v4133_v43, 3  ;;  %v4097_v26 = vadd.f32 %v4055_v16, %v3999_v36  ;;  %v4140_v51 = vmul.f32 %v13991_v10, %v14399_v6  ;;  %v4209_v46 = vrot.slane %v14469_v24, 3 }
 0x469   : > { %v4210_v54 = vrot.slane %v4135_v55, 3  ;;  %v4098_v42 = vadd.f32 %v4056_v33, %v4000_v61  ;;  %v4141_v35 = vmul.f32 %v13991_v10, %v3764_v2  ;;  %v4215_v59 = vrot.slane %v14473_v21, 3  ;;  %v16739_v61 = vld [vmem:[#allocation57_spill] sm:$0xff] }
 0x46a   : > { %v4216_v32 = vrot.slane %v4139_v27, 3  ;;  %v4099_v38 = vadd.f32 %v4056_v33, %v4001_v56  ;;  %v4100_v31 = vadd.f32 %v4057_v25, %v4002_v14  ;;  %v4101_v1 = vadd.f32 %v4057_v25, %v4003_v52 }
 0x46b   : > { %v4106_v19 = vadd.f32 %v4060_v29, %v4008_v3  ;;  %v4107_v5 = vadd.f32 %v4060_v29, %v4009_v47  ;;  %v4202_v17 = vsel %vm3428_vm6, %v4200_v34, %v4201_v44  ;;  %v4205_v36 = vsel %vm3428_vm6, %v4203_v8, %v4204_v4 }
 0x46c   : > { %v4208_v13 = vsel %vm3428_vm6, %v4206_v28, %v4207_v40  ;;  %v4211_v16 = vsel %vm3428_vm6, %v4209_v46, %v4210_v54  ;;  %v4218_v45 = vrot.slane %v4140_v51, 3  ;;  %v4306_v10 = vmul.f32 %v14437_v49, %v16739_v61 }
 0x46d   : > { %v4307_v18 = vmul.f32 %v16739_v61, %v3746_v12  ;;  %v4217_v56 = vsel %vm3428_vm6, %v4215_v59, %v4216_v32  ;;  %v4219_v14 = vrot.slane %v4141_v35, 3  ;;  %v4308_v52 = vmul.f32 %v16739_v61, %v14325_v60  ;;  %v16740_v32 = vld [vmem:[#allocation68_spill] sm:$0xff] }
 0x46e   : > { %v4309_v3 = vmul.f32 %v16739_v61, %v3749_v39  ;;  %v4272_v47 = vadd.f32 %v4200_v34, %v4094_v20  ;;  %v4273_v41 = vadd.f32 %v4202_v17, %v4095_v7  ;;  %v4310_v37 = vmul.f32 %v16739_v61, %v14334_v63 }
 0x46f   : > { %v4311_v0 = vmul.f32 %v16739_v61, %v14444_v48  ;;  %v4312_v49 = vmul.f32 %v16739_v61, %v14391_v23  ;;  %v4313_v12 = vmul.f32 %v16739_v61, %v3755_v11  ;;  %v4316_v62 = vmul.f32 %v9442_v30, %v16739_v61 }
 0x470   : > { %v4317_v43 = vmul.f32 %v16739_v61, %v3761_v50  ;;  %v4318_v39 = vmul.f32 %v16739_v61, %v14399_v6  ;;  %v4319_v33 = vmul.f32 %v16739_v61, %v3764_v2  ;;  %v4378_v25 = vrot.slane %v4306_v10, 4  ;;  %v4490_v10 = vld [vmem:[#allocation2 + $0x150] sm:$0xff] }
 0x471   : > { %v4379_v24 = vrot.slane %v4307_v18, 4  ;;  %v4220_v55 = vsel %vm3428_vm6, %v4218_v45, %v4219_v14  ;;  %v4274_v29 = vadd.f32 %v4203_v8, %v4096_v58  ;;  %v4381_v48 = vrot.slane %v4308_v52, 4 }
 0x472   : > { %v4382_v20 = vrot.slane %v4309_v3, 4  ;;  %v4275_v21 = vadd.f32 %v4205_v36, %v4097_v26  ;;  %v4276_v27 = vadd.f32 %v4206_v28, %v4098_v42  ;;  %v4384_v7 = vrot.slane %v4310_v37, 4 }
 0x473   : > { %v4385_v11 = vrot.slane %v4311_v0, 4  ;;  %v4387_v34 = vrot.slane %v4312_v49, 4  ;;  %v4388_v30 = vrot.slane %v4313_v12, 4  ;;  %v4393_v44 = vrot.slane %v4316_v62, 4  ;;  %v14521_v12 = vld [vmem:[#allocation2 + $0x1e8] sm:$0xff] }
 0x474   : > { %v4394_v50 = vrot.slane %v4317_v43, 4  ;;  %v4277_v4 = vadd.f32 %v4208_v13, %v4099_v38  ;;  %v4380_v40 = vsel %vm3607_vm9, %v4378_v25, %v4379_v24  ;;  %v4396_v51 = vrot.slane %v4318_v39, 4  ;;  %v9444_v43 = vld [vmem:[#allocation2 + $0x180] sm:$0xff] }
 0x475   : > { %v4397_v2 = vrot.slane %v4319_v33, 4  ;;  %v4278_v54 = vadd.f32 %v4209_v46, %v4100_v31  ;;  %v4279_v35 = vadd.f32 %v4211_v16, %v4101_v1  ;;  %v4282_v17 = vadd.f32 %v4215_v59, %v16740_v32 }
 0x476   : > { %v4383_v58 = vsel %vm3607_vm9, %v4381_v48, %v4382_v20  ;;  %v4283_v8 = vadd.f32 %v4217_v56, %v14455_v57  ;;  %v4284_v28 = vadd.f32 %v4218_v45, %v4106_v19  ;;  %v4285_v26 = vadd.f32 %v4220_v55, %v4107_v5  ;;  %v16741_v57 = vld [vmem:[#allocation92_spill] sm:$0xff]  ;;  %v16743_v56 = vld [vmem:[#allocation66_spill] sm:$0xff] }
 0x477   : > { %v4386_v42 = vsel %vm3607_vm9, %v4384_v7, %v4385_v11  ;;  %v4389_v36 = vsel %vm3607_vm9, %v4387_v34, %v4388_v30  ;;  %v4395_v38 = vsel %vm3607_vm9, %v4393_v44, %v4394_v50  ;;  %v4450_v13 = vadd.f32 %v4378_v25, %v4272_v47  ;;  %v14515_v5 = vld [vmem:[#allocation2 + $0x198] sm:$0xff]  ;;  %v9443_v47 = vld [vmem:[#allocation2 + $0x168] sm:$0xff] }
 0x478   : > { %v4451_v61 = vadd.f32 %v4380_v40, %v4273_v41  ;;  %v4398_v46 = vsel %vm3607_vm9, %v4396_v51, %v4397_v2  ;;  %v4452_v31 = vadd.f32 %v4381_v48, %v4274_v29  ;;  %v4453_v1 = vadd.f32 %v4383_v58, %v4275_v21  ;;  %16742 = vst [vmem:[#allocation101_spill] sm:$0xff] %v14515_v5  ;;  %v9445_v48 = vld [vmem:[%s16004_s8 + $0xa] ss:$0 sm:$0xff]  ;;  %v16745_v30 = vld [vmem:[#allocation95_spill] sm:$0xff] }
 0x479   : > { %v4454_v59 = vadd.f32 %v4384_v7, %v4276_v27  ;;  %v4455_v16 = vadd.f32 %v4386_v42, %v4277_v4  ;;  %v4456_v18 = vadd.f32 %v4387_v34, %v4278_v54  ;;  %v4457_v14 = vadd.f32 %v4389_v36, %v4279_v35  ;;  %v9446_v54 = vld [vmem:[%s16004_s8 + $0xb] ss:$0 sm:$0xff] }
 0x47a   : > { %v4459_v19 = vadd.f32 %v14152_v22, %v16741_v57  ;;  %v4460_v45 = vadd.f32 %v4393_v44, %v4282_v17  ;;  %v4532_v52 = vmul.f32 %v16743_v56, %v4490_v10  ;;  %v4533_v3 = vmul.f32 %v16743_v56, %v14325_v60  ;;  %v14525_v22 = vld [vmem:[#allocation2 + $0x1e0] sm:$0xff] }
 0x47b   : > { %v4534_v41 = vmul.f32 %v9443_v47, %v16743_v56  ;;  %v4461_v37 = vadd.f32 %v4395_v38, %v4283_v8  ;;  %v4462_v0 = vadd.f32 %v4396_v51, %v4284_v28  ;;  %v4463_v49 = vadd.f32 %v4398_v46, %v4285_v26  ;;  %16744 = vst [vmem:[#allocation81_spill] sm:$0xff] %v14525_v22 }
 0x47c   : > { %v4535_v62 = vmul.f32 %v16743_v56, %v14334_v63  ;;  %v4536_v39 = vmul.f32 %v9444_v43, %v16743_v56  ;;  %v4537_v33 = vmul.f32 %v16743_v56, %v14391_v23  ;;  %v4538_v25 = vmul.f32 %v16743_v56, %v14515_v5 }
 0x47d   : > { %v4540_v24 = vmul.f32 %v16743_v56, %v14227_v53  ;;  %v4541_v55 = vmul.f32 %v16743_v56, %v14229_v15  ;;  %v4542_v29 = vmul.f32 %v16743_v56, %v14397_v9  ;;  %v4543_v20 = vmul.f32 %v9445_v48, %v14399_v6 }
 0x47e   : > { %v4544_v21 = vmul.f32 %v9445_v48, %v14525_v22  ;;  %v4545_v27 = vmul.f32 %v9445_v48, %v14521_v12  ;;  %v4564_v7 = vadd.f32 %v4532_v52, %v4450_v13  ;;  %v4565_v11 = vadd.f32 %v4533_v3, %v4451_v61 }
 0x47f   : > { %v4566_v34 = vadd.f32 %v4534_v41, %v4452_v31  ;;  %v4598_v44 = vmul.f32 %v16745_v30, %v4490_v10  ;;  %v4599_v50 = vmul.f32 %v16745_v30, %v14325_v60  ;;  %v4600_v4 = vmul.f32 %v9443_v47, %v16745_v30 }
 0x480   : > { %v4601_v40 = vmul.f32 %v16745_v30, %v14334_v63  ;;  %v4567_v51 = vadd.f32 %v4535_v62, %v4453_v1  ;;  %v4568_v2 = vadd.f32 %v4536_v39, %v4454_v59  ;;  %v4602_v35 = vmul.f32 %v9446_v54, %v9444_v43  ;;  %v16746_v1 = vld [vmem:[#allocation99_spill] sm:$0xff] }
 0x481   : > { %v4603_v32 = vmul.f32 %v9446_v54, %v14391_v23  ;;  %v4569_v17 = vadd.f32 %v4537_v33, %v4455_v16  ;;  %v4604_v58 = vmul.f32 %v9446_v54, %v14515_v5  ;;  %v4606_v8 = vmul.f32 %v9446_v54, %v14227_v53  ;;  %v16747_v53 = vld [vmem:[#allocation69_spill] sm:$0xff] }
 0x482   : > { %v4607_v28 = vmul.f32 %v9446_v54, %v14229_v15  ;;  %v4608_v26 = vmul.f32 %v9446_v54, %v14397_v9  ;;  %v4609_v42 = vmul.f32 %v9446_v54, %v14399_v6  ;;  %v4610_v36 = vmul.f32 %v9446_v54, %v14525_v22 }
 0x483   : > { %v4611_v38 = vmul.f32 %v9446_v54, %v14521_v12  ;;  %v4670_v13 = vrot.slane %v4598_v44, 1  ;;  %v4671_v61 = vrot.slane %v4599_v50, 1  ;;  %v4673_v10 = vrot.slane %v4600_v4, 1  ;;  %v16748_v4 = vld [vmem:[#allocation67_spill] sm:$0xff] }
 0x484   : > { %v4674_v46 = vrot.slane %v4601_v40, 1  ;;  %v4570_v31 = vadd.f32 %v4538_v25, %v4456_v18  ;;  %v4571_v59 = vadd.f32 %v16746_v1, %v4457_v14  ;;  %v4676_v16 = vrot.slane %v4602_v35, 1 }
 0x485   : > { %v4677_v57 = vrot.slane %v4603_v32, 1  ;;  %v4572_v56 = vadd.f32 %v4540_v24, %v16747_v53  ;;  %v4679_v52 = vrot.slane %v4604_v58, 1  ;;  %v4682_v3 = vrot.slane %v4606_v8, 1  ;;  %v14600_v53 = vld [vmem:[#allocation2 + $0x1a8] sm:$0x3] }
 0x486   : > { %v4683_v47 = vrot.slane %v4607_v28, 1  ;;  %v4573_v41 = vadd.f32 %v4541_v55, %v4459_v19  ;;  %v4574_v62 = vadd.f32 %v4542_v29, %v4460_v45  ;;  %v4685_v43 = vrot.slane %v4608_v26, 1  ;;  %v9447_v45 = vld [vmem:[%s16004_s8 + $0xc] ss:$0 sm:$0xff] }
 0x487   : > { %v4686_v39 = vrot.slane %v4609_v42, 1  ;;  %v4672_v33 = vsel %vm3151_vm5, %v4670_v13, %v4671_v61  ;;  %v4675_v48 = vsel %vm3151_vm5, %v4673_v10, %v4674_v46  ;;  %v4688_v30 = vrot.slane %v4610_v36, 1  ;;  %v14590_v13 = vld [vmem:[#allocation2 + $0x160] sm:$0x3]  ;;  %v14594_v10 = vld [vmem:[#allocation2 + $0x190] sm:$0x3] }
 0x488   : > { %v4689_v44 = vrot.slane %v4611_v38, 1  ;;  %v4575_v18 = vadd.f32 %v4543_v20, %v4461_v37  ;;  %v4576_v25 = vadd.f32 %v4544_v21, %v4462_v0  ;;  %v4577_v14 = vadd.f32 %v4545_v27, %v4463_v49 }
 0x489   : > { %v4678_v50 = vsel %vm3151_vm5, %v4676_v16, %v4677_v57  ;;  %v16749_v24 = vrot.slane %v16748_v4, 1  ;;  %v4684_v19 = vsel %vm3151_vm5, %v4682_v3, %v4683_v47  ;;  %v4768_v55 = vmul.f32 %v9447_v45, %v14325_v60  ;;  %v9449_v4 = vld [vmem:[#allocation2 + $0x1a0] sm:$0xff] }
 0x48a   : > { %v4769_v29 = vmul.f32 %v9447_v45, %v14334_v63  ;;  %v4687_v37 = vsel %vm3151_vm5, %v4685_v43, %v4686_v39  ;;  %v4742_v0 = vadd.f32 %v4672_v33, %v4564_v7  ;;  %v4743_v49 = vadd.f32 %v4671_v61, %v4565_v11  ;;  %v14592_v61 = vld [vmem:[#allocation2 + $0x178] sm:$0x3] }
 0x48b   : > { %v4681_v40 = vsel %vm3151_vm5, %v4679_v52, %v16749_v24  ;;  %v4744_v20 = vadd.f32 %v4675_v48, %v4566_v34  ;;  %v4690_v21 = vsel %vm3151_vm5, %v4688_v30, %v4689_v44  ;;  %v4745_v27 = vadd.f32 %v4674_v46, %v4567_v51  ;;  %v16750_v34 = vld [vmem:[#allocation96_spill] sm:$0xff]  ;;  %v14611_v48 = vld [vmem:[#allocation2 + $0x1f0] sm:$0x3] }
 0x48c   : > { %v4746_v54 = vadd.f32 %v4678_v50, %v4568_v2  ;;  %v4747_v35 = vadd.f32 %v4677_v57, %v4569_v17  ;;  %v4770_v32 = vmul.f32 %v9447_v45, %v14391_v23  ;;  %v14579_v58 = vmul.f32 %v9447_v45, %v14229_v15 }
 0x48d   : > { %v14582_v8 = vmul.f32 %v9447_v45, %v14399_v6  ;;  %v14585_v28 = vmul.f32 %v9447_v45, %v14521_v12  ;;  %v4748_v26 = vadd.f32 %v4681_v40, %v4570_v31  ;;  %v4800_v7 = vrot.slane %v4768_v55, 2  ;;  %v9448_v31 = vld [vmem:[%s16004_s8 + $0xd] ss:$0 sm:$0xff] }
 0x48e   : > { %v4801_v11 = vrot.slane %v4769_v29, 2  ;;  %v4803_v42 = vrot.slane %v16750_v34, 2  ;;  %v16751_v51 = vmov %v16749_v24  ;;  %v4750_v17 = vadd.f32 %v4684_v19, %v4572_v56 }
 0x48f   : > { %v4749_v2 = vadd.f32 %v16751_v51, %v4571_v59  ;;  %v4751_v36 = vadd.f32 %v4683_v47, %v4573_v41  ;;  %v4752_v38 = vadd.f32 %v4687_v37, %v4574_v62  ;;  %v4753_v46 = vadd.f32 %v4686_v39, %v4575_v18  ;;  %v14605_v47 = vld [vmem:[#allocation2 + $0x1c0] sm:$0x3]  ;;  %v14607_v41 = vld [vmem:[#allocation2 + $0x1d8] sm:$0x3] }
 0x490   : > { %v4754_v1 = vadd.f32 %v4690_v21, %v4576_v25  ;;  %v4755_v16 = vadd.f32 %v4689_v44, %v4577_v14  ;;  %v4874_v57 = vmul.f32 %v9448_v31, %v14325_v60  ;;  %v4802_v59 = vrot.slane %v4770_v32, 2 }
 0x491   : > { %v4804_v56 = vrot.slane %v14579_v58, 2  ;;  %v4805_v52 = vrot.slane %v14582_v8, 2  ;;  %v4806_v3 = vrot.slane %v14585_v28, 2  ;;  %v4840_v62 = vadd.f32 %v4800_v7, %v4742_v0 }
 0x492   : > { %v4841_v43 = vadd.f32 %v4800_v7, %v4743_v49  ;;  %v4842_v39 = vadd.f32 %v4801_v11, %v4744_v20  ;;  %v14609_v33 = vadd.f32 %v4803_v42, %v4748_v26  ;;  %v4843_v30 = vadd.f32 %v4801_v11, %v4745_v27 }
 0x493   : > { %v4875_v44 = vmul.f32 %v9448_v31, %v14590_v13  ;;  %v4876_v18 = vmul.f32 %v9448_v31, %v14334_v63  ;;  %v4877_v25 = vmul.f32 %v9448_v31, %v14592_v61  ;;  %v4878_v14 = vmul.f32 %v9448_v31, %v14391_v23 }
 0x494   : > { %v4879_v50 = vmul.f32 %v9448_v31, %v14594_v10  ;;  %v14618_v24 = vmul.f32 %v9449_v4, %v9448_v31  ;;  %v4881_v40 = vmul.f32 %v9448_v31, %v14600_v53  ;;  %v14622_v19 = vmul.f32 %v9448_v31, %v14229_v15 }
 0x495   : > { %v4883_v45 = vmul.f32 %v9448_v31, %v14605_v47  ;;  %v14626_v55 = vmul.f32 %v9448_v31, %v14399_v6  ;;  %v4885_v29 = vmul.f32 %v9448_v31, %v14607_v41  ;;  %v4844_v37 = vadd.f32 %v4802_v59, %v4746_v54 }
 0x496   : > { %v4845_v0 = vadd.f32 %v4802_v59, %v4747_v35  ;;  %v14630_v49 = vmul.f32 %v9448_v31, %v14521_v12  ;;  %v4887_v20 = vmul.f32 %v9448_v31, %v14611_v48  ;;  %v4946_v21 = vrot.slane %v4874_v57, 3 }
 0x497   : > { %v4947_v27 = vrot.slane %v4875_v44, 3  ;;  %v4949_v32 = vrot.slane %v4876_v18, 3  ;;  %v4950_v58 = vrot.slane %v4877_v25, 3  ;;  %v4952_v8 = vrot.slane %v4878_v14, 3 }
 0x498   : > { %v4953_v28 = vrot.slane %v4879_v50, 3  ;;  %v4955_v26 = vrot.slane %v14618_v24, 3  ;;  %v4956_v7 = vrot.slane %v4881_v40, 3  ;;  %v4958_v11 = vrot.slane %v14622_v19, 3 }
 0x499   : > { %v4959_v34 = vrot.slane %v4883_v45, 3  ;;  %v4961_v54 = vrot.slane %v14626_v55, 3  ;;  %v4962_v35 = vrot.slane %v4885_v29, 3  ;;  %v4847_v51 = vadd.f32 %v4803_v42, %v4749_v2 }
 0x49a   : > { %v4848_v59 = vadd.f32 %v4804_v56, %v4750_v17  ;;  %v4964_v22 = vrot.slane %v14630_v49, 3  ;;  %v4965_v31 = vrot.slane %v4887_v20, 3  ;;  %v4849_v57 = vadd.f32 %v4804_v56, %v4751_v36 }
 0x49b   : > { %v4850_v44 = vadd.f32 %v4805_v52, %v4752_v38  ;;  %v4948_v18 = vsel %vm3428_vm6, %v4946_v21, %v4947_v27  ;;  %v4951_v25 = vsel %vm3428_vm6, %v4949_v32, %v4950_v58  ;;  %v4851_v14 = vadd.f32 %v4805_v52, %v4753_v46  ;;  %v9450_v46 = vld [vmem:[%s16004_s8 + $0xe] ss:$0 sm:$0xff] }
 0x49c   : > { %v4852_v50 = vadd.f32 %v4806_v3, %v4754_v1  ;;  %v4853_v24 = vadd.f32 %v4806_v3, %v4755_v16  ;;  %v4954_v40 = vsel %vm3428_vm6, %v4952_v8, %v4953_v28  ;;  %v4957_v19 = vsel %vm3428_vm6, %v4955_v26, %v4956_v7 }
 0x49d   : > { %v4960_v45 = vsel %vm3428_vm6, %v4958_v11, %v4959_v34  ;;  %v4963_v42 = vsel %vm3428_vm6, %v4961_v54, %v4962_v35  ;;  %v5018_v2 = vadd.f32 %v4946_v21, %v4840_v62  ;;  %v4966_v17 = vsel %vm3428_vm6, %v4964_v22, %v4965_v31 }
 0x49e   : > { %v5019_v36 = vadd.f32 %v4948_v18, %v4841_v43  ;;  %v5020_v38 = vadd.f32 %v4949_v32, %v4842_v39  ;;  %v5021_v56 = vadd.f32 %v4951_v25, %v4843_v30  ;;  %v5052_v1 = vmul.f32 %v9450_v46, %v14325_v60 }
 0x49f   : > { %v5053_v16 = vmul.f32 %v9450_v46, %v14590_v13  ;;  %v5054_v52 = vmul.f32 %v9450_v46, %v14334_v63  ;;  %v5055_v3 = vmul.f32 %v9450_v46, %v14592_v61  ;;  %v5056_v55 = vmul.f32 %v9450_v46, %v14391_v23 }
 0x4a0   : > { %v5057_v62 = vmul.f32 %v9450_v46, %v14594_v10  ;;  %v5058_v29 = vmul.f32 %v9450_v46, %v9449_v4  ;;  %v5059_v43 = vmul.f32 %v9450_v46, %v14600_v53  ;;  %v5060_v39 = vmul.f32 %v9450_v46, %v14229_v15 }
 0x4a1   : > { %v5061_v30 = vmul.f32 %v9450_v46, %v14605_v47  ;;  %v5062_v49 = vmul.f32 %v9450_v46, %v14399_v6  ;;  %v5063_v60 = vmul.f32 %v9450_v46, %v14607_v41  ;;  %v5022_v13 = vadd.f32 %v4952_v8, %v4844_v37 }
 0x4a2   : > { %v5023_v20 = vadd.f32 %v4954_v40, %v4845_v0  ;;  %v5064_v63 = vmul.f32 %v9450_v46, %v14521_v12  ;;  %v5065_v61 = vmul.f32 %v9450_v46, %v14611_v48  ;;  %v5124_v21 = vrot.slane %v5052_v1, 4 }
 0x4a3   : > { %v5125_v27 = vrot.slane %v5053_v16, 4  ;;  %v5127_v10 = vrot.slane %v5054_v52, 4  ;;  %v5128_v4 = vrot.slane %v5055_v3, 4  ;;  %v5130_v32 = vrot.slane %v5056_v55, 4  ;;  %v14674_v55 = vld [vmem:[#allocation2 + $0x1a0] sm:$0xff] }
 0x4a4   : > { %v5131_v53 = vrot.slane %v5057_v62, 4  ;;  %v5133_v58 = vrot.slane %v5058_v29, 4  ;;  %v5134_v15 = vrot.slane %v5059_v43, 4  ;;  %v5136_v28 = vrot.slane %v5060_v39, 4  ;;  %v14676_v62 = vld [vmem:[#allocation2 + $0x1b8] sm:$0xff]  ;;  %v14687_v43 = vld [vmem:[#allocation2 + $0x1b0] sm:$0xff] }
 0x4a5   : > { %v5137_v47 = vrot.slane %v5061_v30, 4  ;;  %v5139_v7 = vrot.slane %v5062_v49, 4  ;;  %v5140_v34 = vrot.slane %v5063_v60, 4  ;;  %v5024_v41 = vadd.f32 %v4955_v26, %v14609_v33  ;;  %16753 = vst [vmem:[#allocation71_spill] sm:$0xff] %v14687_v43  ;;  %v14689_v39 = vld [vmem:[#allocation2 + $0x210] sm:$0xff]  ;;  %v14691_v30 = vld [vmem:[#allocation2 + $0x218] sm:$0xff] }
 0x4a6   : > { %v5025_v37 = vadd.f32 %v4957_v19, %v4847_v51  ;;  %v5142_v0 = vrot.slane %v5064_v63, 4  ;;  %v5143_v8 = vrot.slane %v5065_v61, 4  ;;  %v5026_v35 = vadd.f32 %v4958_v11, %v4848_v59  ;;  %v5236_v59 = vld [vmem:[#allocation2 + $0x168] sm:$0xff]  ;;  %16754 = vst [vmem:[#allocation98_spill] sm:$0xff] %v14689_v39 }
 0x4a7   : > { %v5027_v31 = vadd.f32 %v4960_v45, %v4849_v57  ;;  %v5028_v48 = vadd.f32 %v4961_v54, %v4850_v44  ;;  %v5126_v18 = vsel %vm3607_vm9, %v5124_v21, %v5125_v27  ;;  %v5029_v25 = vadd.f32 %v4963_v42, %v4851_v14  ;;  %16755 = vst [vmem:[#allocation94_spill] sm:$0xff] %v14691_v30  ;;  %v16756_v63 = vld [vmem:[#allocation87_spill] sm:$0xff]  ;;  %v16757_v61 = vld [vmem:[#allocation86_spill] sm:$0xff] }
 0x4a8   : > { %v5030_v40 = vadd.f32 %v4964_v22, %v4852_v50  ;;  %v5031_v46 = vadd.f32 %v4966_v17, %v4853_v24  ;;  %v5129_v1 = vsel %vm3607_vm9, %v5127_v10, %v5128_v4  ;;  %v5132_v16 = vsel %vm3607_vm9, %v5130_v32, %v5131_v53  ;;  %v14668_v50 = vld [vmem:[#allocation2 + $0x170] sm:$0xff]  ;;  %v14670_v24 = vld [vmem:[#allocation2 + $0x180] sm:$0xff] }
 0x4a9   : > { %v5135_v52 = vsel %vm3607_vm9, %v5133_v58, %v5134_v15  ;;  %v5138_v3 = vsel %vm3607_vm9, %v5136_v28, %v5137_v47  ;;  %v5141_v33 = vsel %vm3607_vm9, %v5139_v7, %v5140_v34  ;;  %v5144_v26 = vsel %vm3607_vm9, %v5142_v0, %v5143_v8  ;;  %16752 = vst [vmem:[#allocation93_spill] sm:$0xff] %v14670_v24  ;;  %v16759_v15 = vld [vmem:[#allocation81_spill] sm:$0xff] }
 0x4aa   : > { %v5196_v11 = vadd.f32 %v5124_v21, %v5018_v2  ;;  %v5197_v51 = vadd.f32 %v5126_v18, %v5019_v36  ;;  %v5198_v54 = vadd.f32 %v5127_v10, %v5020_v38  ;;  %v5199_v57 = vadd.f32 %v5129_v1, %v5021_v56  ;;  %v9451_v56 = vld [vmem:[%s16004_s8 + $0xf] ss:$0 sm:$0xff] }
 0x4ab   : > { %v5200_v44 = vadd.f32 %v5130_v32, %v5022_v13  ;;  %v5201_v22 = vadd.f32 %v5132_v16, %v5023_v20  ;;  %v5202_v14 = vadd.f32 %v5133_v58, %v5024_v41  ;;  %v5203_v19 = vadd.f32 %v5135_v52, %v5025_v37  ;;  %v14702_v32 = vld [vmem:[#allocation2 + $0x1f8] sm:$0xff] }
 0x4ac   : > { %v5204_v45 = vadd.f32 %v5136_v28, %v5026_v35  ;;  %v5205_v42 = vadd.f32 %v5138_v3, %v5027_v31  ;;  %v14672_v17 = vadd.f32 %v5139_v7, %v5028_v48  ;;  %v14678_v2 = vadd.f32 %v5141_v33, %v5029_v25  ;;  %16758 = vst [vmem:[#allocation83_spill] sm:$0xff] %v14702_v32  ;;  %v9452_v25 = vld [vmem:[%s16004_s8 + $0x10] ss:$0 sm:$0xff] }
 0x4ad   : > { %v14680_v36 = vadd.f32 %v5142_v0, %v5030_v40  ;;  %v14682_v38 = vadd.f32 %v5144_v26, %v5031_v46  ;;  %v5278_v29 = vmul.f32 %v9451_v56, %v5236_v59  ;;  %v5279_v49 = vmul.f32 %v9451_v56, %v14668_v50 }
 0x4ae   : > { %v5280_v60 = vmul.f32 %v9451_v56, %v14670_v24  ;;  %v5281_v13 = vmul.f32 %v9451_v56, %v14391_v23  ;;  %v5282_v20 = vmul.f32 %v9451_v56, %v14515_v5  ;;  %v5211_v21 = vadd.f32 %v16757_v61, %v16756_v63 }
 0x4af   : > { %v5283_v27 = vmul.f32 %v9451_v56, %v14674_v55  ;;  %v5284_v10 = vmul.f32 %v9451_v56, %v14687_v43  ;;  %v5285_v4 = vmul.f32 %v9451_v56, %v14676_v62  ;;  %v5286_v53 = vmul.f32 %v9451_v56, %v14397_v9 }
 0x4b0   : > { %v5287_v58 = vmul.f32 %v9451_v56, %v14399_v6  ;;  %v5288_v28 = vmul.f32 %v9451_v56, %v16759_v15  ;;  %v5289_v47 = vmul.f32 %v9451_v56, %v14521_v12  ;;  %v5290_v7 = vmul.f32 %v9451_v56, %v14702_v32 }
 0x4b1   : > { %v5292_v34 = vmul.f32 %v9451_v56, %v14689_v39  ;;  %v5293_v41 = vmul.f32 %v9451_v56, %v14691_v30  ;;  %v5310_v37 = vadd.f32 %v5278_v29, %v5196_v11  ;;  %v5311_v0 = vadd.f32 %v5279_v49, %v5197_v51 }
 0x4b2   : > { %v5312_v8 = vadd.f32 %v5280_v60, %v5198_v54  ;;  %v5313_v35 = vadd.f32 %v5281_v13, %v5199_v57  ;;  %v5314_v31 = vadd.f32 %v5282_v20, %v5200_v44  ;;  %v5315_v48 = vadd.f32 %v5283_v27, %v5201_v22 }
 0x4b3   : > { %v5316_v18 = vadd.f32 %v5284_v10, %v5202_v14  ;;  %v5344_v40 = vmul.f32 %v9452_v25, %v5236_v59  ;;  %v5345_v46 = vmul.f32 %v9452_v25, %v14668_v50  ;;  %v5317_v1 = vadd.f32 %v5285_v4, %v5203_v19 }
 0x4b4   : > { %v5318_v16 = vadd.f32 %v5286_v53, %v5204_v45  ;;  %v5346_v52 = vmul.f32 %v9452_v25, %v14670_v24  ;;  %v5347_v3 = vmul.f32 %v9452_v25, %v14391_v23  ;;  %v5348_v33 = vmul.f32 %v9452_v25, %v14515_v5 }
 0x4b5   : > { %v5349_v26 = vmul.f32 %v9452_v25, %v14674_v55  ;;  %v5350_v11 = vmul.f32 %v9452_v25, %v14687_v43  ;;  %v5351_v51 = vmul.f32 %v9452_v25, %v14676_v62  ;;  %v5352_v54 = vmul.f32 %v9452_v25, %v14397_v9 }
 0x4b6   : > { %v5353_v59 = vmul.f32 %v9452_v25, %v14399_v6  ;;  %v5354_v57 = vmul.f32 %v9452_v25, %v16759_v15  ;;  %v5355_v44 = vmul.f32 %v9452_v25, %v14521_v12  ;;  %v5319_v22 = vadd.f32 %v5287_v58, %v5205_v42 }
 0x4b7   : > { %v5356_v14 = vmul.f32 %v9452_v25, %v14702_v32  ;;  %v5416_v19 = vrot.slane %v5344_v40, 1  ;;  %v5417_v45 = vrot.slane %v5345_v46, 1  ;;  %v5358_v56 = vmul.f32 %v9452_v25, %v14689_v39 }
 0x4b8   : > { %v5359_v29 = vmul.f32 %v9452_v25, %v14691_v30  ;;  %v5419_v49 = vrot.slane %v5346_v52, 1  ;;  %v5420_v60 = vrot.slane %v5347_v3, 1  ;;  %v5422_v13 = vrot.slane %v5348_v33, 1  ;;  %v16760_v33 = vld [vmem:[#allocation100_spill] sm:$0xff] }
 0x4b9   : > { %v5423_v20 = vrot.slane %v5349_v26, 1  ;;  %v5425_v9 = vrot.slane %v5350_v11, 1  ;;  %v5426_v63 = vrot.slane %v5351_v51, 1  ;;  %v5428_v61 = vrot.slane %v5352_v54, 1  ;;  %v16761_v11 = vld [vmem:[#allocation91_spill] sm:$0xff] }
 0x4ba   : > { %v5429_v27 = vrot.slane %v5353_v59, 1  ;;  %v5431_v10 = vrot.slane %v5354_v57, 1  ;;  %v5432_v4 = vrot.slane %v5355_v44, 1  ;;  %v5320_v42 = vadd.f32 %v5288_v28, %v14672_v17 }
 0x4bb   : > { %v5321_v53 = vadd.f32 %v5289_v47, %v14678_v2  ;;  %v5418_v58 = vsel %vm3151_vm5, %v5416_v19, %v5417_v45  ;;  %v5434_v40 = vrot.slane %v5356_v14, 1  ;;  %v5322_v46 = vadd.f32 %v5290_v7, %v14680_v36  ;;  %v16762_v36 = vld [vmem:[#allocation59_spill] sm:$0xff] }
 0x4bc   : > { %v5421_v25 = vsel %vm3151_vm5, %v5419_v49, %v5420_v60  ;;  %v5437_v52 = vrot.slane %v5358_v56, 1  ;;  %v5438_v3 = vrot.slane %v5359_v29, 1  ;;  %v5323_v26 = vadd.f32 %v16760_v33, %v14682_v38  ;;  %v9453_v38 = vld [vmem:[%s16004_s8 + $0x11] ss:$0 sm:$0xff] }
 0x4bd   : > { %v5324_v51 = vadd.f32 %v5292_v34, %v16761_v11  ;;  %v5325_v54 = vadd.f32 %v5293_v41, %v5211_v21  ;;  %v5424_v59 = vsel %vm3151_vm5, %v5422_v13, %v5423_v20  ;;  %v5427_v17 = vsel %vm3151_vm5, %v5425_v9, %v5426_v63  ;;  %v14755_v9 = vld [vmem:[#allocation2 + $0x200] sm:$0xff] }
 0x4be   : > { %v5430_v2 = vsel %vm3151_vm5, %v5428_v61, %v5429_v27  ;;  %v5433_v28 = vsel %vm3151_vm5, %v5431_v10, %v5432_v4  ;;  %v5488_v47 = vadd.f32 %v5418_v58, %v5310_v37  ;;  %v16763_v7 = vrot.slane %v16762_v36, 1  ;;  %16764 = vst [vmem:[#allocation76_spill] sm:$0xff] %v14755_v9 }
 0x4bf   : > { %v5489_v44 = vadd.f32 %v5417_v45, %v5311_v0  ;;  %v5490_v14 = vadd.f32 %v5421_v25, %v5312_v8  ;;  %v5514_v21 = vmul.f32 %v9453_v38, %v14668_v50  ;;  %v5439_v34 = vsel %vm3151_vm5, %v5437_v52, %v5438_v3 }
 0x4c0   : > { %v5436_v57 = vsel %vm3151_vm5, %v5434_v40, %v16763_v7  ;;  %v5491_v41 = vadd.f32 %v5420_v60, %v5313_v35  ;;  %v5515_v19 = vmul.f32 %v9453_v38, %v14391_v23  ;;  %v5516_v56 = vmul.f32 %v9453_v38, %v14674_v55 }
 0x4c1   : > { %v5492_v37 = vadd.f32 %v5424_v59, %v5314_v31  ;;  %v5493_v29 = vadd.f32 %v5423_v20, %v5315_v48  ;;  %v5494_v49 = vadd.f32 %v5427_v17, %v5316_v18  ;;  %v5495_v13 = vadd.f32 %v5426_v63, %v5317_v1  ;;  %v14800_v17 = vld [vmem:[#allocation2 + $0x1d8] sm:$0x3] }
 0x4c2   : > { %v5517_v0 = vmul.f32 %v9453_v38, %v14676_v62  ;;  %v5518_v8 = vmul.f32 %v9453_v38, %v14399_v6  ;;  %v14753_v45 = vmul.f32 %v9453_v38, %v14521_v12  ;;  %v14758_v61 = vmul.f32 %v14755_v9, %v9453_v38 }
 0x4c3   : > { %v5496_v35 = vadd.f32 %v5430_v2, %v5318_v16  ;;  %v5497_v23 = vadd.f32 %v5429_v27, %v5319_v22  ;;  %v14761_v60 = vmul.f32 %v9453_v38, %v14691_v30  ;;  %v5546_v31 = vrot.slane %v5514_v21, 2  ;;  %v14802_v2 = vld [vmem:[#allocation2 + $0x1f0] sm:$0x3] }
 0x4c4   : > { %v5498_v48 = vadd.f32 %v5433_v28, %v5320_v42  ;;  %v14763_v18 = vadd.f32 %v5432_v4, %v5321_v53  ;;  %v5547_v1 = vrot.slane %v5515_v19, 2  ;;  %v5548_v20 = vrot.slane %v5516_v56, 2  ;;  %v14777_v4 = vld [vmem:[#allocation2 + $0x178] sm:$0x3]  ;;  %v14779_v53 = vld [vmem:[#allocation2 + $0x190] sm:$0x3] }
 0x4c5   : > { %v14765_v6 = vadd.f32 %v5436_v57, %v5322_v46  ;;  %v16765_v63 = vmov %v16763_v7  ;;  %v14771_v58 = vadd.f32 %v5439_v34, %v5324_v51  ;;  %v14773_v40 = vadd.f32 %v5438_v3, %v5325_v54  ;;  %v14788_v3 = vld [vmem:[#allocation2 + $0x1a8] sm:$0x3]  ;;  %16766 = vst [vmem:[#allocation84_spill] sm:$0xff] %v14802_v2 }
 0x4c6   : > { %v14769_v10 = vadd.f32 %v16765_v63, %v5323_v26  ;;  %v5549_v16 = vrot.slane %v5517_v0, 2  ;;  %v5550_v22 = vrot.slane %v5518_v8, 2  ;;  %v5551_v27 = vrot.slane %v14753_v45, 2  ;;  %v14790_v26 = vld [vmem:[#allocation2 + $0x1c0] sm:$0x3]  ;;  %v9456_v34 = vld [vmem:[#allocation2 + $0x188] sm:$0xff] }
 0x4c7   : > { %v5552_v42 = vrot.slane %v14758_v61, 2  ;;  %v5553_v46 = vrot.slane %v14761_v60, 2  ;;  %v14782_v25 = vadd.f32 %v5546_v31, %v5488_v47  ;;  %v14784_v52 = vadd.f32 %v5546_v31, %v5489_v44  ;;  %v14804_v57 = vld [vmem:[#allocation2 + $0x208] sm:$0x3]  ;;  %v14806_v44 = vld [vmem:[#allocation2 + $0x220] sm:$0x3] }
 0x4c8   : > { %v14786_v33 = vadd.f32 %v5547_v1, %v5490_v14  ;;  %v14792_v11 = vadd.f32 %v5547_v1, %v5491_v41  ;;  %v14794_v51 = vadd.f32 %v5548_v20, %v5492_v37  ;;  %v14796_v54 = vadd.f32 %v5548_v20, %v5493_v29  ;;  %16767 = vst [vmem:[#allocation78_spill] sm:$0xff] %v14804_v57  ;;  %v9455_v14 = vld [vmem:[%s16004_s8 + $0x12] ss:$0 sm:$0xff] }
 0x4c9   : > { %v14798_v59 = vadd.f32 %v5549_v16, %v5494_v49  ;;  %v5593_v28 = vadd.f32 %v5549_v16, %v5495_v13  ;;  %v5594_v47 = vadd.f32 %v5550_v22, %v5496_v35  ;;  %v5595_v36 = vadd.f32 %v5550_v22, %v5497_v23  ;;  %v9457_v13 = vld [vmem:[#allocation2 + $0x1d0] sm:$0xff] }
 0x4ca   : > { %v5596_v7 = vadd.f32 %v5551_v27, %v5498_v48  ;;  %v5620_v38 = vmul.f32 %v9455_v14, %v14668_v50  ;;  %v5621_v21 = vmul.f32 %v9455_v14, %v14777_v4  ;;  %v5622_v41 = vmul.f32 %v9456_v34, %v9455_v14 }
 0x4cb   : > { %v5623_v19 = vmul.f32 %v9455_v14, %v14779_v53  ;;  %v5624_v56 = vmul.f32 %v9455_v14, %v14674_v55  ;;  %v5625_v37 = vmul.f32 %v9455_v14, %v14788_v3  ;;  %v5626_v29 = vmul.f32 %v9455_v14, %v14676_v62 }
 0x4cc   : > { %v5627_v49 = vmul.f32 %v9455_v14, %v14790_v26  ;;  %v5628_v0 = vmul.f32 %v9457_v13, %v9455_v14  ;;  %v5629_v8 = vmul.f32 %v9455_v14, %v14800_v17  ;;  %v5630_v45 = vmul.f32 %v9455_v14, %v14521_v12 }
 0x4cd   : > { %v5631_v61 = vmul.f32 %v9455_v14, %v14802_v2  ;;  %v14822_v35 = vmul.f32 %v9455_v14, %v14755_v9  ;;  %v5633_v23 = vmul.f32 %v9455_v14, %v14804_v57  ;;  %v14826_v60 = vmul.f32 %v9455_v14, %v14691_v30 }
 0x4ce   : > { %v5635_v31 = vmul.f32 %v9455_v14, %v14806_v44  ;;  %v5692_v48 = vrot.slane %v5620_v38, 3  ;;  %v5693_v1 = vrot.slane %v5621_v21, 3  ;;  %v5695_v20 = vrot.slane %v5622_v41, 3 }
 0x4cf   : > { %v5696_v63 = vrot.slane %v5623_v19, 3  ;;  %v5698_v16 = vrot.slane %v5624_v56, 3  ;;  %v5699_v22 = vrot.slane %v5625_v37, 3  ;;  %v5701_v39 = vrot.slane %v5626_v29, 3 }
 0x4d0   : > { %v5702_v32 = vrot.slane %v5627_v49, 3  ;;  %v5704_v15 = vrot.slane %v5628_v0, 3  ;;  %v5705_v43 = vrot.slane %v5629_v8, 3  ;;  %v5707_v5 = vrot.slane %v5630_v45, 3 }
 0x4d1   : > { %v5708_v24 = vrot.slane %v5631_v61, 3  ;;  %v5710_v9 = vrot.slane %v14822_v35, 3  ;;  %v5711_v57 = vrot.slane %v5633_v23, 3  ;;  %v5713_v30 = vrot.slane %v14826_v60, 3 }
 0x4d2   : > { %v5714_v2 = vrot.slane %v5635_v31, 3  ;;  %v5597_v14 = vadd.f32 %v5551_v27, %v14763_v18  ;;  %v5598_v38 = vadd.f32 %v5552_v42, %v14765_v6  ;;  %v5599_v21 = vadd.f32 %v5552_v42, %v14769_v10 }
 0x4d3   : > { %v5694_v41 = vsel %vm3428_vm6, %v5692_v48, %v5693_v1  ;;  %v5600_v19 = vadd.f32 %v5553_v46, %v14771_v58  ;;  %v5601_v56 = vadd.f32 %v5553_v46, %v14773_v40  ;;  %v5697_v37 = vsel %vm3428_vm6, %v5695_v20, %v5696_v63 }
 0x4d4   : > { %v5700_v29 = vsel %vm3428_vm6, %v5698_v16, %v5699_v22  ;;  %v5703_v49 = vsel %vm3428_vm6, %v5701_v39, %v5702_v32  ;;  %v5706_v0 = vsel %vm3428_vm6, %v5704_v15, %v5705_v43  ;;  %v5709_v18 = vsel %vm3428_vm6, %v5707_v5, %v5708_v24 }
 0x4d5   : > { %v5764_v6 = vadd.f32 %v5692_v48, %v14782_v25  ;;  %v5712_v10 = vsel %vm3428_vm6, %v5710_v9, %v5711_v57  ;;  %v5715_v58 = vsel %vm3428_vm6, %v5713_v30, %v5714_v2  ;;  %v5765_v40 = vadd.f32 %v5694_v41, %v14784_v52  ;;  %v9458_v2 = vld [vmem:[%s16004_s8 + $0x13] ss:$0 sm:$0xff] }
 0x4d6   : > { %v5766_v27 = vadd.f32 %v5695_v20, %v14786_v33  ;;  %v5767_v42 = vadd.f32 %v5697_v37, %v14792_v11  ;;  %v5768_v32 = vadd.f32 %v5698_v16, %v14794_v51  ;;  %v5769_v43 = vadd.f32 %v5700_v29, %v14796_v54 }
 0x4d7   : > { %v5770_v24 = vadd.f32 %v5701_v39, %v14798_v59  ;;  %v5771_v46 = vadd.f32 %v5703_v49, %v5593_v28  ;;  %v5772_v25 = vadd.f32 %v5704_v15, %v5594_v47  ;;  %v5773_v8 = vadd.f32 %v5706_v0, %v5595_v36  ;;  %v16768_v47 = vld [vmem:[#allocation84_spill] sm:$0xff] }
 0x4d8   : > { %v5774_v57 = vadd.f32 %v5707_v5, %v5596_v7  ;;  %v5798_v52 = vmul.f32 %v9458_v2, %v14668_v50  ;;  %v5799_v33 = vmul.f32 %v9458_v2, %v14777_v4  ;;  %v5800_v45 = vmul.f32 %v9458_v2, %v9456_v34  ;;  %v16769_v36 = vld [vmem:[#allocation76_spill] sm:$0xff]  ;;  %v16770_v7 = vld [vmem:[#allocation78_spill] sm:$0xff] }
 0x4d9   : > { %v5801_v11 = vmul.f32 %v9458_v2, %v14779_v53  ;;  %v5802_v51 = vmul.f32 %v9458_v2, %v14674_v55  ;;  %v5803_v54 = vmul.f32 %v9458_v2, %v14788_v3  ;;  %v5804_v39 = vmul.f32 %v9458_v2, %v14676_v62  ;;  %v16771_v53 = vld [vmem:[#allocation94_spill] sm:$0xff] }
 0x4da   : > { %v5805_v15 = vmul.f32 %v9458_v2, %v14790_v26  ;;  %v5806_v5 = vmul.f32 %v9458_v2, %v9457_v13  ;;  %v5807_v59 = vmul.f32 %v9458_v2, %v14800_v17  ;;  %v5808_v28 = vmul.f32 %v9458_v2, %v14521_v12 }
 0x4db   : > { %v5809_v50 = vmul.f32 %v9458_v2, %v16768_v47  ;;  %v5810_v4 = vmul.f32 %v9458_v2, %v16769_v36  ;;  %v5811_v34 = vmul.f32 %v9458_v2, %v16770_v7  ;;  %v5812_v61 = vmul.f32 %v9458_v2, %v16771_v53  ;;  %v14902_v7 = vld [vmem:[#allocation2 + $0x230] sm:$0xff] }
 0x4dc   : > { %v5813_v35 = vmul.f32 %v9458_v2, %v14806_v44  ;;  %v5870_v3 = vrot.slane %v5798_v52, 4  ;;  %v5871_v23 = vrot.slane %v5799_v33, 4  ;;  %v5873_v31 = vrot.slane %v5800_v45, 4  ;;  %16774 = vst [vmem:[#allocation57_spill] sm:$0xff] %v14902_v7 }
 0x4dd   : > { %v5874_v48 = vrot.slane %v5801_v11, 4  ;;  %v5876_v26 = vrot.slane %v5802_v51, 4  ;;  %v5877_v13 = vrot.slane %v5803_v54, 4  ;;  %v5879_v1 = vrot.slane %v5804_v39, 4 }
 0x4de   : > { %v5880_v17 = vrot.slane %v5805_v15, 4  ;;  %v5882_v20 = vrot.slane %v5806_v5, 4  ;;  %v5883_v63 = vrot.slane %v5807_v59, 4  ;;  %v5885_v16 = vrot.slane %v5808_v28, 4 }
 0x4df   : > { %v5886_v22 = vrot.slane %v5809_v50, 4  ;;  %v5888_v41 = vrot.slane %v5810_v4, 4  ;;  %v5889_v37 = vrot.slane %v5811_v34, 4  ;;  %v5891_v29 = vrot.slane %v5812_v61, 4  ;;  %v16775_v61 = vld [vmem:[#allocation71_spill] sm:$0xff] }
 0x4e0   : > { %v5892_v49 = vrot.slane %v5813_v35, 4  ;;  %v5775_v0 = vadd.f32 %v5709_v18, %v5597_v14  ;;  %v5776_v47 = vadd.f32 %v5710_v9, %v5598_v38  ;;  %v5777_v36 = vadd.f32 %v5712_v10, %v5599_v21  ;;  %v14880_v18 = vld [vmem:[#allocation2 + $0x188] sm:$0xff] }
 0x4e1   : > { %v5872_v44 = vsel %vm3607_vm9, %v5870_v3, %v5871_v23  ;;  %v5778_v2 = vadd.f32 %v5713_v30, %v5600_v19  ;;  %v5779_v52 = vadd.f32 %v5715_v58, %v5601_v56  ;;  %v5875_v33 = vsel %vm3607_vm9, %v5873_v31, %v5874_v48  ;;  %v16776_v48 = vld [vmem:[#allocation81_spill] sm:$0xff] }
 0x4e2   : > { %v5878_v45 = vsel %vm3607_vm9, %v5876_v26, %v5877_v13  ;;  %v5881_v11 = vsel %vm3607_vm9, %v5879_v1, %v5880_v17  ;;  %v5884_v51 = vsel %vm3607_vm9, %v5882_v20, %v5883_v63  ;;  %v5887_v54 = vsel %vm3607_vm9, %v5885_v16, %v5886_v22  ;;  %v16778_v63 = vld [vmem:[#allocation98_spill] sm:$0xff] }
 0x4e3   : > { %v5942_v39 = vadd.f32 %v5870_v3, %v5764_v6  ;;  %v5890_v9 = vsel %vm3607_vm9, %v5888_v41, %v5889_v37  ;;  %v5893_v14 = vsel %vm3607_vm9, %v5891_v29, %v5892_v49  ;;  %v5943_v38 = vadd.f32 %v5872_v44, %v5765_v40  ;;  %v14890_v40 = vld [vmem:[#allocation2 + $0x1d0] sm:$0xff] }
 0x4e4   : > { %v5944_v21 = vadd.f32 %v5873_v31, %v5766_v27  ;;  %v5945_v60 = vadd.f32 %v5875_v33, %v5767_v42  ;;  %v5946_v30 = vadd.f32 %v5876_v26, %v5768_v32  ;;  %v5947_v19 = vadd.f32 %v5878_v45, %v5769_v43  ;;  %v5992_v42 = vld [vmem:[#allocation2 + $0x1c8] sm:$0xff]  ;;  %v14894_v32 = vld [vmem:[#allocation2 + $0x200] sm:$0xff]  ;;  %v9460_v45 = vld [vmem:[%s16004_s8 + $0x15] ss:$0 sm:$0xff] }
 0x4e5   : > { %v5948_v56 = vadd.f32 %v5879_v1, %v5770_v24  ;;  %v5949_v10 = vadd.f32 %v5881_v11, %v5771_v46  ;;  %v5950_v58 = vadd.f32 %v5882_v20, %v5772_v25  ;;  %v5951_v15 = vadd.f32 %v5884_v51, %v5773_v8  ;;  %v6004_v43 = vld [vmem:[#allocation2 + $0x228] sm:$0xff]  ;;  %v9459_v24 = vld [vmem:[%s16004_s8 + $0x14] ss:$0 sm:$0xff]  ;;  %v16772_v46 = vld [vmem:[#allocation93_spill] sm:$0xff] }
 0x4e6   : > { %v5952_v5 = vadd.f32 %v5885_v16, %v5774_v57  ;;  %v14882_v59 = vadd.f32 %v5887_v54, %v5775_v0  ;;  %v14884_v28 = vadd.f32 %v5888_v41, %v5776_v47  ;;  %v14886_v6 = vadd.f32 %v5890_v9, %v5777_v36  ;;  %v16773_v57 = vld [vmem:[#allocation101_spill] sm:$0xff]  ;;  %v16777_v1 = vld [vmem:[#allocation83_spill] sm:$0xff] }
 0x4e7   : > { %v14888_v50 = vadd.f32 %v5891_v29, %v5778_v2  ;;  %v14892_v27 = vadd.f32 %v5893_v14, %v5779_v52  ;;  %v6025_v25 = vmul.f32 %v9459_v24, %v16772_v46  ;;  %v6026_v8 = vmul.f32 %v9459_v24, %v14880_v18 }
 0x4e8   : > { %v6027_v4 = vmul.f32 %v9459_v24, %v16773_v57  ;;  %v6028_v34 = vmul.f32 %v9459_v24, %v14674_v55  ;;  %v6029_v35 = vmul.f32 %v9459_v24, %v16775_v61  ;;  %v6030_v3 = vmul.f32 %v9459_v24, %v14676_v62 }
 0x4e9   : > { %v6031_v23 = vmul.f32 %v9459_v24, %v5992_v42  ;;  %v6032_v31 = vmul.f32 %v9459_v24, %v14890_v40  ;;  %v6033_v26 = vmul.f32 %v9459_v24, %v16776_v48  ;;  %v6034_v13 = vmul.f32 %v9459_v24, %v14521_v12 }
 0x4ea   : > { %v6035_v17 = vmul.f32 %v9459_v24, %v16777_v1  ;;  %v6036_v20 = vmul.f32 %v9459_v24, %v14894_v32  ;;  %v6037_v16 = vmul.f32 %v9459_v24, %v16778_v63  ;;  %v6038_v22 = vmul.f32 %v9459_v24, %v16771_v53 }
 0x4eb   : > { %v6039_v41 = vmul.f32 %v9459_v24, %v6004_v43  ;;  %v6040_v37 = vmul.f32 %v9459_v24, %v14902_v7  ;;  %v6057_v29 = vadd.f32 %v6025_v25, %v5942_v39  ;;  %v6058_v49 = vadd.f32 %v6026_v8, %v5943_v38 }
 0x4ec   : > { %v6059_v0 = vadd.f32 %v6027_v4, %v5944_v21  ;;  %v6060_v47 = vadd.f32 %v6028_v34, %v5945_v60  ;;  %v6061_v36 = vadd.f32 %v6029_v35, %v5946_v30  ;;  %v6062_v44 = vadd.f32 %v6030_v3, %v5947_v19 }
 0x4ed   : > { %v6063_v2 = vadd.f32 %v6031_v23, %v5948_v56  ;;  %v6064_v52 = vadd.f32 %v6032_v31, %v5949_v10  ;;  %v14915_v33 = vadd.f32 %v6033_v26, %v5950_v58  ;;  %v6091_v11 = vmul.f32 %v9460_v45, %v16772_v46 }
 0x4ee   : > { %v6092_v51 = vmul.f32 %v9460_v45, %v14880_v18  ;;  %v14922_v54 = vadd.f32 %v6034_v13, %v5951_v15  ;;  %v14924_v39 = vadd.f32 %v6035_v17, %v5952_v5  ;;  %v6093_v9 = vmul.f32 %v9460_v45, %v16773_v57 }
 0x4ef   : > { %v6094_v14 = vmul.f32 %v9460_v45, %v14674_v55  ;;  %v6095_v38 = vmul.f32 %v9460_v45, %v16775_v61  ;;  %v6096_v21 = vmul.f32 %v9460_v45, %v14676_v62  ;;  %v6097_v60 = vmul.f32 %v9460_v45, %v5992_v42 }
 0x4f0   : > { %v6098_v30 = vmul.f32 %v9460_v45, %v14890_v40  ;;  %v6099_v19 = vmul.f32 %v9460_v45, %v16776_v48  ;;  %v6100_v56 = vmul.f32 %v9460_v45, %v14521_v12  ;;  %v6101_v10 = vmul.f32 %v9460_v45, %v16777_v1 }
 0x4f1   : > { %v6102_v58 = vmul.f32 %v9460_v45, %v14894_v32  ;;  %v6103_v15 = vmul.f32 %v9460_v45, %v16778_v63  ;;  %v6104_v5 = vmul.f32 %v9460_v45, %v16771_v53  ;;  %v6163_v24 = vrot.slane %v6091_v11, 1 }
 0x4f2   : > { %v6164_v46 = vrot.slane %v6092_v51, 1  ;;  %v6105_v25 = vmul.f32 %v9460_v45, %v6004_v43  ;;  %v6106_v8 = vmul.f32 %v9460_v45, %v14902_v7  ;;  %v6166_v42 = vrot.slane %v6093_v9, 1 }
 0x4f3   : > { %v6167_v57 = vrot.slane %v6094_v14, 1  ;;  %v6169_v4 = vrot.slane %v6095_v38, 1  ;;  %v6170_v34 = vrot.slane %v6096_v21, 1  ;;  %v6172_v61 = vrot.slane %v6097_v60, 1 }
 0x4f4   : > { %v6173_v35 = vrot.slane %v6098_v30, 1  ;;  %v6175_v12 = vrot.slane %v6099_v19, 1  ;;  %v6176_v3 = vrot.slane %v6100_v56, 1  ;;  %v6178_v23 = vrot.slane %v6101_v10, 1 }
 0x4f5   : > { %v6179_v31 = vrot.slane %v6102_v58, 1  ;;  %v6068_v48 = vadd.f32 %v6036_v20, %v14882_v59  ;;  %v6165_v26 = vsel %vm3151_vm5, %v6163_v24, %v6164_v46  ;;  %v6181_v13 = vrot.slane %v6103_v15, 1 }
 0x4f6   : > { %v6182_v1 = vrot.slane %v6104_v5, 1  ;;  %v6069_v43 = vadd.f32 %v6037_v16, %v14884_v28  ;;  %v6168_v17 = vsel %vm3151_vm5, %v6166_v42, %v6167_v57  ;;  %v6184_v63 = vrot.slane %v6105_v25, 1 }
 0x4f7   : > { %v6185_v45 = vrot.slane %v6106_v8, 1  ;;  %v6070_v11 = vadd.f32 %v6038_v22, %v14886_v6  ;;  %v6071_v51 = vadd.f32 %v6039_v41, %v14888_v50  ;;  %v6072_v9 = vadd.f32 %v6040_v37, %v14892_v27  ;;  %v9461_v6 = vld [vmem:[%s16004_s8 + $0x16] ss:$0 sm:$0xff] }
 0x4f8   : > { %v6171_v14 = vsel %vm3151_vm5, %v6169_v4, %v6170_v34  ;;  %v6174_v59 = vsel %vm3151_vm5, %v6172_v61, %v6173_v35  ;;  %v6177_v20 = vsel %vm3151_vm5, %v6175_v12, %v6176_v3  ;;  %v6180_v38 = vsel %vm3151_vm5, %v6178_v23, %v6179_v31  ;;  %v14985_v61 = vld [vmem:[#allocation2 + $0x190] sm:$0x3] }
 0x4f9   : > { %v6235_v21 = vadd.f32 %v6165_v26, %v6057_v29  ;;  %v6183_v28 = vsel %vm3151_vm5, %v6181_v13, %v6182_v1  ;;  %v6236_v16 = vadd.f32 %v6164_v46, %v6058_v49  ;;  %v6237_v60 = vadd.f32 %v6168_v17, %v6059_v0  ;;  %v14958_v0 = vld [vmem:[#allocation2 + $0x1e8] sm:$0xff]  ;;  %v14998_v17 = vld [vmem:[#allocation2 + $0x1f0] sm:$0x3] }
 0x4fa   : > { %v6261_v50 = vmul.f32 %v9461_v6, %v14880_v18  ;;  %v6186_v27 = vsel %vm3151_vm5, %v6184_v63, %v6185_v45  ;;  %v6238_v22 = vadd.f32 %v6167_v57, %v6060_v47  ;;  %v6239_v41 = vadd.f32 %v6171_v14, %v6061_v36  ;;  %v15000_v63 = vld [vmem:[#allocation2 + $0x208] sm:$0x3]  ;;  %v15006_v14 = vld [vmem:[#allocation2 + $0x220] sm:$0x3] }
 0x4fb   : > { %v6262_v37 = vmul.f32 %v9461_v6, %v14674_v55  ;;  %v6240_v30 = vadd.f32 %v6170_v34, %v6062_v44  ;;  %v6241_v19 = vadd.f32 %v6174_v59, %v6063_v2  ;;  %v6242_v56 = vadd.f32 %v6173_v35, %v6064_v52  ;;  %16779 = vst [vmem:[#allocation68_spill] sm:$0xff] %v15000_v63  ;;  %v15008_v59 = vld [vmem:[#allocation2 + $0x238] sm:$0x3] }
 0x4fc   : > { %v6263_v29 = vmul.f32 %v9461_v6, %v14676_v62  ;;  %v6264_v49 = vmul.f32 %v9461_v6, %v14890_v40  ;;  %v6265_v10 = vmul.f32 %v14958_v0, %v9461_v6  ;;  %v14962_v58 = vmul.f32 %v9461_v6, %v14894_v32  ;;  %16780 = vst [vmem:[#allocation92_spill] sm:$0xff] %v15006_v14 }
 0x4fd   : > { %v14965_v15 = vmul.f32 %v9461_v6, %v16771_v53  ;;  %v6243_v47 = vadd.f32 %v6177_v20, %v14915_v33  ;;  %v6244_v36 = vadd.f32 %v6176_v3, %v14922_v54  ;;  %v14970_v44 = vmul.f32 %v9461_v6, %v14902_v7  ;;  %v9463_v20 = vld [vmem:[%s16004_s8 + $0x17] ss:$0 sm:$0xff] }
 0x4fe   : > { %v6293_v2 = vrot.slane %v6261_v50, 2  ;;  %v6245_v52 = vadd.f32 %v6180_v38, %v14924_v39  ;;  %v14973_v5 = vadd.f32 %v6179_v31, %v6068_v48  ;;  %v14975_v24 = vadd.f32 %v6183_v28, %v6069_v43  ;;  %v14987_v39 = vld [vmem:[#allocation2 + $0x1a8] sm:$0x3]  ;;  %v14994_v31 = vld [vmem:[#allocation2 + $0x1c0] sm:$0x3] }
 0x4ff   : > { %v6294_v46 = vrot.slane %v6262_v37, 2  ;;  %v14977_v25 = vadd.f32 %v6182_v1, %v6070_v11  ;;  %v14979_v8 = vadd.f32 %v6186_v27, %v6071_v51  ;;  %v14981_v42 = vadd.f32 %v6185_v45, %v6072_v9  ;;  %v14996_v48 = vld [vmem:[#allocation2 + $0x1d8] sm:$0x3] }
 0x500   : > { %v6295_v33 = vrot.slane %v6263_v29, 2  ;;  %v6296_v57 = vrot.slane %v6264_v49, 2  ;;  %v6297_v54 = vrot.slane %v6265_v10, 2  ;;  %v6298_v4 = vrot.slane %v14962_v58, 2 }
 0x501   : > { %v6299_v34 = vrot.slane %v14965_v15, 2  ;;  %v6300_v35 = vrot.slane %v14970_v44, 2  ;;  %v6333_v12 = vadd.f32 %v6293_v2, %v6235_v21  ;;  %v14990_v3 = vadd.f32 %v6293_v2, %v6236_v16 }
 0x502   : > { %v14992_v23 = vadd.f32 %v6294_v46, %v6237_v60  ;;  %v6336_v26 = vadd.f32 %v6294_v46, %v6238_v22  ;;  %v6337_v13 = vadd.f32 %v6295_v33, %v6239_v41  ;;  %v6338_v1 = vadd.f32 %v6295_v33, %v6240_v30 }
 0x503   : > { %v6339_v43 = vadd.f32 %v6296_v57, %v6241_v19  ;;  %v6340_v45 = vadd.f32 %v6296_v57, %v6242_v56  ;;  %v6341_v11 = vadd.f32 %v6297_v54, %v6243_v47  ;;  %v15002_v51 = vadd.f32 %v6297_v54, %v6244_v36 }
 0x504   : > { %v15004_v9 = vadd.f32 %v6298_v4, %v6245_v52  ;;  %v6367_v38 = vmul.f32 %v9463_v20, %v14880_v18  ;;  %v6368_v21 = vmul.f32 %v9463_v20, %v14985_v61  ;;  %v6369_v28 = vmul.f32 %v9463_v20, %v14674_v55 }
 0x505   : > { %v6370_v16 = vmul.f32 %v9463_v20, %v14987_v39  ;;  %v6371_v60 = vmul.f32 %v9463_v20, %v14676_v62  ;;  %v6372_v6 = vmul.f32 %v9463_v20, %v14994_v31  ;;  %v6373_v50 = vmul.f32 %v9463_v20, %v14890_v40 }
 0x506   : > { %v6374_v27 = vmul.f32 %v9463_v20, %v14996_v48  ;;  %v6375_v22 = vmul.f32 %v9463_v20, %v14958_v0  ;;  %v6376_v41 = vmul.f32 %v9463_v20, %v14998_v17  ;;  %v6377_v37 = vmul.f32 %v9463_v20, %v14894_v32 }
 0x507   : > { %v6378_v30 = vmul.f32 %v9463_v20, %v15000_v63  ;;  %v15026_v19 = vmul.f32 %v9463_v20, %v16771_v53  ;;  %v6380_v56 = vmul.f32 %v9463_v20, %v15006_v14  ;;  %v15030_v29 = vmul.f32 %v9463_v20, %v14902_v7 }
 0x508   : > { %v6382_v49 = vmul.f32 %v9463_v20, %v15008_v59  ;;  %v6439_v10 = vrot.slane %v6367_v38, 3  ;;  %v6440_v58 = vrot.slane %v6368_v21, 3  ;;  %v6442_v15 = vrot.slane %v6369_v28, 3 }
 0x509   : > { %v6443_v47 = vrot.slane %v6370_v16, 3  ;;  %v6445_v36 = vrot.slane %v6371_v60, 3  ;;  %v6446_v44 = vrot.slane %v6372_v6, 3  ;;  %v6448_v2 = vrot.slane %v6373_v50, 3 }
 0x50a   : > { %v6449_v52 = vrot.slane %v6374_v27, 3  ;;  %v6451_v46 = vrot.slane %v6375_v22, 3  ;;  %v6452_v33 = vrot.slane %v6376_v41, 3  ;;  %v6454_v57 = vrot.slane %v6377_v37, 3 }
 0x50b   : > { %v6455_v54 = vrot.slane %v6378_v30, 3  ;;  %v6457_v53 = vrot.slane %v15026_v19, 3  ;;  %v6458_v14 = vrot.slane %v6380_v56, 3  ;;  %v6460_v7 = vrot.slane %v15030_v29, 3  ;;  %v9464_v56 = vld [vmem:[%s16004_s8 + $0x18] ss:$0 sm:$0xff] }
 0x50c   : > { %v6461_v63 = vrot.slane %v6382_v49, 3  ;;  %v6344_v20 = vadd.f32 %v6298_v4, %v14973_v5  ;;  %v6345_v38 = vadd.f32 %v6299_v34, %v14975_v24  ;;  %v6346_v21 = vadd.f32 %v6299_v34, %v14977_v25  ;;  %v16782_v29 = vld [vmem:[#allocation94_spill] sm:$0xff]  ;;  %v16783_v49 = vld [vmem:[#allocation92_spill] sm:$0xff] }
 0x50d   : > { %v6347_v28 = vadd.f32 %v6300_v35, %v14979_v8  ;;  %v6348_v16 = vadd.f32 %v6300_v35, %v14981_v42  ;;  %v6441_v60 = vsel %vm3428_vm6, %v6439_v10, %v6440_v58  ;;  %v6444_v6 = vsel %vm3428_vm6, %v6442_v15, %v6443_v47 }
 0x50e   : > { %v6447_v50 = vsel %vm3428_vm6, %v6445_v36, %v6446_v44  ;;  %v6450_v27 = vsel %vm3428_vm6, %v6448_v2, %v6449_v52  ;;  %v6453_v22 = vsel %vm3428_vm6, %v6451_v46, %v6452_v33  ;;  %v6456_v5 = vsel %vm3428_vm6, %v6454_v57, %v6455_v54  ;;  %v16784_v44 = vld [vmem:[#allocation57_spill] sm:$0xff] }
 0x50f   : > { %v6511_v4 = vadd.f32 %v6439_v10, %v6333_v12  ;;  %v6459_v24 = vsel %vm3428_vm6, %v6457_v53, %v6458_v14  ;;  %v6462_v25 = vsel %vm3428_vm6, %v6460_v7, %v6461_v63  ;;  %v6512_v8 = vadd.f32 %v6441_v60, %v14990_v3 }
 0x510   : > { %v6513_v42 = vadd.f32 %v6442_v15, %v14992_v23  ;;  %v6514_v34 = vadd.f32 %v6444_v6, %v6336_v26  ;;  %v6515_v35 = vadd.f32 %v6445_v36, %v6337_v13  ;;  %v6516_v41 = vadd.f32 %v6447_v50, %v6338_v1 }
 0x511   : > { %v6517_v37 = vadd.f32 %v6448_v2, %v6339_v43  ;;  %v6518_v30 = vadd.f32 %v6450_v27, %v6340_v45  ;;  %v6519_v19 = vadd.f32 %v6451_v46, %v6341_v11  ;;  %v6545_v12 = vmul.f32 %v9464_v56, %v14880_v18  ;;  %v16781_v11 = vld [vmem:[#allocation68_spill] sm:$0xff] }
 0x512   : > { %v6546_v14 = vmul.f32 %v9464_v56, %v14985_v61  ;;  %v6547_v63 = vmul.f32 %v9464_v56, %v14674_v55  ;;  %v6548_v3 = vmul.f32 %v9464_v56, %v14987_v39  ;;  %v6549_v23 = vmul.f32 %v9464_v56, %v14676_v62 }
 0x513   : > { %v6550_v26 = vmul.f32 %v9464_v56, %v14994_v31  ;;  %v6551_v13 = vmul.f32 %v9464_v56, %v14890_v40  ;;  %v6552_v1 = vmul.f32 %v9464_v56, %v14996_v48  ;;  %v6553_v43 = vmul.f32 %v9464_v56, %v14958_v0 }
 0x514   : > { %v6554_v45 = vmul.f32 %v9464_v56, %v14998_v17  ;;  %v6520_v18 = vadd.f32 %v6453_v22, %v15002_v51  ;;  %v6521_v61 = vadd.f32 %v6454_v57, %v15004_v9  ;;  %v6555_v55 = vmul.f32 %v9464_v56, %v14894_v32 }
 0x515   : > { %v6556_v39 = vmul.f32 %v9464_v56, %v16781_v11  ;;  %v6557_v62 = vmul.f32 %v9464_v56, %v16782_v29  ;;  %v6558_v31 = vmul.f32 %v9464_v56, %v16783_v49  ;;  %v6617_v10 = vrot.slane %v6545_v12, 4 }
 0x516   : > { %v6618_v40 = vrot.slane %v6546_v14, 4  ;;  %v6620_v58 = vrot.slane %v6547_v63, 4  ;;  %v6621_v48 = vrot.slane %v6548_v3, 4  ;;  %v6623_v15 = vrot.slane %v6549_v23, 4 }
 0x517   : > { %v6624_v0 = vrot.slane %v6550_v26, 4  ;;  %v6626_v47 = vrot.slane %v6551_v13, 4  ;;  %v6627_v17 = vrot.slane %v6552_v1, 4  ;;  %v6629_v36 = vrot.slane %v6553_v43, 4 }
 0x518   : > { %v6630_v51 = vrot.slane %v6554_v45, 4  ;;  %v6559_v9 = vmul.f32 %v9464_v56, %v16784_v44  ;;  %v6560_v32 = vmul.f32 %v9464_v56, %v15008_v59  ;;  %v6632_v2 = vrot.slane %v6555_v55, 4 }
 0x519   : > { %v6633_v52 = vrot.slane %v6556_v39, 4  ;;  %v6522_v46 = vadd.f32 %v6456_v5, %v6344_v20  ;;  %v6523_v33 = vadd.f32 %v6457_v53, %v6345_v38  ;;  %v6635_v57 = vrot.slane %v6557_v62, 4 }
 0x51a   : > { %v6636_v54 = vrot.slane %v6558_v31, 4  ;;  %v6524_v60 = vadd.f32 %v6459_v24, %v6346_v21  ;;  %v6525_v6 = vadd.f32 %v6460_v7, %v6347_v28  ;;  %v6526_v50 = vadd.f32 %v6462_v25, %v6348_v16 }
 0x51b   : > { %v6619_v27 = vsel %vm3607_vm9, %v6617_v10, %v6618_v40  ;;  %v6622_v22 = vsel %vm3607_vm9, %v6620_v58, %v6621_v48  ;;  %v6625_v12 = vsel %vm3607_vm9, %v6623_v15, %v6624_v0  ;;  %v6628_v14 = vsel %vm3607_vm9, %v6626_v47, %v6627_v17 }
 0x51c   : > { %v6631_v63 = vsel %vm3607_vm9, %v6629_v36, %v6630_v51  ;;  %v6634_v59 = vsel %vm3607_vm9, %v6632_v2, %v6633_v52  ;;  %v6638_v56 = vrot.slane %v6559_v9, 4  ;;  %v6639_v20 = vrot.slane %v6560_v32, 4 }
 0x51d   : > { %v6689_v53 = vadd.f32 %v6617_v10, %v6511_v4  ;;  %v6637_v38 = vsel %vm3607_vm9, %v6635_v57, %v6636_v54  ;;  %v6690_v21 = vadd.f32 %v6619_v27, %v6512_v8  ;;  %v6691_v7 = vadd.f32 %v6620_v58, %v6513_v42 }
 0x51e   : > { %v6692_v28 = vadd.f32 %v6622_v22, %v6514_v34  ;;  %v6693_v16 = vadd.f32 %v6623_v15, %v6515_v35  ;;  %v6694_v5 = vadd.f32 %v6625_v12, %v6516_v41  ;;  %v6695_v24 = vadd.f32 %v6626_v47, %v6517_v37 }
 0x51f   : > { %v6696_v25 = vadd.f32 %v6628_v14, %v6518_v30  ;;  %v6697_v3 = vadd.f32 %v6629_v36, %v6519_v19  ;;  %v6698_v23 = vadd.f32 %v6631_v63, %v6520_v18  ;;  %v6699_v26 = vadd.f32 %v6632_v2, %v6521_v61 }
 0x520   : > { %v6700_v13 = vadd.f32 %v6634_v59, %v6522_v46  ;;  %v6640_v1 = vsel %vm3607_vm9, %v6638_v56, %v6639_v20  ;;  %v6701_v43 = vadd.f32 %v6635_v57, %v6523_v33  ;;  %v6702_v45 = vadd.f32 %v6637_v38, %v6524_v60 }
 0x521   : > { %v6703_v55 = vadd.f32 %v6638_v56, %v6525_v6  ;;  %v15079_v11 = vmul.f32 0.5, %v6689_v53  ;;  %v15081_v4 = vmul.f32 0.5, %v6690_v21  ;;  %v15083_v8 = vmul.f32 0.5, %v6691_v7 }
 0x522   : > { %v15085_v42 = vmul.f32 0.5, %v6692_v28  ;;  %v15087_v34 = vmul.f32 0.5, %v6693_v16  ;;  %v15089_v35 = vmul.f32 0.5, %v6694_v5  ;;  %v15091_v41 = vmul.f32 0.5, %v6695_v24 }
 0x523   : > { %16785 = vst [vmem:[#allocation66_spill] sm:$0xff] %v15079_v11  ;;  %v15093_v37 = vmul.f32 0.5, %v6696_v25  ;;  %v15095_v30 = vmul.f32 0.5, %v6697_v3  ;;  %v15097_v19 = vmul.f32 0.5, %v6698_v23  ;;  %v15099_v18 = vmul.f32 0.5, %v6699_v26 }
 0x524   : > { %16786 = vst [vmem:[#allocation95_spill] sm:$0xff] %v15081_v4  ;;  %v15101_v61 = vmul.f32 0.5, %v6700_v13  ;;  %v15103_v39 = vmul.f32 0.5, %v6701_v43  ;;  %v15105_v29 = vmul.f32 0.5, %v6702_v45  ;;  %v15107_v62 = vmul.f32 0.5, %v6703_v55 }
 0x525   : > { %16787 = vst [vmem:[#allocation99_spill] sm:$0xff] %v15083_v8  ;;  %v6753_v49 = vmul.f32 0.70710677, %v6689_v53  ;;  %v15109_v31 = vadd.f32 %v6640_v1, %v6526_v50  ;;  %v6754_v10 = vmul.f32 0.70710677, %v6690_v21  ;;  %v16801_v54 = vmov -1.0  }
 0x526   : > { %16788 = vst [vmem:[#allocation69_spill] sm:$0xff] %v15085_v42  ;;  %v6755_v40 = vmul.f32 0.70710677, %v6691_v7  ;;  %v6756_v58 = vmul.f32 0.70710677, %v6692_v28 }
 0x527   : > { %16789 = vst [vmem:[#allocation67_spill] sm:$0xff] %v15087_v34  ;;  %v6757_v48 = vmul.f32 0.70710677, %v6693_v16  ;;  %v6758_v15 = vmul.f32 0.70710677, %v6694_v5  ;;  %vm6785_vm5 = vcmp.ge.f32.partialorder %v6753_v49, 0.0 }
 0x528   : > { %16790 = vst [vmem:[#allocation96_spill] sm:$0xff] %v15089_v35  ;;  %v6759_v0 = vmul.f32 0.70710677, %v6695_v24  ;;  %v6760_v47 = vmul.f32 0.70710677, %v6696_v25  ;;  %vm6786_vm6 = vcmp.ge.f32.partialorder %v6754_v10, 0.0 }
 0x529   : > { %16791 = vst [vmem:[#allocation87_spill] sm:$0xff] %v15091_v41  ;;  %v6761_v17 = vmul.f32 0.70710677, %v6697_v3  ;;  %v6762_v36 = vmul.f32 0.70710677, %v6698_v23  ;;  %vm6787_vm9 = vcmp.ge.f32.partialorder %v6755_v40, 0.0 }
 0x52a   : > { %16792 = vst [vmem:[#allocation86_spill] sm:$0xff] %v15093_v37  ;;  %v6763_v51 = vmul.f32 0.70710677, %v6699_v26  ;;  %v6764_v44 = vmul.f32 0.70710677, %v6700_v13  ;;  %vm6788_vm10 = vcmp.ge.f32.partialorder %v6756_v58, 0.0 }
 0x52b   : > { %16793 = vst [vmem:[#allocation100_spill] sm:$0xff] %v15095_v30  ;;  %v6765_v9 = vmul.f32 0.70710677, %v6701_v43  ;;  %v15111_v32 = vmul.f32 0.70710677, %v6702_v45  ;;  %vm6789_vm11 = vcmp.ge.f32.partialorder %v6757_v48, 0.0 }
 0x52c   : > { %16794 = vst [vmem:[#allocation91_spill] sm:$0xff] %v15097_v19  ;;  %v15113_v2 = vmul.f32 0.70710677, %v6703_v55  ;;  %v15116_v52 = vmul.f32 0.70710677, %v15109_v31  ;;  %vm6790_vm2 = vcmp.ge.f32.partialorder %v6758_v15, 0.0 }
 0x52d   : > { %16795 = vst [vmem:[#allocation59_spill] sm:$0xff] %v15099_v18  ;;  %vm6791_vm12 = vcmp.ge.f32.partialorder %v6759_v0, 0.0  ;;  %v15118_v46 = vand.u32 2147483647, %v6753_v49  ;;  %vm6792_vm13 = vcmp.ge.f32.partialorder %v6760_v47, 0.0  ;;  %vm6793_vm14 = vcmp.ge.f32.partialorder %v6761_v17, 0.0 }
 0x52e   : > { %16796 = vst [vmem:[#allocation84_spill] sm:$0xff] %v15101_v61  ;;  %vm6794_vm15 = vcmp.ge.f32.partialorder %v6762_v36, 0.0  ;;  %v15120_v33 = vand.u32 2147483647, %v6754_v10  ;;  %vm6795_vm1 = vcmp.ge.f32.partialorder %v6763_v51, 0.0  ;;  %vm6796_vm3 = vcmp.ge.f32.partialorder %v6764_v44, 0.0 }
 0x52f   : > { %16797 = vst [vmem:[#allocation76_spill] sm:$0xff] %v15103_v39  ;;  %vm6797_vm4 = vcmp.ge.f32.partialorder %v6765_v9, 0.0  ;;  %v15122_v57 = vand.u32 2147483647, %v6755_v40  ;;  %v15126_v60 = vsel %vm6785_vm5, 1.0, %v16801_v54  ;;  %v15130_v6 = vsel %vm6786_vm6, 1.0, %v16801_v54 }
 0x530   : > { %16798 = vst [vmem:[#allocation78_spill] sm:$0xff] %v15105_v29  ;;  %v15134_v50 = vsel %vm6787_vm9, 1.0, %v16801_v54  ;;  %v15136_v27 = vand.u32 2147483647, %v6756_v58  ;;  %vm6798_vm8 = vcmp.ge.f32.partialorder %v15111_v32, 0.0  ;;  %v15141_v22 = vsel %vm6788_vm10, 1.0, %v16801_v54 }
 0x531   : > { %16799 = vst [vmem:[#allocation93_spill] sm:$0xff] %v15107_v62  ;;  %v15145_v12 = vsel %vm6789_vm11, 1.0, %v16801_v54  ;;  %v15147_v14 = vand.u32 2147483647, %v6757_v48  ;;  %v6881_v63 = vmul.f32 0.3275911, %v15118_v46 }
 0x532   : > { %16800 = vst [vmem:[#allocation101_spill] sm:$0xff] %v15109_v31  ;;  %v15152_v59 = vsel %vm6790_vm2, 1.0, %v16801_v54  ;;  %v15156_v56 = vsel %vm6791_vm12, 1.0, %v16801_v54  ;;  %v15158_v20 = vand.u32 2147483647, %v6758_v15  ;;  %v15163_v38 = vsel %vm6792_vm13, 1.0, %v16801_v54 }
 0x533   : > { %16802 = vst [vmem:[#allocation71_spill] sm:$0xff] %v15126_v60  ;;  %v6882_v53 = vmul.f32 0.3275911, %v15120_v33  ;;  %v15167_v21 = vsel %vm6793_vm14, 1.0, %v16801_v54  ;;  %v15169_v7 = vand.u32 2147483647, %v6759_v0 }
 0x534   : > { %16803 = vst [vmem:[#allocation81_spill] sm:$0xff] %v15130_v6  ;;  %v6883_v28 = vmul.f32 0.3275911, %v15122_v57  ;;  %vm6799_vm5 = vcmp.ge.f32.partialorder %v15113_v2, 0.0  ;;  %v15173_v16 = vand.u32 2147483647, %v6760_v47 }
 0x535   : > { %16804 = vst [vmem:[#allocation83_spill] sm:$0xff] %v15134_v50  ;;  %v15175_v5 = vand.u32 2147483647, %v6761_v17  ;;  %v6884_v24 = vmul.f32 0.3275911, %v15136_v27  ;;  %v15180_v25 = vsel %vm6794_vm15, 1.0, %v16801_v54 }
 0x536   : > { %16805 = vst [vmem:[#allocation98_spill] sm:$0xff] %v15141_v22  ;;  %v15182_v3 = vand.u32 2147483647, %v6762_v36  ;;  %v6885_v23 = vmul.f32 0.3275911, %v15147_v14  ;;  %v6913_v26 = vadd.f32 1.0, %v6881_v63 }
 0x537   : > { %16806 = vst [vmem:[#allocation68_spill] sm:$0xff] %v15145_v12  ;;  %vm6800_vm6 = vcmp.ge.f32.partialorder %v15116_v52, 0.0  ;;  %v15188_v13 = vsel %vm6795_vm1, 1.0, %v16801_v54  ;;  %v15190_v1 = vand.u32 2147483647, %v6763_v51  ;;  %v6914_v45 = vadd.f32 1.0, %v6882_v53 }
 0x538   : > { %16807 = vst [vmem:[#allocation94_spill] sm:$0xff] %v15152_v59  ;;  %v6886_v43 = vmul.f32 0.3275911, %v15158_v20  ;;  %v15195_v55 = vsel %vm6796_vm3, 1.0, %v16801_v54  ;;  %v15197_v49 = vand.u32 2147483647, %v6764_v44  ;;  %9236 = vrcp.f32 %v6913_v26 }
 0x539   : > { %16808 = vst [vmem:[#allocation92_spill] sm:$0xff] %v15156_v56  ;;  %v6887_v10 = vmul.f32 0.3275911, %v15169_v7  ;;  %v6915_v40 = vadd.f32 1.0, %v6883_v28  ;;  %v15202_v58 = vsel %vm6797_vm4, 1.0, %v16801_v54  ;;  %v6916_v0 = vadd.f32 1.0, %v6884_v24 }
 0x53a   : > { %16809 = vst [vmem:[#allocation57_spill] sm:$0xff] %v15163_v38  ;;  %v15204_v48 = vand.u32 2147483647, %v6765_v9  ;;  %v6888_v15 = vmul.f32 0.3275911, %v15173_v16  ;;  %v6917_v36 = vadd.f32 1.0, %v6885_v23  ;;  %9238 = vrcp.f32 %v6914_v45 }
 0x53b   : > { %16810 = vst [vmem:[#allocation104_spill] sm:$0xff] %v15167_v21  ;;  %v15208_v47 = vand.u32 2147483647, %v15111_v32  ;;  %v6889_v17 = vmul.f32 0.3275911, %v15175_v5  ;;  %v6918_v63 = vadd.f32 1.0, %v6886_v43  ;;  %9240 = vrcp.f32 %v6915_v40 }
 0x53c   : > { %16811 = vst [vmem:[#allocation105_spill] sm:$0xff] %v15180_v25  ;;  %v15212_v51 = vand.u32 2147483647, %v15113_v2  ;;  %v6890_v44 = vmul.f32 0.3275911, %v15182_v3  ;;  %v6919_v28 = vadd.f32 1.0, %v6887_v10  ;;  %9242 = vrcp.f32 %v6916_v0 }
 0x53d   : > { %16812 = vst [vmem:[#allocation106_spill] sm:$0xff] %v15188_v13  ;;  %v15216_v9 = vand.u32 2147483647, %v15116_v52  ;;  %v6891_v53 = vmul.f32 0.3275911, %v15190_v1  ;;  %v15222_v24 = vsel %vm6798_vm8, 1.0, %v16801_v54  ;;  %9244 = vrcp.f32 %v6917_v36 }
 0x53e   : > { %16813 = vst [vmem:[#allocation107_spill] sm:$0xff] %v15195_v55  ;;  %v6892_v23 = vmul.f32 0.3275911, %v15197_v49  ;;  %v6920_v26 = vadd.f32 1.0, %v6888_v15  ;;  %v6893_v62 = vmul.f32 0.3275911, %v15204_v48  ;;  %9246 = vrcp.f32 %v6918_v63  ;;  %v15229_v40 = vpop.eup %9236 }
 0x53f   : > { %16814 = vst [vmem:[#allocation108_spill] sm:$0xff] %v15202_v58  ;;  %v6894_v43 = vmul.f32 0.3275911, %v15208_v47  ;;  %v6921_v45 = vadd.f32 1.0, %v6889_v17  ;;  %v6895_v31 = vmul.f32 0.3275911, %v15212_v51  ;;  %9248 = vrcp.f32 %v6919_v28 }
 0x540   : > { %16815 = vst [vmem:[#allocation109_spill] sm:$0xff] %v15222_v24  ;;  %v6922_v29 = vadd.f32 1.0, %v6890_v44  ;;  %v7265_v10 = vsub.f32 0.0, %v15118_v46  ;;  %v15234_v32 = vsel %vm6799_vm5, 1.0, %v16801_v54  ;;  %v6896_v15 = vmul.f32 0.3275911, %v15216_v9  ;;  %v15237_v39 = vpop.eup %9238 }
 0x541   : > { %16816 = vst [vmem:[#allocation110_spill] sm:$0xff] %v15234_v32  ;;  %v6923_v0 = vadd.f32 1.0, %v6891_v53  ;;  %v6924_v17 = vadd.f32 1.0, %v6892_v23  ;;  %9250 = vrcp.f32 %v6920_v26  ;;  %v7266_v36 = vsub.f32 0.0, %v15120_v33  ;;  %v15241_v63 = vpop.eup %9240 }
 0x542   : > { %v7267_v44 = vsub.f32 0.0, %v15122_v57  ;;  %v15246_v2 = vsel %vm6800_vm6, 1.0, %v16801_v54  ;;  %v6925_v61 = vadd.f32 1.0, %v6893_v62  ;;  %v6926_v18 = vadd.f32 1.0, %v6894_v43  ;;  %v15248_v53 = vpop.eup %9242 }
 0x543   : > { %16817 = vst [vmem:[#allocation111_spill] sm:$0xff] %v15246_v2  ;;  %9252 = vrcp.f32 %v6921_v45  ;;  %v6927_v28 = vadd.f32 1.0, %v6895_v31  ;;  %v6977_v23 = vmul.f32 1.0614054, %v15229_v40  ;;  %v7297_v26 = vmul.f32 %v7265_v10, %v15118_v46  ;;  %v15252_v19 = vpop.eup %9244 }
 0x544   : > { %9254 = vrcp.f32 %v6922_v29  ;;  %v6928_v30 = vadd.f32 1.0, %v6896_v15  ;;  %v6978_v37 = vmul.f32 1.0614054, %v15237_v39  ;;  %v7268_v52 = vsub.f32 0.0, %v15136_v27  ;;  %v15256_v54 = vpop.eup %9246 }
 0x545   : > { %9256 = vrcp.f32 %v6923_v0  ;;  %v6979_v62 = vmul.f32 1.0614054, %v15241_v63  ;;  %v7298_v31 = vmul.f32 %v7266_v36, %v15120_v33  ;;  %v15261_v29 = vmul.f32 %v7267_v44, %v15122_v57  ;;  %v15263_v43 = vpop.eup %9248 }
 0x546   : > { %9258 = vrcp.f32 %v6924_v17  ;;  %v6980_v46 = vmul.f32 1.0614054, %v15248_v53  ;;  %v7270_v10 = vsub.f32 0.0, %v15158_v20  ;;  %v6981_v0 = vmul.f32 1.0614054, %v15252_v19 }
 0x547   : > { %9260 = vrcp.f32 %v6925_v61  ;;  %v15268_v15 = vpop.eup %9250  ;;  %v7009_v17 = vadd.f32 -1.4531521, %v6977_v23  ;;  %v15271_v41 = vmul.f32 1.442695, %v7297_v26  ;;  %v6982_v57 = vmul.f32 1.0614054, %v15256_v54 }
 0x548   : > { %9262 = vrcp.f32 %v6926_v18  ;;  %v6983_v61 = vmul.f32 1.0614054, %v15263_v43  ;;  %v7010_v36 = vadd.f32 -1.4531521, %v6978_v37  ;;  %v6984_v45 = vmul.f32 1.0614054, %v15268_v15 }
 0x549   : > { %v15273_v33 = vpop.eup %9252  ;;  %9264 = vrcp.f32 %v6927_v28  ;;  %v7011_v35 = vadd.f32 -1.4531521, %v6979_v62  ;;  %v7012_v26 = vadd.f32 -1.4531521, %v6980_v46  ;;  %v15285_v28 = vmul.f32 %v7268_v52, %v15136_v27 }
 0x54a   : > { %v15277_v44 = vpop.eup %9254  ;;  %9266 = vrcp.f32 %v6928_v30  ;;  %v6985_v18 = vmul.f32 1.0614054, %v15273_v33  ;;  %v15287_v42 = vmul.f32 1.442695, %v7298_v31  ;;  %v7013_v30 = vadd.f32 -1.4531521, %v6981_v0 }
 0x54b   : > { %v15281_v34 = vpop.eup %9256  ;;  %v6986_v23 = vmul.f32 1.0614054, %v15277_v44  ;;  %v7041_v2 = vmul.f32 %v15229_v40, %v7009_v17  ;;  %v15294_v4 = vmul.f32 %v7270_v10, %v15158_v20  ;;  %v7014_v46 = vadd.f32 -1.4531521, %v6982_v57 }
 0x54c   : > { %v15289_v8 = vpop.eup %9258  ;;  %v6987_v37 = vmul.f32 1.0614054, %v15281_v34  ;;  %v7015_v24 = vadd.f32 -1.4531521, %v6983_v61  ;;  %v7042_v27 = vmul.f32 %v15237_v39, %v7010_v36  ;;  %v7016_v58 = vadd.f32 -1.4531521, %v6984_v45 }
 0x54d   : > { %v15296_v62 = vpop.eup %9260  ;;  %v6988_v32 = vmul.f32 1.0614054, %v15289_v8  ;;  %v7017_v55 = vadd.f32 -1.4531521, %v6985_v18  ;;  %v7043_v0 = vmul.f32 %v15241_v63, %v7011_v35  ;;  %v7018_v10 = vadd.f32 -1.4531521, %v6986_v23 }
 0x54e   : > { %v15300_v52 = vpop.eup %9262  ;;  %v6989_v31 = vmul.f32 1.0614054, %v15296_v62  ;;  %v7019_v13 = vadd.f32 -1.4531521, %v6987_v37  ;;  %v7044_v25 = vmul.f32 %v15248_v53, %v7012_v26  ;;  %v7045_v38 = vmul.f32 %v15252_v19, %v7013_v30 }
 0x54f   : > { %v15304_v17 = vpop.eup %9264  ;;  %v6990_v20 = vmul.f32 1.0614054, %v15300_v52  ;;  %v7020_v36 = vadd.f32 -1.4531521, %v6988_v32  ;;  %v7046_v35 = vmul.f32 %v15256_v54, %v7014_v46  ;;  %v7073_v56 = vadd.f32 1.4214138, %v7041_v2 }
 0x550   : > { %v15308_v57 = vpop.eup %9266  ;;  %v6991_v61 = vmul.f32 1.0614054, %v15304_v17  ;;  %v7021_v21 = vadd.f32 -1.4531521, %v6989_v31  ;;  %v7047_v23 = vmul.f32 %v15263_v43, %v7015_v24  ;;  %v7048_v37 = vmul.f32 %v15268_v15, %v7016_v58 }
 0x551   : > { %v6992_v45 = vmul.f32 1.0614054, %v15308_v57  ;;  %v7022_v18 = vadd.f32 -1.4531521, %v6990_v20  ;;  %v7074_v26 = vadd.f32 1.4214138, %v7042_v27  ;;  %v7049_v12 = vmul.f32 %v15273_v33, %v7017_v55 }
 0x552   : > { %v7023_v59 = vadd.f32 -1.4531521, %v6991_v61  ;;  %v7050_v32 = vmul.f32 %v15277_v44, %v7018_v10  ;;  %v7051_v31 = vmul.f32 %v15281_v34, %v7019_v13  ;;  %v7052_v30 = vmul.f32 %v15289_v8, %v7020_v36 }
 0x553   : > { %v7024_v11 = vadd.f32 -1.4531521, %v6992_v45  ;;  %v7053_v20 = vmul.f32 %v15296_v62, %v7021_v21  ;;  %v7054_v46 = vmul.f32 %v15300_v52, %v7022_v18  ;;  %v7075_v2 = vadd.f32 1.4214138, %v7043_v0 }
 0x554   : > { %v7055_v61 = vmul.f32 %v15304_v17, %v7023_v59  ;;  %v7076_v58 = vadd.f32 1.4214138, %v7044_v25  ;;  %v7077_v27 = vadd.f32 1.4214138, %v7045_v38  ;;  %v7078_v45 = vadd.f32 1.4214138, %v7046_v35 }
 0x555   : > { %v7056_v24 = vmul.f32 %v15308_v57, %v7024_v11  ;;  %v7079_v22 = vadd.f32 1.4214138, %v7047_v23  ;;  %v7080_v55 = vadd.f32 1.4214138, %v7048_v37  ;;  %v16818_v10 = vsub.f32 0.0, %v15147_v14 }
 0x556   : > { %v7081_v36 = vadd.f32 1.4214138, %v7049_v12  ;;  %v7082_v50 = vadd.f32 1.4214138, %v7050_v32  ;;  %v7083_v21 = vadd.f32 1.4214138, %v7051_v31  ;;  %v7105_v18 = vmul.f32 %v15229_v40, %v7073_v56 }
 0x557   : > { %v15327_v13 = vmul.f32 %v16818_v10, %v15147_v14  ;;  %v7084_v0 = vadd.f32 1.4214138, %v7052_v30  ;;  %v7085_v6 = vadd.f32 1.4214138, %v7053_v20  ;;  %v7086_v59 = vadd.f32 1.4214138, %v7054_v46 }
 0x558   : > { %v7106_v11 = vmul.f32 %v15237_v39, %v7074_v26  ;;  %v7087_v25 = vadd.f32 1.4214138, %v7055_v61  ;;  %v7088_v38 = vadd.f32 1.4214138, %v7056_v24  ;;  %v7107_v35 = vmul.f32 %v15241_v63, %v7075_v2 }
 0x559   : > { %v7108_v23 = vmul.f32 %v15248_v53, %v7076_v58  ;;  %v7109_v37 = vmul.f32 %v15252_v19, %v7077_v27  ;;  %v7110_v14 = vmul.f32 %v15256_v54, %v7078_v45  ;;  %v7111_v12 = vmul.f32 %v15263_v43, %v7079_v22 }
 0x55a   : > { %v7112_v32 = vmul.f32 %v15268_v15, %v7080_v55  ;;  %v7113_v56 = vmul.f32 %v15273_v33, %v7081_v36  ;;  %v7114_v31 = vmul.f32 %v15277_v44, %v7082_v50  ;;  %v7115_v26 = vmul.f32 %v15281_v34, %v7083_v21 }
 0x55b   : > { %v7137_v30 = vadd.f32 -0.28449672, %v7105_v18  ;;  %v7116_v20 = vmul.f32 %v15289_v8, %v7084_v0  ;;  %v7117_v46 = vmul.f32 %v15296_v62, %v7085_v6  ;;  %v7118_v2 = vmul.f32 %v15300_v52, %v7086_v59 }
 0x55c   : > { %v7138_v61 = vadd.f32 -0.28449672, %v7106_v11  ;;  %v7119_v24 = vmul.f32 %v15304_v17, %v7087_v25  ;;  %v7120_v22 = vmul.f32 %v15308_v57, %v7088_v38  ;;  %v7139_v58 = vadd.f32 -0.28449672, %v7107_v35 }
 0x55d   : > { %v7140_v27 = vadd.f32 -0.28449672, %v7108_v23  ;;  %v7141_v45 = vadd.f32 -0.28449672, %v7109_v37  ;;  %v7142_v55 = vadd.f32 -0.28449672, %v7110_v14  ;;  %9268 = vpow2.f32 %v15271_v41 }
 0x55e   : > { %v7143_v10 = vadd.f32 -0.28449672, %v7111_v12  ;;  %v7144_v50 = vadd.f32 -0.28449672, %v7112_v32  ;;  %v7145_v36 = vadd.f32 -0.28449672, %v7113_v56  ;;  %v7169_v18 = vmul.f32 %v15229_v40, %v7137_v30 }
 0x55f   : > { %v7146_v21 = vadd.f32 -0.28449672, %v7114_v31  ;;  %v7147_v6 = vadd.f32 -0.28449672, %v7115_v26  ;;  %v7148_v0 = vadd.f32 -0.28449672, %v7116_v20  ;;  %v7170_v11 = vmul.f32 %v15237_v39, %v7138_v61 }
 0x560   : > { %v7149_v59 = vadd.f32 -0.28449672, %v7117_v46  ;;  %v7150_v25 = vadd.f32 -0.28449672, %v7118_v2  ;;  %v7151_v60 = vadd.f32 -0.28449672, %v7119_v24  ;;  %v7171_v35 = vmul.f32 %v15241_v63, %v7139_v58 }
 0x561   : > { %v7152_v38 = vadd.f32 -0.28449672, %v7120_v22  ;;  %v7172_v23 = vmul.f32 %v15248_v53, %v7140_v27  ;;  %v7173_v37 = vmul.f32 %v15252_v19, %v7141_v45  ;;  %v7174_v41 = vmul.f32 %v15256_v54, %v7142_v55 }
 0x562   : > { %v7175_v14 = vmul.f32 %v15263_v43, %v7143_v10  ;;  %v7176_v12 = vmul.f32 %v15268_v15, %v7144_v50  ;;  %v7177_v32 = vmul.f32 %v15273_v33, %v7145_v36  ;;  %v7178_v56 = vmul.f32 %v15277_v44, %v7146_v21 }
 0x563   : > { %v7201_v31 = vadd.f32 0.2548296, %v7169_v18  ;;  %v9269_v26 = vpop.eup %9268  ;;  %v7179_v30 = vmul.f32 %v15281_v34, %v7147_v6  ;;  %v7180_v20 = vmul.f32 %v15289_v8, %v7148_v0  ;;  %v7181_v46 = vmul.f32 %v15296_v62, %v7149_v59 }
 0x564   : > { %v7202_v2 = vadd.f32 0.2548296, %v7170_v11  ;;  %v7182_v61 = vmul.f32 %v15300_v52, %v7150_v25  ;;  %v7183_v24 = vmul.f32 %v15304_v17, %v7151_v60  ;;  %v7184_v22 = vmul.f32 %v15308_v57, %v7152_v38 }
 0x565   : > { %v7203_v58 = vadd.f32 0.2548296, %v7171_v35  ;;  %v7204_v27 = vadd.f32 0.2548296, %v7172_v23  ;;  %v7205_v45 = vadd.f32 0.2548296, %v7173_v37  ;;  %9270 = vpow2.f32 %v15287_v42 }
 0x566   : > { %v7206_v55 = vadd.f32 0.2548296, %v7174_v41  ;;  %v7207_v10 = vadd.f32 0.2548296, %v7175_v14  ;;  %v7208_v50 = vadd.f32 0.2548296, %v7176_v12  ;;  %v7233_v21 = vmul.f32 %v15229_v40, %v7201_v31 }
 0x567   : > { %v7209_v36 = vadd.f32 0.2548296, %v7177_v32  ;;  %v7210_v18 = vadd.f32 0.2548296, %v7178_v56  ;;  %v7211_v6 = vadd.f32 0.2548296, %v7179_v30  ;;  %v7234_v59 = vmul.f32 %v15237_v39, %v7202_v2 }
 0x568   : > { %v7212_v0 = vadd.f32 0.2548296, %v7180_v20  ;;  %v7213_v11 = vadd.f32 0.2548296, %v7181_v46  ;;  %v7214_v60 = vadd.f32 0.2548296, %v7182_v61  ;;  %v15366_v38 = vmul.f32 %v15241_v63, %v7203_v58 }
 0x569   : > { %v7215_v25 = vadd.f32 0.2548296, %v7183_v24  ;;  %v7216_v35 = vadd.f32 0.2548296, %v7184_v22  ;;  %v15369_v23 = vmul.f32 %v15248_v53, %v7204_v27  ;;  %v7271_v42 = vsub.f32 0.0, %v15169_v7 }
 0x56a   : > { %v7272_v37 = vsub.f32 0.0, %v15173_v16  ;;  %v15374_v40 = vmul.f32 %v15252_v19, %v7205_v45  ;;  %v15377_v41 = vmul.f32 %v15256_v54, %v7206_v55  ;;  %v15380_v39 = vmul.f32 %v15263_v43, %v7207_v10 }
 0x56b   : > { %v7273_v63 = vsub.f32 0.0, %v15175_v5  ;;  %v9271_v14 = vpop.eup %9270  ;;  %v15384_v12 = vmul.f32 %v15268_v15, %v7208_v50  ;;  %v15387_v53 = vmul.f32 %v15273_v33, %v7209_v36  ;;  %v15390_v32 = vmul.f32 %v15277_v44, %v7210_v18 }
 0x56c   : > { %v7274_v19 = vsub.f32 0.0, %v15182_v3  ;;  %v15394_v54 = vmul.f32 %v15281_v34, %v7211_v6  ;;  %v15397_v43 = vmul.f32 %v15289_v8, %v7212_v0  ;;  %v7275_v56 = vsub.f32 0.0, %v15190_v1 }
 0x56d   : > { %v7303_v31 = vmul.f32 %v7271_v42, %v15169_v7  ;;  %v7276_v15 = vsub.f32 0.0, %v15197_v49  ;;  %v7277_v33 = vsub.f32 0.0, %v15204_v48  ;;  %v7278_v30 = vsub.f32 0.0, %v15208_v47 }
 0x56e   : > { %v7304_v44 = vmul.f32 %v7272_v37, %v15173_v16  ;;  %v7279_v20 = vsub.f32 0.0, %v15212_v51  ;;  %v7305_v34 = vmul.f32 %v7273_v63, %v15175_v5  ;;  %v7349_v46 = vmul.f32 1.442695, %v15261_v29  ;;  %v16820_v37 = vld [vmem:[#allocation81_spill] sm:$0xff] }
 0x56f   : > { %v7351_v8 = vmul.f32 1.442695, %v15285_v28  ;;  %v7306_v2 = vmul.f32 %v7274_v19, %v15182_v3  ;;  %v7353_v7 = vmul.f32 1.442695, %v15327_v13  ;;  %v7355_v61 = vmul.f32 1.442695, %v15294_v4 }
 0x570   : > { %v7393_v24 = vmul.f32 %v9269_v26, %v7233_v21  ;;  %v7280_v22 = vsub.f32 0.0, %v15216_v9  ;;  %v7307_v58 = vmul.f32 %v7275_v56, %v15190_v1  ;;  %9272 = vpow2.f32 %v7349_v46  ;;  %v16819_v21 = vld [vmem:[#allocation71_spill] sm:$0xff] }
 0x571   : > { %v7357_v16 = vmul.f32 1.442695, %v7303_v31  ;;  %v15415_v27 = vmul.f32 %v15296_v62, %v7213_v11  ;;  %v7308_v5 = vmul.f32 %v7276_v15, %v15197_v49  ;;  %9274 = vpow2.f32 %v7351_v8  ;;  %v16821_v15 = vld [vmem:[#allocation83_spill] sm:$0xff] }
 0x572   : > { %v7359_v29 = vmul.f32 1.442695, %v7304_v44  ;;  %v7309_v3 = vmul.f32 %v7277_v33, %v15204_v48  ;;  %v7310_v28 = vmul.f32 %v7278_v30, %v15208_v47  ;;  %9276 = vpow2.f32 %v7353_v7  ;;  %v16822_v44 = vld [vmem:[#allocation98_spill] sm:$0xff] }
 0x573   : > { %v7361_v4 = vmul.f32 1.442695, %v7305_v34  ;;  %9278 = vpow2.f32 %v7355_v61  ;;  %v7363_v13 = vmul.f32 1.442695, %v7306_v2  ;;  %v7394_v26 = vmul.f32 %v9271_v14, %v7234_v59  ;;  %v16823_v61 = vld [vmem:[#allocation68_spill] sm:$0xff] }
 0x574   : > { %v7425_v45 = vsub.f32 1.0, %v7393_v24  ;;  %v7311_v1 = vmul.f32 %v7279_v20, %v15212_v51  ;;  %v7312_v55 = vmul.f32 %v7280_v22, %v15216_v9  ;;  %9280 = vpow2.f32 %v7357_v16  ;;  %v16824_v22 = vld [vmem:[#allocation66_spill] sm:$0xff] }
 0x575   : > { %v7365_v62 = vmul.f32 1.442695, %v7307_v58  ;;  %v15423_v49 = vmul.f32 %v15300_v52, %v7214_v60  ;;  %9282 = vpow2.f32 %v7359_v29  ;;  %v7367_v10 = vmul.f32 1.442695, %v7308_v5  ;;  %v16825_v29 = vld [vmem:[#allocation94_spill] sm:$0xff] }
 0x576   : > { %v7426_v48 = vsub.f32 1.0, %v7394_v26  ;;  %v9273_v50 = vpop.eup %9272  ;;  %v15426_v47 = vmul.f32 %v15304_v17, %v7215_v25  ;;  %9284 = vpow2.f32 %v7361_v4  ;;  %v7369_v36 = vmul.f32 1.442695, %v7309_v3  ;;  %v16826_v26 = vld [vmem:[#allocation92_spill] sm:$0xff] }
 0x577   : > { %v7457_v18 = vmul.f32 %v7425_v45, %v16819_v21  ;;  %v9275_v6 = vpop.eup %9274  ;;  %v15430_v51 = vmul.f32 %v15308_v57, %v7216_v35  ;;  %9286 = vpow2.f32 %v7363_v13  ;;  %v7371_v9 = vmul.f32 1.442695, %v7310_v28 }
 0x578   : > { %v7395_v52 = vmul.f32 %v9273_v50, %v15366_v38  ;;  %v9277_v0 = vpop.eup %9276  ;;  %9288 = vpow2.f32 %v7365_v62  ;;  %v7373_v59 = vmul.f32 1.442695, %v7311_v1  ;;  %v7375_v11 = vmul.f32 1.442695, %v7312_v55  ;;  %v15451_v55 = vpop.permute.xlu2 %7559 }
 0x579   : > { %v7396_v60 = vmul.f32 %v9275_v6, %v15369_v23  ;;  %v9279_v17 = vpop.eup %9278  ;;  %9290 = vpow2.f32 %v7367_v10  ;;  %v7397_v25 = vmul.f32 %v9277_v0, %v15374_v40  ;;  %v7458_v63 = vmul.f32 %v7426_v48, %v16820_v37  ;;  %v16827_v48 = vld [vmem:[#allocation57_spill] sm:$0xff]  ;;  %v16831_v37 = vld [vmem:[#allocation107_spill] sm:$0xff] }
 0x57a   : > { %v7427_v42 = vsub.f32 1.0, %v7395_v52  ;;  %v9281_v14 = vpop.eup %9280  ;;  %9292 = vpow2.f32 %v7369_v36  ;;  %v7398_v57 = vmul.f32 %v9279_v17, %v15377_v41  ;;  %v7489_v19 = vadd.f32 1.0, %v7457_v18 }
 0x57b   : > { %v7428_v35 = vsub.f32 1.0, %v7396_v60  ;;  %v9283_v38 = vpop.eup %9282  ;;  %9294 = vpow2.f32 %v7371_v9  ;;  %v7399_v56 = vmul.f32 %v9281_v14, %v15380_v39  ;;  %v7429_v31 = vsub.f32 1.0, %v7397_v25  ;;  %v16829_v9 = vld [vmem:[#allocation105_spill] sm:$0xff]  ;;  %v16830_v60 = vld [vmem:[#allocation106_spill] sm:$0xff] }
 0x57c   : > { %v7459_v23 = vmul.f32 %v7427_v42, %v16821_v15  ;;  %v9285_v33 = vpop.eup %9284  ;;  %9296 = vpow2.f32 %v7373_v59  ;;  %v7400_v40 = vmul.f32 %v9283_v38, %v15384_v12  ;;  %v7430_v30 = vsub.f32 1.0, %v7398_v57  ;;  %v16833_v15 = vld [vmem:[#allocation109_spill] sm:$0xff] }
 0x57d   : > { %v7460_v20 = vmul.f32 %v7428_v35, %v16822_v44  ;;  %v9287_v34 = vpop.eup %9286  ;;  %9298 = vpow2.f32 %v7375_v11  ;;  %v7401_v41 = vmul.f32 %v9285_v33, %v15387_v53  ;;  %v7431_v46 = vsub.f32 1.0, %v7399_v56  ;;  %v16832_v35 = vld [vmem:[#allocation108_spill] sm:$0xff]  ;;  %v15463_v56 = vpop.permute.xlu0 %2791 }
 0x57e   : > { %v7490_v8 = vadd.f32 1.0, %v7458_v63  ;;  %v9289_v2 = vpop.eup %9288  ;;  %v7402_v7 = vmul.f32 %v9287_v34, %v15390_v32  ;;  %v7432_v39 = vsub.f32 1.0, %v7400_v40  ;;  %v7461_v24 = vmul.f32 %v7429_v31, %v16823_v61  ;;  %v16834_v40 = vld [vmem:[#allocation110_spill] sm:$0xff]  ;;  %v16838_v61 = vld [vmem:[#allocation69_spill] sm:$0xff] }
 0x57f   : > { %v15445_v58 = vmul.f32 %v7489_v19, %v16824_v22  ;;  %v9291_v16 = vpop.eup %9290  ;;  %v7403_v12 = vmul.f32 %v9289_v2, %v15394_v54  ;;  %v7433_v5 = vsub.f32 1.0, %v7401_v41  ;;  %v7462_v3 = vmul.f32 %v7430_v30, %v16825_v29  ;;  %v16828_v54 = vld [vmem:[#allocation104_spill] sm:$0xff]  ;;  %v16836_v41 = vld [vmem:[#allocation111_spill] sm:$0xff] }
 0x580   : > { %v7491_v28 = vadd.f32 1.0, %v7459_v23  ;;  %v9293_v4 = vpop.eup %9292  ;;  %v7404_v53 = vmul.f32 %v9291_v16, %v15397_v43  ;;  %v7434_v13 = vsub.f32 1.0, %v7402_v7  ;;  %v7463_v45 = vmul.f32 %v7431_v46, %v16826_v26  ;;  %v16837_v7 = vld [vmem:[#allocation99_spill] sm:$0xff]  ;;  %v16843_v26 = vld [vmem:[#allocation100_spill] sm:$0xff] }
 0x581   : > { %v7492_v32 = vadd.f32 1.0, %v7460_v20  ;;  %v9295_v1 = vpop.eup %9294  ;;  %v7405_v62 = vmul.f32 %v9293_v4, %v15415_v27  ;;  %v7435_v10 = vsub.f32 1.0, %v7403_v12  ;;  %v7464_v50 = vmul.f32 %v7432_v39, %v16827_v48  ;;  %v16835_v20 = vld [vmem:[#allocation95_spill] sm:$0xff]  ;;  %v16840_v12 = vld [vmem:[#allocation96_spill] sm:$0xff] }
 0x582   : > { %v7465_v36 = vmul.f32 %v7433_v5, %v16828_v54  ;;  %v9297_v21 = vpop.eup %9296  ;;  %v7406_v18 = vmul.f32 %v9295_v1, %v15423_v49  ;;  %v7436_v6 = vsub.f32 1.0, %v7404_v53  ;;  %v7466_v43 = vmul.f32 %v7434_v13, %v16829_v9  ;;  %v16839_v22 = vld [vmem:[#allocation67_spill] sm:$0xff]  ;;  %v15495_v1 = vpop.permute.xlu2 %2807  ;;  %v16846_v48 = vld [vmem:[#allocation84_spill] sm:$0xff] }
 0x583   : > { %v7493_v52 = vadd.f32 1.0, %v7461_v24  ;;  %v9299_v0 = vpop.eup %9298  ;;  %v7407_v59 = vmul.f32 %v9297_v21, %v15426_v47  ;;  %v7437_v11 = vsub.f32 1.0, %v7405_v62  ;;  %v7467_v17 = vmul.f32 %v7435_v10, %v16830_v60  ;;  %v16841_v29 = vld [vmem:[#allocation87_spill] sm:$0xff]  ;;  %v16847_v54 = vld [vmem:[#allocation76_spill] sm:$0xff] }
 0x584   : > { %v7494_v25 = vadd.f32 1.0, %v7462_v3  ;;  %v7408_v27 = vmul.f32 %v9299_v0, %v15430_v51  ;;  %v7438_v42 = vsub.f32 1.0, %v7406_v18  ;;  %v7468_v63 = vmul.f32 %v7436_v6, %v16831_v37  ;;  %v16845_v62 = vld [vmem:[#allocation59_spill] sm:$0xff]  ;;  %v16849_v18 = vld [vmem:[#allocation78_spill] sm:$0xff] }
 0x585   : > { %v7495_v14 = vadd.f32 1.0, %v7463_v45  ;;  %v7439_v57 = vsub.f32 1.0, %v7407_v59  ;;  %v7469_v49 = vmul.f32 %v7437_v11, %v16832_v35  ;;  %v7496_v19 = vadd.f32 1.0, %v7464_v50  ;;  %v16844_v45 = vld [vmem:[#allocation91_spill] sm:$0xff]  ;;  %v16853_v35 = vld [vmem:[#allocation60_spill] sm:$0xff] }
 0x586   : > { %v7497_v38 = vadd.f32 1.0, %v7465_v36  ;;  %v7440_v31 = vsub.f32 1.0, %v7408_v27  ;;  %v7470_v47 = vmul.f32 %v7438_v42, %v16833_v15  ;;  %v7498_v23 = vadd.f32 1.0, %v7466_v43  ;;  %v15528_v15 = vpop.permute.xlu0 %2795 }
 0x587   : > { %v7499_v33 = vadd.f32 1.0, %v7467_v17  ;;  %v7471_v30 = vmul.f32 %v7439_v57, %v16834_v40  ;;  %v7500_v44 = vadd.f32 1.0, %v7468_v63  ;;  %v7501_v51 = vadd.f32 1.0, %v7469_v49  ;;  %v15517_v17 = vpop.permute.xlu1 %2799  ;;  %v16851_v63 = vld [vmem:[#allocation80_spill] sm:$0xff] }
 0x588   : > { %v15468_v34 = vmul.f32 %v7490_v8, %v16835_v20  ;;  %v7472_v46 = vmul.f32 %v7440_v31, %v16836_v41  ;;  %v7502_v2 = vadd.f32 1.0, %v7470_v47  ;;  %v15472_v39 = vmul.f32 %v7491_v28, %v16837_v7  ;;  %v16842_v8 = vld [vmem:[#allocation86_spill] sm:$0xff]  ;;  %v16855_v47 = vld [vmem:[#allocation93_spill] sm:$0xff] }
 0x589   : > { %v15475_v24 = vmul.f32 %v7492_v32, %v16838_v61  ;;  %v15478_v16 = vmul.f32 %v7493_v52, %v16839_v22  ;;  %v15481_v5 = vmul.f32 %v7494_v25, %v16840_v12  ;;  %v15484_v3 = vmul.f32 %v7495_v14, %v16841_v29  ;;  %v16852_v14 = vld [vmem:[#allocation103_spill] sm:$0xff] }
 0x58a   : > { %v15487_v4 = vmul.f32 %v7496_v19, %v16842_v8  ;;  %v7503_v53 = vadd.f32 1.0, %v7471_v30  ;;  %v7504_v13 = vadd.f32 1.0, %v7472_v46  ;;  %v15490_v28 = vmul.f32 %v7497_v38, %v16843_v26  ;;  %v16854_v19 = vld [vmem:[#allocation101_spill] sm:$0xff] }
 0x58b   : > { %v15493_v32 = vmul.f32 %v7498_v23, %v16844_v45  ;;  %v15498_v10 = vmul.f32 %v7499_v33, %v16845_v62  ;;  %v15501_v50 = vmul.f32 %v7500_v44, %v16846_v48  ;;  %v15504_v36 = vmul.f32 %v7501_v51, %v16847_v54  ;;  %v7563_v45 = vpop.permute.xlu2 %7562 }
 0x58c   : > { %v7851_v21 = vrot.slane %v15445_v58, 6  ;;  %v15508_v6 = vmul.f32 %v7502_v2, %v16849_v18  ;;  %v7852_v9 = vrot.slane %v15468_v34, 6  ;;  %v7854_v43 = vrot.slane %v15472_v39, 6 }
 0x58d   : > { %16848 = vst [vmem:[#allocation71_spill] sm:$0xff] %v15504_v36  ;;  %v7855_v52 = vrot.slane %v15475_v24, 6  ;;  %v7857_v0 = vrot.slane %v15478_v16, 6  ;;  %v7858_v59 = vrot.slane %v15481_v5, 6  ;;  %v7860_v11 = vrot.slane %v15484_v3, 6 }
 0x58e   : > { %16850 = vst [vmem:[#allocation81_spill] sm:$0xff] %v15508_v6  ;;  %v7861_v60 = vrot.slane %v15487_v4, 6  ;;  %v7853_v25 = vsel %vm7826_vm7, %v7851_v21, %v7852_v9  ;;  %v7863_v42 = vrot.slane %v15490_v28, 6  ;;  %v7864_v37 = vrot.slane %v15493_v32, 6 }
 0x58f   : > { %v7856_v27 = vsel %vm7826_vm7, %v7854_v43, %v7855_v52  ;;  %v7966_v57 = vmul.f32 %v16852_v14, %v16851_v63  ;;  %v7976_v49 = vsub.f32 0.0, %v16853_v35  ;;  %v6736_v38 = vmul.f32 0.5, %v16854_v19 }
 0x590   : > { %v7859_v31 = vsel %vm7826_vm7, %v7857_v0, %v7858_v59  ;;  %v15531_v23 = vmul.f32 %v7503_v53, %v16855_v47  ;;  %v7862_v33 = vsel %vm7826_vm7, %v7860_v11, %v7861_v60  ;;  %v7866_v40 = vrot.slane %v15498_v10, 6  ;;  %v15557_v59 = vpop.permute.xlu1 %7556  ;;  %v15559_v11 = vpop.permute.xlu0 %8015 }
 0x591   : > { %v7867_v30 = vrot.slane %v15501_v50, 6  ;;  %v15536_v44 = vmul.f32 %v7504_v13, %v6736_v38  ;;  %v7865_v51 = vsel %vm7826_vm7, %v7863_v42, %v7864_v37  ;;  %v7912_v20 = vsel %vm562_vm0, %v7853_v25, 0.0 }
 0x592   : > { %v7913_v41 = vsel %vm562_vm0, %v7856_v27, 0.0  ;;  %v7869_v46 = vrot.slane %v15504_v36, 6  ;;  %v7870_v2 = vrot.slane %v15508_v6, 6  ;;  %v7915_v61 = vsel %vm562_vm0, %v7859_v31, 0.0 }
 0x593   : > { %16856 = vst [vmem:[#allocation83_spill] sm:$0xff] %v15536_v44  ;;  %v7914_v7 = vadd.f32 %v7913_v41, %v7912_v20  ;;  %v7917_v22 = vsel %vm562_vm0, %v7862_v33, 0.0  ;;  %v7968_v12 = vadd.f32 -0.28449672, %v7966_v57  ;;  %v7868_v29 = vsel %vm7826_vm7, %v7866_v40, %v7867_v30  ;;  %v15571_v31 = vpop.permute.xlu2 %2815 }
 0x594   : > { %v7978_v53 = vmul.f32 %v7976_v49, %v16853_v35  ;;  %v7872_v13 = vrot.slane %v15531_v23, 6  ;;  %v7919_v26 = vsel %vm562_vm0, %v7865_v51, 0.0  ;;  %v7871_v62 = vsel %vm7826_vm7, %v7869_v46, %v7870_v2  ;;  %v16858_v46 = vld [vmem:[#allocation97_spill] sm:$0xff] }
 0x595   : > { %v7916_v8 = vadd.f32 %v7915_v61, %v7914_v7  ;;  %v7873_v48 = vrot.slane %v15536_v44, 6  ;;  %v7593_v21 = vrot.slane %v7563_v45, 2  ;;  %v7921_v18 = vsel %vm562_vm0, %v7868_v29, 0.0 }
 0x596   : > { %v7970_v9 = vmul.f32 %v16852_v14, %v7968_v12  ;;  %v7980_v60 = vmul.f32 1.442695, %v7978_v53  ;;  %v7923_v25 = vsel %vm562_vm0, %v7871_v62, 0.0  ;;  %vm16857_vm8 = vcmask 1040384  }
 0x597   : > { %v7918_v54 = vadd.f32 %v7917_v22, %v7916_v8  ;;  %v15554_v52 = vmul.f32 %v7593_v21, %v15445_v58  ;;  %v7634_v0 = vmul.f32 %v7593_v21, %v15468_v34  ;;  %v7874_v27 = vsel %vm7826_vm7, %v7872_v13, %v7873_v48  ;;  %v16860_v13 = vld [vmem:[#allocation58_spill] sm:$0xff]  ;;  %vm16862_vm9 = vmmov %vm16857_vm8 }
 0x598   : > { %v7972_v57 = vadd.f32 0.2548296, %v7970_v9  ;;  %9300 = vpow2.f32 %v7980_v60  ;;  %v7925_v34 = vsel %vm562_vm0, %v7874_v27, 0.0  ;;  %v15573_v47 = vpop.permute.xlu0 %8019  ;;  %v15575_v40 = vpop.permute.xlu1 %2803  ;;  %vm7946_vm7 = vcmp.ge.f32.partialorder %v16858_v46, 0.0  ;;  %vm16867_vm10 = vmmov %vm16857_vm8 }
 0x599   : > { %v7920_v43 = vadd.f32 %v7919_v26, %v7918_v54  ;;  %v16238_v37 = vrot.slane %v15554_v52, 7  ;;  %v7707_v63 = vrot.slane %v7634_v0, 7  ;;  %v16859_v12 = vmov -1.0   ;;  %v16861_v0 = vld [vmem:[#allocation50_spill] sm:$0xff]  ;;  %vm16888_vm11 = vmmov %vm16857_vm8 }
 0x59a   : > { %v7974_v19 = vmul.f32 %v16852_v14, %v7972_v57  ;;  %v7948_v29 = vsel %vm7946_vm7, 1.0, %v16859_v12  ;;  %v7942_v60 = vmul.f32 0.5, %v16861_v0  ;;  %vm16889_vm2 = vmmov %vm16857_vm8 }
 0x59b   : > { %v7922_v42 = vadd.f32 %v7921_v18, %v7920_v43  ;;  %v15567_v58 = vsel %vm16857_vm8, %v16238_v37, %v7707_v63  ;;  %v15578_v61 = vpop.permute.xlu2 %8031  ;;  %vm16890_vm12 = vmmov %vm16889_vm2 }
 0x59c   : > { %vm16914_vm14 = vmmov %vm16889_vm2 }
 0x59d   : > { %v7924_v35 = vadd.f32 %v7923_v25, %v7922_v42  ;;  %vm16922_vm15 = vmmov %vm16889_vm2 }
 0x59e   : > { %v9301_v30 = vpop.eup %9300  ;;  %vm16923_vm1 = vmmov %vm16889_vm2 }
 0x59f   : > { %v7926_v49 = vadd.f32 %v7925_v34, %v7924_v35  ;;  %v7984_v51 = vmul.f32 %v9301_v30, %v7974_v19  ;;  %v16863_v19 = vld [vmem:[#allocation90_spill] sm:$0xff]  ;;  %vm16924_vm3 = vmmov %vm16923_vm1 }
 0x5a0   : > { %v15580_v14 = vpop.permute.xlu1 %8023  ;;  %v7566_v8 = vpop.permute.xlu0 %7565  ;;  %vm16926_vm4 = vmmov %vm16923_vm1 }
 0x5a1   : > { %v7927_v38 = vrot.slane %v7926_v49, 4  ;;  %v7986_v2 = vsub.f32 1.0, %v7984_v51  ;;  %v7594_v45 = vrot.slane %v7566_v8, 2  ;;  %v16865_v51 = vld [vmem:[#allocation70_spill] sm:$0xff]  ;;  %v16869_v8 = vld [vmem:[#allocation28_spill] sm:$0xff]  ;;  %vm16930_vm5 = vmmov %vm16923_vm1 }
 0x5a2   : > { %vm16931_vm6 = vmmov %vm16923_vm1 }
 0x5a3   : > { %v7928_v33 = vadd.f32 %v7927_v38, %v7926_v49  ;;  %v7988_v53 = vmul.f32 %v7986_v2, %v7948_v29  ;;  %v15590_v48 = vmul.f32 %v7594_v45, %v15472_v39  ;;  %v7636_v54 = vmul.f32 %v7594_v45, %v15475_v24  ;;  %v15601_v42 = vpop.permute.xlu2 %2819  ;;  %vm16932_vm8 = vmmov %vm16923_vm1 }
 0x5a4   : > { %v2841_v38 = vrot.slane %v16863_v19, 1  ;;  %v16873_v19 = vld [vmem:[#allocation85_spill] sm:$0xff]  ;;  %vm16933_vm7 = vmmov %vm16923_vm1 }
 0x5a5   : > { %v7929_v20 = vrot.slane %v7928_v33, 2  ;;  %v7990_v21 = vadd.f32 1.0, %v7988_v53  ;;  %v16239_v9 = vrot.slane %v15590_v48, 7  ;;  %v7710_v43 = vrot.slane %v7636_v54, 7 }
 0x5a6   : > { %v2874_v53 = vmul.f32 %v2841_v38, %v16869_v8 }
 0x5a7   : > { %v7930_v41 = vadd.f32 %v7929_v20, %v7928_v33  ;;  %v15599_v27 = vsel %vm16862_vm9, %v16239_v9, %v7710_v43  ;;  %v15603_v63 = vmul.f32 %v7990_v21, %v7942_v60  ;;  %v16864_v33 = vld [vmem:[#allocation88_spill] sm:$0xff]  ;;  %v16870_v21 = vld [vmem:[#allocation30_spill] sm:$0xff]  ;;  %vm16935_vm9 = vmmov %vm16923_vm1 }
 0x5a8   : > { %v7569_v39 = vpop.permute.xlu0 %7568  ;;  %v15605_v57 = vpop.permute.xlu1 %2811  ;;  %v2842_v30 = vrot.slane %v16864_v33, 1  ;;  %v16874_v33 = vrot.slane %v16873_v19, 7  ;;  %v16882_v9 = vld [vmem:[#allocation26_spill] sm:$0xff] }
 0x5a9   : > { %v7931_v7 = vrot.slane %v7930_v41, 1  ;;  %v7595_v35 = vrot.slane %v7569_v39, 2  ;;  %v8058_v20 = vmul.f32 %v16865_v51, %v15603_v63 }
 0x5aa   : > { %v2875_v43 = vmul.f32 %v2842_v30, %v16870_v21  ;;  %v2844_v21 = vrot.slane %v15463_v56, 1  ;;  %v16879_v56 = vld [vmem:[#allocation18_spill] sm:$0xff] }
 0x5ab   : > { %v7932_v22 = vadd.f32 %v7931_v7, %v7930_v41  ;;  %v15608_v34 = vmul.f32 %v7595_v35, %v15478_v16  ;;  %v7638_v49 = vmul.f32 %v7595_v35, %v15481_v5  ;;  %v16866_v41 = vld [vmem:[#allocation79_spill] sm:$0xff]  ;;  %v16868_v5 = vld [vmem:[#allocation20_spill] sm:$0xff]  ;;  %v8090_v45 = vrot.slane %v8058_v20, 1  ;;  %v16872_v35 = vld [vmem:[#allocation77_spill] sm:$0xff] }
 0x5ac   : > { %v8059_v46 = vmul.f32 %v16866_v41, %v15603_v63  ;;  %v2873_v29 = vmul.f32 %v2841_v38, %v16868_v5  ;;  %v16875_v38 = vld [vmem:[#allocation53_spill] sm:$0xff]  ;;  %v16878_v5 = vld [vmem:[#allocation39_spill] sm:$0xff]  ;;  %v2879_v6 = vmul.f32 %v2844_v21, %v16882_v9 }
 0x5ad   : > { %v15584_v26 = vmul.f32 %v16860_v13, %v7932_v22  ;;  %v16237_v2 = vrot.slane %v15608_v34, 7  ;;  %v7713_v7 = vrot.slane %v7638_v49, 7  ;;  %v15618_v22 = vpop.permute.xlu2 %8039  ;;  %v2843_v49 = vrot.slane %v16872_v35, 1  ;;  %v16883_v9 = vld [vmem:[#allocation49_spill] sm:$0xff] }
 0x5ae   : > { %v8091_v54 = vrot.slane %v8059_v46, 1  ;;  %v7762_v51 = vadd.f32 %v16874_v33, %v2873_v29  ;;  %v7763_v41 = vadd.f32 %v16875_v38, %v2874_v53  ;;  %v8875_v33 = vld [vmem:[%s9813_s10] sm:$0xff] }
 0x5af   : > { %v15587_v62 = vmul.f32 0.70710677, %v15584_v26  ;;  %v15623_v16 = vsel %vm16867_vm10, %v16237_v2, %v7713_v7  ;;  %v16876_v7 = vld [vmem:[#allocation24_spill] sm:$0xff]  ;;  %vm16939_vm10 = vmmov %vm16923_vm1 }
 0x5b0   : > { %v15630_v60 = vpop.permute.xlu1 %8027  ;;  %v16877_v20 = vrot.slane %v16876_v7, 7  ;;  %v8122_v35 = vadd.f32 %v8090_v45, %v7762_v51  ;;  %v8123_v29 = vadd.f32 %v8090_v45, %v7763_v41 }
 0x5b1   : > { %v7951_v18 = vand.u32 2147483647, %v15587_v62  ;;  %vm7947_vm13 = vcmp.ge.f32.partialorder %v15587_v62, 0.0 }
 0x5b2   : > { %v7764_v46 = vadd.f32 %v16877_v20, %v2875_v43  ;;  %v8186_v41 = vrot.slane %v8122_v35, 7  ;;  %v16884_v35 = vld [vmem:[#allocation54_spill] sm:$0xff] }
 0x5b3   : > { %v7953_v25 = vmul.f32 0.3275911, %v7951_v18  ;;  %v7977_v0 = vsub.f32 0.0, %v7951_v18 }
 0x5b4   : > { %v8124_v19 = vadd.f32 %v8091_v54, %v7764_v46 }
 0x5b5   : > { %v7955_v24 = vadd.f32 1.0, %v7953_v25  ;;  %v16871_v25 = vld [vmem:[#allocation31_spill] sm:$0xff]  ;;  %v7979_v53 = vmul.f32 %v7977_v0, %v7951_v18  ;;  %v7578_v20 = vpop.permute.xlu2 %7577  ;;  %v8187_v18 = vrot.slane %v8123_v29, 7  ;;  %v15669_v29 = vmul.f32 %v16884_v35, %v15603_v63 }
 0x5b6   : > { %v2876_v39 = vmul.f32 %v2842_v30, %v16871_v25  ;;  %v8874_v30 = vld [vmem:[%s16005_s9] sm:$0xff]  ;;  %v7598_v45 = vrot.slane %v7578_v20, 2  ;;  %v8189_v0 = vrot.slane %v8124_v19, 7  ;;  %v16885_v19 = vld [vmem:[#allocation36_spill] sm:$0xff] }
 0x5b7   : > { %9302 = vrcp.f32 %v7955_v24  ;;  %v8883_v25 = vld [vmem:[%s15997_s1] sm:$0xff]  ;;  %8301 = vmatpush.bf16.msrb.mxu2 %v8874_v30 }
 0x5b8   : > { %v7765_v8 = vadd.f32 %v16878_v5, %v2876_v39  ;;  %8442 = vmatpush.bf16.msrb.mxu3 %v8883_v25  ;;  %v2877_v39 = vmul.f32 %v2843_v49, %v16879_v56  ;;  %v16881_v5 = vld [vmem:[#allocation27_spill] sm:$0xff]  ;;  %v15655_v46 = vpop.permute.xlu1 %8035  ;;  %v7644_v30 = vmul.f32 %v7598_v45, %v15501_v50  ;;  %v15665_v25 = vmul.f32 %v16883_v9, %v15603_v63  ;;  %v15680_v9 = vpop.permute.xlu0 %2823 }
 0x5b9   : > { %v8060_v37 = vmul.f32 %v16881_v5, %v15603_v63  ;;  %v2846_v5 = vrot.slane %v15517_v17, 1 }
 0x5ba   : > { %v8125_v38 = vadd.f32 %v8091_v54, %v7765_v8  ;;  %v7982_v54 = vmul.f32 1.442695, %v7979_v53  ;;  %v2880_v53 = vmul.f32 %v2844_v21, %v16885_v19  ;;  %v7722_v20 = vrot.slane %v7644_v30, 7  ;;  %v16892_v30 = vld [vmem:[#allocation25_spill] sm:$0xff]  ;;  %v16893_v19 = vld [vmem:[#allocation44_spill] sm:$0xff] }
 0x5bb   : > { %8836 = vmatmul.msk.bf16.vlgmr.msrb.gmra.mxu3 %vm562_vm0, %v8875_v33  ;;  %v2845_v33 = vrot.slane %v15528_v15, 1  ;;  %v8092_v50 = vrot.slane %v8060_v37, 1  ;;  %v8188_v21 = vsel %vm16889_vm2, %v8186_v41, %v8187_v18  ;;  %v16897_v18 = vld [vmem:[#allocation32_spill] sm:$0xff]  ;;  %vm16945_vm2 = vmmov %vm16923_vm1 }
 0x5bc   : > { %9304 = vpow2.f32 %v7982_v54  ;;  %v16891_v54 = vld [vmem:[#allocation37_spill] sm:$0xff] }
 0x5bd   : > { %v15627_v13 = vpop.eup %9302 }
 0x5be   : > { %v7959_v24 = vmul.f32 1.0614054, %v15627_v13 }
 0x5c0   : > { %v7961_v2 = vadd.f32 -1.4531521, %v7959_v24  ;;  %v16880_v24 = vld [vmem:[#allocation22_spill] sm:$0xff]  ;;  %v7572_v17 = vpop.permute.xlu1 %7571 }
 0x5c1   : > { %v2878_v7 = vmul.f32 %v2843_v49, %v16880_v24  ;;  %v15660_v49 = vmul.f32 %v7598_v45, %v15498_v10 }
 0x5c2   : > { %v7963_v43 = vmul.f32 %v15627_v13, %v7961_v2  ;;  %v8190_v2 = vrot.slane %v8125_v38, 7  ;;  %v16886_v38 = vld [vmem:[#allocation41_spill] sm:$0xff] }
 0x5c3   : > { %v16241_v10 = vrot.slane %v15660_v49, 7  ;;  %v7767_v35 = vadd.f32 %v16892_v30, %v2878_v7  ;;  %v16899_v7 = vld [vmem:[#allocation38_spill] sm:$0xff]  ;;  %v9305_v30 = vpop.eup %9304 }
 0x5c4   : > { %v7965_v51 = vadd.f32 1.4214138, %v7963_v43  ;;  %v16887_v43 = vrot.slane %v16886_v38, 7  ;;  %v16894_v38 = vrot.slane %v16893_v19, 7 }
 0x5c5   : > { %v15685_v15 = vsel %vm16888_vm11, %v16241_v10, %v7722_v20  ;;  %v16895_v10 = vld [vmem:[#allocation43_spill] sm:$0xff]  ;;  %vm16940_vm11 = vmmov %vm16923_vm1 }
 0x5c6   : > { %v7967_v8 = vmul.f32 %v15627_v13, %v7965_v51  ;;  %v7766_v56 = vadd.f32 %v16887_v43, %v2877_v39  ;;  %v8063_v51 = vmul.f32 %v15559_v11, %v15603_v63  ;;  %v8191_v39 = vsel %vm16890_vm12, %v8189_v0, %v8190_v2  ;;  %v16898_v2 = vld [vmem:[#allocation33_spill] sm:$0xff]  ;;  %vm16946_vm12 = vmmov %vm16923_vm1 }
 0x5c7   : > { %v8250_v11 = vpack.c.bf16 %v8191_v39, %v8188_v21  ;;  %v7768_v43 = vadd.f32 %v16894_v38, %v2879_v6  ;;  %v16896_v36 = vrot.slane %v16895_v10, 7  ;;  %v2883_v0 = vmul.f32 %v2846_v5, %v16897_v18 }
 0x5c8   : > { %v7969_v24 = vadd.f32 -0.28449672, %v7967_v8  ;;  %v2881_v8 = vmul.f32 %v2845_v33, %v16891_v54  ;;  %v2884_v37 = vmul.f32 %v2846_v5, %v16898_v2  ;;  %v8095_v44 = vrot.slane %v8063_v51, 1  ;;  %v16902_v5 = vld [vmem:[#allocation51_spill] sm:$0xff] }
 0x5c9   : > { %8792 = vmatmul.msk.bf16.vlgmr.msrb.gmra.mxu2 %vm562_vm0, %v8250_v11  ;;  %v8126_v21 = vadd.f32 %v8092_v50, %v7766_v56  ;;  %v8127_v39 = vadd.f32 %v8092_v50, %v7767_v35  ;;  %v2882_v54 = vmul.f32 %v2845_v33, %v16899_v7  ;;  %v16903_v51 = vrot.slane %v16902_v5, 7  ;;  %v16904_v11 = vld [vmem:[#allocation23_spill] sm:$0xff]  ;;  %v16905_v35 = vld [vmem:[#allocation56_spill] sm:$0xff] }
 0x5ca   : > { %v7971_v45 = vmul.f32 %v15627_v13, %v7969_v24  ;;  %v7592_v24 = vrot.slane %v15451_v55, 2  ;;  %v7770_v41 = vadd.f32 %v16896_v36, %v2881_v8  ;;  %v16901_v36 = vrot.slane %v15669_v29, 1  ;;  %v8876_v2 = vld [vmem:[%s9813_s10 + $0x8] sm:$0xff] }
 0x5cb   : > { %v7772_v19 = vadd.f32 %v16903_v51, %v2883_v0  ;;  %v7773_v56 = vadd.f32 %v16904_v11, %v2884_v37  ;;  %v2850_v50 = vrot.slane %v15571_v31, 1  ;;  %v7769_v38 = vadd.f32 %v16905_v35, %v2880_v53  ;;  %8837 = vmatmul.msk.bf16.gmra.mxu3 %vm562_vm0, %v8876_v2 }
 0x5cc   : > { %v7973_v20 = vadd.f32 0.2548296, %v7971_v45  ;;  %v16900_v45 = vrot.slane %v15665_v25, 1  ;;  %v15709_v8 = vadd.f32 %v16901_v36, %v7770_v41  ;;  %v8192_v0 = vrot.slane %v8126_v21, 7  ;;  %v16908_v36 = vld [vmem:[#allocation82_spill] sm:$0xff] }
 0x5cd   : > { %v15721_v18 = vadd.f32 %v8095_v44, %v7772_v19  ;;  %v15723_v41 = vadd.f32 %v8095_v44, %v7773_v56  ;;  %v8193_v7 = vrot.slane %v8127_v39, 7  ;;  %v2851_v31 = vrot.slane %v15601_v42, 1  ;;  %v16909_v44 = vld [vmem:[#allocation74_spill] sm:$0xff]  ;;  %v2828_v19 = vpop.permute.xlu0 %2827 }
 0x5ce   : > { %v7975_v6 = vmul.f32 %v15627_v13, %v7973_v20  ;;  %v15705_v10 = vadd.f32 %v16900_v45, %v7768_v43  ;;  %v2849_v13 = vrot.slane %v15605_v57, 1  ;;  %v16906_v43 = vld [vmem:[#allocation29_spill] sm:$0xff]  ;;  %v7949_v57 = vsel %vm7947_vm13, 1.0, %v16859_v12  ;;  %v16910_v42 = vld [vmem:[#allocation46_spill] sm:$0xff]  ;;  %vm16947_vm13 = vmmov %vm16923_vm1 }
 0x5cf   : > { %v15719_v20 = vadd.f32 %v16906_v43, %v2882_v54  ;;  %v7596_v53 = vrot.slane %v7572_v17, 2  ;;  %v8201_v21 = vrot.slane %v15721_v18, 7  ;;  %v8202_v39 = vrot.slane %v15723_v41, 7  ;;  %v16912_v43 = vld [vmem:[#allocation42_spill] sm:$0xff] }
 0x5d0   : > { %v7985_v33 = vmul.f32 %v9305_v30, %v7975_v6  ;;  %v8195_v62 = vrot.slane %v15705_v10, 7  ;;  %v8198_v6 = vrot.slane %v15709_v8, 7  ;;  %v16907_v30 = vld [vmem:[#allocation102_spill] sm:$0xff]  ;;  %v2889_v5 = vmul.f32 %v2849_v13, %v16908_v36 }
 0x5d1   : > { %v2891_v54 = vmul.f32 %v2850_v50, %v16907_v30  ;;  %v2890_v51 = vmul.f32 %v2849_v13, %v16909_v44  ;;  %v2892_v11 = vmul.f32 %v2850_v50, %v16910_v42  ;;  %v7943_v56 = vmul.f32 0.5, %v15584_v26  ;;  %v16913_v13 = vld [vmem:[#allocation40_spill] sm:$0xff] }
 0x5d2   : > { %v7987_v37 = vsub.f32 1.0, %v7985_v33  ;;  %v7575_v33 = vpop.permute.xlu1 %7574  ;;  %v16911_v17 = vrot.slane %v15590_v48, 7  ;;  %v2894_v30 = vmul.f32 %v2851_v31, %v16913_v13  ;;  %v7639_v36 = vmul.f32 %v7596_v53, %v15484_v3 }
 0x5d3   : > { %v7640_v44 = vmul.f32 %v7596_v53, %v15487_v4  ;;  %v8194_v50 = vsel %vm16914_vm14, %v8192_v0, %v8193_v7  ;;  %v16915_v26 = vrot.slane %v15554_v52, 7  ;;  %v16916_v48 = vrot.slane %v15608_v34, 7  ;;  %vm16948_vm14 = vmmov %vm16923_vm1 }
 0x5d4   : > { %v7989_v45 = vmul.f32 %v7987_v37, %v7949_v57  ;;  %v7780_v35 = vadd.f32 %v16911_v17, %v2891_v54  ;;  %v2893_v37 = vmul.f32 %v2851_v31, %v16912_v43  ;;  %v7597_v57 = vrot.slane %v7575_v33, 2 }
 0x5d5   : > { %v7778_v2 = vadd.f32 %v16915_v26, %v2889_v5  ;;  %v7783_v33 = vadd.f32 %v15623_v16, %v2894_v30  ;;  %v16917_v4 = vrot.slane %v15665_v25, 1  ;;  %v7715_v7 = vrot.slane %v7639_v36, 7  ;;  %v16919_v36 = vld [vmem:[#allocation47_spill] sm:$0xff] }
 0x5d6   : > { %v7991_v12 = vadd.f32 1.0, %v7989_v45  ;;  %v7779_v45 = vadd.f32 %v15567_v58, %v2890_v51  ;;  %v7782_v54 = vadd.f32 %v16916_v48, %v2893_v37  ;;  %v7641_v31 = vmul.f32 %v7597_v57, %v15490_v28 }
 0x5d7   : > { %v7642_v3 = vmul.f32 %v7597_v57, %v15493_v32  ;;  %v8129_v53 = vadd.f32 %v16917_v4, %v7769_v38  ;;  %v2852_v58 = vrot.slane %v15680_v9, 1  ;;  %v2853_v28 = vrot.slane %v2828_v19, 1  ;;  %v8044_v32 = vpop.permute.xlu2 %8043  ;;  %v16918_v57 = vld [vmem:[#allocation45_spill] sm:$0xff] }
 0x5d8   : > { %v15745_v42 = vmul.f32 %v7991_v12, %v7943_v56  ;;  %v7716_v25 = vrot.slane %v7640_v44, 7  ;;  %v8048_v56 = vpop.permute.xlu0 %8047  ;;  %v7781_v19 = vadd.f32 %v15599_v27, %v2892_v11  ;;  %v16921_v4 = vld [vmem:[#allocation73_spill] sm:$0xff]  ;;  %v8877_v27 = vld [vmem:[%s9813_s10 + $0x10] sm:$0xff]  ;;  %v7591_v41 = vrot.slane %v15557_v59, 2 }
 0x5d9   : > { %v7719_v12 = vrot.slane %v7642_v3, 7  ;;  %v8196_v17 = vrot.slane %v8129_v53, 7  ;;  %v2895_v13 = vmul.f32 %v2852_v58, %v16918_v57  ;;  %v2897_v44 = vmul.f32 %v2853_v28, %v16919_v36 }
 0x5da   : > { %v8067_v0 = vmul.f32 %v15578_v61, %v15745_v42  ;;  %v8066_v52 = vmul.f32 %v15630_v60, %v15745_v42  ;;  %v8068_v34 = vmul.f32 %v15655_v46, %v15745_v42  ;;  %v15766_v16 = vmul.f32 %v15618_v22, %v15745_v42  ;;  %v2832_v26 = vpop.permute.xlu1 %2831 }
 0x5db   : > { %v8070_v61 = vmul.f32 %v8044_v32, %v15745_v42  ;;  %v7718_v60 = vrot.slane %v7641_v31, 7  ;;  %v8071_v9 = vmul.f32 %v8048_v56, %v15745_v42  ;;  %v16920_v31 = vld [vmem:[#allocation21_spill] sm:$0xff]  ;;  %v16928_v56 = vld [vmem:[#allocation35_spill] sm:$0xff]  ;;  %8838 = vmatmul.msk.bf16.gmra.mxu3 %vm562_vm0, %v8877_v27  ;;  %v16929_v18 = vrot.slane %v15660_v49, 7 }
 0x5dc   : > { %v8099_v38 = vrot.slane %v8067_v0, 1  ;;  %v8098_v5 = vrot.slane %v8066_v52, 1  ;;  %v8100_v51 = vrot.slane %v8068_v34, 1  ;;  %v8101_v48 = vrot.slane %v15766_v16, 1 }
 0x5dd   : > { %v2896_v3 = vmul.f32 %v2852_v58, %v16920_v31  ;;  %v2898_v0 = vmul.f32 %v2853_v28, %v16921_v4  ;;  %v8102_v53 = vrot.slane %v8070_v61, 1  ;;  %v8103_v52 = vrot.slane %v8071_v9, 1  ;;  %v16936_v4 = vld [vmem:[#allocation52_spill] sm:$0xff] }
 0x5de   : > { %v8140_v46 = vadd.f32 %v8099_v38, %v7780_v35  ;;  %v8138_v43 = vadd.f32 %v8098_v5, %v7778_v2  ;;  %v8139_v22 = vadd.f32 %v8098_v5, %v7779_v45  ;;  %v8142_v37 = vadd.f32 %v8100_v51, %v7782_v54 }
 0x5df   : > { %v8143_v30 = vadd.f32 %v8100_v51, %v7783_v33  ;;  %v7717_v35 = vsel %vm16922_vm15, %v7715_v7, %v7716_v25  ;;  %v7784_v2 = vadd.f32 %v7715_v7, %v2895_v13  ;;  %v7720_v45 = vsel %vm16923_vm1, %v7718_v60, %v7719_v12  ;;  %v16927_v51 = vld [vmem:[#allocation34_spill] sm:$0xff]  ;;  %vm16956_vm15 = vmmov %vm16923_vm1 }
 0x5e0   : > { %v7786_v54 = vadd.f32 %v7718_v60, %v2897_v44  ;;  %v8210_v11 = vrot.slane %v8138_v43, 7  ;;  %v2854_v33 = vrot.slane %v2832_v26, 1  ;;  %v8197_v34 = vsel %vm16924_vm3, %v8195_v62, %v8196_v17  ;;  %v16934_v44 = vld [vmem:[#allocation72_spill] sm:$0xff]  ;;  %vm16957_vm3 = vmmov %vm16923_vm1 }
 0x5e1   : > { %v8211_v16 = vrot.slane %v8139_v22, 7  ;;  %v8251_v32 = vpack.c.bf16 %v8197_v34, %v8194_v50  ;;  %v16925_v58 = vrot.slane %v15669_v29, 1  ;;  %v8203_v7 = vsel %vm16926_vm4, %v8201_v21, %v8202_v39  ;;  %vm16958_vm4 = vmmov %vm16923_vm1 }
 0x5e2   : > { %v8144_v25 = vadd.f32 %v8101_v48, %v7784_v2  ;;  %v8146_v5 = vadd.f32 %v8102_v53, %v7786_v54  ;;  %v2899_v61 = vmul.f32 %v2854_v33, %v16927_v51  ;;  %v2900_v10 = vmul.f32 %v2854_v33, %v16928_v56  ;;  %v16938_v2 = vld [vmem:[#allocation19_spill] sm:$0xff] }
 0x5e3   : > { %v8131_v28 = vadd.f32 %v16925_v58, %v15719_v20  ;;  %v8216_v60 = vrot.slane %v8142_v37, 7  ;;  %v8217_v62 = vrot.slane %v8143_v30, 7  ;;  %8793 = vmatmul.msk.bf16.gmra.mxu2 %vm562_vm0, %v8251_v32  ;;  %v8141_v20 = vadd.f32 %v8099_v38, %v7781_v19 }
 0x5e4   : > { %v8213_v50 = vrot.slane %v8140_v46, 7  ;;  %v7788_v21 = vadd.f32 %v16929_v18, %v2899_v61  ;;  %v7789_v39 = vadd.f32 %v15685_v15, %v2900_v10  ;;  %v7785_v12 = vadd.f32 %v7717_v35, %v2896_v3  ;;  %v16944_v61 = vld [vmem:[#allocation63_spill] sm:$0xff] }
 0x5e5   : > { %v8199_v29 = vrot.slane %v8131_v28, 7  ;;  %v7787_v9 = vadd.f32 %v7720_v45, %v2898_v0  ;;  %v15802_v43 = vsel %vm16931_vm6, %v8210_v11, %v8211_v16  ;;  %v8214_v19 = vrot.slane %v8141_v20, 7  ;;  %v16937_v0 = vld [vmem:[#allocation89_spill] sm:$0xff]  ;;  %v16941_v28 = vld [vmem:[#allocation64_spill] sm:$0xff] }
 0x5e6   : > { %v8148_v22 = vadd.f32 %v8103_v52, %v7788_v21  ;;  %v8149_v37 = vadd.f32 %v8103_v52, %v7789_v39  ;;  %v8219_v59 = vrot.slane %v8144_v25, 7  ;;  %v8222_v46 = vrot.slane %v8146_v5, 7  ;;  %v16943_v5 = vld [vmem:[#allocation62_spill] sm:$0xff] }
 0x5e7   : > { %v8200_v17 = vsel %vm16930_vm5, %v8198_v6, %v8199_v29  ;;  %v8145_v57 = vadd.f32 %v8101_v48, %v7785_v12  ;;  %v8218_v49 = vsel %vm16932_vm8, %v8216_v60, %v8217_v62  ;;  %v8215_v30 = vsel %vm16933_vm7, %v8213_v50, %v8214_v19  ;;  %v8880_v19 = vld [vmem:[%s9813_s10 + $0x28] sm:$0xff] }
 0x5e8   : > { %v8252_v38 = vpack.c.bf16 %v8203_v7, %v8200_v17  ;;  %v8225_v13 = vrot.slane %v8148_v22, 7  ;;  %v8226_v15 = vrot.slane %v8149_v37, 7  ;;  %v8147_v36 = vadd.f32 %v8102_v53, %v7787_v9  ;;  %v16942_v7 = vld [vmem:[#allocation65_spill] sm:$0xff] }
 0x5e9   : > { %v8254_v8 = vpack.c.bf16 %v8215_v30, %v15802_v43  ;;  %v8220_v6 = vrot.slane %v8145_v57, 7  ;;  %v7631_v26 = vmul.f32 %v7592_v24, %v16934_v44  ;;  %v7632_v48 = vmul.f32 %v7592_v24, %v16936_v4  ;;  %v8879_v37 = vld [vmem:[%s9813_s10 + $0x20] sm:$0xff]  ;;  %v8881_v57 = vld [vmem:[%s9813_s10 + $0x30] sm:$0xff] }
 0x5ea   : > { %v8223_v31 = vrot.slane %v8147_v36, 7  ;;  %v15811_v3 = vsel %vm16935_vm9, %v8225_v13, %v8226_v15  ;;  %v7629_v35 = vmul.f32 %v7591_v41, %v16937_v0  ;;  %v7630_v53 = vmul.f32 %v7591_v41, %v16938_v2  ;;  %v8884_v13 = vld [vmem:[%s16007_s11] sm:$0xff] }
 0x5eb   : > { %v8221_v45 = vsel %vm16939_vm10, %v8219_v59, %v8220_v6  ;;  %v2848_v54 = vrot.slane %v15495_v1, 1  ;;  %v2847_v27 = vrot.slane %v15575_v40, 1  ;;  %v8064_v55 = vmul.f32 %v15573_v47, %v15603_v63  ;;  %v8878_v1 = vld [vmem:[%s9813_s10 + $0x18] sm:$0xff]  ;;  %v7581_v59 = vpop.permute.xlu1 %7580  ;;  %8551 = vmatpush.bf16.msrb.mxu0 %v8884_v13  ;;  %v16949_v6 = vld [vmem:[#allocation83_spill] sm:$0xff] }
 0x5ec   : > { %v8255_v11 = vpack.c.bf16 %v8221_v45, %v8218_v49  ;;  %v15822_v52 = vsel %vm16940_vm11, %v8222_v46, %v8223_v31  ;;  %v8065_v24 = vmul.f32 %v15580_v14, %v15603_v63  ;;  %v7703_v34 = vrot.slane %v7631_v26, 7  ;;  %8839 = vmatmul.msk.bf16.gmra.mxu3 %vm562_vm0, %v8878_v1  ;;  %v7584_v46 = vpop.permute.xlu2 %7583  ;;  %v16950_v26 = vld [vmem:[#allocation71_spill] sm:$0xff]  ;;  %v16951_v4 = vld [vmem:[#allocation81_spill] sm:$0xff] }
 0x5ed   : > { %v8256_v33 = vpack.c.bf16 %v15811_v3, %v15822_v52  ;;  %v7704_v16 = vrot.slane %v7632_v48, 7  ;;  %v7700_v32 = vrot.slane %v7629_v35, 7  ;;  %v7701_v58 = vrot.slane %v7630_v53, 7 }
 0x5ee   : > { %v2887_v40 = vmul.f32 %v2848_v54, %v16941_v28  ;;  %v2888_v25 = vmul.f32 %v2848_v54, %v16942_v7  ;;  %v2885_v51 = vmul.f32 %v2847_v27, %v16943_v5  ;;  %v2886_v56 = vmul.f32 %v2847_v27, %v16944_v61  ;;  %v8052_v27 = vpop.permute.xlu0 %8051  ;;  %v16955_v28 = vld [vmem:[#allocation61_spill] sm:$0xff] }
 0x5ef   : > { %v8096_v10 = vrot.slane %v8064_v55, 1  ;;  %v8097_v60 = vrot.slane %v8065_v24, 1  ;;  %v7705_v47 = vsel %vm16945_vm2, %v7703_v34, %v7704_v16  ;;  %v7702_v62 = vsel %vm16946_vm12, %v7700_v32, %v7701_v58  ;;  %v8882_v24 = vld [vmem:[%s9813_s10 + $0x38] sm:$0xff]  ;;  %s8625_s10 = sshll.u32 %s8622_s21, 4  ;;  %s8626_s10 = int_to_ptr.hbm [resolvable:$true] %s8625_s10 }
 0x5f0   : > { %v7776_v14 = vadd.f32 %v7703_v34, %v2887_v40  ;;  %v7777_v63 = vadd.f32 %v7705_v47, %v2888_v25  ;;  %v7774_v29 = vadd.f32 %v7700_v32, %v2885_v51  ;;  %v7775_v20 = vadd.f32 %v7702_v62, %v2886_v56  ;;  %v16952_v34 = vld [vmem:[#allocation55_spill] sm:$0xff]  ;;  %v16954_v58 = vld [vmem:[#allocation48_spill] sm:$0xff]  ;;  %s9569_s13 = sshra.s32 %s8626_s10, 4  ;;  %s9570_s13 = int_to_ptr.hbm [resolvable:$true] %s9569_s13 }
 0x5f1   : > { %v7600_v15 = vrot.slane %v7584_v46, 2  ;;  %v7599_v30 = vrot.slane %v7581_v59, 2  ;;  %v8072_v7 = vmul.f32 %v8052_v27, %v15745_v42  ;;  %s9571_s29 = scalar_lea.hbm %s9570_s13, 128  ;;  %p9576_p0 = scmp.lt.s32.totalorder %s9570_s13, %s16962_s5 }
 0x5f2   : > { %v8134_v41 = vadd.f32 %v8096_v10, %v7774_v29  ;;  %v8135_v50 = vadd.f32 %v8096_v10, %v7775_v20  ;;  %v8136_v18 = vadd.f32 %v8097_v60, %v7776_v14  ;;  %v8137_v21 = vadd.f32 %v8097_v60, %v7777_v63  ;;  %p9572_p4 = scmp.ne.s32.totalorder %s9570_s13, %s9571_s29  ;;  %p9577_p7 = scmp.lt.s32.totalorder %s9575_s14, %s9571_s29 }
 0x5f3   : > { %8794 = vmatmul.msk.bf16.gmra.mxu2 %vm562_vm0, %v8252_v38  ;;  %v2836_v49 = vpop.permute.xlu1 %2835  ;;  %v7648_v44 = vmul.f32 %v7600_v15, %v16949_v6  ;;  %v7645_v31 = vmul.f32 %v7599_v30, %v16950_v26  ;;  %v7646_v48 = vmul.f32 %v7599_v30, %v16951_v4  ;;  %v8104_v47 = vrot.slane %v8072_v7, 1 }
 0x5f4   : > { %v8204_v39 = vrot.slane %v8134_v41, 7  ;;  %v8205_v12 = vrot.slane %v8135_v50, 7  ;;  %v8207_v9 = vrot.slane %v8136_v18, 7  ;;  %v8208_v17 = vrot.slane %v8137_v21, 7  ;;  %v2840_v36 = vpop.permute.xlu2 %2839  ;;  %p9573_p6 = pnand %p9572_p4, %p9761_p11  ;;  %p9578_p5 = por %p9577_p7, %p9576_p0 }
 0x5f5   : > { %v2856_v35 = vrot.slane %v2840_v36, 1  ;;  %v2855_v2 = vrot.slane %v2836_v49, 1  ;;  %v7728_v54 = vrot.slane %v7648_v44, 7  ;;  %v7725_v55 = vrot.slane %v7646_v48, 7 }
 0x5f6   : > { %v8206_v43 = vsel %vm16947_vm13, %v8204_v39, %v8205_v12  ;;  %v8209_v22 = vsel %vm16948_vm14, %v8207_v9, %v8208_v17  ;;  %v15877_v12 = vld [vmem:[%s16000_s4] ss:$0 sm:$0xff]  ;;  %p9574_p13 = pneg %p9573_p6 }
 0x5f7   : > { %v8253_v38 = vpack.c.bf16 %v8209_v22, %v8206_v43  ;;  %v2903_v16 = vmul.f32 %v2856_v35, %v16952_v34  ;;  %v2901_v1 = vmul.f32 %v2855_v2, %v16954_v58  ;;  %v2902_v40 = vmul.f32 %v2855_v2, %v16955_v28  ;;  %v15882_v9 = vld [vmem:[%s16959_s20] ss:$0 sm:$0xff] }
 0x5f8   : > { %p9579_p8 = pnand %p9578_p5, %p9574_p13 }
 0x5fb   : > { %v8056_v0 = vpop.permute.xlu1 %8055 }
 0x5fc   : > { %8840 = vmatmul.msk.bf16.gmra.mxu3 %vm562_vm0, %v8879_v37  ;;  %v8073_v53 = vmul.f32 %v8056_v0, %v15745_v42 }
 0x5fe   : > { %v8105_v25 = vrot.slane %v8073_v53, 1 }
 0x603   : > { %8795 = vmatmul.msk.bf16.gmra.mxu2 %vm562_vm0, %v8253_v38 }
 0x60c   : > { %8841 = vmatmul.msk.bf16.gmra.mxu3 %vm562_vm0, %v8880_v19 }
 0x613   : > { %8796 = vmatmul.msk.bf16.gmra.mxu2 %vm562_vm0, %v8254_v8  ;;  %v7647_v8 = vmul.f32 %v7600_v15, %v15531_v23  ;;  %v16953_v23 = vld [vmem:[#allocation75_spill] sm:$0xff] }
 0x614   : > { %v2904_v32 = vmul.f32 %v2856_v35, %v16953_v23 }
 0x615   : > { %v7727_v45 = vrot.slane %v7647_v8, 7 }
 0x617   : > { %v7729_v5 = vsel %vm16956_vm15, %v7727_v45, %v7728_v54  ;;  %v7792_v61 = vadd.f32 %v7727_v45, %v2903_v16 }
 0x618   : > { %v7793_v56 = vadd.f32 %v7729_v5, %v2904_v32 }
 0x619   : > { %v8152_v62 = vadd.f32 %v8105_v25, %v7792_v61 }
 0x61a   : > { %v8153_v14 = vadd.f32 %v8105_v25, %v7793_v56 }
 0x61b   : > { %v8231_v29 = vrot.slane %v8152_v62, 7 }
 0x61c   : > { %8842 = vmatmul.msk.bf16.gmra.mxu3 %vm562_vm0, %v8881_v57  ;;  %v8232_v20 = vrot.slane %v8153_v14, 7 }
 0x61e   : > { %v8233_v18 = vsel %vm16957_vm3, %v8231_v29, %v8232_v20 }
 0x623   : > { %8797 = vmatmul.msk.bf16.gmra.mxu2 %vm562_vm0, %v8255_v11  ;;  %v7724_v11 = vrot.slane %v7645_v31, 7 }
 0x625   : > { %v7726_v51 = vsel %vm16923_vm1, %v7724_v11, %v7725_v55  ;;  %v7790_v10 = vadd.f32 %v7724_v11, %v2901_v1 }
 0x626   : > { %v7791_v60 = vadd.f32 %v7726_v51, %v2902_v40 }
 0x627   : > { %v8150_v42 = vadd.f32 %v8104_v47, %v7790_v10 }
 0x628   : > { %v8151_v63 = vadd.f32 %v8104_v47, %v7791_v60 }
 0x629   : > { %v8228_v41 = vrot.slane %v8150_v42, 7 }
 0x62a   : > { %v8229_v50 = vrot.slane %v8151_v63, 7 }
 0x62c   : > { %8843 = vmatmul.msk.bf16.gmra.mxu3 %vm562_vm0, %v8882_v24  ;;  %v8230_v3 = vsel %vm16958_vm4, %v8228_v41, %v8229_v50 }
 0x62d   : > { %v8257_v52 = vpack.c.bf16 %v8233_v18, %v8230_v3 }
 0x633   : > { %8798 = vmatmul.msk.bf16.gmra.mxu2 %vm562_vm0, %v8256_v33 }
 0x63e   : > { %v8444_v33 = vpop.f32.mrf.mxu3 }
 0x63f   : > { %v8445_v17 = vadd.f32 %v15877_v12, %v8444_v33 }
 0x643   : > { %8799 = vmatmul.msk.bf16.gmra.mxu2 %vm562_vm0, %v8257_v52 }
 0x646   : > { %v8446_v39 = vpop.f32.mrf.mxu3 }
 0x647   : > { %v8447_v38 = vadd.f32 %v15877_v12, %v8446_v39 }
 0x64c   : > { %v8303_v21 = vpop.f32.mrf.mxu2 }
 0x64d   : > { %v8304_v43 = vadd.f32 %v15882_v9, %v8303_v21 }
 0x64e   : > { %v8449_v37 = vpop.f32.mrf.mxu3 }
 0x64f   : > { %v8484_v59 = vmul.f32 %v8445_v17, %v8304_v43  ;;  %v8450_v30 = vadd.f32 %v15877_v12, %v8449_v37 }
 0x654   : > { %v8305_v22 = vpop.f32.mrf.mxu2 }
 0x655   : > { %v8306_v19 = vadd.f32 %v15882_v9, %v8305_v22 }
 0x656   : > { %v8451_v49 = vpop.f32.mrf.mxu3 }
 0x657   : > { %v8485_v46 = vmul.f32 %v8447_v38, %v8306_v19  ;;  %v8452_v44 = vadd.f32 %v15877_v12, %v8451_v49 }
 0x659   : > { %v8500_v57 = vpack.c.bf16 %v8485_v46, %v8484_v59 }
 0x65b   : > { %8848 = vmatmul.msk.bf16.vlgmr.msrb.gmra.mxu0 %vm562_vm0, %v8500_v57 }
 0x65e   : > { %v8454_v15 = vpop.f32.mrf.mxu3 }
 0x65f   : > { %v8455_v2 = vadd.f32 %v15877_v12, %v8454_v15 }
 0x666   : > { %v8308_v13 = vpop.f32.mrf.mxu2  ;;  %v8456_v6 = vpop.f32.mrf.mxu3 }
 0x667   : > { %v8309_v36 = vadd.f32 %v15882_v9, %v8308_v13  ;;  %v8457_v27 = vadd.f32 %v15877_v12, %v8456_v6 }
 0x669   : > { %v8486_v31 = vmul.f32 %v8450_v30, %v8309_v36 }
 0x66e   : > { %v8310_v8 = vpop.f32.mrf.mxu2 }
 0x66f   : > { %v8311_v26 = vadd.f32 %v15882_v9, %v8310_v8  ;;  %v8459_v35 = vpop.f32.mrf.mxu3 }
 0x670   : > { %v8460_v32 = vadd.f32 %v15877_v12, %v8459_v35 }
 0x671   : > { %v8487_v4 = vmul.f32 %v8452_v44, %v8311_v26 }
 0x673   : > { %v8501_v48 = vpack.c.bf16 %v8487_v4, %v8486_v31 }
 0x675   : > { %8849 = vmatmul.msk.bf16.gmra.mxu0 %vm562_vm0, %v8501_v48 }
 0x676   : > { %v8313_v0 = vpop.f32.mrf.mxu2 }
 0x677   : > { %v8314_v53 = vadd.f32 %v15882_v9, %v8313_v0  ;;  %v8461_v54 = vpop.f32.mrf.mxu3 }
 0x678   : > { %v8462_v28 = vadd.f32 %v15877_v12, %v8461_v54 }
 0x679   : > { %v8488_v55 = vmul.f32 %v8455_v2, %v8314_v53  ;;  %v9039_v2 = vld [vmem:[%s16960_s22] ss:$0 sm:$0xff] }
 0x67e   : > { %v8315_v45 = vpop.f32.mrf.mxu2 }
 0x67f   : > { %v8316_v11 = vadd.f32 %v15882_v9, %v8315_v45  ;;  %v8464_v23 = vpop.f32.mrf.mxu3 }
 0x680   : > { %v8465_v10 = vadd.f32 %v15877_v12, %v8464_v23 }
 0x681   : > { %v8489_v24 = vmul.f32 %v8457_v27, %v8316_v11 }
 0x683   : > { %v8502_v34 = vpack.c.bf16 %v8489_v24, %v8488_v55 }
 0x685   : > { %8850 = vmatmul.msk.bf16.gmra.mxu0 %vm562_vm0, %v8502_v34 }
 0x686   : > { %v8318_v16 = vpop.f32.mrf.mxu2 }
 0x687   : > { %v8319_v58 = vadd.f32 %v15882_v9, %v8318_v16  ;;  %v8466_v7 = vpop.f32.mrf.mxu3 }
 0x688   : > { %v8467_v62 = vadd.f32 %v15877_v12, %v8466_v7 }
 0x689   : > { %v8490_v25 = vmul.f32 %v8460_v32, %v8319_v58 }
 0x68e   : > { %v8320_v1 = vpop.f32.mrf.mxu2 }
 0x68f   : > { %v8321_v40 = vadd.f32 %v15882_v9, %v8320_v1  ;;  %v8469_v56 = vpop.f32.mrf.mxu3 }
 0x690   : > { %v8470_v50 = vadd.f32 %v15877_v12, %v8469_v56 }
 0x691   : > { %v8491_v5 = vmul.f32 %v8462_v28, %v8321_v40 }
 0x693   : > { %v8503_v51 = vpack.c.bf16 %v8491_v5, %v8490_v25 }
 0x695   : > { %8851 = vmatmul.msk.bf16.gmra.mxu0 %vm562_vm0, %v8503_v51 }
 0x696   : > { %v8323_v61 = vpop.f32.mrf.mxu2 }
 0x697   : > { %v8324_v60 = vadd.f32 %v15882_v9, %v8323_v61  ;;  %v8471_v20 = vpop.f32.mrf.mxu3 }
 0x698   : > { %v8472_v33 = vadd.f32 %v15877_v12, %v8471_v20 }
 0x699   : > { %v8492_v42 = vmul.f32 %v8465_v10, %v8324_v60 }
 0x69e   : > { %v8325_v47 = vpop.f32.mrf.mxu2 }
 0x69f   : > { %v8326_v14 = vadd.f32 %v15882_v9, %v8325_v47  ;;  %v8474_v52 = vpop.f32.mrf.mxu3 }
 0x6a0   : > { %v8475_v38 = vadd.f32 %v15877_v12, %v8474_v52 }
 0x6a1   : > { %v8493_v63 = vmul.f32 %v8467_v62, %v8326_v14 }
 0x6a3   : > { %v8504_v29 = vpack.c.bf16 %v8493_v63, %v8492_v42 }
 0x6a5   : > { %8852 = vmatmul.msk.bf16.gmra.mxu0 %vm562_vm0, %v8504_v29 }
 0x6a6   : > { %v8328_v41 = vpop.f32.mrf.mxu2 }
 0x6a7   : > { %v8329_v18 = vadd.f32 %v15882_v9, %v8328_v41  ;;  %v8476_v37 = vpop.f32.mrf.mxu3 }
 0x6a8   : > { %v8477_v46 = vadd.f32 %v15877_v12, %v8476_v37 }
 0x6a9   : > { %v8494_v39 = vmul.f32 %v8470_v50, %v8329_v18 }
 0x6ae   : > { %v8330_v3 = vpop.f32.mrf.mxu2 }
 0x6af   : > { %v8331_v21 = vadd.f32 %v15882_v9, %v8330_v3  ;;  %v8479_v15 = vpop.f32.mrf.mxu3 }
 0x6b0   : > { %v8480_v6 = vadd.f32 %v15877_v12, %v8479_v15 }
 0x6b1   : > { %v8495_v17 = vmul.f32 %v8472_v33, %v8331_v21 }
 0x6b3   : > { %v8505_v43 = vpack.c.bf16 %v8495_v17, %v8494_v39 }
 0x6b5   : > { %8853 = vmatmul.msk.bf16.gmra.mxu0 %vm562_vm0, %v8505_v43 }
 0x6b6   : > { %v8333_v22 = vpop.f32.mrf.mxu2 }
 0x6b7   : > { %v8334_v19 = vadd.f32 %v15882_v9, %v8333_v22  ;;  %v8481_v8 = vpop.f32.mrf.mxu3 }
 0x6b8   : > { %v8482_v31 = vadd.f32 %v15877_v12, %v8481_v8 }
 0x6b9   : > { %v8496_v49 = vmul.f32 %v8475_v38, %v8334_v19 }
 0x6be   : > { %v8335_v59 = vpop.f32.mrf.mxu2 }
 0x6bf   : > { %v8336_v57 = vadd.f32 %v15882_v9, %v8335_v59 }
 0x6c1   : > { %v8497_v13 = vmul.f32 %v8477_v46, %v8336_v57 }
 0x6c3   : > { %v8506_v30 = vpack.c.bf16 %v8497_v13, %v8496_v49 }
 0x6c5   : > { %8854 = vmatmul.msk.bf16.gmra.mxu0 %vm562_vm0, %v8506_v30 }
 0x6c6   : > { %v8338_v36 = vpop.f32.mrf.mxu2 }
 0x6c7   : > { %v8339_v44 = vadd.f32 %v15882_v9, %v8338_v36 }
 0x6c9   : > { %v8498_v48 = vmul.f32 %v8480_v6, %v8339_v44 }
 0x6ce   : > { %v8340_v26 = vpop.f32.mrf.mxu2 }
 0x6cf   : > { %v8341_v4 = vadd.f32 %v15882_v9, %v8340_v26 }
 0x6d1   : > { %v8499_v0 = vmul.f32 %v8482_v31, %v8341_v4 }
 0x6d3   : > { %v8507_v35 = vpack.c.bf16 %v8499_v0, %v8498_v48 }
 0x6d5   : > { %8855 = vmatmul.msk.bf16.gmra.mxu0 %vm562_vm0, %v8507_v35 }
 0x6d8   : > { %v8553_v53 = vpop.f32.mrf.mxu0 }
 0x6d9   : > { %v8554_v45 = vadd.f32 %v9039_v2, %v8553_v53 }
 0x6db   : > { %8593 = vst.msk [vmem:[%s15928_s19] sm:$0xff] %vm562_vm0, %v8554_v45 }
 0x6e0   : > { %v8555_v12 = vpop.f32.mrf.mxu0 }
 0x6e1   : > { %v8556_v9 = vadd.f32 %v9039_v2, %v8555_v12 }
 0x6e3   : > { %8594 = vst.msk [vmem:[%s15928_s19 + $0x8] sm:$0xff] %vm562_vm0, %v8556_v9 }
 0x6f2   : > { %v8558_v54 = vpop.f32.mrf.mxu0 }
 0x6f3   : > { %v8559_v27 = vadd.f32 %v9039_v2, %v8558_v54 }
 0x6f5   : > { %8595 = vst.msk [vmem:[%s15928_s19 + $0x10] sm:$0xff] %vm562_vm0, %v8559_v27 }
 0x6fa   : > { %v8560_v11 = vpop.f32.mrf.mxu0 }
 0x6fb   : > { %v8561_v55 = vadd.f32 %v9039_v2, %v8560_v11 }
 0x6fd   : > { %8596 = vst.msk [vmem:[%s15928_s19 + $0x18] sm:$0xff] %vm562_vm0, %v8561_v55 }
 0x702   : > { %v8563_v24 = vpop.f32.mrf.mxu0 }
 0x703   : > { %v8564_v34 = vadd.f32 %v9039_v2, %v8563_v24 }
 0x705   : > { %8597 = vst.msk [vmem:[%s15928_s19 + $0x20] sm:$0xff] %vm562_vm0, %v8564_v34 }
 0x70a   : > { %v8565_v16 = vpop.f32.mrf.mxu0 }
 0x70b   : > { %v8566_v23 = vadd.f32 %v9039_v2, %v8565_v16 }
 0x70d   : > { %8598 = vst.msk [vmem:[%s15928_s19 + $0x28] sm:$0xff] %vm562_vm0, %v8566_v23 }
 0x712   : > { %v8568_v32 = vpop.f32.mrf.mxu0 }
 0x713   : > { %v8569_v58 = vadd.f32 %v9039_v2, %v8568_v32 }
 0x715   : > { %8599 = vst.msk [vmem:[%s15928_s19 + $0x30] sm:$0xff] %vm562_vm0, %v8569_v58 }
 0x71a   : > { %v8570_v1 = vpop.f32.mrf.mxu0 }
 0x71b   : > { %v8571_v28 = vadd.f32 %v9039_v2, %v8570_v1 }
 0x71d   : > { %8600 = vst.msk [vmem:[%s15928_s19 + $0x38] sm:$0xff] %vm562_vm0, %v8571_v28 }
 0x722   : > { %v8573_v40 = vpop.f32.mrf.mxu0 }
 0x723   : > { %v8574_v7 = vadd.f32 %v9039_v2, %v8573_v40 }
 0x725   : > { %8601 = vst.msk [vmem:[%s15928_s19 + $0x40] sm:$0xff] %vm562_vm0, %v8574_v7 }
 0x72a   : > { %v8575_v25 = vpop.f32.mrf.mxu0 }
 0x72b   : > { %v8576_v5 = vadd.f32 %v9039_v2, %v8575_v25 }
 0x72d   : > { %8602 = vst.msk [vmem:[%s15928_s19 + $0x48] sm:$0xff] %vm562_vm0, %v8576_v5 }
 0x732   : > { %v8578_v51 = vpop.f32.mrf.mxu0 }
 0x733   : > { %v8579_v61 = vadd.f32 %v9039_v2, %v8578_v51 }
 0x735   : > { %8603 = vst.msk [vmem:[%s15928_s19 + $0x50] sm:$0xff] %vm562_vm0, %v8579_v61 }
 0x73a   : > { %v8580_v56 = vpop.f32.mrf.mxu0 }
 0x73b   : > { %v8581_v10 = vadd.f32 %v9039_v2, %v8580_v56 }
 0x73d   : > { %8604 = vst.msk [vmem:[%s15928_s19 + $0x58] sm:$0xff] %vm562_vm0, %v8581_v10 }
 0x742   : > { %v8583_v60 = vpop.f32.mrf.mxu0 }
 0x743   : > { %v8584_v47 = vadd.f32 %v9039_v2, %v8583_v60 }
 0x745   : > { %8605 = vst.msk [vmem:[%s15928_s19 + $0x60] sm:$0xff] %vm562_vm0, %v8584_v47 }
 0x74a   : > { %v8585_v62 = vpop.f32.mrf.mxu0 }
 0x74b   : > { %v8586_v14 = vadd.f32 %v9039_v2, %v8585_v62 }
 0x74d   : > { %8606 = vst.msk [vmem:[%s15928_s19 + $0x68] sm:$0xff] %vm562_vm0, %v8586_v14 }
 0x752   : > { %v8588_v42 = vpop.f32.mrf.mxu0 }
 0x753   : > { %v8589_v63 = vadd.f32 %v9039_v2, %v8588_v42 }
 0x755   : > { %8607 = vst.msk [vmem:[%s15928_s19 + $0x70] sm:$0xff] %vm562_vm0, %v8589_v63 }
 0x75a   : > { %v8590_v29 = vpop.f32.mrf.mxu0 }
 0x75b   : > { %v8591_v20 = vadd.f32 %v9039_v2, %v8590_v29 }
 0x75d   : > { %8608 = vst.msk [vmem:[%s15928_s19 + $0x78] sm:$0xff] %vm562_vm0, %v8591_v20 }
 0x75e   : > { %9582 = shalt.err (!%p9579_p8)
}
 0x75f   : > { %s9637_s15 = smov 128   ;;  %s9638_s22 = smov 8  }
 0x760   : > { %8900 = dma.vmem_to_hbm [thread:$0]  (%p9761_p11), %s8624_s24, 2048, %s8626_s10, %s8610_s12, %s9637_s15, %s9637_s15, %s9638_s22  }
 0x761 PF: > { %s16963_s19 = sld [smem:[#allocation13_spill]]  ;;  %p16965_p9 = scmp.ge.s32.totalorder %s9625_s28, 2 }
 0x763   : > { %p8914_p10 = pnand %p16965_p9, %p9765_p12 }
 0x765   : > { %p8915_p1 = pneg %p8914_p10 }
 0x767   : > { %s8640_s18 = sand.u32 1, %s16963_s19  }
 0x768   : > { %s8641_s16 = scalar_lea.sflag [#allocation5], %s8640_s18 }
 0x769   : > { %9608 = dma.done.wait (%p8915_p1), %s8641_s16, 2048  }
 0x76a   : > { %9610 = vsyncadd (%p8915_p1), %s8641_s16, 4294965248  ;;  %s16966_s28 = sld [smem:[#allocation14_spill]]  ;;  %s16968_s25 = smov %s9617_s26 }
 0x76b   : > { %s16967_s21 = sld [smem:[#allocation15_spill]]  ;;  %s16969_s26 = smov %s9621_s27 }
 0x770   : > { %p27_p2 = scmp.ge.s32.totalorder %s16966_s28, 4  }
 0x771   : > { %s16970_s27 = smov %s16967_s21 }
 0x772   :  { %29 = sbr.rel (!%p27_p2) target bundleno = 12 (0xc), region = 130 }
 0x777   :  { %8647 = vsyncpa [#allocation4], 1 }
 0x778   :  { %8649 = vsyncpa [#allocation4 + $0x1], 1 }
 0x779   :  { %8650 = vsyncpa [#allocation7], 1 }
 0x77a   :  { %8651 = vsyncpa [#allocation5], 1 }
 0x77b   :  { %8653 = vsyncpa [#allocation5 + $0x1], 1 }

</bundles_post_ra>
